<compile_context>
chip_gen: v5e
topology: v5e:2x2
jax: 0.10.0
libtpu: 0.0.40
codegen_flags: <defaults>
</compile_context>

<pallas_src>
import jax
import jax.numpy as jnp
from jax import lax
from jax.experimental import pallas as pl
from jax.experimental.pallas import tpu as pltpu

LRELU_COEFF = 0.2
BN_EPS = 1e-5


def _leaky_relu(x):
    return jnp.where(x >= 0, x, LRELU_COEFF * x)


def _bn_train(h, gamma, beta):
    # h: (C, M) channel-major; gamma/beta: (C, 1).
    # Training-mode BatchNorm (biased variance over all N*H*W pixels),
    # single-pass statistics (sum + sum-of-squares) in f32.
    mean = jnp.mean(h, axis=1, keepdims=True)
    ex2 = jnp.mean(h * h, axis=1, keepdims=True)
    var = ex2 - mean * mean
    scale = gamma * lax.rsqrt(var + BN_EPS)
    return h * scale + (beta - mean * scale)


def _make_kernel(N, H, W, cin, ich, cout, pad):
    M = N * H * W
    taps = [(dy, dx) for dy in (-1, 0, 1) for dx in (-1, 0, 1)]

    def conv_im2col(hpad_ref, masks, w_lhs, nch):
        # Activation lives (zero-haloed) in hpad_ref[:nch, pad:pad+M].
        # Tap (dy,dx) is a lane-shifted flat slice; cross-row / cross-image
        # reads are zeroed by the precomputed masks. The 9 taps are stacked
        # into a (9*nch, M) im2col matrix consumed by ONE MXU matmul.
        cols = []
        for k, (dy, dx) in enumerate(taps):
            s = pad + dy * W + dx
            t = hpad_ref[:nch, s:s + M]
            if not (dy == 0 and dx == 0):
                t = t * masks[k:k + 1, :]
            cols.append(t)
        patches = jnp.concatenate(cols, axis=0)                # (9*nch, M)
        return jnp.dot(w_lhs, patches, preferred_element_type=jnp.float32)

    def kernel(x_ref, masks_ref,
               g0_ref, b0_ref,
               w1_ref, c1b_ref, g1_ref, b1_ref,
               w2_ref, c2b_ref, g2_ref, b2_ref,
               w3_ref, c3b_ref,
               o_ref, hpad_ref):
        nrows = hpad_ref.shape[0]
        masks = masks_ref[...]                                  # (9, M)

        # Zero ONLY the two (lane-aligned) halo strips, once.
        hpad_ref[:, :pad] = jnp.zeros((nrows, pad), jnp.float32)
        hpad_ref[:, pad + M:] = jnp.zeros((nrows, pad), jnp.float32)

        # --- BatchNorm2d(n_in) on the input --------------------------------
        h = _bn_train(x_ref[...], g0_ref[...], b0_ref[...])       # (cin, M)

        # --- Conv(n_in -> internal) + BN + LeakyReLU ------------------------
        hpad_ref[:cin, pad:pad + M] = h
        h = conv_im2col(hpad_ref, masks, w1_ref[...], cin) + c1b_ref[...]
        h = _leaky_relu(_bn_train(h, g1_ref[...], b1_ref[...]))   # (ich, M)

        # --- Conv(internal -> internal) + BN + LeakyReLU --------------------
        hpad_ref[:ich, pad:pad + M] = h
        h = conv_im2col(hpad_ref, masks, w2_ref[...], ich) + c2b_ref[...]
        h = _leaky_relu(_bn_train(h, g2_ref[...], b2_ref[...]))   # (ich, M)

        # --- Conv(internal -> n_out); no activation (matches forward()) -----
        hpad_ref[:ich, pad:pad + M] = h
        out = conv_im2col(hpad_ref, masks, w3_ref[...], ich)      # (coutp, M)
        o_ref[...] = out[:cout, :] + c3b_ref[...]                 # lane-dense

    return kernel


def _full_spec(shape):
    nd = len(shape)
    return pl.BlockSpec(shape, lambda i, _nd=nd: (0,) * _nd)


def iterative_block_forward(x_nchw, params):
    """x_nchw: (N, n_in, H, W) float32 -> (N, n_out, H, W) float32."""
    x_nchw = x_nchw.astype(jnp.float32)
    N, cin, H, W = x_nchw.shape
    ich = params["w1"].shape[-1]
    cout = params["w3"].shape[-1]
    cout_p = ((cout + 7) // 8) * 8          # pad final-conv LHS rows to >= 8
    M = N * H * W
    nrows = max(cin, ich)
    pad = ((W + 1 + 127) // 128) * 128      # lane-aligned halo >= W+1

    # Channel-major, flattened-spatial input: (cin, N*H*W).
    x_cm = jnp.transpose(x_nchw, (1, 0, 2, 3)).reshape(cin, M)

    # Border-validity masks for the 9 taps on the flattened spatial axis.
    m_idx = jnp.arange(M, dtype=jnp.int32)
    pix = m_idx % (H * W)
    yy = pix // W
    xx = pix % W
    mask_rows = []
    for dy in (-1, 0, 1):
        for dx in (-1, 0, 1):
            valid = ((yy + dy >= 0) & (yy + dy < H) &
                     (xx + dx >= 0) & (xx + dx < W))
            mask_rows.append(valid.astype(jnp.float32))
    masks = jnp.stack(mask_rows, axis=0)                        # (9, M)

    def stack_w(w):   # HWIO (3,3,ci,co) -> fused im2col LHS (co, 9*ci)
        kh, kw, ci, co = w.shape
        return jnp.transpose(w.reshape(kh * kw * ci, co))

    w1l = stack_w(params["w1"]).astype(jnp.float32)             # (ich, 9*cin)
    w2l = stack_w(params["w2"]).astype(jnp.float32)             # (ich, 9*ich)
    w3l = stack_w(params["w3"]).astype(jnp.float32)             # (cout, 9*ich)
    w3l = jnp.concatenate(                                      # avoid 1-row LHS
        [w3l, jnp.zeros((cout_p - cout, w3l.shape[1]), jnp.float32)], axis=0)

    col = lambda v: v.astype(jnp.float32).reshape(-1, 1)        # -> (C, 1)

    args = (x_cm, masks,
            col(params["g0"]), col(params["b0"]),
            w1l, col(params["c1b"]), col(params["g1"]), col(params["b1"]),
            w2l, col(params["c2b"]), col(params["g2"]), col(params["b2"]),
            w3l, col(params["c3b"]))

    kernel = _make_kernel(N, H, W, cin, ich, cout, pad)

    # TODO(synk): for large H*W the (9*ich, M) im2col working set would need a
    # pixel-tiled grid (with two-pass cross-tile BN statistics) to fit v7x's
    # 64 MiB VMEM; at these shapes the whole working set is <1 MiB, so a single
    # invocation keeps BN batch statistics exact.
    out_cm = pl.pallas_call(
        kernel,
        out_shape=jax.ShapeDtypeStruct((cout, M), jnp.float32),
        grid_spec=pltpu.PrefetchScalarGridSpec(
            num_scalar_prefetch=0,
            grid=(1,),
            in_specs=[_full_spec(a.shape) for a in args],
            out_specs=_full_spec((cout, M)),
            scratch_shapes=[
                pltpu.VMEM((nrows, M + 2 * pad), jnp.float32),  # halo buffer
            ]),
        compiler_params=pltpu.CompilerParams(
            dimension_semantics=("arbitrary",),
            vmem_limit_bytes=32 * 1024 * 1024),
    )(*args)

    # (cout, N*H*W) -> (N, cout, H, W)
    return jnp.transpose(out_cm.reshape(cout, N, H, W), (1, 0, 2, 3))


def init_params(key, n_in=2, n_out=1, internal_ch=32, kernel_size=3):
    ks = jax.random.split(key, 6)

    def conv_init(k, cin, cout):
        fan_in = cin * kernel_size * kernel_size
        bound = 1.0 / float(fan_in) ** 0.5
        w = jax.random.uniform(k, (kernel_size, kernel_size, cin, cout),
                               jnp.float32, -bound, bound)
        b = jax.random.uniform(jax.random.fold_in(k, 1), (1, cout),
                               jnp.float32, -bound, bound)
        return w, b

    def bn_init(k, c):
        g = 1.0 + 0.1 * jax.random.normal(k, (1, c), jnp.float32)
        b = 0.1 * jax.random.normal(jax.random.fold_in(k, 1), (1, c), jnp.float32)
        return g, b

    w1, c1b = conv_init(ks[0], n_in, internal_ch)
    w2, c2b = conv_init(ks[1], internal_ch, internal_ch)
    w3, c3b = conv_init(ks[2], internal_ch, n_out)
    g0, b0 = bn_init(ks[3], n_in)
    g1, b1 = bn_init(ks[4], internal_ch)
    g2, b2 = bn_init(ks[5], internal_ch)
    return dict(w1=w1, c1b=c1b, w2=w2, c2b=c2b, w3=w3, c3b=c3b,
                g0=g0, b0=b0, g1=g1, b1=b1, g2=g2, b2=b2)


def reference_forward(x_nchw, params):
    # Pure-JAX reference (NHWC) for correctness checking.
    x = jnp.transpose(x_nchw, (0, 2, 3, 1)).astype(jnp.float32)

    def bn(h, g, b):
        mean = jnp.mean(h, axis=(0, 1, 2), keepdims=True)
        var = jnp.mean((h - mean) ** 2, axis=(0, 1, 2), keepdims=True)
        return ((h - mean) * lax.rsqrt(var + BN_EPS)
                * g.reshape(1, 1, 1, -1) + b.reshape(1, 1, 1, -1))

    def conv(h, w, b):
        y = lax.conv_general_dilated(h, w, (1, 1), 'SAME',
                                     dimension_numbers=('NHWC', 'HWIO', 'NHWC'))
        return y + b.reshape(1, 1, 1, -1)

    h = bn(x, params["g0"], params["b0"])
    h = _leaky_relu(bn(conv(h, params["w1"], params["c1b"]),
                       params["g1"], params["b1"]))
    h = _leaky_relu(bn(conv(h, params["w2"], params["c2b"]),
                       params["g2"], params["b2"]))
    h = conv(h, params["w3"], params["c3b"])
    return jnp.transpose(h, (0, 3, 1, 2))


if __name__ == "__main__":
    key = jax.random.PRNGKey(0)
    kp, kx = jax.random.split(key)
    params = init_params(kp)                                   # n_in=2, n_out=1
    x = jax.random.normal(kx, (2, 2, 16, 16), jnp.float32)     # NCHW, like PyTorch

    out = iterative_block_forward(x, params)
    out = jax.block_until_ready(out)
    assert out.shape == (2, 1, 16, 16), out.shape

    ref = reference_forward(x, params)
    max_err = float(jnp.max(jnp.abs(out - ref)))
    assert max_err < 1e-3, f"max abs error too large: {max_err}"

    # TODO(synk): BatchNorm running_mean/var buffer updates (a training-time
    # side effect, not part of the returned value) are not emitted.
    print("KERNEL_OK")
</pallas_src>

<mosaic_0001>
module attributes {stable_mosaic.version = 11 : i64} {
  func.func @kernel(%arg0: i32, %arg1: memref<2x512xf32, #tpu.memory_space<vmem>>, %arg2: memref<9x512xf32, #tpu.memory_space<vmem>>, %arg3: memref<2x1xf32, #tpu.memory_space<vmem>>, %arg4: memref<2x1xf32, #tpu.memory_space<vmem>>, %arg5: memref<32x18xf32, #tpu.memory_space<vmem>>, %arg6: memref<32x1xf32, #tpu.memory_space<vmem>>, %arg7: memref<32x1xf32, #tpu.memory_space<vmem>>, %arg8: memref<32x1xf32, #tpu.memory_space<vmem>>, %arg9: memref<32x288xf32, #tpu.memory_space<vmem>>, %arg10: memref<32x1xf32, #tpu.memory_space<vmem>>, %arg11: memref<32x1xf32, #tpu.memory_space<vmem>>, %arg12: memref<32x1xf32, #tpu.memory_space<vmem>>, %arg13: memref<8x288xf32, #tpu.memory_space<vmem>>, %arg14: memref<1x1xf32, #tpu.memory_space<vmem>>, %arg15: memref<1x512xf32, #tpu.memory_space<vmem>>, %arg16: memref<32x768xf32, #tpu.memory_space<vmem>>) attributes {dimension_semantics = [#tpu.dimension_semantics<arbitrary>], iteration_bounds = array<i64: 1>, scalar_prefetch = 0 : i64, scratch_operands = 1 : i64, tpu.core_type = #tpu.core_type<tc>, window_params = [{pipeline_mode = #tpu.pipeline_mode<synchronous>, transform_indices = @transform_0, window_bounds = array<i64: 2, 512>}, {pipeline_mode = #tpu.pipeline_mode<synchronous>, transform_indices = @transform_1, window_bounds = array<i64: 9, 512>}, {pipeline_mode = #tpu.pipeline_mode<synchronous>, transform_indices = @transform_2, window_bounds = array<i64: 2, 1>}, {pipeline_mode = #tpu.pipeline_mode<synchronous>, transform_indices = @transform_3, window_bounds = array<i64: 2, 1>}, {pipeline_mode = #tpu.pipeline_mode<synchronous>, transform_indices = @transform_4, window_bounds = array<i64: 32, 18>}, {pipeline_mode = #tpu.pipeline_mode<synchronous>, transform_indices = @transform_5, window_bounds = array<i64: 32, 1>}, {pipeline_mode = #tpu.pipeline_mode<synchronous>, transform_indices = @transform_6, window_bounds = array<i64: 32, 1>}, {pipeline_mode = #tpu.pipeline_mode<synchronous>, transform_indices = @transform_7, window_bounds = array<i64: 32, 1>}, {pipeline_mode = #tpu.pipeline_mode<synchronous>, transform_indices = @transform_8, window_bounds = array<i64: 32, 288>}, {pipeline_mode = #tpu.pipeline_mode<synchronous>, transform_indices = @transform_9, window_bounds = array<i64: 32, 1>}, {pipeline_mode = #tpu.pipeline_mode<synchronous>, transform_indices = @transform_10, window_bounds = array<i64: 32, 1>}, {pipeline_mode = #tpu.pipeline_mode<synchronous>, transform_indices = @transform_11, window_bounds = array<i64: 32, 1>}, {pipeline_mode = #tpu.pipeline_mode<synchronous>, transform_indices = @transform_12, window_bounds = array<i64: 8, 288>}, {pipeline_mode = #tpu.pipeline_mode<synchronous>, transform_indices = @transform_13, window_bounds = array<i64: 1, 1>}, {pipeline_mode = #tpu.pipeline_mode<synchronous>, transform_indices = @transform_14, window_bounds = array<i64: 1, 512>}]} {
    %c0 = arith.constant 0 : index
    %c0_0 = arith.constant 0 : index
    %0 = vector.load %arg2[%c0, %c0_0] : memref<9x512xf32, #tpu.memory_space<vmem>>, vector<9x512xf32>
    %cst = arith.constant 0.000000e+00 : f32
    %1 = vector.broadcast %cst : f32 to vector<32x128xf32>
    %c0_1 = arith.constant 0 : index
    %c0_2 = arith.constant 0 : index
    %2 = vector.load %arg16[%c0_1, %c0_2] : memref<32x768xf32, #tpu.memory_space<vmem>>, vector<32x128xf32>
    tpu.vector_store %arg16[%c0_1, %c0_2], %1 {strides = array<i32>} : memref<32x768xf32, #tpu.memory_space<vmem>>, vector<32x128xf32>,
    %cst_3 = arith.constant 0.000000e+00 : f32
    %3 = vector.broadcast %cst_3 : f32 to vector<32x128xf32>
    %c0_4 = arith.constant 0 : index
    %c640 = arith.constant 640 : index
    %4 = vector.load %arg16[%c0_4, %c640] : memref<32x768xf32, #tpu.memory_space<vmem>>, vector<32x128xf32>
    tpu.vector_store %arg16[%c0_4, %c640], %3 {strides = array<i32>} : memref<32x768xf32, #tpu.memory_space<vmem>>, vector<32x128xf32>,
    %c0_5 = arith.constant 0 : index
    %c0_6 = arith.constant 0 : index
    %5 = vector.load %arg1[%c0_5, %c0_6] : memref<2x512xf32, #tpu.memory_space<vmem>>, vector<2x512xf32>
    %c0_7 = arith.constant 0 : index
    %c0_8 = arith.constant 0 : index
    %6 = vector.load %arg3[%c0_7, %c0_8] : memref<2x1xf32, #tpu.memory_space<vmem>>, vector<2x1xf32>
    %c0_9 = arith.constant 0 : index
    %c0_10 = arith.constant 0 : index
    %7 = vector.load %arg4[%c0_9, %c0_10] : memref<2x1xf32, #tpu.memory_space<vmem>>, vector<2x1xf32>
    %cst_11 = arith.constant dense<0.000000e+00> : vector<2xf32>
    %8 = vector.multi_reduction <add>, %5, %cst_11 [1] : vector<2x512xf32> to vector<2xf32>
    %9 = vector.shape_cast %8 : vector<2xf32> to vector<2x1xf32>
    %cst_12 = arith.constant 5.120000e+02 : f32
    %10 = vector.broadcast %cst_12 : f32 to vector<2x1xf32>
    %11 = arith.divf %9, %10 : vector<2x1xf32>
    %12 = arith.mulf %5, %5 : vector<2x512xf32>
    %cst_13 = arith.constant dense<0.000000e+00> : vector<2xf32>
    %13 = vector.multi_reduction <add>, %12, %cst_13 [1] : vector<2x512xf32> to vector<2xf32>
    %14 = vector.shape_cast %13 : vector<2xf32> to vector<2x1xf32>
    %cst_14 = arith.constant 5.120000e+02 : f32
    %15 = vector.broadcast %cst_14 : f32 to vector<2x1xf32>
    %16 = arith.divf %14, %15 : vector<2x1xf32>
    %17 = arith.mulf %11, %11 : vector<2x1xf32>
    %18 = arith.subf %16, %17 : vector<2x1xf32>
    %cst_15 = arith.constant 9.99999974E-6 : f32
    %19 = vector.broadcast %cst_15 : f32 to vector<2x1xf32>
    %20 = arith.addf %18, %19 : vector<2x1xf32>
    %21 = math.rsqrt %20 : vector<2x1xf32>
    %22 = arith.mulf %6, %21 : vector<2x1xf32>
    %23 = vector.broadcast %22 : vector<2x1xf32> to vector<2x512xf32>
    %24 = arith.mulf %5, %23 : vector<2x512xf32>
    %25 = arith.mulf %11, %22 : vector<2x1xf32>
    %26 = arith.subf %7, %25 : vector<2x1xf32>
    %27 = vector.broadcast %26 : vector<2x1xf32> to vector<2x512xf32>
    %28 = arith.addf %24, %27 : vector<2x512xf32>
    %c0_16 = arith.constant 0 : index
    %c128 = arith.constant 128 : index
    %29 = vector.load %arg16[%c0_16, %c128] : memref<32x768xf32, #tpu.memory_space<vmem>>, vector<2x512xf32>
    tpu.vector_store %arg16[%c0_16, %c128], %28 {strides = array<i32>} : memref<32x768xf32, #tpu.memory_space<vmem>>, vector<2x512xf32>,
    %c0_17 = arith.constant 0 : index
    %c0_18 = arith.constant 0 : index
    %30 = vector.load %arg5[%c0_17, %c0_18] : memref<32x18xf32, #tpu.memory_space<vmem>>, vector<32x18xf32>
    %c0_19 = arith.constant 0 : index
    %c111 = arith.constant 111 : index
    %31 = vector.load %arg16[%c0_19, %c111] : memref<32x768xf32, #tpu.memory_space<vmem>>, vector<2x512xf32>
    %32 = vector.extract_strided_slice %0 {offsets = [0, 0], sizes = [1, 512], strides = [1, 1]} : vector<9x512xf32> to vector<1x512xf32>
    %33 = vector.broadcast %32 : vector<1x512xf32> to vector<2x512xf32>
    %34 = arith.mulf %31, %33 : vector<2x512xf32>
    %c0_20 = arith.constant 0 : index
    %c112 = arith.constant 112 : index
    %35 = vector.load %arg16[%c0_20, %c112] : memref<32x768xf32, #tpu.memory_space<vmem>>, vector<2x512xf32>
    %36 = vector.extract_strided_slice %0 {offsets = [1, 0], sizes = [1, 512], strides = [1, 1]} : vector<9x512xf32> to vector<1x512xf32>
    %37 = vector.broadcast %36 : vector<1x512xf32> to vector<2x512xf32>
    %38 = arith.mulf %35, %37 : vector<2x512xf32>
    %c0_21 = arith.constant 0 : index
    %c113 = arith.constant 113 : index
    %39 = vector.load %arg16[%c0_21, %c113] : memref<32x768xf32, #tpu.memory_space<vmem>>, vector<2x512xf32>
    %40 = vector.extract_strided_slice %0 {offsets = [2, 0], sizes = [1, 512], strides = [1, 1]} : vector<9x512xf32> to vector<1x512xf32>
    %41 = vector.broadcast %40 : vector<1x512xf32> to vector<2x512xf32>
    %42 = arith.mulf %39, %41 : vector<2x512xf32>
    %c0_22 = arith.constant 0 : index
    %c127 = arith.constant 127 : index
    %43 = vector.load %arg16[%c0_22, %c127] : memref<32x768xf32, #tpu.memory_space<vmem>>, vector<2x512xf32>
    %44 = vector.extract_strided_slice %0 {offsets = [3, 0], sizes = [1, 512], strides = [1, 1]} : vector<9x512xf32> to vector<1x512xf32>
    %45 = vector.broadcast %44 : vector<1x512xf32> to vector<2x512xf32>
    %46 = arith.mulf %43, %45 : vector<2x512xf32>
    %c0_23 = arith.constant 0 : index
    %c128_24 = arith.constant 128 : index
    %47 = vector.load %arg16[%c0_23, %c128_24] : memref<32x768xf32, #tpu.memory_space<vmem>>, vector<2x512xf32>
    %c0_25 = arith.constant 0 : index
    %c129 = arith.constant 129 : index
    %48 = vector.load %arg16[%c0_25, %c129] : memref<32x768xf32, #tpu.memory_space<vmem>>, vector<2x512xf32>
    %49 = vector.extract_strided_slice %0 {offsets = [5, 0], sizes = [1, 512], strides = [1, 1]} : vector<9x512xf32> to vector<1x512xf32>
    %50 = vector.broadcast %49 : vector<1x512xf32> to vector<2x512xf32>
    %51 = arith.mulf %48, %50 : vector<2x512xf32>
    %c0_26 = arith.constant 0 : index
    %c143 = arith.constant 143 : index
    %52 = vector.load %arg16[%c0_26, %c143] : memref<32x768xf32, #tpu.memory_space<vmem>>, vector<2x512xf32>
    %53 = vector.extract_strided_slice %0 {offsets = [6, 0], sizes = [1, 512], strides = [1, 1]} : vector<9x512xf32> to vector<1x512xf32>
    %54 = vector.broadcast %53 : vector<1x512xf32> to vector<2x512xf32>
    %55 = arith.mulf %52, %54 : vector<2x512xf32>
    %c0_27 = arith.constant 0 : index
    %c144 = arith.constant 144 : index
    %56 = vector.load %arg16[%c0_27, %c144] : memref<32x768xf32, #tpu.memory_space<vmem>>, vector<2x512xf32>
    %57 = vector.extract_strided_slice %0 {offsets = [7, 0], sizes = [1, 512], strides = [1, 1]} : vector<9x512xf32> to vector<1x512xf32>
    %58 = vector.broadcast %57 : vector<1x512xf32> to vector<2x512xf32>
    %59 = arith.mulf %56, %58 : vector<2x512xf32>
    %c0_28 = arith.constant 0 : index
    %c145 = arith.constant 145 : index
    %60 = vector.load %arg16[%c0_28, %c145] : memref<32x768xf32, #tpu.memory_space<vmem>>, vector<2x512xf32>
    %61 = vector.extract_strided_slice %0 {offsets = [8, 0], sizes = [1, 512], strides = [1, 1]} : vector<9x512xf32> to vector<1x512xf32>
    %62 = vector.broadcast %61 : vector<1x512xf32> to vector<2x512xf32>
    %63 = arith.mulf %60, %62 : vector<2x512xf32>
    %64 = tpu.concatenate %34, %38, %42, %46, %47, %51, %55, %59, %63 in 0 : vector<2x512xf32>, vector<2x512xf32>, vector<2x512xf32>, vector<2x512xf32>, vector<2x512xf32>, vector<2x512xf32>, vector<2x512xf32>, vector<2x512xf32>, vector<2x512xf32> -> vector<18x512xf32>
    %cst_29 = arith.constant dense<0.000000e+00> : vector<32x512xf32>
    %65 = tpu.matmul %30, %64, %cst_29 {dimension_numbers = #tpu.dot_dimension_numbers<[1], [0], [0], [1], [0, 0, 1, 1], [], []>} : vector<32x18xf32>, vector<18x512xf32>, vector<32x512xf32> -> vector<32x512xf32>
    %c0_30 = arith.constant 0 : index
    %c0_31 = arith.constant 0 : index
    %66 = vector.load %arg6[%c0_30, %c0_31] : memref<32x1xf32, #tpu.memory_space<vmem>>, vector<32x1xf32>
    %67 = vector.broadcast %66 : vector<32x1xf32> to vector<32x512xf32>
    %68 = arith.addf %65, %67 : vector<32x512xf32>
    %c0_32 = arith.constant 0 : index
    %c0_33 = arith.constant 0 : index
    %69 = vector.load %arg7[%c0_32, %c0_33] : memref<32x1xf32, #tpu.memory_space<vmem>>, vector<32x1xf32>
    %c0_34 = arith.constant 0 : index
    %c0_35 = arith.constant 0 : index
    %70 = vector.load %arg8[%c0_34, %c0_35] : memref<32x1xf32, #tpu.memory_space<vmem>>, vector<32x1xf32>
    %cst_36 = arith.constant dense<0.000000e+00> : vector<32xf32>
    %71 = vector.multi_reduction <add>, %68, %cst_36 [1] : vector<32x512xf32> to vector<32xf32>
    %72 = vector.shape_cast %71 : vector<32xf32> to vector<32x1xf32>
    %cst_37 = arith.constant 5.120000e+02 : f32
    %73 = vector.broadcast %cst_37 : f32 to vector<32x1xf32>
    %74 = arith.divf %72, %73 : vector<32x1xf32>
    %75 = arith.mulf %68, %68 : vector<32x512xf32>
    %cst_38 = arith.constant dense<0.000000e+00> : vector<32xf32>
    %76 = vector.multi_reduction <add>, %75, %cst_38 [1] : vector<32x512xf32> to vector<32xf32>
    %77 = vector.shape_cast %76 : vector<32xf32> to vector<32x1xf32>
    %cst_39 = arith.constant 5.120000e+02 : f32
    %78 = vector.broadcast %cst_39 : f32 to vector<32x1xf32>
    %79 = arith.divf %77, %78 : vector<32x1xf32>
    %80 = arith.mulf %74, %74 : vector<32x1xf32>
    %81 = arith.subf %79, %80 : vector<32x1xf32>
    %cst_40 = arith.constant 9.99999974E-6 : f32
    %82 = vector.broadcast %cst_40 : f32 to vector<32x1xf32>
    %83 = arith.addf %81, %82 : vector<32x1xf32>
    %84 = math.rsqrt %83 : vector<32x1xf32>
    %85 = arith.mulf %69, %84 : vector<32x1xf32>
    %86 = vector.broadcast %85 : vector<32x1xf32> to vector<32x512xf32>
    %87 = arith.mulf %68, %86 : vector<32x512xf32>
    %88 = arith.mulf %74, %85 : vector<32x1xf32>
    %89 = arith.subf %70, %88 : vector<32x1xf32>
    %90 = vector.broadcast %89 : vector<32x1xf32> to vector<32x512xf32>
    %91 = arith.addf %87, %90 : vector<32x512xf32>
    %cst_41 = arith.constant 0.000000e+00 : f32
    %92 = vector.broadcast %cst_41 : f32 to vector<32x512xf32>
    %93 = arith.cmpf oge, %91, %92 : vector<32x512xf32>
    %cst_42 = arith.constant 2.000000e-01 : f32
    %94 = vector.broadcast %cst_42 : f32 to vector<32x512xf32>
    %95 = arith.mulf %94, %91 : vector<32x512xf32>
    %96 = arith.select %93, %91, %95 : vector<32x512xi1>, vector<32x512xf32>
    %c0_43 = arith.constant 0 : index
    %c128_44 = arith.constant 128 : index
    %97 = vector.load %arg16[%c0_43, %c128_44] : memref<32x768xf32, #tpu.memory_space<vmem>>, vector<32x512xf32>
    tpu.vector_store %arg16[%c0_43, %c128_44], %96 {strides = array<i32>} : memref<32x768xf32, #tpu.memory_space<vmem>>, vector<32x512xf32>,
    %c0_45 = arith.constant 0 : index
    %c0_46 = arith.constant 0 : index
    %98 = vector.load %arg9[%c0_45, %c0_46] : memref<32x288xf32, #tpu.memory_space<vmem>>, vector<32x288xf32>
    %c0_47 = arith.constant 0 : index
    %c111_48 = arith.constant 111 : index
    %99 = vector.load %arg16[%c0_47, %c111_48] : memref<32x768xf32, #tpu.memory_space<vmem>>, vector<32x512xf32>
    %100 = vector.extract_strided_slice %0 {offsets = [0, 0], sizes = [1, 512], strides = [1, 1]} : vector<9x512xf32> to vector<1x512xf32>
    %101 = vector.broadcast %100 : vector<1x512xf32> to vector<32x512xf32>
    %102 = arith.mulf %99, %101 : vector<32x512xf32>
    %c0_49 = arith.constant 0 : index
    %c112_50 = arith.constant 112 : index
    %103 = vector.load %arg16[%c0_49, %c112_50] : memref<32x768xf32, #tpu.memory_space<vmem>>, vector<32x512xf32>
    %104 = vector.extract_strided_slice %0 {offsets = [1, 0], sizes = [1, 512], strides = [1, 1]} : vector<9x512xf32> to vector<1x512xf32>
    %105 = vector.broadcast %104 : vector<1x512xf32> to vector<32x512xf32>
    %106 = arith.mulf %103, %105 : vector<32x512xf32>
    %c0_51 = arith.constant 0 : index
    %c113_52 = arith.constant 113 : index
    %107 = vector.load %arg16[%c0_51, %c113_52] : memref<32x768xf32, #tpu.memory_space<vmem>>, vector<32x512xf32>
    %108 = vector.extract_strided_slice %0 {offsets = [2, 0], sizes = [1, 512], strides = [1, 1]} : vector<9x512xf32> to vector<1x512xf32>
    %109 = vector.broadcast %108 : vector<1x512xf32> to vector<32x512xf32>
    %110 = arith.mulf %107, %109 : vector<32x512xf32>
    %c0_53 = arith.constant 0 : index
    %c127_54 = arith.constant 127 : index
    %111 = vector.load %arg16[%c0_53, %c127_54] : memref<32x768xf32, #tpu.memory_space<vmem>>, vector<32x512xf32>
    %112 = vector.extract_strided_slice %0 {offsets = [3, 0], sizes = [1, 512], strides = [1, 1]} : vector<9x512xf32> to vector<1x512xf32>
    %113 = vector.broadcast %112 : vector<1x512xf32> to vector<32x512xf32>
    %114 = arith.mulf %111, %113 : vector<32x512xf32>
    %c0_55 = arith.constant 0 : index
    %c128_56 = arith.constant 128 : index
    %115 = vector.load %arg16[%c0_55, %c128_56] : memref<32x768xf32, #tpu.memory_space<vmem>>, vector<32x512xf32>
    %c0_57 = arith.constant 0 : index
    %c129_58 = arith.constant 129 : index
    %116 = vector.load %arg16[%c0_57, %c129_58] : memref<32x768xf32, #tpu.memory_space<vmem>>, vector<32x512xf32>
    %117 = vector.extract_strided_slice %0 {offsets = [5, 0], sizes = [1, 512], strides = [1, 1]} : vector<9x512xf32> to vector<1x512xf32>
    %118 = vector.broadcast %117 : vector<1x512xf32> to vector<32x512xf32>
    %119 = arith.mulf %116, %118 : vector<32x512xf32>
    %c0_59 = arith.constant 0 : index
    %c143_60 = arith.constant 143 : index
    %120 = vector.load %arg16[%c0_59, %c143_60] : memref<32x768xf32, #tpu.memory_space<vmem>>, vector<32x512xf32>
    %121 = vector.extract_strided_slice %0 {offsets = [6, 0], sizes = [1, 512], strides = [1, 1]} : vector<9x512xf32> to vector<1x512xf32>
    %122 = vector.broadcast %121 : vector<1x512xf32> to vector<32x512xf32>
    %123 = arith.mulf %120, %122 : vector<32x512xf32>
    %c0_61 = arith.constant 0 : index
    %c144_62 = arith.constant 144 : index
    %124 = vector.load %arg16[%c0_61, %c144_62] : memref<32x768xf32, #tpu.memory_space<vmem>>, vector<32x512xf32>
    %125 = vector.extract_strided_slice %0 {offsets = [7, 0], sizes = [1, 512], strides = [1, 1]} : vector<9x512xf32> to vector<1x512xf32>
    %126 = vector.broadcast %125 : vector<1x512xf32> to vector<32x512xf32>
    %127 = arith.mulf %124, %126 : vector<32x512xf32>
    %c0_63 = arith.constant 0 : index
    %c145_64 = arith.constant 145 : index
    %128 = vector.load %arg16[%c0_63, %c145_64] : memref<32x768xf32, #tpu.memory_space<vmem>>, vector<32x512xf32>
    %129 = vector.extract_strided_slice %0 {offsets = [8, 0], sizes = [1, 512], strides = [1, 1]} : vector<9x512xf32> to vector<1x512xf32>
    %130 = vector.broadcast %129 : vector<1x512xf32> to vector<32x512xf32>
    %131 = arith.mulf %128, %130 : vector<32x512xf32>
    %132 = tpu.concatenate %102, %106, %110, %114, %115, %119, %123, %127, %131 in 0 : vector<32x512xf32>, vector<32x512xf32>, vector<32x512xf32>, vector<32x512xf32>, vector<32x512xf32>, vector<32x512xf32>, vector<32x512xf32>, vector<32x512xf32>, vector<32x512xf32> -> vector<288x512xf32>
    %cst_65 = arith.constant dense<0.000000e+00> : vector<32x512xf32>
    %133 = tpu.matmul %98, %132, %cst_65 {dimension_numbers = #tpu.dot_dimension_numbers<[1], [0], [0], [1], [0, 0, 1, 1], [], []>} : vector<32x288xf32>, vector<288x512xf32>, vector<32x512xf32> -> vector<32x512xf32>
    %c0_66 = arith.constant 0 : index
    %c0_67 = arith.constant 0 : index
    %134 = vector.load %arg10[%c0_66, %c0_67] : memref<32x1xf32, #tpu.memory_space<vmem>>, vector<32x1xf32>
    %135 = vector.broadcast %134 : vector<32x1xf32> to vector<32x512xf32>
    %136 = arith.addf %133, %135 : vector<32x512xf32>
    %c0_68 = arith.constant 0 : index
    %c0_69 = arith.constant 0 : index
    %137 = vector.load %arg11[%c0_68, %c0_69] : memref<32x1xf32, #tpu.memory_space<vmem>>, vector<32x1xf32>
    %c0_70 = arith.constant 0 : index
    %c0_71 = arith.constant 0 : index
    %138 = vector.load %arg12[%c0_70, %c0_71] : memref<32x1xf32, #tpu.memory_space<vmem>>, vector<32x1xf32>
    %cst_72 = arith.constant dense<0.000000e+00> : vector<32xf32>
    %139 = vector.multi_reduction <add>, %136, %cst_72 [1] : vector<32x512xf32> to vector<32xf32>
    %140 = vector.shape_cast %139 : vector<32xf32> to vector<32x1xf32>
    %cst_73 = arith.constant 5.120000e+02 : f32
    %141 = vector.broadcast %cst_73 : f32 to vector<32x1xf32>
    %142 = arith.divf %140, %141 : vector<32x1xf32>
    %143 = arith.mulf %136, %136 : vector<32x512xf32>
    %cst_74 = arith.constant dense<0.000000e+00> : vector<32xf32>
    %144 = vector.multi_reduction <add>, %143, %cst_74 [1] : vector<32x512xf32> to vector<32xf32>
    %145 = vector.shape_cast %144 : vector<32xf32> to vector<32x1xf32>
    %cst_75 = arith.constant 5.120000e+02 : f32
    %146 = vector.broadcast %cst_75 : f32 to vector<32x1xf32>
    %147 = arith.divf %145, %146 : vector<32x1xf32>
    %148 = arith.mulf %142, %142 : vector<32x1xf32>
    %149 = arith.subf %147, %148 : vector<32x1xf32>
    %cst_76 = arith.constant 9.99999974E-6 : f32
    %150 = vector.broadcast %cst_76 : f32 to vector<32x1xf32>
    %151 = arith.addf %149, %150 : vector<32x1xf32>
    %152 = math.rsqrt %151 : vector<32x1xf32>
    %153 = arith.mulf %137, %152 : vector<32x1xf32>
    %154 = vector.broadcast %153 : vector<32x1xf32> to vector<32x512xf32>
    %155 = arith.mulf %136, %154 : vector<32x512xf32>
    %156 = arith.mulf %142, %153 : vector<32x1xf32>
    %157 = arith.subf %138, %156 : vector<32x1xf32>
    %158 = vector.broadcast %157 : vector<32x1xf32> to vector<32x512xf32>
    %159 = arith.addf %155, %158 : vector<32x512xf32>
    %cst_77 = arith.constant 0.000000e+00 : f32
    %160 = vector.broadcast %cst_77 : f32 to vector<32x512xf32>
    %161 = arith.cmpf oge, %159, %160 : vector<32x512xf32>
    %cst_78 = arith.constant 2.000000e-01 : f32
    %162 = vector.broadcast %cst_78 : f32 to vector<32x512xf32>
    %163 = arith.mulf %162, %159 : vector<32x512xf32>
    %164 = arith.select %161, %159, %163 : vector<32x512xi1>, vector<32x512xf32>
    %c0_79 = arith.constant 0 : index
    %c128_80 = arith.constant 128 : index
    %165 = vector.load %arg16[%c0_79, %c128_80] : memref<32x768xf32, #tpu.memory_space<vmem>>, vector<32x512xf32>
    tpu.vector_store %arg16[%c0_79, %c128_80], %164 {strides = array<i32>} : memref<32x768xf32, #tpu.memory_space<vmem>>, vector<32x512xf32>,
    %c0_81 = arith.constant 0 : index
    %c0_82 = arith.constant 0 : index
    %166 = vector.load %arg13[%c0_81, %c0_82] : memref<8x288xf32, #tpu.memory_space<vmem>>, vector<8x288xf32>
    %c0_83 = arith.constant 0 : index
    %c111_84 = arith.constant 111 : index
    %167 = vector.load %arg16[%c0_83, %c111_84] : memref<32x768xf32, #tpu.memory_space<vmem>>, vector<32x512xf32>
    %168 = vector.extract_strided_slice %0 {offsets = [0, 0], sizes = [1, 512], strides = [1, 1]} : vector<9x512xf32> to vector<1x512xf32>
    %169 = vector.broadcast %168 : vector<1x512xf32> to vector<32x512xf32>
    %170 = arith.mulf %167, %169 : vector<32x512xf32>
    %c0_85 = arith.constant 0 : index
    %c112_86 = arith.constant 112 : index
    %171 = vector.load %arg16[%c0_85, %c112_86] : memref<32x768xf32, #tpu.memory_space<vmem>>, vector<32x512xf32>
    %172 = vector.extract_strided_slice %0 {offsets = [1, 0], sizes = [1, 512], strides = [1, 1]} : vector<9x512xf32> to vector<1x512xf32>
    %173 = vector.broadcast %172 : vector<1x512xf32> to vector<32x512xf32>
    %174 = arith.mulf %171, %173 : vector<32x512xf32>
    %c0_87 = arith.constant 0 : index
    %c113_88 = arith.constant 113 : index
    %175 = vector.load %arg16[%c0_87, %c113_88] : memref<32x768xf32, #tpu.memory_space<vmem>>, vector<32x512xf32>
    %176 = vector.extract_strided_slice %0 {offsets = [2, 0], sizes = [1, 512], strides = [1, 1]} : vector<9x512xf32> to vector<1x512xf32>
    %177 = vector.broadcast %176 : vector<1x512xf32> to vector<32x512xf32>
    %178 = arith.mulf %175, %177 : vector<32x512xf32>
    %c0_89 = arith.constant 0 : index
    %c127_90 = arith.constant 127 : index
    %179 = vector.load %arg16[%c0_89, %c127_90] : memref<32x768xf32, #tpu.memory_space<vmem>>, vector<32x512xf32>
    %180 = vector.extract_strided_slice %0 {offsets = [3, 0], sizes = [1, 512], strides = [1, 1]} : vector<9x512xf32> to vector<1x512xf32>
    %181 = vector.broadcast %180 : vector<1x512xf32> to vector<32x512xf32>
    %182 = arith.mulf %179, %181 : vector<32x512xf32>
    %c0_91 = arith.constant 0 : index
    %c128_92 = arith.constant 128 : index
    %183 = vector.load %arg16[%c0_91, %c128_92] : memref<32x768xf32, #tpu.memory_space<vmem>>, vector<32x512xf32>
    %c0_93 = arith.constant 0 : index
    %c129_94 = arith.constant 129 : index
    %184 = vector.load %arg16[%c0_93, %c129_94] : memref<32x768xf32, #tpu.memory_space<vmem>>, vector<32x512xf32>
    %185 = vector.extract_strided_slice %0 {offsets = [5, 0], sizes = [1, 512], strides = [1, 1]} : vector<9x512xf32> to vector<1x512xf32>
    %186 = vector.broadcast %185 : vector<1x512xf32> to vector<32x512xf32>
    %187 = arith.mulf %184, %186 : vector<32x512xf32>
    %c0_95 = arith.constant 0 : index
    %c143_96 = arith.constant 143 : index
    %188 = vector.load %arg16[%c0_95, %c143_96] : memref<32x768xf32, #tpu.memory_space<vmem>>, vector<32x512xf32>
    %189 = vector.extract_strided_slice %0 {offsets = [6, 0], sizes = [1, 512], strides = [1, 1]} : vector<9x512xf32> to vector<1x512xf32>
    %190 = vector.broadcast %189 : vector<1x512xf32> to vector<32x512xf32>
    %191 = arith.mulf %188, %190 : vector<32x512xf32>
    %c0_97 = arith.constant 0 : index
    %c144_98 = arith.constant 144 : index
    %192 = vector.load %arg16[%c0_97, %c144_98] : memref<32x768xf32, #tpu.memory_space<vmem>>, vector<32x512xf32>
    %193 = vector.extract_strided_slice %0 {offsets = [7, 0], sizes = [1, 512], strides = [1, 1]} : vector<9x512xf32> to vector<1x512xf32>
    %194 = vector.broadcast %193 : vector<1x512xf32> to vector<32x512xf32>
    %195 = arith.mulf %192, %194 : vector<32x512xf32>
    %c0_99 = arith.constant 0 : index
    %c145_100 = arith.constant 145 : index
    %196 = vector.load %arg16[%c0_99, %c145_100] : memref<32x768xf32, #tpu.memory_space<vmem>>, vector<32x512xf32>
    %197 = vector.extract_strided_slice %0 {offsets = [8, 0], sizes = [1, 512], strides = [1, 1]} : vector<9x512xf32> to vector<1x512xf32>
    %198 = vector.broadcast %197 : vector<1x512xf32> to vector<32x512xf32>
    %199 = arith.mulf %196, %198 : vector<32x512xf32>
    %200 = tpu.concatenate %170, %174, %178, %182, %183, %187, %191, %195, %199 in 0 : vector<32x512xf32>, vector<32x512xf32>, vector<32x512xf32>, vector<32x512xf32>, vector<32x512xf32>, vector<32x512xf32>, vector<32x512xf32>, vector<32x512xf32>, vector<32x512xf32> -> vector<288x512xf32>
    %cst_101 = arith.constant dense<0.000000e+00> : vector<8x512xf32>
    %201 = tpu.matmul %166, %200, %cst_101 {dimension_numbers = #tpu.dot_dimension_numbers<[1], [0], [0], [1], [0, 0, 1, 1], [], []>} : vector<8x288xf32>, vector<288x512xf32>, vector<8x512xf32> -> vector<8x512xf32>
    %202 = vector.extract_strided_slice %201 {offsets = [0, 0], sizes = [1, 512], strides = [1, 1]} : vector<8x512xf32> to vector<1x512xf32>
    %c0_102 = arith.constant 0 : index
    %c0_103 = arith.constant 0 : index
    %203 = vector.load %arg14[%c0_102, %c0_103] : memref<1x1xf32, #tpu.memory_space<vmem>>, vector<1x1xf32>
    %204 = vector.broadcast %203 : vector<1x1xf32> to vector<1x512xf32>
    %205 = arith.addf %202, %204 : vector<1x512xf32>
    %c0_104 = arith.constant 0 : index
    %c0_105 = arith.constant 0 : index
    %206 = vector.load %arg15[%c0_104, %c0_105] : memref<1x512xf32, #tpu.memory_space<vmem>>, vector<1x512xf32>
    tpu.vector_store %arg15[%c0_104, %c0_105], %205 {strides = array<i32>} : memref<1x512xf32, #tpu.memory_space<vmem>>, vector<1x512xf32>,
    return
  }
  func.func @transform_0(%arg0: i32) -> (i32, i32) {
    %c0_i32 = arith.constant 0 : i32
    %c0_i32_0 = arith.constant 0 : i32
    %c0_i32_1 = arith.constant 0 : i32
    return %c0_i32, %c0_i32_0 : i32, i32
  }
  func.func @transform_1(%arg0: i32) -> (i32, i32) {
    %c0_i32 = arith.constant 0 : i32
    %c0_i32_0 = arith.constant 0 : i32
    %c0_i32_1 = arith.constant 0 : i32
    return %c0_i32, %c0_i32_0 : i32, i32
  }
  func.func @transform_2(%arg0: i32) -> (i32, i32) {
    %c0_i32 = arith.constant 0 : i32
    %c0_i32_0 = arith.constant 0 : i32
    %c0_i32_1 = arith.constant 0 : i32
    return %c0_i32, %c0_i32_0 : i32, i32
  }
  func.func @transform_3(%arg0: i32) -> (i32, i32) {
    %c0_i32 = arith.constant 0 : i32
    %c0_i32_0 = arith.constant 0 : i32
    %c0_i32_1 = arith.constant 0 : i32
    return %c0_i32, %c0_i32_0 : i32, i32
  }
  func.func @transform_4(%arg0: i32) -> (i32, i32) {
    %c0_i32 = arith.constant 0 : i32
    %c0_i32_0 = arith.constant 0 : i32
    %c0_i32_1 = arith.constant 0 : i32
    return %c0_i32, %c0_i32_0 : i32, i32
  }
  func.func @transform_5(%arg0: i32) -> (i32, i32) {
    %c0_i32 = arith.constant 0 : i32
    %c0_i32_0 = arith.constant 0 : i32
    %c0_i32_1 = arith.constant 0 : i32
    return %c0_i32, %c0_i32_0 : i32, i32
  }
  func.func @transform_6(%arg0: i32) -> (i32, i32) {
    %c0_i32 = arith.constant 0 : i32
    %c0_i32_0 = arith.constant 0 : i32
    %c0_i32_1 = arith.constant 0 : i32
    return %c0_i32, %c0_i32_0 : i32, i32
  }
  func.func @transform_7(%arg0: i32) -> (i32, i32) {
    %c0_i32 = arith.constant 0 : i32
    %c0_i32_0 = arith.constant 0 : i32
    %c0_i32_1 = arith.constant 0 : i32
    return %c0_i32, %c0_i32_0 : i32, i32
  }
  func.func @transform_8(%arg0: i32) -> (i32, i32) {
    %c0_i32 = arith.constant 0 : i32
    %c0_i32_0 = arith.constant 0 : i32
    %c0_i32_1 = arith.constant 0 : i32
    return %c0_i32, %c0_i32_0 : i32, i32
  }
  func.func @transform_9(%arg0: i32) -> (i32, i32) {
    %c0_i32 = arith.constant 0 : i32
    %c0_i32_0 = arith.constant 0 : i32
    %c0_i32_1 = arith.constant 0 : i32
    return %c0_i32, %c0_i32_0 : i32, i32
  }
  func.func @transform_10(%arg0: i32) -> (i32, i32) {
    %c0_i32 = arith.constant 0 : i32
    %c0_i32_0 = arith.constant 0 : i32
    %c0_i32_1 = arith.constant 0 : i32
    return %c0_i32, %c0_i32_0 : i32, i32
  }
  func.func @transform_11(%arg0: i32) -> (i32, i32) {
    %c0_i32 = arith.constant 0 : i32
    %c0_i32_0 = arith.constant 0 : i32
    %c0_i32_1 = arith.constant 0 : i32
    return %c0_i32, %c0_i32_0 : i32, i32
  }
  func.func @transform_12(%arg0: i32) -> (i32, i32) {
    %c0_i32 = arith.constant 0 : i32
    %c0_i32_0 = arith.constant 0 : i32
    %c0_i32_1 = arith.constant 0 : i32
    return %c0_i32, %c0_i32_0 : i32, i32
  }
  func.func @transform_13(%arg0: i32) -> (i32, i32) {
    %c0_i32 = arith.constant 0 : i32
    %c0_i32_0 = arith.constant 0 : i32
    %c0_i32_1 = arith.constant 0 : i32
    return %c0_i32, %c0_i32_0 : i32, i32
  }
  func.func @transform_14(%arg0: i32) -> (i32, i32) {
    %c0_i32 = arith.constant 0 : i32
    %c0_i32_0 = arith.constant 0 : i32
    %c0_i32_1 = arith.constant 0 : i32
    return %c0_i32, %c0_i32_0 : i32, i32
  }
}

</mosaic_0001>

<bundles_post_ra>
// kernel: tpu_custom_call.1
= control target key start
LH: loop header
LB: loop body
LE: loop exit
PB: predicated region body
PF: predicated region fallthrough
CT: control target
= control target key end

     0   :  { %s12914_s0 = inlined_call_operand.vmem [shape: f32[2,512], index: 0, kind: input, shape index: {}]   ;;  %s12915_s1 = inlined_call_operand.vmem [shape: f32[9,512], index: 1, kind: input, shape index: {}]   ;;  %s12916_s2 = inlined_call_operand.vmem [shape: f32[2,1], index: 2, kind: input, shape index: {}]   ;;  %s12917_s3 = inlined_call_operand.vmem [shape: f32[2,1], index: 3, kind: input, shape index: {}]   ;;  %s12918_s4 = inlined_call_operand.vmem [shape: f32[32,18], index: 4, kind: input, shape index: {}]   ;;  %s12919_s5 = inlined_call_operand.vmem [shape: f32[32,1], index: 5, kind: input, shape index: {}]   ;;  %s12920_s6 = inlined_call_operand.vmem [shape: f32[32,1], index: 6, kind: input, shape index: {}]   ;;  %s12921_s7 = inlined_call_operand.vmem [shape: f32[32,1], index: 7, kind: input, shape index: {}]   ;;  %s12922_s8 = inlined_call_operand.hbm [shape: f32[32,288], index: 8, kind: input, shape index: {}]   ;;  %s12923_s9 = inlined_call_operand.vmem [shape: f32[32,1], index: 9, kind: input, shape index: {}]   ;;  %s12924_s10 = inlined_call_operand.vmem [shape: f32[32,1], index: 10, kind: input, shape index: {}]   ;;  %s12925_s11 = inlined_call_operand.vmem [shape: f32[32,1], index: 11, kind: input, shape index: {}]   ;;  %s12926_s12 = inlined_call_operand.vmem [shape: f32[8,288], index: 12, kind: input, shape index: {}]   ;;  %s12927_s13 = inlined_call_operand.<no memory space> [shape: f32[1,1], index: 13, kind: input, shape index: {}]   ;;  %s12928_s14 = inlined_call_operand.hbm [shape: f32[1,512], index: 14, kind: output, shape index: {}]  }
   0x1   :  { %v19_v0 = vstv %s12927_s13 }
   0x2   :  { %20 = vst [vmem:[#allocation3] sm:$0x1] %v19_v0 }
   0x3   :  { %21 = vsyncpa [#allocation5], 0 }
   0x4   :  { %22 = vsyncpa [#allocation6], 0  ;;  %s43_s17 = sshll.u32 %s12922_s8, 4  ;;  %s6975_s18 = smov [#allocation4]   ;;  %s44_s17 = int_to_ptr.hbm [resolvable:$true] %s43_s17 }
   0x5   :  { %s45_s19 = sshll.u32 %s6975_s18, 4  ;;  %s6976_s20 = smov 384   ;;  %s46_s19 = int_to_ptr.vmem [resolvable:$true] %s45_s19 }
   0x6   :  { %s6977_s21 = smov 24  }
   0x7   :  { %51 = dma.hbm_to_vmem [thread:$0]  %s44_s17, 1536, %s46_s19, [#allocation5], %s6976_s20, %s6976_s20, %s6977_s21  }
   0x8   :  { %6971 = dma.done.wait [#allocation5], 1536  }
   0x9   :  { %6972 = vsyncadd [#allocation5], 4294965760  ;;  %v7080_v1 = vld [vmem:[%s12915_s1 + $0x18] sm:$0xff]  ;;  %v7085_v2 = vld [vmem:[%s12915_s1 + $0x10] sm:$0xff]  ;;  %s6978_s28 = smov 111   ;;  %vm95_vm0 = vcmask 1041408  }
   0xa   :  { %v7090_v3 = vld [vmem:[%s12915_s1] sm:$0xff]  ;;  %v196_v4 = vperm.slane %v7080_v1, 0  ;;  %v195_v5 = vperm.slane %v7085_v2, 0  ;;  %v7107_v8 = vld [vmem:[%s12915_s1 + $0x8] sm:$0xff]  ;;  %v226_v16 = vperm.slane %v7080_v1, 1  ;;  %v255_v23 = vperm.slane %v7085_v2, 2 }
   0xb   :  { %v193_v6 = vperm.slane %v7090_v3, 0  ;;  %v7098_v7 = vld [vmem:[%s12914_s0] sm:$0xff]  ;;  %v194_v10 = vperm.slane %v7107_v8, 0  ;;  %v224_v15 = vperm.slane %v7107_v8, 1  ;;  %s6979_s0 = smov 112   ;;  %s6980_s15 = smov 113  }
   0xc   :  { %86 = vst [vmem:[#allocation1] ss:$4 sm:$0xff] %v7098_v7  ;;  %207 = vrot.lane.b32.xlu1 %v196_v4, %s6978_s28  ;;  %205 = vrot.lane.b32.xlu0 %v195_v5, %s6978_s28  ;;  %v113_v9 = vmul.f32 %v7098_v7, %v7098_v7  ;;  %v223_v31 = vperm.slane %v7090_v3, 1  ;;  %v284_v34 = vperm.slane %v7107_v8, 3  ;;  %s6981_s16 = smov 127   ;;  %v314_v38 = vperm.slane %v7090_v3, 5 }
   0xd   :  { %201 = vrot.lane.b32.xlu2 %v193_v6, %s6978_s28  ;;  %s6982_s17 = smov 1   ;;  %v317_v39 = vperm.slane %v7080_v1, 5  ;;  %v225_v40 = vperm.slane %v7085_v2, 1  ;;  %v254_v41 = vperm.slane %v7107_v8, 2  ;;  %v283_v42 = vperm.slane %v7090_v3, 3  ;;  %s6983_s18 = smov 15  }
   0xe   :  { %v346_v43 = vperm.slane %v7085_v2, 6  ;;  %v286_v44 = vperm.slane %v7080_v1, 3  ;;  %v253_v45 = vperm.slane %v7090_v3, 2  ;;  %v6984_v46 = vmov 0   ;;  %s6985_s19 = smov 16   ;;  %s6986_s22 = smov 17  }
   0xf   :  { %5120 = vset.pattern.permute.xlu1 %v6984_v46  ;;  %5121 = vset.pattern.permute.xlu2 %v6984_v46  ;;  %v375_v47 = vperm.slane %v7107_v8, 7  ;;  %v256_v48 = vperm.slane %v7080_v1, 2  ;;  %v316_v49 = vperm.slane %v7085_v2, 5  ;;  %v6897_v50 = vld [vmem:[%s12915_s1 + $0x20] ss:$0 sm:$0xff]  ;;  %v285_v51 = vperm.slane %v7085_v2, 3 }
  0x10   :  { %5119 = vset.pattern.permute.xlu0 %v6984_v46  ;;  %v345_v52 = vperm.slane %v7107_v8, 6  ;;  %v6898_v53 = vld [vmem:[%s12915_s1 + $0x38] ss:$0 sm:$0xff]  ;;  %v315_v54 = vperm.slane %v7107_v8, 5  ;;  %v374_v55 = vperm.slane %v7090_v3, 7  ;;  %v344_v56 = vperm.slane %v7090_v3, 6 }
  0x11   :  { %v685_v57 = vld [vmem:[%s12919_s5 + $0x8] sm:$0xff]  ;;  %v377_v58 = vperm.slane %v7080_v1, 7  ;;  %v6899_v59 = vld [vmem:[%s12915_s1 + $0x30] ss:$0 sm:$0xff]  ;;  %v347_v60 = vperm.slane %v7080_v1, 6  ;;  %v687_v61 = vld [vmem:[%s12919_s5 + $0x18] sm:$0xff] }
  0x12   :  { %v6987_v62 = vmov 512.0   ;;  %v376_v63 = vperm.slane %v7085_v2, 7  ;;  %v1983_v0 = vld [vmem:[%s12923_s9 + $0x10] sm:$0xff]  ;;  %v6900_v4 = vld [vmem:[%s12915_s1 + $0x28] ss:$0 sm:$0xff]  ;;  %s6991_s23 = smov 94  }
  0x13   :  { %v87_v11 = vld.sshfl [vmem:[#allocation1] sm:$0xff pattern:$0x73625140]  ;;  %v88_v12 = vld.sshfl [vmem:[#allocation1 + $0x8] sm:$0xff pattern:$0x73625140]  ;;  %6901 = vrcp.f32 %v6987_v62 }
  0x14   :  { %v89_v13 = vld.sshfl [vmem:[#allocation1 + $0x10] sm:$0xff pattern:$0x73625140]  ;;  %v90_v14 = vld.sshfl [vmem:[#allocation1 + $0x18] sm:$0xff pattern:$0x73625140]  ;;  %233 = vrot.lane.b32.xlu1 %v224_v15, %s6979_s0 }
  0x15   :  { %115 = vst [vmem:[#allocation1] ss:$4 sm:$0xff] %v113_v9  ;;  %203 = vrot.lane.b32.xlu2 %v194_v10, %s6978_s28  ;;  %v96_v17 = vsel %vm95_vm0, %v87_v11, 0.0  ;;  %v97_v18 = vsel %vm95_vm0, %v88_v12, 0.0  ;;  %v99_v20 = vsel %vm95_vm0, %v89_v13, 0.0  ;;  %v101_v25 = vsel %vm95_vm0, %v90_v14, 0.0 }
  0x16   :  { %v98_v19 = vadd.f32 %v97_v18, %v96_v17  ;;  %s6992_s8 = smov 95   ;;  %vm239_vm5 = vcmask 916480   ;;  %vm420_vm6 = vcmask 138240   ;;  %vm269_vm7 = vcmask 924672  }
  0x17   :  { %vm299_vm8 = vcmask 1039360   ;;  %vm330_vm9 = vcmask 7168   ;;  %vm360_vm10 = vcmask 121856   ;;  %vm390_vm11 = vcmask 130048  }
  0x18   :  { %v100_v24 = vadd.f32 %v99_v20, %v98_v19  ;;  %vm647_vm12 = vcmask 769024   ;;  %vm209_vm13 = vcmask 908288   ;;  %vm483_vm14 = vcmask 1031168  }
  0x19   :  { %v6902_v1 = vpop.eup %6901  ;;  %vm562_vm15 = vcmask 900096  }
  0x1a   :  { %v102_v29 = vadd.f32 %v101_v25, %v100_v24  ;;  %v106_v6 = vmul.f32 512.0, %v6902_v1  ;;  %vm110_vm1 = vweird.f32 %v6902_v1 }
  0x1c   :  { %237 = vrot.lane.b32.xlu1 %v226_v16, %s6979_s0  ;;  %v116_v21 = vld.sshfl [vmem:[#allocation1] sm:$0xff pattern:$0x73625140]  ;;  %v117_v22 = vld.sshfl [vmem:[#allocation1 + $0x8] sm:$0xff pattern:$0x73625140] }
  0x1d   :  { %v124_v26 = vsel %vm95_vm0, %v116_v21, 0.0  ;;  %v125_v27 = vsel %vm95_vm0, %v117_v22, 0.0  ;;  %v118_v28 = vld.sshfl [vmem:[#allocation1 + $0x10] sm:$0xff pattern:$0x73625140]  ;;  %231 = vrot.lane.b32.xlu2 %v223_v31, %s6979_s0  ;;  %v107_v2 = vsub.f32 1.0, %v106_v6 }
  0x1e   :  { %v126_v30 = vadd.f32 %v125_v27, %v124_v26  ;;  %v127_v32 = vsel %vm95_vm0, %v118_v28, 0.0  ;;  %v119_v33 = vld.sshfl [vmem:[#allocation1 + $0x18] sm:$0xff pattern:$0x73625140]  ;;  %v6988_v28 = vmov 0.0  }
  0x1f   :  { %v129_v36 = vsel %vm95_vm0, %v119_v33, 0.0  ;;  %v108_v9 = vmul.f32 %v6902_v1, %v107_v2  ;;  %78 = vst [vmem:[#allocation2 + $0x38] sm:$0xff] %v6988_v28  ;;  %v1981_v2 = vld [vmem:[%s12923_s9] sm:$0xff] }
  0x20   :  { %v128_v35 = vadd.f32 %v127_v32, %v126_v30  ;;  %74 = vst [vmem:[#allocation2 + $0xa8] sm:$0xff] %v6988_v28 }
  0x21   :  { %v109_v12 = vadd.f32 %v6902_v1, %v108_v9  ;;  %v684_v9 = vld [vmem:[%s12919_s5] sm:$0xff] }
  0x22   :  { %v130_v37 = vadd.f32 %v129_v36, %v128_v35  ;;  %v83_v35 = vld [vmem:[%s12916_s2] sm:$0x3]  ;;  %s6989_s2 = smov 110  }
  0x23   :  { %v7204_v14 = vsel %vm110_vm1, %v6902_v1, %v109_v12  ;;  %vm657_vm1 = vcmask 1043456  }
  0x24   :  { %265 = vrot.lane.b32.xlu1 %v255_v23, %s6980_s15  ;;  %13400 = vst [vmem:[#allocation12_spill] sm:$0xff] %v7204_v14 }
  0x25   :  { %235 = vrot.lane.b32.xlu2 %v225_v40, %s6979_s0 }
  0x2c   :  { %293 = vrot.lane.b32.xlu1 %v284_v34, %s6981_s16 }
  0x2d   :  { %261 = vrot.lane.b32.xlu2 %v253_v45, %s6980_s15 }
  0x34   :  { %322 = vrot.lane.b32.xlu1 %v314_v38, %s6982_s17 }
  0x35   :  { %267 = vrot.lane.b32.xlu2 %v256_v48, %s6980_s15 }
  0x36   :  { %103 = vadd.xlane.f32.xlu0 %v102_v29 }
  0x3c   :  { %328 = vrot.lane.b32.xlu1 %v317_v39, %s6982_s17  ;;  %v313_v39 = vld [vmem:[#allocation2 + $0x38] sm:$0x3] }
  0x3d   :  { %295 = vrot.lane.b32.xlu2 %v285_v51, %s6981_s16 }
  0x3e   :  { %131 = vadd.xlane.f32.xlu0 %v130_v37 }
  0x44   :  { %356 = vrot.lane.b32.xlu1 %v346_v43, %s6983_s18 }
  0x45   :  { %324 = vrot.lane.b32.xlu2 %v315_v54, %s6982_s17 }
  0x4c   :  { %384 = vrot.lane.b32.xlu1 %v375_v47, %s6985_s19 }
  0x4d   :  { %352 = vrot.lane.b32.xlu2 %v344_v56, %s6983_s18 }
  0x52   :  { %263 = vrot.lane.b32.xlu0 %v254_v41, %s6980_s15 }
  0x54   :  { %412 = vrot.lane.b32.xlu1 %v6897_v50, %s6986_s22 }
  0x55   :  { %358 = vrot.lane.b32.xlu2 %v347_v60, %s6983_s18 }
  0x5a   :  { %291 = vrot.lane.b32.xlu0 %v283_v42, %s6981_s16 }
  0x5c   :  { %418 = vrot.lane.b32.xlu1 %v6898_v53, %s6986_s22 }
  0x5d   :  { %386 = vrot.lane.b32.xlu2 %v376_v63, %s6985_s19 }
  0x62   :  { %297 = vrot.lane.b32.xlu0 %v286_v44, %s6981_s16  ;;  %v84_v44 = vld [vmem:[%s12917_s3] sm:$0x3]  ;;  %s6990_s3 = smov 96  }
  0x64   :  { %695 = vperm.xlu1 %5120, %v685_v57  }
  0x65   :  { %414 = vrot.lane.b32.xlu2 %v6900_v4, %s6986_s22 }
  0x67   :  { %v7190_v3 = vpop.permute.xlu2 %201 }
  0x68   :  { %13398 = vst [vmem:[#allocation10_spill] sm:$0xff] %v7190_v3 }
  0x6a   :  { %326 = vrot.lane.b32.xlu0 %v316_v49, %s6982_s17 }
  0x6c   :  { %705 = vperm.xlu1 %5120, %v687_v61  }
  0x6f   :  { %v7202_v11 = vpop.permute.xlu2 %203 }
  0x72   :  { %354 = vrot.lane.b32.xlu0 %v345_v52, %s6983_s18 }
  0x74   :  { %1997 = vperm.xlu1 %5120, %v1983_v0   ;;  %v686_v0 = vld [vmem:[%s12919_s5 + $0x10] sm:$0xff]  ;;  %s6994_s5 = smov 126  }
  0x77   :  { %v7208_v16 = vpop.permute.xlu2 %231 }
  0x78   :  { %13402 = vst [vmem:[#allocation14_spill] sm:$0xff] %v7208_v16 }
  0x7a   :  { %382 = vrot.lane.b32.xlu0 %v374_v55, %s6985_s19 }
  0x7e   :  { %v7195_v5 = vpop.permute.xlu1 %207  ;;  %v7198_v8 = vpop.permute.xlu0 %205 }
  0x7f   :  { %13399 = vst [vmem:[#allocation11_spill] sm:$0xff] %v7195_v5  ;;  %v7214_v23 = vpop.permute.xlu2 %235 }
  0x82   :  { %388 = vrot.lane.b32.xlu0 %v377_v58, %s6985_s19 }
  0x86   :  { %v7200_v10 = vpop.permute.xlu1 %233 }
  0x87   :  { %v7218_v26 = vpop.permute.xlu2 %261 }
  0x88   :  { %13403 = vst [vmem:[#allocation15_spill] sm:$0xff] %v7218_v26 }
  0x8a   :  { %416 = vrot.lane.b32.xlu0 %v6899_v59, %s6986_s22 }
  0x8e   :  { %v7206_v15 = vpop.permute.xlu1 %237 }
  0x8f   :  { %13401 = vst [vmem:[#allocation13_spill] sm:$0xff] %v7206_v15  ;;  %v7222_v34 = vpop.permute.xlu2 %267 }
  0x90   :  { %13405 = vst [vmem:[#allocation17_spill] sm:$0xff] %v7222_v34 }
  0x96   :  { %v7212_v22 = vpop.permute.xlu1 %265 }
  0x97   :  { %v7229_v41 = vpop.permute.xlu2 %295 }
  0x9e   :  { %v7216_v25 = vpop.permute.xlu1 %293 }
  0x9f   :  { %v7238_v48 = vpop.permute.xlu2 %324 }
  0xa6   :  { %v7220_v32 = vpop.permute.xlu1 %322 }
  0xa7   :  { %13404 = vst [vmem:[#allocation16_spill] sm:$0xff] %v7220_v32  ;;  %v7242_v50 = vpop.permute.xlu2 %352 }
  0xa8   :  { %13407 = vst [vmem:[#allocation19_spill] sm:$0xff] %v7242_v50 }
  0xa9   :  { %v104_v13 = vpop.xlane.xlu0 %103 }
  0xaa   :  { %v112_v17 = vmul.f32 %v7204_v14, %v104_v13  ;;  %v1984_v13 = vld [vmem:[%s12923_s9 + $0x18] sm:$0xff] }
  0xac   :  { %v134_v19 = vmul.f32 %v112_v17, %v112_v17 }
  0xae   :  { %v7227_v40 = vpop.permute.xlu1 %328 }
  0xaf   :  { %13406 = vst [vmem:[#allocation18_spill] sm:$0xff] %v7227_v40  ;;  %v343_v42 = vmul.f32 %v7227_v40, %v313_v39  ;;  %v7248_v53 = vpop.permute.xlu2 %358 }
  0xb0   :  { %13409 = vst [vmem:[#allocation21_spill] sm:$0xff] %v7248_v53  ;;  %v373_v54 = vmul.f32 %v7248_v53, %v313_v39 }
  0xb1   :  { %v132_v18 = vpop.xlane.xlu0 %131  ;;  %v551_v45 = vrot.slane %v343_v42, 6 }
  0xb2   :  { %v133_v20 = vmul.f32 %v132_v18, %v7204_v14  ;;  %v581_v55 = vrot.slane %v373_v54, 4 }
  0xb3   :  { %560 = vrot.lane.b32.xlu0 %v551_v45, %s6989_s2 }
  0xb4   :  { %v135_v21 = vsub.f32 %v133_v20, %v134_v19  ;;  %v6993_v19 = vmov 269488144  }
  0xb5   :  { %v153_v20 = vunpack.c.l.s4 %v6993_v19  ;;  %v7338_v19 = vsel %vm239_vm5, %v7200_v10, %v7214_v23 }
  0xb6   :  { %v136_v24 = vadd.f32 1e-05, %v135_v21  ;;  %v7236_v47 = vpop.permute.xlu1 %356  ;;  %13420 = vst [vmem:[#allocation32_spill] sm:$0xff] %v7338_v19 }
  0xb8   :  { %6903 = vrsqrt.f32 %v136_v24  ;;  %vm143_vm3 = vweird.f32 %v136_v24 }
  0xbb   :  { %590 = vrot.lane.b32.xlu0 %v581_v55, %s6990_s3 }
  0xbe   :  { %v6904_v27 = vpop.eup %6903  ;;  %v7240_v49 = vpop.permute.xlu1 %384 }
  0xbf   :  { %v138_v29 = vmul.f32 %v6904_v27, %v136_v24  ;;  %vm144_vm2 = vweird.f32 %v6904_v27  ;;  %v154_v24 = vunpack.c.0.s8 %v153_v20  ;;  %v7343_v20 = vsel %vm239_vm5, %v7214_v23, %v7206_v15 }
  0xc0   :  { %vm145_vm4 = vmor %vm143_vm3, %vm144_vm2  ;;  %13421 = vst [vmem:[#allocation33_spill] sm:$0xff] %v7343_v20  ;;  %vm592_vm2 = vcmask 785408   ;;  %vm663_vm3 = vcmask 1045504  }
  0xc1   :  { %v139_v30 = vmul.f32 %v6904_v27, %v138_v29 }
  0xc3   :  { %v140_v31 = vmul.f32 0.5, %v139_v30 }
  0xc4   :  { %v7244_v51 = vpop.permute.xlu0 %263 }
  0xc5   :  { %v141_v33 = vsub.f32 1.5, %v140_v31 }
  0xc6   :  { %v7246_v52 = vpop.permute.xlu1 %412 }
  0xc7   :  { %v142_v36 = vmul.f32 %v6904_v27, %v141_v33  ;;  %13408 = vst [vmem:[#allocation20_spill] sm:$0xff] %v7246_v52 }
  0xc9   :  { %v146_v37 = vsel %vm145_vm4, %v6904_v27, %v142_v36  ;;  %vm622_vm4 = vcmask 777216  }
  0xca   :  { %v147_v38 = vmul.f32 %v146_v37, %v83_v35 }
  0xcc   :  { %150 = vperm.xlu1 %5120, %v147_v38   ;;  %v158_v43 = vmul.f32 %v147_v38, %v112_v17  ;;  %v7255_v58 = vpop.permute.xlu0 %291  ;;  %v1982_v17 = vld [vmem:[%s12923_s9 + $0x8] sm:$0xff]  ;;  %v7292_v38 = vpop.permute.xlu2 %386 }
  0xcd   :  { %13411 = vst [vmem:[#allocation23_spill] sm:$0xff] %v7255_v58 }
  0xce   :  { %v159_v46 = vsub.f32 %v84_v44, %v158_v43  ;;  %v7251_v56 = vpop.permute.xlu1 %418 }
  0xcf   :  { %13410 = vst [vmem:[#allocation22_spill] sm:$0xff] %v7251_v56  ;;  %v433_v57 = vmul.f32 %v7251_v56, %v313_v39 }
  0xd1   :  { %645 = vrot.lane.b32.xlu2 %v433_v57, %s6991_s23 }
  0xd4   :  { %162 = vperm.xlu1 %5120, %v159_v46   ;;  %v7258_v59 = vpop.permute.xlu0 %297  ;;  %v415_v55 = vpop.permute.xlu2 %414 }
  0xd5   :  { %13412 = vst [vmem:[#allocation24_spill] sm:$0xff] %v7258_v59 }
  0xd6   :  { %v7272_v4 = vpop.permute.xlu1 %695 }
  0xd9   :  { %700 = vperm.xlu2 %5121, %v686_v0   ;;  %v7318_v0 = vsel %vm239_vm5, %v7208_v16, %v7200_v10 }
  0xda   :  { %13417 = vst [vmem:[#allocation29_spill] sm:$0xff] %v7318_v0 }
  0xdc   :  { %v7260_v60 = vpop.permute.xlu0 %326 }
  0xde   :  { %v7281_v12 = vpop.permute.xlu1 %705 }
  0xe1   :  { %1987 = vperm.xlu2 %5121, %v1981_v2  }
  0xe4   :  { %v7262_v61 = vpop.permute.xlu0 %354 }
  0xe6   :  { %v7289_v18 = vpop.permute.xlu1 %1997 }
  0xe7   :  { %13415 = vst [vmem:[#allocation27_spill] sm:$0xff] %v7289_v18 }
  0xe9   :  { %2002 = vperm.xlu2 %5121, %v1984_v13  }
  0xec   :  { %v7264_v62 = vpop.permute.xlu0 %382 }
  0xed   :  { %13413 = vst [vmem:[#allocation25_spill] sm:$0xff] %v7264_v62 }
  0xf4   :  { %v7266_v63 = vpop.permute.xlu0 %388 }
  0xf5   :  { %13414 = vst [vmem:[#allocation26_spill] sm:$0xff] %v7266_v63  ;;  %v403_v1 = vmul.f32 %v7266_v63, %v313_v39 }
  0xf7   :  { %v611_v6 = vrot.slane %v403_v1, 2  ;;  %v7322_v1 = vsel %vm420_vm6, %v7246_v52, %v415_v55 }
  0xf8   :  { %13418 = vst [vmem:[#allocation30_spill] sm:$0xff] %v7322_v1 }
  0xf9   :  { %620 = vrot.lane.b32.xlu0 %v611_v6, %s6992_s8 }
  0xfc   :  { %v417_v54 = vpop.permute.xlu0 %416 }
  0xfd   :  { %v7313_v57 = vsel %vm420_vm6, %v417_v54, %v7251_v56  ;;  %v7325_v6 = vsel %vm420_vm6, %v415_v55, %v417_v54  ;;  %v7369_v54 = vsel %vm269_vm7, %v7244_v51, %v7212_v22  ;;  %v7374_v55 = vsel %vm269_vm7, %v7212_v22, %v7222_v34 }
  0xfe   :  { %13416 = vst [vmem:[#allocation28_spill] sm:$0xff] %v7313_v57  ;;  %v1249_v22 = vmul.f32 0.0, %v7218_v26 }
  0xff   :  { %13419 = vst [vmem:[#allocation31_spill] sm:$0xff] %v7325_v6 }
 0x100   :  { %13423 = vst [vmem:[#allocation35_spill] sm:$0xff] %v7369_v54 }
 0x101   :  { %690 = vperm.xlu0 %5119, %v684_v9   ;;  %13424 = vst [vmem:[#allocation36_spill] sm:$0xff] %v7374_v55 }
 0x109   :  { %1992 = vperm.xlu0 %5119, %v1982_v17  }
 0x13e   :  { %v151_v21 = vpop.permute.xlu1 %150 }
 0x13f   :  { %v155_v27 = vperm.slane %v151_v21, %v154_v24  ;;  %v7346_v21 = vld [vmem:[#allocation2 + $0xa8] sm:$0x3] }
 0x141   :  { %v157_v29 = vmul.f32 %v155_v27, %v7098_v7 }
 0x146   :  { %v163_v28 = vpop.permute.xlu1 %162 }
 0x147   :  { %v167_v30 = vperm.slane %v163_v28, %v154_v24  ;;  %v248_v28 = vmul.f32 %v7208_v16, %v7346_v21 }
 0x149   :  { %v169_v31 = vadd.f32 %v167_v30, %v157_v29  ;;  %v1229_v30 = vmul.f32 0.0, %v7208_v16 }
 0x14b   :  { %171 = vst [vmem:[#allocation1] ss:$4 sm:$0xff] %v169_v31 }
 0x152   :  { %v172_v33 = vld.sshfl [vmem:[#allocation1] sm:$0xff pattern:$0x73625140]  ;;  %v173_v35 = vld.sshfl [vmem:[#allocation1 + $0x8] sm:$0xff pattern:$0x73625140] }
 0x153   :  { %180 = vst [vmem:[#allocation2 + $0x70] sm:$0x3] %v172_v33  ;;  %v174_v36 = vld.sshfl [vmem:[#allocation1 + $0x10] sm:$0xff pattern:$0x73625140] }
 0x154   :  { %181 = vst [vmem:[#allocation2 + $0x78] sm:$0x3] %v173_v35  ;;  %v175_v37 = vld.sshfl [vmem:[#allocation1 + $0x18] sm:$0xff pattern:$0x73625140]  ;;  %v439_v35 = vrot.slane %v248_v28, 6 }
 0x155   :  { %182 = vst [vmem:[#allocation2 + $0x90] sm:$0x3] %v174_v36  ;;  %v7361_v36 = vsel %vm269_vm7, %v7218_v26, %v7244_v51  ;;  %vm768_vm7 = vcmask 146432  }
 0x156   :  { %183 = vst [vmem:[#allocation2 + $0x80] sm:$0x3] %v175_v37 }
 0x157   :  { %13422 = vst [vmem:[#allocation34_spill] sm:$0xff] %v7361_v36 }
 0x15a   :  { %v7294_v39 = vld [vmem:[#allocation2 + $0x70] sm:$0x3] }
 0x15b   :  { %v429_v42 = vmul.f32 %v7246_v52, %v7294_v39  ;;  %v7298_v43 = vld [vmem:[#allocation2 + $0x78] sm:$0x3]  ;;  %v249_v17 = vmul.f32 %v7318_v0, %v7294_v39 }
 0x15c   :  { %v5122_v7 = vpack.i.bf16 %v7298_v43, %v7294_v39  ;;  %v7302_v44 = vld [vmem:[#allocation2 + $0x90] sm:$0x3]  ;;  %v430_v13 = vmul.f32 %v7322_v1, %v7298_v43  ;;  %v250_v27 = vmul.f32 %v7338_v19, %v7298_v43 }
 0x15d   :  { %637 = vrot.lane.b32.xlu1 %v429_v42, %s6991_s23  ;;  %v7305_v45 = vld [vmem:[#allocation2 + $0x80] sm:$0x3]  ;;  %v431_v24 = vmul.f32 %v7325_v6, %v7302_v44  ;;  %v251_v10 = vmul.f32 %v7343_v20, %v7302_v44  ;;  %v440_v29 = vrot.slane %v249_v17, 6  ;;  %v278_v17 = vmul.f32 %v7218_v26, %v7346_v21 }
 0x15e   :  { %5123 = vrot.lane.b32.xlu2 %v5122_v7, %s6978_s28  ;;  %v5127_v46 = vpack.i.bf16 %v7305_v45, %v7302_v44  ;;  %v432_v2 = vmul.f32 %v7313_v57, %v7305_v45  ;;  %v252_v9 = vmul.f32 %v7206_v15, %v7305_v45  ;;  %v441_v31 = vrot.slane %v250_v27, 6 }
 0x15f   :  { %v442_v33 = vrot.slane %v251_v10, 6  ;;  %v282_v42 = vmul.f32 %v7222_v34, %v7305_v45  ;;  %v5132_v7 = vpack.i.bf16 %v440_v29, %v439_v35  ;;  %v468_v28 = vrot.slane %v278_v17, 4 }
 0x160   :  { %5128 = vrot.lane.b32.xlu0 %v5127_v46, %s6978_s28  ;;  %v443_v23 = vrot.slane %v252_v9, 6  ;;  %v279_v46 = vmul.f32 %v7361_v36, %v7294_v39  ;;  %v280_v9 = vmul.f32 %v7369_v54, %v7298_v43  ;;  %v312_v29 = vmul.f32 %v7258_v59, %v7305_v45 }
 0x161   :  { %v472_v51 = vrot.slane %v282_v42, 4  ;;  %v7397_v35 = vsel %vm299_vm8, %v7216_v25, %v7229_v41  ;;  %v7422_v17 = vsel %vm330_vm9, %v7238_v48, %v7260_v60 }
 0x162   :  { %v5142_v37 = vpack.i.bf16 %v1229_v30, %v443_v23  ;;  %v470_v27 = vrot.slane %v280_v9, 4  ;;  %v7390_v30 = vsel %vm299_vm8, %v7255_v58, %v7216_v25  ;;  %13426 = vst [vmem:[#allocation38_spill] sm:$0xff] %v7397_v35  ;;  %v308_v25 = vmul.f32 %v7255_v58, %v7346_v21 }
 0x163   :  { %v5157_v23 = vpack.i.bf16 %v1249_v22, %v472_v51  ;;  %13425 = vst [vmem:[#allocation37_spill] sm:$0xff] %v7390_v30 }
 0x164   :  { %13429 = vst [vmem:[#allocation41_spill] sm:$0xff] %v7422_v17  ;;  %v498_v22 = vrot.slane %v308_v25, 2  ;;  %v7442_v25 = vsel %vm360_vm10, %v7242_v50, %v7262_v61 }
 0x165   :  { %643 = vrot.lane.b32.xlu1 %v432_v2, %s6991_s23  ;;  %v5137_v2 = vpack.i.bf16 %v442_v33, %v441_v31  ;;  %v309_v33 = vmul.f32 %v7390_v30, %v7294_v39  ;;  %13431 = vst [vmem:[#allocation43_spill] sm:$0xff] %v7442_v25 }
 0x166   :  { %639 = vrot.lane.b32.xlu2 %v430_v13, %s6991_s23  ;;  %v281_v13 = vmul.f32 %v7374_v55, %v7302_v44 }
 0x167   :  { %v499_v9 = vrot.slane %v309_v33, 2 }
 0x168   :  { %641 = vrot.lane.b32.xlu0 %v431_v24, %s6991_s23  ;;  %v469_v24 = vrot.slane %v279_v46, 4  ;;  %v471_v10 = vrot.slane %v281_v13, 4  ;;  %v1269_v13 = vmul.f32 0.0, %v7255_v58 }
 0x16a   :  { %v5147_v31 = vpack.i.bf16 %v469_v24, %v468_v28  ;;  %v5152_v42 = vpack.i.bf16 %v471_v10, %v470_v27  ;;  %v7427_v27 = vsel %vm330_vm9, %v7260_v60, %v7227_v40  ;;  %v339_v28 = vmul.f32 %v7220_v32, %v7294_v39 }
 0x16b   :  { %13430 = vst [vmem:[#allocation42_spill] sm:$0xff] %v7427_v27 }
 0x16c   :  { %v547_v60 = vrot.slane %v339_v28, 6 }
 0x16d   :  { %5143 = vrot.lane.b32.xlu1 %v5142_v37, %s6981_s16  ;;  %v7403_v37 = vsel %vm299_vm8, %v7229_v41, %v7258_v59  ;;  %v7416_v41 = vsel %vm330_vm9, %v7220_v32, %v7238_v48  ;;  %v341_v48 = vmul.f32 %v7422_v17, %v7302_v44 }
 0x16e   :  { %5133 = vrot.lane.b32.xlu2 %v5132_v7, %s6981_s16  ;;  %13427 = vst [vmem:[#allocation39_spill] sm:$0xff] %v7403_v37  ;;  %v310_v7 = vmul.f32 %v7397_v35, %v7298_v43  ;;  %v311_v46 = vmul.f32 %v7403_v37, %v7302_v44 }
 0x16f   :  { %13428 = vst [vmem:[#allocation40_spill] sm:$0xff] %v7416_v41 }
 0x170   :  { %5138 = vrot.lane.b32.xlu0 %v5137_v2, %s6981_s16  ;;  %v502_v2 = vrot.slane %v312_v29, 2  ;;  %v500_v51 = vrot.slane %v310_v7, 2  ;;  %v501_v24 = vrot.slane %v311_v46, 2  ;;  %v5162_v29 = vpack.i.bf16 %v499_v9, %v498_v22 }
 0x171   :  { %v549_v7 = vrot.slane %v341_v48, 6 }
 0x172   :  { %v5172_v10 = vpack.i.bf16 %v1269_v13, %v502_v2  ;;  %v5167_v33 = vpack.i.bf16 %v501_v24, %v500_v51  ;;  %v7446_v2 = vsel %vm360_vm10, %v7262_v61, %v7236_v47  ;;  %v369_v13 = vmul.f32 %v7242_v50, %v7294_v39 }
 0x173   :  { %13432 = vst [vmem:[#allocation44_spill] sm:$0xff] %v7446_v2  ;;  %v370_v51 = vmul.f32 %v7442_v25, %v7298_v43  ;;  %v7454_v24 = vsel %vm360_vm10, %v7236_v47, %v7248_v53  ;;  %v7464_v47 = vsel %vm390_vm11, %v7264_v62, %v7240_v49 }
 0x174   :  { %13433 = vst [vmem:[#allocation45_spill] sm:$0xff] %v7454_v24  ;;  %v372_v28 = vmul.f32 %v7454_v24, %v7305_v45  ;;  %v577_v61 = vrot.slane %v369_v13, 4 }
 0x175   :  { %5158 = vrot.lane.b32.xlu1 %v5157_v23, %s6994_s5  ;;  %v340_v23 = vmul.f32 %v7416_v41, %v7298_v43  ;;  %13434 = vst [vmem:[#allocation46_spill] sm:$0xff] %v7464_v47 }
 0x176   :  { %5148 = vrot.lane.b32.xlu2 %v5147_v31, %s6994_s5  ;;  %v342_v31 = vmul.f32 %v7427_v27, %v7305_v45  ;;  %v580_v48 = vrot.slane %v372_v28, 4  ;;  %v646_v28 = vpop.permute.xlu2 %645 }
 0x178   :  { %5153 = vrot.lane.b32.xlu0 %v5152_v42, %s6994_s5  ;;  %v548_v42 = vrot.slane %v340_v23, 6  ;;  %v550_v46 = vrot.slane %v342_v31, 6  ;;  %v578_v23 = vrot.slane %v370_v51, 4  ;;  %v7468_v31 = vsel %vm390_vm11, %v7240_v49, %v7292_v38 }
 0x179   :  { %13435 = vst [vmem:[#allocation47_spill] sm:$0xff] %v7468_v31 }
 0x17a   :  { %v5177_v9 = vpack.i.bf16 %v548_v42, %v547_v60  ;;  %v5182_v22 = vpack.i.bf16 %v550_v46, %v549_v7  ;;  %v399_v60 = vmul.f32 %v7264_v62, %v7294_v39  ;;  %v400_v42 = vmul.f32 %v7464_v47, %v7298_v43 }
 0x17b   :  { %v7476_v7 = vsel %vm390_vm11, %v7292_v38, %v7266_v63 }
 0x17c   :  { %13436 = vst [vmem:[#allocation48_spill] sm:$0xff] %v7476_v7  ;;  %v402_v13 = vmul.f32 %v7476_v7, %v7305_v45  ;;  %v607_v49 = vrot.slane %v399_v60, 2  ;;  %v608_v51 = vrot.slane %v400_v42, 2 }
 0x17d   :  { %5173 = vrot.lane.b32.xlu1 %v5172_v10, %s6979_s0  ;;  %v371_v10 = vmul.f32 %v7446_v2, %v7302_v44 }
 0x17e   :  { %5163 = vrot.lane.b32.xlu2 %v5162_v29, %s6979_s0  ;;  %v7486_v38 = vpop.permute.xlu2 %700 }
 0x17f   :  { %v579_v29 = vrot.slane %v371_v10, 4  ;;  %v610_v10 = vrot.slane %v402_v13, 2 }
 0x180   :  { %5168 = vrot.lane.b32.xlu0 %v5167_v33, %s6979_s0  ;;  %v5187_v33 = vpack.i.bf16 %v578_v23, %v577_v61  ;;  %v5197_v61 = vpack.i.bf16 %v608_v51, %v607_v49 }
 0x181   :  { %v5192_v46 = vpack.i.bf16 %v580_v48, %v579_v29  ;;  %v7488_v29 = vpop.permute.xlu0 %560 }
 0x185   :  { %5178 = vrot.lane.b32.xlu1 %v5177_v9, %s6989_s2  ;;  %v401_v9 = vmul.f32 %v7468_v31, %v7302_v44 }
 0x186   :  { %5183 = vrot.lane.b32.xlu2 %v5182_v22, %s6989_s2  ;;  %v7490_v48 = vpop.permute.xlu2 %1987 }
 0x187   :  { %v609_v22 = vrot.slane %v401_v9, 2  ;;  %13437 = vst [vmem:[#allocation49_spill] sm:$0xff] %v7490_v48 }
 0x189   :  { %v5202_v23 = vpack.i.bf16 %v610_v10, %v609_v22 }
 0x18d   :  { %5188 = vrot.lane.b32.xlu1 %v5187_v33, %s6990_s3  ;;  %v7492_v33 = vpop.permute.xlu0 %590 }
 0x18e   :  { %5193 = vrot.lane.b32.xlu2 %v5192_v46, %s6990_s3  ;;  %v7494_v46 = vpop.permute.xlu2 %2002 }
 0x18f   :  { %13438 = vst [vmem:[#allocation50_spill] sm:$0xff] %v7494_v46 }
 0x195   :  { %5198 = vrot.lane.b32.xlu1 %v5197_v61, %s6992_s8  ;;  %v7496_v60 = vpop.permute.xlu0 %620 }
 0x196   :  { %5203 = vrot.lane.b32.xlu2 %v5202_v23, %s6992_s8 }
 0x19d   :  { %v7500_v9 = vpop.permute.xlu0 %690 }
 0x1a5   :  { %v7502_v49 = vpop.permute.xlu0 %1992 }
 0x1a6   :  { %13439 = vst [vmem:[#allocation51_spill] sm:$0xff] %v7502_v49 }
 0x1b8   :  { %v7498_v42 = vpop.permute.xlu2 %5123 }
 0x1c0   :  { %v640_v13 = vpop.permute.xlu2 %639 }
 0x1c8   :  { %v5134_v51 = vpop.permute.xlu2 %5133 }
 0x1c9   :  { %v5136_v40 = vunpack.i.h.bf16 %v5134_v51  ;;  %v5135_v26 = vunpack.i.l.bf16 %v5134_v51  ;;  %v218_v51 = vmul.f32 %v7190_v3, %v7346_v21 }
 0x1cb   :  { %v454_v1 = vsel %vm299_vm8, %v5135_v26, %v5136_v40 }
 0x1cc   :  { %v652_v26 = vsel %vm95_vm0, %v218_v51, %v454_v1 }
 0x1cf   :  { %v638_v22 = vpop.permute.xlu1 %637 }
 0x1d0   :  { %v5149_v10 = vpop.permute.xlu2 %5148  ;;  %738 = vrot.lane.b32.xlu1 %v638_v22, %s6986_s22  ;;  %v648_v61 = vsel %vm647_vm12, %v638_v22, %v640_v13 }
 0x1d1   :  { %740 = vrot.lane.b32.xlu2 %v648_v61, %s6986_s22 }
 0x1d2   :  { %v7507_v23 = vpop.permute.xlu0 %5128 }
 0x1d7   :  { %v644_v46 = vpop.permute.xlu1 %643 }
 0x1d8   :  { %v7509_v18 = vpop.permute.xlu2 %5163  ;;  %v651_v48 = vsel %vm647_vm12, %v644_v46, %v646_v28 }
 0x1d9   :  { %746 = vrot.lane.b32.xlu2 %v651_v48, %s6986_s22  ;;  %v7526_v48 = vsel %vm209_vm13, %v7198_v8, %v7195_v5  ;;  %v5166_v52 = vunpack.i.h.bf16 %v7509_v18  ;;  %v5165_v21 = vunpack.i.l.bf16 %v7509_v18 }
 0x1da   :  { %v642_v49 = vpop.permute.xlu0 %641  ;;  %13442 = vst [vmem:[#allocation54_spill] sm:$0xff] %v7526_v48  ;;  %v221_v57 = vmul.f32 %v7526_v48, %v7302_v44 }
 0x1db   :  { %v650_v63 = vsel %vm647_vm12, %v642_v49, %v644_v46  ;;  %v649_v56 = vsel %vm647_vm12, %v640_v13, %v642_v49  ;;  %v7538_v46 = vsel %vm209_vm13, %v7202_v11, %v7198_v8  ;;  %v5151_v13 = vunpack.i.h.bf16 %v5149_v10 }
 0x1dc   :  { %744 = vrot.lane.b32.xlu1 %v650_v63, %s6986_s22  ;;  %742 = vrot.lane.b32.xlu0 %v649_v56, %s6986_s22  ;;  %v7531_v63 = vsel %vm209_vm13, %v7190_v3, %v7202_v11  ;;  %13444 = vst [vmem:[#allocation56_spill] sm:$0xff] %v7538_v46  ;;  %v5150_v49 = vunpack.i.l.bf16 %v5149_v10  ;;  %v220_v16 = vmul.f32 %v7538_v46, %v7298_v43 }
 0x1dd   :  { %13443 = vst [vmem:[#allocation55_spill] sm:$0xff] %v7531_v63  ;;  %v219_v6 = vmul.f32 %v7531_v63, %v7294_v39  ;;  %v5131_v39 = vunpack.i.h.bf16 %v7507_v23  ;;  %v513_v46 = vsel %vm239_vm5, %v5165_v21, %v5166_v52 }
 0x1de   :  { %v484_v43 = vsel %vm483_vm14, %v5150_v49, %v5151_v13 }
 0x1df   :  { %v7517_v22 = vpop.permute.xlu1 %5143  ;;  %v658_v47 = vsel %vm657_vm1, %v652_v26, %v484_v43 }
 0x1e0   :  { %13440 = vst [vmem:[#allocation52_spill] sm:$0xff] %v7517_v22  ;;  %v7519_v61 = vpop.permute.xlu2 %5183  ;;  %v12965_v8 = vunpack.i.l.bf16 %v7517_v22 }
 0x1e2   :  { %v5139_v53 = vpop.permute.xlu0 %5138 }
 0x1e3   :  { %v5141_v11 = vunpack.i.h.bf16 %v5139_v53  ;;  %v5140_v10 = vunpack.i.l.bf16 %v5139_v53 }
 0x1e5   :  { %v457_v18 = vsel %vm299_vm8, %v5141_v11, %v12965_v8  ;;  %v455_v3 = vsel %vm299_vm8, %v5136_v40, %v5140_v10  ;;  %v456_v49 = vsel %vm299_vm8, %v5140_v10, %v5141_v11  ;;  %v5185_v10 = vunpack.i.l.bf16 %v7519_v61 }
 0x1e6   :  { %v654_v21 = vsel %vm95_vm0, %v220_v16, %v456_v49  ;;  %v655_v43 = vsel %vm95_vm0, %v221_v57, %v457_v18  ;;  %v653_v26 = vsel %vm95_vm0, %v219_v6, %v455_v3 }
 0x1e7   :  { %v7521_v28 = vpop.permute.xlu1 %5158 }
 0x1e8   :  { %13441 = vst [vmem:[#allocation53_spill] sm:$0xff] %v7521_v28  ;;  %v7533_v56 = vpop.permute.xlu2 %5193  ;;  %v13446_v1 = vunpack.i.l.bf16 %v7521_v28 }
 0x1e9   :  { %v5196_v25 = vunpack.i.h.bf16 %v7533_v56 }
 0x1ea   :  { %v5154_v58 = vpop.permute.xlu0 %5153 }
 0x1eb   :  { %v5156_v44 = vunpack.i.h.bf16 %v5154_v58  ;;  %v5155_v48 = vunpack.i.l.bf16 %v5154_v58  ;;  %v5186_v58 = vunpack.i.h.bf16 %v7519_v61 }
 0x1ed   :  { %v487_v51 = vsel %vm483_vm14, %v5156_v44, %v13446_v1  ;;  %v485_v53 = vsel %vm483_vm14, %v5151_v13, %v5155_v48  ;;  %v486_v8 = vsel %vm483_vm14, %v5155_v48, %v5156_v44  ;;  %v5195_v1 = vunpack.i.l.bf16 %v7533_v56 }
 0x1ee   :  { %v660_v44 = vsel %vm657_vm1, %v654_v21, %v486_v8  ;;  %v661_v40 = vsel %vm657_vm1, %v655_v43, %v487_v51  ;;  %v659_v61 = vsel %vm657_vm1, %v653_v26, %v485_v53  ;;  %v664_v8 = vsel %vm663_vm3, %v658_v47, %v513_v46 }
 0x1ef   :  { %v7562_v63 = vpop.permute.xlu1 %5173  ;;  %v566_v53 = vsel %vm562_vm15, %v5186_v58, %v7488_v29  ;;  %v565_v51 = vsel %vm562_vm15, %v5185_v10, %v5186_v58  ;;  %v596_v26 = vsel %vm592_vm2, %v5196_v25, %v7492_v33 }
 0x1f0   :  { %13445 = vst [vmem:[#allocation57_spill] sm:$0xff] %v7562_v63  ;;  %v7573_v11 = vpop.permute.xlu2 %5203  ;;  %v13447_v3 = vunpack.i.l.bf16 %v7562_v63  ;;  %v673_v58 = vsel %vm95_vm0, %v5131_v39, %v566_v53 }
 0x1f1   :  { %v5206_v48 = vunpack.i.h.bf16 %v7573_v11  ;;  %v5205_v16 = vunpack.i.l.bf16 %v7573_v11 }
 0x1f2   :  { %v5169_v62 = vpop.permute.xlu0 %5168 }
 0x1f3   :  { %v5171_v13 = vunpack.i.h.bf16 %v5169_v62  ;;  %v5170_v50 = vunpack.i.l.bf16 %v5169_v62  ;;  %v625_v47 = vsel %vm622_vm4, %v5205_v16, %v5206_v48  ;;  %v626_v29 = vsel %vm622_vm4, %v5206_v48, %v7496_v60 }
 0x1f4   :  { %v5126_v48 = vunpack.i.h.bf16 %v7498_v42 }
 0x1f5   :  { %v515_v57 = vsel %vm239_vm5, %v5170_v50, %v5171_v13  ;;  %v516_v6 = vsel %vm239_vm5, %v5171_v13, %v13447_v3  ;;  %v514_v56 = vsel %vm239_vm5, %v5166_v52, %v5170_v50  ;;  %v595_v50 = vsel %vm592_vm2, %v5195_v1, %v5196_v25 }
 0x1f6   :  { %v666_v62 = vsel %vm663_vm3, %v660_v44, %v515_v57  ;;  %v667_v18 = vsel %vm663_vm3, %v661_v40, %v516_v6  ;;  %v665_v49 = vsel %vm663_vm3, %v659_v61, %v514_v56  ;;  %v13448_v52 = vunpack.i.l.bf16 %v7507_v23 }
 0x1f7   :  { %v5217_v11 = vpack.i.bf16 %v667_v18, %v666_v62  ;;  %v5212_v21 = vpack.i.bf16 %v665_v49, %v664_v8  ;;  %v5179_v43 = vpop.permute.xlu1 %5178  ;;  %v678_v25 = vsel %vm657_vm1, %v673_v58, %v596_v26  ;;  %v222_v62 = vmul.f32 %v7195_v5, %v7305_v45 }
 0x1f8   :  { %v536_v40 = vsel %vm209_vm13, %v13448_v52, %v5131_v39  ;;  %v683_v44 = vsel %vm663_vm3, %v678_v25, %v626_v29  ;;  %v5181_v3 = vunpack.i.h.bf16 %v5179_v43  ;;  %v5180_v6 = vunpack.i.l.bf16 %v5179_v43 }
 0x1f9   :  { %5218 = vrot.lane.b32.xlu0 %v5217_v11, %s6986_s22  ;;  %5213 = vrot.lane.b32.xlu2 %v5212_v21, %s6986_s22  ;;  %v672_v46 = vsel %vm95_vm0, %v536_v40, %v565_v51  ;;  %v5125_v39 = vunpack.i.l.bf16 %v7498_v42  ;;  %v13449_v8 = vunpack.i.l.bf16 %v7517_v22  ;;  %v13450_v21 = vmov %v13448_v52 }
 0x1fa   :  { %v677_v33 = vsel %vm657_vm1, %v672_v46, %v595_v50  ;;  %v563_v18 = vsel %vm562_vm15, %v5180_v6, %v5181_v3  ;;  %v564_v53 = vsel %vm562_vm15, %v5181_v3, %v5185_v10  ;;  %v535_v43 = vsel %vm209_vm13, %v5126_v48, %v13450_v21 }
 0x1fb   :  { %v682_v13 = vsel %vm663_vm3, %v677_v33, %v625_v47  ;;  %v656_v49 = vsel %vm95_vm0, %v222_v62, %v13449_v8  ;;  %v534_v11 = vsel %vm209_vm13, %v5125_v39, %v5126_v48  ;;  %v13451_v45 = vunpack.i.l.bf16 %v7521_v28 }
 0x1fc   :  { %v5227_v61 = vpack.i.bf16 %v683_v44, %v682_v13  ;;  %v669_v52 = vsel %vm95_vm0, %v5125_v39, %v5180_v6  ;;  %v670_v10 = vsel %vm95_vm0, %v534_v11, %v563_v18  ;;  %v13452_v29 = vunpack.i.l.bf16 %v7562_v63 }
 0x1fd   :  { %v662_v50 = vsel %vm657_vm1, %v656_v49, %v13451_v45  ;;  %v671_v58 = vsel %vm95_vm0, %v535_v43, %v564_v53 }
 0x1fe   :  { %v668_v46 = vsel %vm663_vm3, %v662_v50, %v13452_v29  ;;  %v184_v50 = vld [vmem:[%s12918_s4] sm:$0xff] }
 0x1ff   :  { %v5189_v57 = vpop.permute.xlu1 %5188 }
 0x200   :  { %v5191_v56 = vunpack.i.h.bf16 %v5189_v57  ;;  %v5190_v60 = vunpack.i.l.bf16 %v5189_v57 }
 0x201   :  { %5228 = vrot.lane.b32.xlu0 %v5227_v61, %s6986_s22 }
 0x202   :  { %v593_v51 = vsel %vm592_vm2, %v5190_v60, %v5191_v56  ;;  %v594_v42 = vsel %vm592_vm2, %v5191_v56, %v5195_v1  ;;  %v674_v23 = vsel %vm657_vm1, %v669_v52, %v5190_v60 }
 0x203   :  { %v675_v1 = vsel %vm657_vm1, %v670_v10, %v593_v51  ;;  %v676_v44 = vsel %vm657_vm1, %v671_v58, %v594_v42 }
 0x207   :  { %v5199_v26 = vpop.permute.xlu1 %5198 }
 0x208   :  { %v5201_v40 = vunpack.i.h.bf16 %v5199_v26  ;;  %v5200_v47 = vunpack.i.l.bf16 %v5199_v26 }
 0x20a   :  { %v679_v33 = vsel %vm663_vm3, %v674_v23, %v5200_v47  ;;  %v623_v25 = vsel %vm622_vm4, %v5200_v47, %v5201_v40  ;;  %v624_v13 = vsel %vm622_vm4, %v5201_v40, %v5205_v16 }
 0x20b   :  { %v5207_v61 = vpack.i.bf16 %v679_v33, %v668_v46  ;;  %v680_v57 = vsel %vm663_vm3, %v675_v1, %v623_v25  ;;  %v681_v3 = vsel %vm663_vm3, %v676_v44, %v624_v13  ;;  %v185_v46 = vld [vmem:[%s12918_s4 + $0x8] sm:$0xff]  ;;  %v186_v33 = vld [vmem:[%s12918_s4 + $0x10] sm:$0xff] }
 0x20c   :  { %v5222_v6 = vpack.i.bf16 %v681_v3, %v680_v57 }
 0x20d   :  { %5208 = vrot.lane.b32.xlu1 %v5207_v61, %s6986_s22 }
 0x20e   :  { %5223 = vrot.lane.b32.xlu2 %v5222_v6, %s6986_s22 }
 0x22b   :  { %v741_v56 = vpop.permute.xlu2 %740 }
 0x233   :  { %v747_v39 = vpop.permute.xlu2 %746 }
 0x242   :  { %v739_v60 = vpop.permute.xlu1 %738 }
 0x243   :  { %v756_v48 = vsel %vm420_vm6, %v739_v60, %v741_v56 }
 0x244   :  { %5058 = vmatpush.msk.msra.mxu0 %vm95_vm0, %v756_v48 }
 0x24e   :  { %v745_v16 = vpop.permute.xlu1 %744  ;;  %v743_v62 = vpop.permute.xlu0 %742 }
 0x24f   :  { %v757_v18 = vsel %vm420_vm6, %v741_v56, %v743_v62  ;;  %v758_v8 = vsel %vm420_vm6, %v743_v62, %v745_v16  ;;  %v759_v49 = vsel %vm420_vm6, %v745_v16, %v747_v39  ;;  %v187_v56 = vld [vmem:[%s12918_s4 + $0x18] sm:$0xff] }
 0x250   :  { %5063 = vmatpush.msk.msra.mxu1 %vm95_vm0, %v757_v18  ;;  %5068 = vmatpush.msk.msra.mxu2 %vm95_vm0, %v758_v8 }
 0x251   :  { %5073 = vmatpush.msk.msra.mxu3 %vm95_vm0, %v759_v49 }
 0x253   :  { %v5214_v53 = vpop.permute.xlu2 %5213 }
 0x254   :  { %v5216_v26 = vunpack.i.h.bf16 %v5214_v53  ;;  %v5215_v13 = vunpack.i.l.bf16 %v5214_v53 }
 0x256   :  { %v748_v6 = vsel %vm420_vm6, %v5215_v13, %v5216_v26 }
 0x268   :  { %v5224_v51 = vpop.permute.xlu2 %5223 }
 0x269   :  { %v5226_v11 = vunpack.i.h.bf16 %v5224_v51  ;;  %v5225_v21 = vunpack.i.l.bf16 %v5224_v51 }
 0x26b   :  { %v5219_v43 = vpop.permute.xlu0 %5218  ;;  %v753_v42 = vsel %vm420_vm6, %v5225_v21, %v5226_v11 }
 0x26c   :  { %v5220_v45 = vunpack.i.l.bf16 %v5219_v43  ;;  %832 = vmatpush.msra.mxu1 %v753_v42  ;;  %v5221_v47 = vunpack.i.h.bf16 %v5219_v43 }
 0x26e   :  { %v749_v52 = vsel %vm420_vm6, %v5216_v26, %v5220_v45  ;;  %v750_v1 = vsel %vm420_vm6, %v5220_v45, %v5221_v47 }
 0x26f   :  { %833 = vmatpush.msra.mxu1 %v749_v52 }
 0x270   :  { %5064 = vmatmul.msk.f32.vlgmr.msra.gmra.mxu1 %vm768_vm7, %v184_v50 }
 0x273   :  { %v5229_v40 = vpop.permute.xlu0 %5228 }
 0x274   :  { %v5231_v10 = vunpack.i.h.bf16 %v5229_v40  ;;  %v5230_v29 = vunpack.i.l.bf16 %v5229_v40 }
 0x276   :  { %v754_v23 = vsel %vm420_vm6, %v5226_v11, %v5230_v29  ;;  %v755_v58 = vsel %vm420_vm6, %v5230_v29, %v5231_v10 }
 0x277   :  { %861 = vmatpush.msra.mxu2 %v754_v23  ;;  %890 = vmatpush.msra.mxu3 %v755_v58 }
 0x278   :  { %5065 = vmatmul.msk.f32.gmra.mxu1 %vm768_vm7, %v185_v46 }
 0x279   :  { %862 = vmatpush.msra.mxu2 %v750_v1 }
 0x27a   :  { %5069 = vmatmul.msk.f32.vlgmr.msra.gmra.mxu2 %vm768_vm7, %v184_v50 }
 0x27f   :  { %v5209_v25 = vpop.permute.xlu1 %5208 }
 0x280   :  { %v5211_v44 = vunpack.i.h.bf16 %v5209_v25  ;;  %v5210_v61 = vunpack.i.l.bf16 %v5209_v25  ;;  %5066 = vmatmul.msk.f32.gmra.mxu1 %vm768_vm7, %v186_v33 }
 0x282   :  { %5070 = vmatmul.msk.f32.gmra.mxu2 %vm768_vm7, %v185_v46  ;;  %v752_v57 = vsel %vm420_vm6, %v5211_v44, %v5225_v21  ;;  %v751_v3 = vsel %vm420_vm6, %v5221_v47, %v5210_v61 }
 0x283   :  { %803 = vmatpush.msra.mxu0 %v752_v57  ;;  %891 = vmatpush.msra.mxu3 %v751_v3 }
 0x284   :  { %5074 = vmatmul.msk.f32.vlgmr.msra.gmra.mxu3 %vm768_vm7, %v184_v50 }
 0x285   :  { %804 = vmatpush.msra.mxu0 %v748_v6 }
 0x286   :  { %5059 = vmatmul.msk.f32.vlgmr.msra.gmra.mxu0 %vm768_vm7, %v184_v50 }
 0x288   :  { %5067 = vmatmul.msk.f32.gmra.mxu1 %vm768_vm7, %v187_v56 }
 0x28a   :  { %5071 = vmatmul.msk.f32.gmra.mxu2 %vm768_vm7, %v186_v33 }
 0x28c   :  { %5075 = vmatmul.msk.f32.gmra.mxu3 %vm768_vm7, %v185_v46 }
 0x28e   :  { %5060 = vmatmul.msk.f32.gmra.mxu0 %vm768_vm7, %v185_v46 }
 0x292   :  { %5072 = vmatmul.msk.f32.gmra.mxu2 %vm768_vm7, %v187_v56 }
 0x294   :  { %5076 = vmatmul.msk.f32.gmra.mxu3 %vm768_vm7, %v186_v33 }
 0x296   :  { %5061 = vmatmul.msk.f32.gmra.mxu0 %vm768_vm7, %v186_v33 }
 0x29c   :  { %5077 = vmatmul.msk.f32.gmra.mxu3 %vm768_vm7, %v187_v56 }
 0x29e   :  { %5062 = vmatmul.msk.f32.gmra.mxu0 %vm768_vm7, %v187_v56 }
 0x2ed   :  { %v835_v60 = vpop.f32.mrf.mxu1 }
 0x2ee   :  { %v7695_v16 = vadd.f32 %v835_v60, %v7500_v9 }
 0x2f0   :  { %v938_v11 = vmul.f32 %v7695_v16, %v7695_v16 }
 0x2f5   :  { %v838_v39 = vpop.f32.mrf.mxu1 }
 0x2f6   :  { %v7719_v10 = vadd.f32 %v838_v39, %v7272_v4 }
 0x2f8   :  { %v942_v13 = vmul.f32 %v7719_v10, %v7719_v10 }
 0x2fd   :  { %v864_v48 = vpop.f32.mrf.mxu2  ;;  %v841_v29 = vpop.f32.mrf.mxu1 }
 0x2fe   :  { %v7701_v8 = vadd.f32 %v864_v48, %v7500_v9  ;;  %v7738_v57 = vadd.f32 %v841_v29, %v7486_v38 }
 0x300   :  { %v939_v26 = vmul.f32 %v7701_v8, %v7701_v8 }
 0x303   :  { %v806_v62 = vpop.f32.mrf.mxu0 }
 0x304   :  { %v7698_v18 = vadd.f32 %v806_v62, %v7500_v9 }
 0x305   :  { %v867_v49 = vpop.f32.mrf.mxu2  ;;  %v844_v62 = vpop.f32.mrf.mxu1 }
 0x306   :  { %v913_v53 = vadd.f32 %v7695_v16, %v7698_v18  ;;  %v937_v51 = vmul.f32 %v7698_v18, %v7698_v18  ;;  %v7725_v23 = vadd.f32 %v867_v49, %v7272_v4 }
 0x307   :  { %v893_v21 = vpop.f32.mrf.mxu3 }
 0x308   :  { %v7710_v43 = vadd.f32 %v893_v21, %v7500_v9  ;;  %v914_v42 = vadd.f32 %v913_v53, %v7701_v8  ;;  %v953_v45 = vadd.f32 %v938_v11, %v937_v51  ;;  %v943_v60 = vmul.f32 %v7725_v23, %v7725_v23 }
 0x30a   :  { %v915_v50 = vadd.f32 %v914_v42, %v7710_v43  ;;  %v940_v52 = vmul.f32 %v7710_v43, %v7710_v43  ;;  %v954_v47 = vadd.f32 %v953_v45, %v939_v26 }
 0x30b   :  { %v809_v40 = vpop.f32.mrf.mxu0 }
 0x30c   :  { %v7722_v9 = vadd.f32 %v809_v40, %v7272_v4  ;;  %916 = vadd.xlane.f32.xlu0 %v915_v50  ;;  %v955_v46 = vadd.f32 %v954_v47, %v940_v52  ;;  %v7764_v52 = vadd.f32 %v844_v62, %v7281_v12 }
 0x30d   :  { %v870_v33 = vpop.f32.mrf.mxu2 }
 0x30e   :  { %v918_v58 = vadd.f32 %v7719_v10, %v7722_v9  ;;  %v941_v1 = vmul.f32 %v7722_v9, %v7722_v9  ;;  %956 = vadd.xlane.f32.xlu2 %v955_v46  ;;  %v7744_v48 = vadd.f32 %v870_v33, %v7486_v38 }
 0x30f   :  { %v896_v25 = vpop.f32.mrf.mxu3 }
 0x310   :  { %v7734_v44 = vadd.f32 %v896_v25, %v7272_v4  ;;  %v919_v61 = vadd.f32 %v918_v58, %v7725_v23  ;;  %v958_v6 = vadd.f32 %v942_v13, %v941_v1  ;;  %v946_v4 = vmul.f32 %v7738_v57, %v7738_v57 }
 0x311   :  { %v947_v42 = vmul.f32 %v7744_v48, %v7744_v48  ;;  %v950_v13 = vmul.f32 %v7764_v52, %v7764_v52 }
 0x312   :  { %v920_v3 = vadd.f32 %v919_v61, %v7734_v44  ;;  %v944_v51 = vmul.f32 %v7734_v44, %v7734_v44  ;;  %v959_v11 = vadd.f32 %v958_v6, %v943_v60 }
 0x313   :  { %v812_v56 = vpop.f32.mrf.mxu0 }
 0x314   :  { %v7747_v39 = vadd.f32 %v812_v56, %v7486_v38  ;;  %921 = vadd.xlane.f32.xlu1 %v920_v3  ;;  %v960_v47 = vadd.f32 %v959_v11, %v944_v51 }
 0x315   :  { %v873_v40 = vpop.f32.mrf.mxu2 }
 0x316   :  { %v923_v49 = vadd.f32 %v7738_v57, %v7747_v39  ;;  %v945_v53 = vmul.f32 %v7747_v39, %v7747_v39  ;;  %v7770_v33 = vadd.f32 %v873_v40, %v7281_v12 }
 0x317   :  { %v899_v21 = vpop.f32.mrf.mxu3 }
 0x318   :  { %v7760_v26 = vadd.f32 %v899_v21, %v7486_v38  ;;  %v924_v45 = vadd.f32 %v923_v49, %v7744_v48  ;;  %v963_v50 = vadd.f32 %v946_v4, %v945_v53  ;;  %v951_v56 = vmul.f32 %v7770_v33, %v7770_v33 }
 0x31a   :  { %v925_v29 = vadd.f32 %v924_v45, %v7760_v26  ;;  %v948_v46 = vmul.f32 %v7760_v26, %v7760_v26  ;;  %v964_v58 = vadd.f32 %v963_v50, %v947_v42 }
 0x31b   :  { %v815_v1 = vpop.f32.mrf.mxu0 }
 0x31c   :  { %v7773_v38 = vadd.f32 %v815_v1, %v7281_v12  ;;  %961 = vadd.xlane.f32.xlu1 %v960_v47  ;;  %926 = vadd.xlane.f32.xlu2 %v925_v29  ;;  %v965_v25 = vadd.f32 %v964_v58, %v948_v46 }
 0x31e   :  { %v928_v61 = vadd.f32 %v7764_v52, %v7773_v38  ;;  %v949_v3 = vmul.f32 %v7773_v38, %v7773_v38  ;;  %966 = vadd.xlane.f32.xlu0 %v965_v25 }
 0x31f   :  { %v902_v6 = vpop.f32.mrf.mxu3 }
 0x320   :  { %v7784_v60 = vadd.f32 %v902_v6, %v7281_v12  ;;  %v968_v4 = vadd.f32 %v950_v13, %v949_v3  ;;  %v929_v62 = vadd.f32 %v928_v61, %v7770_v33 }
 0x322   :  { %v952_v49 = vmul.f32 %v7784_v60, %v7784_v60  ;;  %v969_v53 = vadd.f32 %v968_v4, %v951_v56  ;;  %v930_v11 = vadd.f32 %v929_v62, %v7784_v60 }
 0x324   :  { %v970_v51 = vadd.f32 %v969_v53, %v952_v49 }
 0x326   :  { %971 = vadd.xlane.f32.xlu2 %v970_v51  ;;  %931 = vadd.xlane.f32.xlu0 %v930_v11 }
 0x37f   :  { %v917_v21 = vpop.xlane.xlu0 %916 }
 0x380   :  { %v933_v42 = vmul.f32 %v917_v21, %v7204_v14 }
 0x381   :  { %v957_v50 = vpop.xlane.xlu2 %956 }
 0x382   :  { %v977_v45 = vmul.f32 %v933_v42, %v933_v42  ;;  %v973_v12 = vmul.f32 %v957_v50, %v7204_v14 }
 0x384   :  { %v981_v40 = vsub.f32 %v973_v12, %v977_v45  ;;  %v905_v12 = vld [vmem:[%s12920_s6] sm:$0xff] }
 0x386   :  { %v985_v47 = vadd.f32 1e-05, %v981_v40 }
 0x387   :  { %v922_v29 = vpop.xlane.xlu1 %921 }
 0x388   :  { %6905 = vrsqrt.f32 %v985_v47  ;;  %v7793_v46 = vmul.f32 %v922_v29, %v7204_v14  ;;  %vm995_vm10 = vweird.f32 %v985_v47 }
 0x38a   :  { %v978_v61 = vmul.f32 %v7793_v46, %v7793_v46 }
 0x38e   :  { %v6906_v58 = vpop.eup %6905 }
 0x38f   :  { %v962_v1 = vpop.xlane.xlu1 %961  ;;  %v927_v25 = vpop.xlane.xlu2 %926  ;;  %v990_v13 = vmul.f32 %v6906_v58, %v985_v47  ;;  %vm996_vm9 = vweird.f32 %v6906_v58  ;;  %v909_v47 = vld [vmem:[%s12921_s7] sm:$0xff] }
 0x390   :  { %v974_v3 = vmul.f32 %v962_v1, %v7204_v14  ;;  %v7799_v6 = vmul.f32 %v927_v25, %v7204_v14  ;;  %vm997_vm11 = vmor %vm995_vm10, %vm996_vm9 }
 0x391   :  { %v967_v56 = vpop.xlane.xlu0 %966  ;;  %v991_v4 = vmul.f32 %v6906_v58, %v990_v13 }
 0x392   :  { %v982_v62 = vsub.f32 %v974_v3, %v978_v61  ;;  %v979_v49 = vmul.f32 %v7799_v6, %v7799_v6  ;;  %v975_v53 = vmul.f32 %v967_v56, %v7204_v14 }
 0x393   :  { %v992_v51 = vmul.f32 0.5, %v991_v4 }
 0x394   :  { %v986_v11 = vadd.f32 1e-05, %v982_v62  ;;  %v983_v21 = vsub.f32 %v975_v53, %v979_v49 }
 0x395   :  { %v993_v50 = vsub.f32 1.5, %v992_v51 }
 0x396   :  { %6907 = vrsqrt.f32 %v986_v11  ;;  %v987_v45 = vadd.f32 1e-05, %v983_v21  ;;  %vm1005_vm7 = vweird.f32 %v986_v11 }
 0x397   :  { %v994_v40 = vmul.f32 %v6906_v58, %v993_v50 }
 0x398   :  { %6909 = vrsqrt.f32 %v987_v45  ;;  %vm1015_vm10 = vweird.f32 %v987_v45 }
 0x399   :  { %v972_v29 = vpop.xlane.xlu2 %971  ;;  %v932_v1 = vpop.xlane.xlu0 %931  ;;  %v998_v13 = vsel %vm997_vm11, %v6906_v58, %v994_v40 }
 0x39a   :  { %v936_v25 = vmul.f32 %v932_v1, %v7204_v14  ;;  %v1029_v61 = vmul.f32 %v998_v13, %v905_v12  ;;  %v976_v56 = vmul.f32 %v972_v29, %v7204_v14  ;;  %v906_v13 = vld [vmem:[%s12920_s6 + $0x8] sm:$0xff] }
 0x39c   :  { %v6908_v3 = vpop.eup %6907  ;;  %v980_v4 = vmul.f32 %v936_v25, %v936_v25  ;;  %1035 = vperm.xlu1 %5120, %v1029_v61   ;;  %v1069_v63 = vmul.f32 %v1029_v61, %v933_v42 }
 0x39d   :  { %v1000_v62 = vmul.f32 %v6908_v3, %v986_v11  ;;  %vm1006_vm1 = vweird.f32 %v6908_v3 }
 0x39e   :  { %v6910_v49 = vpop.eup %6909  ;;  %v984_v53 = vsub.f32 %v976_v56, %v980_v4  ;;  %v1073_v12 = vsub.f32 %v909_v47, %v1069_v63  ;;  %vm1007_vm9 = vmor %vm1005_vm7, %vm1006_vm1  ;;  %v907_v56 = vld [vmem:[%s12920_s6 + $0x10] sm:$0xff] }
 0x39f   :  { %v1001_v51 = vmul.f32 %v6908_v3, %v1000_v62  ;;  %v1010_v21 = vmul.f32 %v6910_v49, %v987_v45  ;;  %vm1016_vm3 = vweird.f32 %v6910_v49 }
 0x3a0   :  { %v988_v50 = vadd.f32 1e-05, %v984_v53  ;;  %vm1017_vm11 = vmor %vm1015_vm10, %vm1016_vm3  ;;  %v910_v53 = vld [vmem:[%s12921_s7 + $0x8] sm:$0xff] }
 0x3a1   :  { %v1002_v28 = vmul.f32 0.5, %v1001_v51  ;;  %v1011_v1 = vmul.f32 %v6910_v49, %v1010_v21 }
 0x3a2   :  { %6911 = vrsqrt.f32 %v988_v50  ;;  %vm1025_vm3 = vweird.f32 %v988_v50 }
 0x3a3   :  { %v1012_v58 = vmul.f32 0.5, %v1011_v1  ;;  %v1003_v40 = vsub.f32 1.5, %v1002_v28 }
 0x3a4   :  { %1079 = vperm.xlu1 %5120, %v1073_v12  }
 0x3a5   :  { %v1013_v29 = vsub.f32 1.5, %v1012_v58  ;;  %v1004_v42 = vmul.f32 %v6908_v3, %v1003_v40  ;;  %v911_v58 = vld [vmem:[%s12921_s7 + $0x10] sm:$0xff] }
 0x3a7   :  { %v1008_v61 = vsel %vm1007_vm9, %v6908_v3, %v1004_v42  ;;  %v1014_v4 = vmul.f32 %v6910_v49, %v1013_v29 }
 0x3a8   :  { %v6912_v63 = vpop.eup %6911  ;;  %v1030_v28 = vmul.f32 %v1008_v61, %v906_v13 }
 0x3a9   :  { %v1020_v62 = vmul.f32 %v6912_v63, %v988_v50  ;;  %v1018_v51 = vsel %vm1017_vm11, %v6910_v49, %v1014_v4  ;;  %vm1026_vm1 = vweird.f32 %v6912_v63  ;;  %v908_v49 = vld [vmem:[%s12920_s6 + $0x18] sm:$0xff] }
 0x3aa   :  { %1040 = vperm.xlu0 %5119, %v1030_v28   ;;  %v1070_v11 = vmul.f32 %v1030_v28, %v7793_v46  ;;  %v1031_v21 = vmul.f32 %v1018_v51, %v907_v56  ;;  %vm1027_vm7 = vmor %vm1025_vm3, %vm1026_vm1 }
 0x3ab   :  { %v1021_v45 = vmul.f32 %v6912_v63, %v1020_v62 }
 0x3ac   :  { %v1074_v3 = vsub.f32 %v910_v53, %v1070_v11  ;;  %v1071_v47 = vmul.f32 %v1031_v21, %v7799_v6  ;;  %v912_v6 = vld [vmem:[%s12921_s7 + $0x18] sm:$0xff] }
 0x3ad   :  { %v1022_v1 = vmul.f32 0.5, %v1021_v45 }
 0x3ae   :  { %1084 = vperm.xlu2 %5121, %v1074_v3   ;;  %v1075_v40 = vsub.f32 %v911_v58, %v1071_v47 }
 0x3af   :  { %v1023_v12 = vsub.f32 1.5, %v1022_v1 }
 0x3b1   :  { %v1024_v29 = vmul.f32 %v6912_v63, %v1023_v12 }
 0x3b2   :  { %1089 = vperm.xlu0 %5119, %v1075_v40  }
 0x3b3   :  { %v1028_v46 = vsel %vm1027_vm7, %v6912_v63, %v1024_v29 }
 0x3b4   :  { %v1032_v13 = vmul.f32 %v1028_v46, %v908_v49 }
 0x3b6   :  { %v1072_v42 = vmul.f32 %v1032_v13, %v936_v25  ;;  %1045 = vperm.xlu2 %5121, %v1031_v21  }
 0x3b8   :  { %v1076_v61 = vsub.f32 %v912_v6, %v1072_v42 }
 0x3ba   :  { %1050 = vperm.xlu0 %5119, %v1032_v13   ;;  %1094 = vperm.xlu1 %5120, %v1076_v61  }
 0x40e   :  { %v1036_v56 = vpop.permute.xlu1 %1035 }
 0x40f   :  { %v1053_v4 = vmul.f32 %v1036_v56, %v7698_v18  ;;  %v1054_v28 = vmul.f32 %v1036_v56, %v7695_v16  ;;  %v1055_v50 = vmul.f32 %v1036_v56, %v7701_v8  ;;  %v1056_v62 = vmul.f32 %v1036_v56, %v7710_v43 }
 0x416   :  { %v1080_v63 = vpop.permute.xlu1 %1079 }
 0x417   :  { %v1097_v53 = vadd.f32 %v1080_v63, %v1053_v4  ;;  %v1098_v51 = vadd.f32 %v1080_v63, %v1054_v28  ;;  %v1099_v11 = vadd.f32 %v1080_v63, %v1055_v50  ;;  %v1100_v45 = vadd.f32 %v1080_v63, %v1056_v62 }
 0x419   :  { %vm1113_vm9 = vcmp.ge.f32.partialorder %v1097_v53, 0.0  ;;  %vm1114_vm10 = vcmp.ge.f32.partialorder %v1098_v51, 0.0  ;;  %vm1115_vm11 = vcmp.ge.f32.partialorder %v1099_v11, 0.0  ;;  %vm1116_vm1 = vcmp.ge.f32.partialorder %v1100_v45, 0.0 }
 0x41a   :  { %v1129_v25 = vmul.f32 0.2, %v1097_v53  ;;  %v1130_v21 = vmul.f32 0.2, %v1098_v51  ;;  %v1131_v3 = vmul.f32 0.2, %v1099_v11 }
 0x41b   :  { %v1132_v47 = vmul.f32 0.2, %v1100_v45 }
 0x41c   :  { %v7836_v18 = vsel %vm1113_vm9, %v1097_v53, %v1129_v25  ;;  %v7838_v16 = vsel %vm1114_vm10, %v1098_v51, %v1130_v21  ;;  %v7840_v8 = vsel %vm1115_vm11, %v1099_v11, %v1131_v3 }
 0x41d   :  { %v7842_v43 = vsel %vm1116_vm1, %v1100_v45, %v1132_v47  ;;  %v5232_v1 = vpack.i.bf16 %v7838_v16, %v7836_v18  ;;  %v1252_v12 = vmul.f32 %v7840_v8, %v7374_v55  ;;  %v1230_v29 = vmul.f32 %v7836_v18, %v7318_v0 }
 0x41e   :  { %v5237_v58 = vpack.i.bf16 %v7842_v43, %v7840_v8  ;;  %v1253_v40 = vmul.f32 %v7842_v43, %v7222_v34  ;;  %v1231_v46 = vmul.f32 %v7838_v16, %v7338_v19  ;;  %v1232_v13 = vmul.f32 %v7840_v8, %v7343_v20 }
 0x41f   :  { %5233 = vrot.lane.b32.xlu2 %v5232_v1, %s6978_s28  ;;  %v1233_v6 = vmul.f32 %v7842_v43, %v7206_v15  ;;  %v1270_v56 = vmul.f32 %v7836_v18, %v7390_v30  ;;  %v1271_v4 = vmul.f32 %v7838_v16, %v7397_v35  ;;  %v1272_v28 = vmul.f32 %v7840_v8, %v7403_v37 }
 0x420   :  { %5238 = vrot.lane.b32.xlu0 %v5237_v58, %s6978_s28  ;;  %v5257_v49 = vpack.i.bf16 %v1253_v40, %v1252_v12  ;;  %v5242_v42 = vpack.i.bf16 %v1231_v46, %v1230_v29  ;;  %v1273_v62 = vmul.f32 %v7842_v43, %v7258_v59  ;;  %v1250_v63 = vmul.f32 %v7836_v18, %v7361_v36  ;;  %v1041_v46 = vpop.permute.xlu0 %1040 }
 0x421   :  { %v5247_v61 = vpack.i.bf16 %v1233_v6, %v1232_v13  ;;  %v5262_v50 = vpack.i.bf16 %v1271_v4, %v1270_v56  ;;  %v1251_v53 = vmul.f32 %v7838_v16, %v7369_v54  ;;  %v1309_v45 = vmul.f32 %v7836_v18, %v7220_v32  ;;  %v13453_v13 = vld [vmem:[#allocation19_spill] sm:$0xff]  ;;  %v13455_v4 = vld [vmem:[#allocation25_spill] sm:$0xff] }
 0x422   :  { %5258 = vrot.lane.b32.xlu1 %v5257_v49, %s6994_s5  ;;  %v5267_v51 = vpack.i.bf16 %v1273_v62, %v1272_v28  ;;  %v1310_v25 = vmul.f32 %v7838_v16, %v7416_v41  ;;  %v1311_v21 = vmul.f32 %v7840_v8, %v7422_v17  ;;  %v1312_v47 = vmul.f32 %v7842_v43, %v7427_v27 }
 0x423   :  { %v5252_v11 = vpack.i.bf16 %v1251_v53, %v1250_v63  ;;  %v1331_v1 = vmul.f32 %v7840_v8, %v7446_v2  ;;  %v1332_v58 = vmul.f32 %v7842_v43, %v7454_v24  ;;  %v1351_v49 = vmul.f32 %v7840_v8, %v7468_v31  ;;  %v1085_v53 = vpop.permute.xlu2 %1084 }
 0x424   :  { %v5272_v3 = vpack.i.bf16 %v1310_v25, %v1309_v45  ;;  %v5277_v12 = vpack.i.bf16 %v1312_v47, %v1311_v21  ;;  %v1352_v29 = vmul.f32 %v7842_v43, %v7476_v7  ;;  %v1329_v6 = vmul.f32 %v7836_v18, %v13453_v13  ;;  %v13457_v45 = vld [vmem:[#allocation20_spill] sm:$0xff]  ;;  %v13458_v21 = vld [vmem:[#allocation30_spill] sm:$0xff] }
 0x425   :  { %v5287_v40 = vpack.i.bf16 %v1332_v58, %v1331_v1  ;;  %v1349_v28 = vmul.f32 %v7836_v18, %v13455_v4  ;;  %v1060_v63 = vmul.f32 %v1041_v46, %v7734_v44  ;;  %v1369_v25 = vmul.f32 %v7836_v18, %v13457_v45  ;;  %v13459_v58 = vld [vmem:[#allocation31_spill] sm:$0xff] }
 0x426   :  { %v1371_v44 = vmul.f32 %v7840_v8, %v13459_v58 }
 0x427   :  { %5243 = vrot.lane.b32.xlu2 %v5242_v42, %s6981_s16  ;;  %v5297_v42 = vpack.i.bf16 %v1352_v29, %v1351_v49  ;;  %v1104_v47 = vadd.f32 %v1085_v53, %v1060_v63  ;;  %v13461_v49 = vld [vmem:[#allocation55_spill] sm:$0xff]  ;;  %v13462_v63 = vld [vmem:[#allocation10_spill] sm:$0xff] }
 0x428   :  { %5248 = vrot.lane.b32.xlu0 %v5247_v61, %s6981_s16  ;;  %v13454_v61 = vld [vmem:[#allocation43_spill] sm:$0xff]  ;;  %v1210_v29 = vmul.f32 %v7836_v18, %v13461_v49  ;;  %v13463_v18 = vld [vmem:[#allocation56_spill] sm:$0xff] }
 0x429   :  { %v1330_v56 = vmul.f32 %v7838_v16, %v13454_v61  ;;  %vm1120_vm3 = vcmp.ge.f32.partialorder %v1104_v47, 0.0 }
 0x42a   :  { %5263 = vrot.lane.b32.xlu1 %v5262_v50, %s6979_s0  ;;  %v13456_v50 = vld [vmem:[#allocation46_spill] sm:$0xff] }
 0x42b   :  { %v1350_v62 = vmul.f32 %v7838_v16, %v13456_v50 }
 0x42f   :  { %5268 = vrot.lane.b32.xlu2 %v5267_v51, %s6979_s0  ;;  %v5282_v51 = vpack.i.bf16 %v1330_v56, %v1329_v6  ;;  %v1057_v6 = vmul.f32 %v1041_v46, %v7722_v9  ;;  %v1059_v56 = vmul.f32 %v1041_v46, %v7725_v23  ;;  %v1211_v9 = vmul.f32 %v7838_v16, %v13463_v18 }
 0x430   :  { %5253 = vrot.lane.b32.xlu0 %v5252_v11, %s6994_s5  ;;  %v5292_v11 = vpack.i.bf16 %v1350_v62, %v1349_v28  ;;  %v1136_v28 = vmul.f32 0.2, %v1104_v47  ;;  %v7925_v62 = vld [vmem:[#allocation2 + $0x38] sm:$0xff] }
 0x431   :  { %v1101_v23 = vadd.f32 %v1085_v53, %v1057_v6  ;;  %v1103_v14 = vadd.f32 %v1085_v53, %v1059_v56 }
 0x432   :  { %5273 = vrot.lane.b32.xlu1 %v5272_v3, %s6989_s2  ;;  %v1370_v3 = vmul.f32 %v7838_v16, %v13458_v21  ;;  %v7936_v22 = vsel %vm1120_vm3, %v1104_v47, %v1136_v28 }
 0x433   :  { %v1133_v16 = vmul.f32 0.2, %v1101_v23  ;;  %vm1117_vm7 = vcmp.ge.f32.partialorder %v1101_v23, 0.0  ;;  %vm1119_vm10 = vcmp.ge.f32.partialorder %v1103_v14, 0.0 }
 0x434   :  { %v5302_v1 = vpack.i.bf16 %v1370_v3, %v1369_v25  ;;  %v13464_v3 = vld [vmem:[#allocation54_spill] sm:$0xff] }
 0x437   :  { %5278 = vrot.lane.b32.xlu2 %v5277_v12, %s6989_s2  ;;  %v13460_v12 = vld [vmem:[#allocation28_spill] sm:$0xff] }
 0x438   :  { %5288 = vrot.lane.b32.xlu0 %v5287_v40, %s6990_s3  ;;  %v1372_v40 = vmul.f32 %v7842_v43, %v13460_v12 }
 0x43a   :  { %5298 = vrot.lane.b32.xlu1 %v5297_v42, %s6992_s8  ;;  %v1058_v42 = vmul.f32 %v1041_v46, %v7719_v10  ;;  %v1212_v10 = vmul.f32 %v7840_v8, %v13464_v3  ;;  %v13465_v8 = vld [vmem:[#allocation14_spill] sm:$0xff] }
 0x43c   :  { %v1102_v46 = vadd.f32 %v1085_v53, %v1058_v42  ;;  %v7947_v53 = vmul.f32 %v7925_v62, %v13465_v8  ;;  %v1090_v8 = vpop.permute.xlu0 %1089 }
 0x43e   :  { %vm1118_vm9 = vcmp.ge.f32.partialorder %v1102_v46, 0.0  ;;  %13466 = vst [vmem:[#allocation58_spill] sm:$0xff] %v7947_v53 }
 0x43f   :  { %5283 = vrot.lane.b32.xlu2 %v5282_v51, %s6990_s3  ;;  %v7929_v51 = vmul.f32 %v7925_v62, %v13462_v63  ;;  %v1135_v63 = vmul.f32 0.2, %v1103_v14 }
 0x440   :  { %5293 = vrot.lane.b32.xlu0 %v5292_v11, %s6992_s8  ;;  %v5307_v11 = vpack.i.bf16 %v1372_v40, %v1371_v44  ;;  %v1213_v44 = vmul.f32 %v7842_v43, %v7195_v5  ;;  %v1238_v40 = vmul.f32 %v7936_v22, %v7206_v15  ;;  %v7951_v43 = vsel %vm1117_vm7, %v1101_v23, %v1133_v16 }
 0x441   :  { %v5312_v25 = vpack.i.bf16 %v1210_v29, %v7929_v51  ;;  %v1134_v29 = vmul.f32 0.2, %v1102_v46  ;;  %v7955_v56 = vsel %vm1119_vm10, %v1103_v14, %v1135_v63  ;;  %v1235_v63 = vmul.f32 %v7951_v43, %v7318_v0 }
 0x442   :  { %5303 = vrot.lane.b32.xlu1 %v5302_v1, %s6991_s23  ;;  %v5317_v1 = vpack.i.bf16 %v1212_v10, %v1211_v9  ;;  %v5322_v47 = vpack.i.bf16 %v7929_v51, %v1213_v44  ;;  %v5347_v6 = vpack.i.bf16 %v7947_v53, %v1238_v40  ;;  %v5332_v9 = vpack.i.bf16 %v7936_v22, %v7955_v56  ;;  %v13467_v44 = vld [vmem:[#allocation23_spill] sm:$0xff] }
 0x443   :  { %v7953_v42 = vsel %vm1118_vm9, %v1102_v46, %v1134_v29  ;;  %v5337_v10 = vpack.i.bf16 %v1235_v63, %v7947_v53  ;;  %v1237_v46 = vmul.f32 %v7955_v56, %v7343_v20  ;;  %v7982_v40 = vmul.f32 %v7925_v62, %v13467_v44 }
 0x444   :  { %v5327_v28 = vpack.i.bf16 %v7953_v42, %v7951_v43  ;;  %v1236_v23 = vmul.f32 %v7953_v42, %v7338_v19 }
 0x445   :  { %13468 = vst [vmem:[#allocation59_spill] sm:$0xff] %v7982_v40 }
 0x446   :  { %v5342_v16 = vpack.i.bf16 %v1237_v46, %v1236_v23  ;;  %v1276_v46 = vmul.f32 %v7953_v42, %v7397_v35 }
 0x447   :  { %5308 = vrot.lane.b32.xlu2 %v5307_v11, %s6991_s23  ;;  %v1256_v11 = vmul.f32 %v7953_v42, %v7369_v54 }
 0x448   :  { %5313 = vrot.lane.b32.xlu0 %v5312_v25, %s6986_s22  ;;  %v1257_v25 = vmul.f32 %v7955_v56, %v7374_v55 }
 0x44a   :  { %5318 = vrot.lane.b32.xlu1 %v5317_v1, %s6986_s22  ;;  %v5357_v14 = vpack.i.bf16 %v1257_v25, %v1256_v11  ;;  %v1275_v1 = vmul.f32 %v7951_v43, %v7390_v30  ;;  %v1314_v25 = vmul.f32 %v7951_v43, %v7220_v32 }
 0x44c   :  { %v5367_v29 = vpack.i.bf16 %v1275_v1, %v7982_v40  ;;  %v1277_v1 = vmul.f32 %v7955_v56, %v7403_v37 }
 0x44f   :  { %5323 = vrot.lane.b32.xlu2 %v5322_v47, %s6986_s22  ;;  %v1258_v47 = vmul.f32 %v7936_v22, %v7222_v34 }
 0x450   :  { %5348 = vrot.lane.b32.xlu0 %v5347_v6, %s6981_s16  ;;  %v13469_v6 = vld [vmem:[#allocation15_spill] sm:$0xff] }
 0x452   :  { %5328 = vrot.lane.b32.xlu1 %v5327_v28, %s6978_s28  ;;  %v7991_v28 = vmul.f32 %v7925_v62, %v13469_v6 }
 0x454   :  { %13470 = vst [vmem:[#allocation60_spill] sm:$0xff] %v7991_v28  ;;  %v5362_v11 = vpack.i.bf16 %v7991_v28, %v1258_v47  ;;  %v1278_v47 = vmul.f32 %v7936_v22, %v7258_v59 }
 0x456   :  { %v5377_v44 = vpack.i.bf16 %v7982_v40, %v1278_v47  ;;  %v1317_v47 = vmul.f32 %v7936_v22, %v7427_v27 }
 0x457   :  { %5333 = vrot.lane.b32.xlu2 %v5332_v9, %s6978_s28  ;;  %v1255_v9 = vmul.f32 %v7951_v43, %v7361_v36 }
 0x458   :  { %5358 = vrot.lane.b32.xlu0 %v5357_v14, %s6994_s5  ;;  %v13471_v14 = vld [vmem:[#allocation18_spill] sm:$0xff] }
 0x459   :  { %v8001_v63 = vmul.f32 %v7925_v62, %v13471_v14  ;;  %v5352_v23 = vpack.i.bf16 %v1255_v9, %v7991_v28  ;;  %v13477_v14 = vld [vmem:[#allocation26_spill] sm:$0xff] }
 0x45a   :  { %5338 = vrot.lane.b32.xlu1 %v5337_v10, %s6981_s16 }
 0x45b   :  { %13472 = vst [vmem:[#allocation61_spill] sm:$0xff] %v8001_v63  ;;  %v5382_v10 = vpack.i.bf16 %v1314_v25, %v8001_v63  ;;  %v5392_v6 = vpack.i.bf16 %v8001_v63, %v1317_v47  ;;  %v1375_v63 = vmul.f32 %v7953_v42, %v13458_v21 }
 0x45f   :  { %5343 = vrot.lane.b32.xlu2 %v5342_v16, %s6981_s16  ;;  %v5372_v16 = vpack.i.bf16 %v1277_v1, %v1276_v46  ;;  %v1046_v46 = vpop.permute.xlu2 %1045 }
 0x460   :  { %5368 = vrot.lane.b32.xlu0 %v5367_v29, %s6979_s0  ;;  %v1337_v29 = vmul.f32 %v7936_v22, %v7454_v24 }
 0x462   :  { %5363 = vrot.lane.b32.xlu1 %v5362_v11, %s6994_s5  ;;  %v13473_v11 = vld [vmem:[#allocation21_spill] sm:$0xff] }
 0x463   :  { %v8018_v25 = vmul.f32 %v7925_v62, %v13473_v11 }
 0x465   :  { %13474 = vst [vmem:[#allocation62_spill] sm:$0xff] %v8018_v25  ;;  %v5407_v9 = vpack.i.bf16 %v8018_v25, %v1337_v29  ;;  %v1356_v29 = vmul.f32 %v7955_v56, %v7468_v31 }
 0x467   :  { %5353 = vrot.lane.b32.xlu2 %v5352_v23, %s6994_s5  ;;  %v1316_v23 = vmul.f32 %v7955_v56, %v7422_v17 }
 0x468   :  { %5383 = vrot.lane.b32.xlu0 %v5382_v10, %s6989_s2  ;;  %v1315_v10 = vmul.f32 %v7953_v42, %v7416_v41 }
 0x46a   :  { %5373 = vrot.lane.b32.xlu1 %v5372_v16, %s6979_s0  ;;  %v5387_v1 = vpack.i.bf16 %v1316_v23, %v1315_v10  ;;  %v1355_v16 = vmul.f32 %v7953_v42, %v13456_v50  ;;  %v1374_v23 = vmul.f32 %v7951_v43, %v13457_v45 }
 0x46c   :  { %v5417_v11 = vpack.i.bf16 %v1356_v29, %v1355_v16  ;;  %v1336_v16 = vmul.f32 %v7955_v56, %v7446_v2  ;;  %v13476_v29 = vld [vmem:[#allocation22_spill] sm:$0xff] }
 0x46f   :  { %5378 = vrot.lane.b32.xlu2 %v5377_v44, %s6979_s0 }
 0x470   :  { %5408 = vrot.lane.b32.xlu0 %v5407_v9, %s6990_s3  ;;  %v1334_v9 = vmul.f32 %v7951_v43, %v13453_v13 }
 0x472   :  { %5388 = vrot.lane.b32.xlu1 %v5387_v1, %s6989_s2  ;;  %v5397_v10 = vpack.i.bf16 %v1334_v9, %v8018_v25  ;;  %v1335_v1 = vmul.f32 %v7953_v42, %v13454_v61  ;;  %v1357_v9 = vmul.f32 %v7936_v22, %v7476_v7 }
 0x474   :  { %v5402_v47 = vpack.i.bf16 %v1336_v16, %v1335_v1  ;;  %v1354_v1 = vmul.f32 %v7951_v43, %v13455_v4  ;;  %v1215_v16 = vmul.f32 %v7951_v43, %v13461_v49  ;;  %v1376_v43 = vmul.f32 %v7955_v56, %v13459_v58 }
 0x477   :  { %5393 = vrot.lane.b32.xlu2 %v5392_v6, %s6989_s2 }
 0x478   :  { %5418 = vrot.lane.b32.xlu0 %v5417_v11, %s6992_s8  ;;  %v8052_v11 = vmul.f32 %v7925_v62, %v13476_v29  ;;  %v1062_v29 = vmul.f32 %v1046_v46, %v7738_v57  ;;  %v1064_v57 = vmul.f32 %v1046_v46, %v7760_v26  ;;  %v8084_v26 = vpop.permute.xlu0 %1050 }
 0x479   :  { %v8040_v44 = vpop.permute.xlu2 %5233 }
 0x47a   :  { %13475 = vst [vmem:[#allocation63_spill] sm:$0xff] %v8040_v44  ;;  %5398 = vrot.lane.b32.xlu1 %v5397_v10, %s6990_s3  ;;  %v5427_v6 = vpack.i.bf16 %v1374_v23, %v8052_v11  ;;  %v8061_v44 = vmul.f32 %v7925_v62, %v13477_v14  ;;  %v1061_v10 = vmul.f32 %v1046_v46, %v7747_v39 }
 0x47b   :  { %v1063_v62 = vmul.f32 %v1046_v46, %v7744_v48  ;;  %v1106_v14 = vadd.f32 %v1090_v8, %v1062_v29  ;;  %v1108_v28 = vadd.f32 %v1090_v8, %v1064_v57  ;;  %v5432_v29 = vpack.i.bf16 %v1376_v43, %v1375_v63 }
 0x47c   :  { %v5422_v23 = vpack.i.bf16 %v8061_v44, %v1357_v9  ;;  %v5412_v9 = vpack.i.bf16 %v1354_v1, %v8061_v44 }
 0x47d   :  { %v1107_v39 = vadd.f32 %v1090_v8, %v1063_v62  ;;  %v1138_v53 = vmul.f32 0.2, %v1106_v14  ;;  %vm1122_vm1 = vcmp.ge.f32.partialorder %v1106_v14, 0.0  ;;  %vm1124_vm7 = vcmp.ge.f32.partialorder %v1108_v28, 0.0 }
 0x47f   :  { %5403 = vrot.lane.b32.xlu2 %v5402_v47, %s6990_s3  ;;  %v1105_v47 = vadd.f32 %v1090_v8, %v1061_v10  ;;  %v1139_v48 = vmul.f32 0.2, %v1107_v39  ;;  %vm1123_vm3 = vcmp.ge.f32.partialorder %v1107_v39, 0.0  ;;  %v1140_v10 = vmul.f32 0.2, %v1108_v28 }
 0x480   :  { %5428 = vrot.lane.b32.xlu0 %v5427_v6, %s6991_s23  ;;  %v1216_v6 = vmul.f32 %v7953_v42, %v13463_v18  ;;  %v1377_v42 = vmul.f32 %v7936_v22, %v13460_v12 }
 0x481   :  { %v8065_v25 = vpop.permute.xlu2 %5243  ;;  %v1137_v40 = vmul.f32 0.2, %v1105_v47  ;;  %vm1121_vm11 = vcmp.ge.f32.partialorder %v1105_v47, 0.0  ;;  %v8095_v1 = vsel %vm1123_vm3, %v1107_v39, %v1139_v48  ;;  %vm2673_vm3 = vcmask 261120  }
 0x482   :  { %13478 = vst [vmem:[#allocation64_spill] sm:$0xff] %v8065_v25  ;;  %5423 = vrot.lane.b32.xlu1 %v5422_v23, %s6992_s8  ;;  %v5442_v25 = vpack.i.bf16 %v1216_v6, %v1215_v16  ;;  %v8092_v23 = vsel %vm1122_vm1, %v1106_v14, %v1138_v53  ;;  %v5437_v16 = vpack.i.bf16 %v8052_v11, %v1377_v42 }
 0x483   :  { %v8090_v8 = vsel %vm1121_vm11, %v1105_v47, %v1137_v40  ;;  %v1217_v6 = vmul.f32 %v7955_v56, %v13464_v3  ;;  %v1218_v40 = vmul.f32 %v7936_v22, %v7195_v5  ;;  %v8106_v53 = vsel %vm1124_vm7, %v1108_v28, %v1140_v10 }
 0x484   :  { %v5452_v63 = vpack.i.bf16 %v8092_v23, %v8090_v8  ;;  %v1242_v14 = vmul.f32 %v8095_v1, %v7343_v20  ;;  %v1243_v56 = vmul.f32 %v8106_v53, %v7206_v15  ;;  %v1262_v22 = vmul.f32 %v8095_v1, %v7374_v55 }
 0x485   :  { %v5447_v47 = vpack.i.bf16 %v1218_v40, %v1217_v6  ;;  %v1263_v28 = vmul.f32 %v8106_v53, %v7222_v34  ;;  %v5457_v48 = vpack.i.bf16 %v8106_v53, %v8095_v1  ;;  %v1280_v10 = vmul.f32 %v8090_v8, %v7390_v30 }
 0x486   :  { %v1261_v6 = vmul.f32 %v8092_v23, %v7369_v54 }
 0x487   :  { %5413 = vrot.lane.b32.xlu2 %v5412_v9, %s6992_s8  ;;  %v5467_v9 = vpack.i.bf16 %v1243_v56, %v1242_v14  ;;  %v5477_v43 = vpack.i.bf16 %v1263_v28, %v1262_v22  ;;  %v1240_v56 = vmul.f32 %v8090_v8, %v7318_v0  ;;  %v1241_v22 = vmul.f32 %v8092_v23, %v7338_v19 }
 0x488   :  { %5443 = vrot.lane.b32.xlu0 %v5442_v25, %s6986_s22  ;;  %v8097_v25 = vpop.permute.xlu1 %1094  ;;  %v1319_v28 = vmul.f32 %v8090_v8, %v7220_v32 }
 0x489   :  { %v8086_v46 = vpop.permute.xlu2 %5268 }
 0x48a   :  { %5433 = vrot.lane.b32.xlu1 %v5432_v29, %s6991_s23 }
 0x48f   :  { %5438 = vrot.lane.b32.xlu2 %v5437_v16, %s6991_s23  ;;  %v1281_v16 = vmul.f32 %v8092_v23, %v7397_v35 }
 0x490   :  { %5453 = vrot.lane.b32.xlu0 %v5452_v63, %s6978_s28  ;;  %v1260_v63 = vmul.f32 %v8090_v8, %v7361_v36 }
 0x491   :  { %v8112_v62 = vpop.permute.xlu2 %5278  ;;  %v5482_v14 = vpack.i.bf16 %v1281_v16, %v1280_v10  ;;  %v1320_v10 = vmul.f32 %v8092_v23, %v7416_v41  ;;  %v1341_v16 = vmul.f32 %v8095_v1, %v7446_v2 }
 0x492   :  { %13479 = vst [vmem:[#allocation65_spill] sm:$0xff] %v8112_v62  ;;  %v8114_v57 = vpop.permute.xlu0 %5238  ;;  %5448 = vrot.lane.b32.xlu1 %v5447_v47, %s6986_s22  ;;  %v5472_v47 = vpack.i.bf16 %v1261_v6, %v1260_v63  ;;  %v1342_v63 = vmul.f32 %v8106_v53, %v7454_v24 }
 0x494   :  { %v8123_v39 = vpop.permute.xlu1 %5258 }
 0x497   :  { %5468 = vrot.lane.b32.xlu2 %v5467_v9, %s6981_s16 }
 0x498   :  { %5478 = vrot.lane.b32.xlu0 %v5477_v43, %s6994_s5  ;;  %v5462_v43 = vpack.i.bf16 %v1241_v22, %v1240_v56  ;;  %v1282_v56 = vmul.f32 %v8095_v1, %v7403_v37  ;;  %v1283_v22 = vmul.f32 %v8106_v53, %v7258_v59 }
 0x499   :  { %v8129_v29 = vpop.permute.xlu2 %5283 }
 0x49a   :  { %13480 = vst [vmem:[#allocation66_spill] sm:$0xff] %v8129_v29  ;;  %v8131_v42 = vpop.permute.xlu0 %5248  ;;  %5458 = vrot.lane.b32.xlu1 %v5457_v48, %s6978_s28 }
 0x49c   :  { %v8142_v40 = vpop.permute.xlu1 %5263 }
 0x49f   :  { %5473 = vrot.lane.b32.xlu2 %v5472_v47, %s6994_s5  ;;  %v5507_v47 = vpack.i.bf16 %v1342_v63, %v1341_v16  ;;  %v1360_v16 = vmul.f32 %v8092_v23, %v13456_v50 }
 0x4a0   :  { %5483 = vrot.lane.b32.xlu0 %v5482_v14, %s6979_s0  ;;  %v5492_v14 = vpack.i.bf16 %v1320_v10, %v1319_v28  ;;  %v1362_v28 = vmul.f32 %v8106_v53, %v7476_v7  ;;  %v1359_v10 = vmul.f32 %v8090_v8, %v13455_v4 }
 0x4a1   :  { %v8152_v9 = vpop.permute.xlu2 %5308 }
 0x4a2   :  { %13481 = vst [vmem:[#allocation67_spill] sm:$0xff] %v8152_v9  ;;  %v8154_v48 = vpop.permute.xlu0 %5253  ;;  %5463 = vrot.lane.b32.xlu1 %v5462_v43, %s6981_s16  ;;  %v1361_v9 = vmul.f32 %v8095_v1, %v7468_v31  ;;  %v5487_v43 = vpack.i.bf16 %v1283_v22, %v1282_v56  ;;  %v1321_v56 = vmul.f32 %v8095_v1, %v7422_v17 }
 0x4a3   :  { %v1322_v22 = vmul.f32 %v8106_v53, %v7427_v27 }
 0x4a4   :  { %v8163_v6 = vpop.permute.xlu1 %5273 }
 0x4a5   :  { %13482 = vst [vmem:[#allocation68_spill] sm:$0xff] %v8163_v6 }
 0x4a7   :  { %5508 = vrot.lane.b32.xlu2 %v5507_v47, %s6990_s3  ;;  %v5512_v47 = vpack.i.bf16 %v1360_v16, %v1359_v10  ;;  %v1379_v10 = vmul.f32 %v8090_v8, %v13457_v45  ;;  %v1380_v16 = vmul.f32 %v8092_v23, %v13458_v21 }
 0x4a8   :  { %5493 = vrot.lane.b32.xlu0 %v5492_v14, %s6989_s2  ;;  %v5517_v14 = vpack.i.bf16 %v1362_v28, %v1361_v9  ;;  %v5497_v9 = vpack.i.bf16 %v1322_v22, %v1321_v56 }
 0x4a9   :  { %v8173_v29 = vpop.permute.xlu2 %5323  ;;  %v5522_v22 = vpack.i.bf16 %v1380_v16, %v1379_v10  ;;  %v1221_v16 = vmul.f32 %v8092_v23, %v13463_v18 }
 0x4aa   :  { %13483 = vst [vmem:[#allocation69_spill] sm:$0xff] %v8173_v29  ;;  %v8175_v62 = vpop.permute.xlu0 %5288  ;;  %5488 = vrot.lane.b32.xlu1 %v5487_v43, %s6979_s0  ;;  %v1065_v29 = vmul.f32 %v8084_v26, %v7773_v38  ;;  %v1220_v38 = vmul.f32 %v8090_v8, %v13461_v49 }
 0x4ab   :  { %13484 = vst [vmem:[#allocation70_spill] sm:$0xff] %v8175_v62  ;;  %v1066_v62 = vmul.f32 %v8084_v26, %v7764_v52  ;;  %v1068_v52 = vmul.f32 %v8084_v26, %v7784_v60  ;;  %v1067_v60 = vmul.f32 %v8084_v26, %v7770_v33  ;;  %v1222_v33 = vmul.f32 %v8095_v1, %v13464_v3 }
 0x4ac   :  { %v8184_v63 = vpop.permute.xlu1 %5298 }
 0x4ad   :  { %13485 = vst [vmem:[#allocation71_spill] sm:$0xff] %v8184_v63  ;;  %v1339_v63 = vmul.f32 %v8090_v8, %v13453_v13  ;;  %v1111_v26 = vadd.f32 %v8097_v25, %v1067_v60 }
 0x4af   :  { %5513 = vrot.lane.b32.xlu2 %v5512_v47, %s6992_s8  ;;  %v1110_v47 = vadd.f32 %v8097_v25, %v1066_v62  ;;  %vm1127_vm1 = vcmp.ge.f32.partialorder %v1111_v26, 0.0 }
 0x4b0   :  { %5518 = vrot.lane.b32.xlu0 %v5517_v14, %s6992_s8  ;;  %v1109_v14 = vadd.f32 %v8097_v25, %v1065_v29  ;;  %v1112_v29 = vadd.f32 %v8097_v25, %v1068_v52  ;;  %v1382_v25 = vmul.f32 %v8106_v53, %v13460_v12 }
 0x4b1   :  { %v8196_v43 = vpop.permute.xlu2 %5333  ;;  %v1142_v62 = vmul.f32 0.2, %v1110_v47  ;;  %vm1126_vm10 = vcmp.ge.f32.partialorder %v1110_v47, 0.0 }
 0x4b2   :  { %13486 = vst [vmem:[#allocation72_spill] sm:$0xff] %v8196_v43  ;;  %v8198_v28 = vpop.permute.xlu0 %5293  ;;  %5498 = vrot.lane.b32.xlu1 %v5497_v9, %s6989_s2  ;;  %v5532_v43 = vpack.i.bf16 %v1220_v38, %v7929_v51  ;;  %v1141_v6 = vmul.f32 0.2, %v1109_v14  ;;  %vm1125_vm9 = vcmp.ge.f32.partialorder %v1109_v14, 0.0  ;;  %v1144_v38 = vmul.f32 0.2, %v1112_v29 }
 0x4b3   :  { %13487 = vst [vmem:[#allocation73_spill] sm:$0xff] %v8198_v28  ;;  %v1340_v28 = vmul.f32 %v8092_v23, %v13454_v61  ;;  %vm1128_vm11 = vcmp.ge.f32.partialorder %v1112_v29, 0.0  ;;  %v1381_v23 = vmul.f32 %v8095_v1, %v13459_v58 }
 0x4b4   :  { %v8211_v56 = vpop.permute.xlu1 %5303  ;;  %v8232_v52 = vsel %vm1125_vm9, %v1109_v14, %v1141_v6  ;;  %v8245_v6 = vsel %vm1128_vm11, %v1112_v29, %v1144_v38  ;;  %v1223_v38 = vmul.f32 %v8106_v53, %v7195_v5 }
 0x4b5   :  { %13488 = vst [vmem:[#allocation74_spill] sm:$0xff] %v8211_v56  ;;  %v5502_v10 = vpack.i.bf16 %v1340_v28, %v1339_v63  ;;  %v8234_v56 = vsel %vm1126_vm10, %v1110_v47, %v1142_v62  ;;  %v5537_v63 = vpack.i.bf16 %v1222_v33, %v1221_v16  ;;  %v5527_v47 = vpack.i.bf16 %v1382_v25, %v1381_v23  ;;  %v13491_v16 = vld [vmem:[#allocation58_spill] sm:$0xff] }
 0x4b6   :  { %v5547_v28 = vpack.i.bf16 %v8234_v56, %v8232_v52  ;;  %v1248_v62 = vmul.f32 %v8245_v6, %v7206_v15  ;;  %v1266_v23 = vmul.f32 %v8234_v56, %v7369_v54 }
 0x4b7   :  { %5533 = vrot.lane.b32.xlu2 %v5532_v43, %s6986_s22 }
 0x4b8   :  { %5523 = vrot.lane.b32.xlu0 %v5522_v22, %s6991_s23  ;;  %v1143_v22 = vmul.f32 0.2, %v1111_v26  ;;  %v5567_v33 = vpack.i.bf16 %v13491_v16, %v1248_v62 }
 0x4b9   :  { %v8223_v9 = vpop.permute.xlu2 %5343 }
 0x4ba   :  { %v8225_v8 = vpop.permute.xlu0 %5313  ;;  %5503 = vrot.lane.b32.xlu1 %v5502_v10, %s6990_s3  ;;  %v8255_v1 = vsel %vm1127_vm1, %v1111_v26, %v1143_v22  ;;  %v5542_v26 = vpack.i.bf16 %v7929_v51, %v1223_v38  ;;  %v1245_v22 = vmul.f32 %v8232_v52, %v7318_v0  ;;  %v1246_v51 = vmul.f32 %v8234_v56, %v7338_v19  ;;  %v13508_v0 = vld [vmem:[#allocation73_spill] sm:$0xff] }
 0x4bb   :  { %13489 = vst [vmem:[#allocation75_spill] sm:$0xff] %v8225_v8  ;;  %v5552_v29 = vpack.i.bf16 %v8245_v6, %v8255_v1  ;;  %v1267_v25 = vmul.f32 %v8255_v1, %v7374_v55 }
 0x4bc   :  { %v8237_v43 = vpop.permute.xlu1 %5318  ;;  %v5557_v62 = vpack.i.bf16 %v1245_v22, %v13491_v16  ;;  %v1268_v16 = vmul.f32 %v8245_v6, %v7222_v34 }
 0x4bd   :  { %13490 = vst [vmem:[#allocation76_spill] sm:$0xff] %v8237_v43 }
 0x4bf   :  { %5548 = vrot.lane.b32.xlu2 %v5547_v28, %s6978_s28 }
 0x4c0   :  { %5538 = vrot.lane.b32.xlu0 %v5537_v63, %s6986_s22 }
 0x4c1   :  { %v8249_v14 = vpop.permute.xlu2 %5353 }
 0x4c2   :  { %v8251_v60 = vpop.permute.xlu0 %5348  ;;  %5528 = vrot.lane.b32.xlu1 %v5527_v47, %s6991_s23  ;;  %v5577_v47 = vpack.i.bf16 %v1267_v25, %v1266_v23  ;;  %v13492_v25 = vld [vmem:[#allocation59_spill] sm:$0xff] }
 0x4c4   :  { %v8258_v10 = vpop.permute.xlu1 %5328 }
 0x4c7   :  { %5568 = vrot.lane.b32.xlu2 %v5567_v33, %s6981_s16 }
 0x4c8   :  { %5553 = vrot.lane.b32.xlu0 %v5552_v29, %s6978_s28  ;;  %v1247_v29 = vmul.f32 %v8255_v1, %v7343_v20 }
 0x4c9   :  { %v8267_v63 = vpop.permute.xlu2 %5378 }
 0x4ca   :  { %v8270_v28 = vpop.permute.xlu0 %5358  ;;  %5543 = vrot.lane.b32.xlu1 %v5542_v26, %s6986_s22  ;;  %v5562_v38 = vpack.i.bf16 %v1247_v29, %v1246_v51  ;;  %v1285_v26 = vmul.f32 %v8232_v52, %v7390_v30 }
 0x4cc   :  { %v8279_v53 = vpop.permute.xlu1 %5338  ;;  %v5587_v22 = vpack.i.bf16 %v1285_v26, %v13492_v25  ;;  %v1286_v26 = vmul.f32 %v8234_v56, %v7397_v35 }
 0x4cf   :  { %5578 = vrot.lane.b32.xlu2 %v5577_v47, %s6994_s5  ;;  %v13493_v47 = vld [vmem:[#allocation60_spill] sm:$0xff] }
 0x4d0   :  { %5558 = vrot.lane.b32.xlu0 %v5557_v62, %s6981_s16  ;;  %v5582_v15 = vpack.i.bf16 %v13493_v47, %v1268_v16  ;;  %v1265_v62 = vmul.f32 %v8232_v52, %v7361_v36  ;;  %v1287_v16 = vmul.f32 %v8255_v1, %v7403_v37 }
 0x4d1   :  { %v8288_v33 = vpop.permute.xlu2 %5393 }
 0x4d2   :  { %v8290_v54 = vpop.permute.xlu0 %5368  ;;  %5563 = vrot.lane.b32.xlu1 %v5562_v38, %s6981_s16  ;;  %v5572_v29 = vpack.i.bf16 %v1265_v62, %v13493_v47  ;;  %v1324_v38 = vmul.f32 %v8232_v52, %v7220_v32  ;;  %v5592_v20 = vpack.i.bf16 %v1287_v16, %v1286_v26  ;;  %v1288_v47 = vmul.f32 %v8245_v6, %v7258_v59 }
 0x4d3   :  { %v1326_v26 = vmul.f32 %v8255_v1, %v7422_v17 }
 0x4d4   :  { %v8297_v23 = vpop.permute.xlu1 %5363  ;;  %v5597_v32 = vpack.i.bf16 %v13492_v25, %v1288_v47  ;;  %v1327_v25 = vmul.f32 %v8245_v6, %v7427_v27 }
 0x4d7   :  { %5588 = vrot.lane.b32.xlu2 %v5587_v22, %s6979_s0 }
 0x4d8   :  { %5583 = vrot.lane.b32.xlu0 %v5582_v15, %s6994_s5  ;;  %v13494_v15 = vld [vmem:[#allocation61_spill] sm:$0xff] }
 0x4d9   :  { %v8305_v51 = vpop.permute.xlu2 %5403  ;;  %v5602_v36 = vpack.i.bf16 %v1324_v38, %v13494_v15  ;;  %v1325_v38 = vmul.f32 %v8234_v56, %v7416_v41 }
 0x4da   :  { %v8308_v30 = vpop.permute.xlu0 %5383  ;;  %5573 = vrot.lane.b32.xlu1 %v5572_v29, %s6994_s5  ;;  %v1347_v29 = vmul.f32 %v8245_v6, %v7454_v24  ;;  %v5612_v24 = vpack.i.bf16 %v13494_v15, %v1327_v25  ;;  %v1345_v15 = vmul.f32 %v8234_v56, %v13454_v61  ;;  %v1346_v25 = vmul.f32 %v8255_v1, %v7446_v2 }
 0x4db   :  { %v5607_v59 = vpack.i.bf16 %v1326_v26, %v1325_v38  ;;  %v1344_v38 = vmul.f32 %v8232_v52, %v13453_v13 }
 0x4dc   :  { %v8317_v22 = vpop.permute.xlu1 %5373  ;;  %v5622_v13 = vpack.i.bf16 %v1346_v25, %v1345_v15 }
 0x4df   :  { %5603 = vrot.lane.b32.xlu2 %v5602_v36, %s6989_s2 }
 0x4e0   :  { %5593 = vrot.lane.b32.xlu0 %v5592_v20, %s6979_s0  ;;  %v13495_v20 = vld [vmem:[#allocation62_spill] sm:$0xff] }
 0x4e1   :  { %v8324_v62 = vpop.permute.xlu2 %5413  ;;  %v5627_v16 = vpack.i.bf16 %v13495_v20, %v1347_v29  ;;  %v1366_v29 = vmul.f32 %v8255_v1, %v7468_v31 }
 0x4e2   :  { %v8327_v35 = vpop.permute.xlu0 %5408  ;;  %5598 = vrot.lane.b32.xlu1 %v5597_v32, %s6979_s0  ;;  %v1365_v32 = vmul.f32 %v8234_v56, %v13456_v50 }
 0x4e4   :  { %v8336_v36 = vpop.permute.xlu1 %5388 }
 0x4e7   :  { %5628 = vrot.lane.b32.xlu2 %v5627_v16, %s6990_s3  ;;  %v5617_v16 = vpack.i.bf16 %v1344_v38, %v13495_v20  ;;  %v1367_v20 = vmul.f32 %v8245_v6, %v7476_v7 }
 0x4e8   :  { %5608 = vrot.lane.b32.xlu0 %v5607_v59, %s6989_s2  ;;  %v5637_v59 = vpack.i.bf16 %v1366_v29, %v1365_v32 }
 0x4e9   :  { %v8343_v47 = vpop.permute.xlu2 %5438  ;;  %v5642_v38 = vpack.i.bf16 %v8061_v44, %v1367_v20  ;;  %v1225_v20 = vmul.f32 %v8232_v52, %v13461_v49 }
 0x4ea   :  { %v8346_v41 = vpop.permute.xlu0 %5418  ;;  %5613 = vrot.lane.b32.xlu1 %v5612_v24, %s6989_s2  ;;  %v1384_v24 = vmul.f32 %v8232_v52, %v13457_v45 }
 0x4ec   :  { %v8355_v26 = vpop.permute.xlu1 %5398  ;;  %v5647_v29 = vpack.i.bf16 %v1384_v24, %v8052_v11  ;;  %v1386_v24 = vmul.f32 %v8255_v1, %v13459_v58 }
 0x4ef   :  { %5638 = vrot.lane.b32.xlu2 %v5637_v59, %s6992_s8  ;;  %v1364_v59 = vmul.f32 %v8232_v52, %v13455_v4  ;;  %v5240_v4 = vunpack.i.l.bf16 %v8114_v57  ;;  %v13497_v52 = vld [vmem:[#allocation63_spill] sm:$0xff] }
 0x4f0   :  { %5618 = vrot.lane.b32.xlu0 %v5617_v16, %s6990_s3  ;;  %v1385_v16 = vmul.f32 %v8234_v56, %v13458_v21  ;;  %v5236_v49 = vunpack.i.h.bf16 %v13497_v52 }
 0x4f1   :  { %v8364_v50 = vpop.permute.xlu2 %5468 }
 0x4f2   :  { %v8366_v31 = vpop.permute.xlu0 %5428  ;;  %5623 = vrot.lane.b32.xlu1 %v5622_v13, %s6990_s3  ;;  %v5632_v13 = vpack.i.bf16 %v1364_v59, %v8061_v44  ;;  %v5652_v21 = vpack.i.bf16 %v1386_v24, %v1385_v16  ;;  %v1387_v44 = vmul.f32 %v8245_v6, %v13460_v12  ;;  %v13031_v59 = vunpack.i.h.bf16 %v8114_v57 }
 0x4f3   :  { %v1227_v16 = vmul.f32 %v8255_v1, %v13464_v3  ;;  %v1228_v24 = vmul.f32 %v8245_v6, %v7195_v5  ;;  %v13039_v1 = vunpack.i.h.bf16 %v8131_v42  ;;  %v5250_v6 = vunpack.i.l.bf16 %v8131_v42  ;;  %v13499_v5 = vld [vmem:[#allocation64_spill] sm:$0xff] }
 0x4f4   :  { %v8373_v32 = vpop.permute.xlu1 %5423  ;;  %v13500_v3 = vld [vmem:[#allocation52_spill] sm:$0xff] }
 0x4f5   :  { %v5146_v58 = vunpack.i.h.bf16 %v13500_v3  ;;  %v5255_v3 = vunpack.i.l.bf16 %v8154_v48 }
 0x4f7   :  { %5648 = vrot.lane.b32.xlu2 %v5647_v29, %s6991_s23  ;;  %v1226_v29 = vmul.f32 %v8234_v56, %v13463_v18 }
 0x4f8   :  { %5643 = vrot.lane.b32.xlu0 %v5642_v38, %s6992_s8 }
 0x4f9   :  { %v8383_v15 = vpop.permute.xlu2 %5473  ;;  %v5662_v45 = vpack.i.bf16 %v1226_v29, %v1225_v20  ;;  %v5235_v20 = vunpack.i.l.bf16 %v13497_v52  ;;  %v5256_v52 = vunpack.i.h.bf16 %v8154_v48 }
 0x4fa   :  { %v8386_v25 = vpop.permute.xlu0 %5443  ;;  %5633 = vrot.lane.b32.xlu1 %v5632_v13, %s6992_s8  ;;  %v5657_v13 = vpack.i.bf16 %v8052_v11, %v1387_v44  ;;  %v5667_v11 = vpack.i.bf16 %v1228_v24, %v1227_v16  ;;  %v5245_v24 = vunpack.i.l.bf16 %v13499_v5 }
 0x4fb   :  { %13496 = vst [vmem:[#allocation58_spill] sm:$0xff] %v8386_v25  ;;  %v1665_v12 = vsel %vm209_vm13, %v5235_v20, %v5236_v49  ;;  %v1526_v48 = vsel %vm483_vm14, %v5255_v3, %v5256_v52 }
 0x4fc   :  { %v8395_v38 = vpop.permute.xlu1 %5433  ;;  %v5672_v16 = vpack.i.bf16 %v1665_v12, %v5235_v20  ;;  %v1449_v12 = vsel %vm299_vm8, %v5146_v58, %v5245_v24 }
 0x4ff   :  { %5663 = vrot.lane.b32.xlu2 %v5662_v45, %s6986_s22  ;;  %v1667_v45 = vsel %vm209_vm13, %v5240_v4, %v13031_v59  ;;  %v5260_v59 = vunpack.i.l.bf16 %v8123_v39 }
 0x500   :  { %5653 = vrot.lane.b32.xlu0 %v5652_v21, %s6991_s23  ;;  %v1666_v21 = vsel %vm209_vm13, %v5236_v49, %v5240_v4  ;;  %v5246_v4 = vunpack.i.h.bf16 %v13499_v5 }
 0x501   :  { %v8404_v56 = vpop.permute.xlu2 %5508  ;;  %v5677_v44 = vpack.i.bf16 %v1667_v45, %v1666_v21 }
 0x502   :  { %v8407_v18 = vpop.permute.xlu0 %5453  ;;  %5658 = vrot.lane.b32.xlu1 %v5657_v13, %s6991_s23  ;;  %v13040_v13 = vunpack.i.h.bf16 %v8123_v39  ;;  %v1451_v45 = vsel %vm299_vm8, %v5246_v4, %v5250_v6  ;;  %v1450_v2 = vsel %vm299_vm8, %v5245_v24, %v5246_v4 }
 0x504   :  { %v8419_v29 = vpop.permute.xlu1 %5448  ;;  %v1528_v5 = vsel %vm483_vm14, %v5260_v59, %v13040_v13  ;;  %v13502_v13 = vld [vmem:[#allocation57_spill] sm:$0xff] }
 0x505   :  { %13498 = vst [vmem:[#allocation59_spill] sm:$0xff] %v8419_v29  ;;  %v5176_v58 = vunpack.i.h.bf16 %v13502_v13  ;;  %v13511_v29 = vld [vmem:[#allocation74_spill] sm:$0xff] }
 0x506   :  { %v5306_v8 = vunpack.i.h.bf16 %v13511_v29 }
 0x507   :  { %5678 = vrot.lane.b32.xlu2 %v5677_v44, %s6986_s22  ;;  %v1527_v44 = vsel %vm483_vm14, %v5256_v52, %v5260_v59 }
 0x508   :  { %5668 = vrot.lane.b32.xlu0 %v5667_v11, %s6986_s22  ;;  %v1452_v11 = vsel %vm299_vm8, %v5250_v6, %v13039_v1  ;;  %v5697_v61 = vpack.i.bf16 %v1528_v5, %v1527_v44  ;;  %v5266_v6 = vunpack.i.h.bf16 %v8142_v40  ;;  %v5265_v1 = vunpack.i.l.bf16 %v8142_v40 }
 0x509   :  { %v8431_v49 = vpop.permute.xlu2 %5513  ;;  %v5687_v7 = vpack.i.bf16 %v1452_v11, %v1451_v45  ;;  %v5682_v44 = vpack.i.bf16 %v1450_v2, %v1449_v12  ;;  %v13504_v12 = vld [vmem:[#allocation68_spill] sm:$0xff] }
 0x50a   :  { %v8433_v21 = vpop.permute.xlu0 %5478  ;;  %5673 = vrot.lane.b32.xlu1 %v5672_v16, %s6986_s22  ;;  %v13501_v16 = vld [vmem:[#allocation53_spill] sm:$0xff]  ;;  %v1601_v4 = vsel %vm239_vm5, %v5176_v58, %v5265_v1  ;;  %v1602_v24 = vsel %vm239_vm5, %v5265_v1, %v5266_v6  ;;  %v5275_v1 = vunpack.i.l.bf16 %v13504_v12 }
 0x50b   :  { %v5161_v59 = vunpack.i.h.bf16 %v13501_v16  ;;  %v5702_v11 = vpack.i.bf16 %v1602_v24, %v1601_v4  ;;  %v5276_v16 = vunpack.i.h.bf16 %v13504_v12  ;;  %v13507_v12 = vld [vmem:[#allocation66_spill] sm:$0xff] }
 0x50c   :  { %v8446_v20 = vpop.permute.xlu1 %5458  ;;  %v5285_v37 = vunpack.i.l.bf16 %v13507_v12 }
 0x50d   :  { %v1525_v40 = vsel %vm483_vm14, %v5161_v59, %v5255_v3  ;;  %v13505_v3 = vld [vmem:[#allocation65_spill] sm:$0xff] }
 0x50e   :  { %v5692_v2 = vpack.i.bf16 %v1526_v48, %v1525_v40  ;;  %v13052_v59 = vunpack.i.h.bf16 %v13505_v3  ;;  %v5280_v58 = vunpack.i.l.bf16 %v13505_v3  ;;  %v1737_v40 = vsel %vm562_vm15, %v5275_v1, %v5276_v16  ;;  %v13506_v48 = vld [vmem:[#allocation70_spill] sm:$0xff] }
 0x50f   :  { %5688 = vrot.lane.b32.xlu2 %v5687_v7, %s6986_s22  ;;  %v13043_v7 = vunpack.i.h.bf16 %v8086_v46  ;;  %v5712_v17 = vpack.i.bf16 %v1737_v40, %v5275_v1 }
 0x510   :  { %5698 = vrot.lane.b32.xlu0 %v5697_v61, %s6986_s22  ;;  %v5270_v61 = vunpack.i.l.bf16 %v8086_v46  ;;  %v1738_v24 = vsel %vm562_vm15, %v5276_v16, %v5280_v58 }
 0x511   :  { %v8456_v27 = vpop.permute.xlu2 %5533 }
 0x512   :  { %13503 = vst [vmem:[#allocation60_spill] sm:$0xff] %v8456_v27  ;;  %v8458_v45 = vpop.permute.xlu0 %5483  ;;  %5683 = vrot.lane.b32.xlu1 %v5682_v44, %s6986_s22  ;;  %v1603_v5 = vsel %vm239_vm5, %v5266_v6, %v5270_v61  ;;  %v1604_v52 = vsel %vm239_vm5, %v5270_v61, %v13043_v7  ;;  %v1739_v61 = vsel %vm562_vm15, %v5280_v58, %v13052_v59  ;;  %v5286_v7 = vunpack.i.h.bf16 %v13507_v12  ;;  %v13509_v58 = vld [vmem:[#allocation71_spill] sm:$0xff] }
 0x513   :  { %v5707_v4 = vpack.i.bf16 %v1604_v52, %v1603_v5  ;;  %v5717_v52 = vpack.i.bf16 %v1739_v61, %v1738_v24  ;;  %v5301_v59 = vunpack.i.h.bf16 %v13509_v58  ;;  %v5300_v1 = vunpack.i.l.bf16 %v13509_v58 }
 0x514   :  { %v8467_v13 = vpop.permute.xlu1 %5463  ;;  %v1813_v12 = vsel %vm592_vm2, %v5285_v37, %v5286_v7 }
 0x517   :  { %5693 = vrot.lane.b32.xlu2 %v5692_v2, %s6986_s22  ;;  %v5290_v2 = vunpack.i.l.bf16 %v13506_v48 }
 0x518   :  { %5703 = vrot.lane.b32.xlu0 %v5702_v11, %s6986_s22  ;;  %v13055_v11 = vunpack.i.h.bf16 %v13506_v48 }
 0x519   :  { %v8479_v44 = vpop.permute.xlu2 %5548  ;;  %v1814_v16 = vsel %vm592_vm2, %v5286_v7, %v5290_v2  ;;  %v13512_v7 = vld [vmem:[#allocation67_spill] sm:$0xff] }
 0x51a   :  { %v8481_v6 = vpop.permute.xlu0 %5493  ;;  %5708 = vrot.lane.b32.xlu1 %v5707_v4, %s6986_s22  ;;  %v1815_v19 = vsel %vm592_vm2, %v5290_v2, %v13055_v11  ;;  %v5296_v4 = vunpack.i.h.bf16 %v13508_v0  ;;  %v5295_v2 = vunpack.i.l.bf16 %v13508_v0  ;;  %v5311_v0 = vunpack.i.h.bf16 %v13512_v7 }
 0x51b   :  { %v5727_v61 = vpack.i.bf16 %v1815_v19, %v1814_v16  ;;  %v5305_v19 = vunpack.i.l.bf16 %v13511_v29  ;;  %v5310_v16 = vunpack.i.l.bf16 %v13512_v7  ;;  %v5330_v29 = vunpack.i.l.bf16 %v8258_v10 }
 0x51c   :  { %v8492_v5 = vpop.permute.xlu1 %5488  ;;  %v1890_v34 = vsel %vm622_vm4, %v5296_v4, %v5300_v1  ;;  %v1889_v58 = vsel %vm622_vm4, %v5295_v2, %v5296_v4 }
 0x51d   :  { %v1965_v4 = vsel %vm647_vm12, %v5305_v19, %v5306_v8 }
 0x51e   :  { %v5742_v7 = vpack.i.bf16 %v1965_v4, %v5305_v19  ;;  %v5385_v4 = vunpack.i.l.bf16 %v8308_v30 }
 0x51f   :  { %5713 = vrot.lane.b32.xlu2 %v5712_v17, %s6986_s22  ;;  %v5722_v17 = vpack.i.bf16 %v1813_v12, %v5285_v37  ;;  %v5331_v12 = vunpack.i.h.bf16 %v8258_v10 }
 0x520   :  { %5718 = vrot.lane.b32.xlu0 %v5717_v52, %s6986_s22  ;;  %v1891_v52 = vsel %vm622_vm4, %v5300_v1, %v5301_v59 }
 0x521   :  { %v8504_v40 = vpop.permute.xlu2 %5568  ;;  %v5737_v55 = vpack.i.bf16 %v1891_v52, %v1890_v34  ;;  %v1966_v34 = vsel %vm647_vm12, %v5306_v8, %v5310_v16  ;;  %v13513_v52 = vld [vmem:[#allocation72_spill] sm:$0xff]  ;;  %v1668_v8 = vsel %vm209_vm13, %v5330_v29, %v5331_v12 }
 0x522   :  { %13510 = vst [vmem:[#allocation61_spill] sm:$0xff] %v8504_v40  ;;  %v8506_v24 = vpop.permute.xlu0 %5518  ;;  %5728 = vrot.lane.b32.xlu1 %v5727_v61, %s6986_s22  ;;  %v5732_v61 = vpack.i.bf16 %v1889_v58, %v5295_v2  ;;  %v5336_v43 = vunpack.i.h.bf16 %v13513_v52 }
 0x524   :  { %v8513_v11 = vpop.permute.xlu1 %5498 }
 0x527   :  { %5738 = vrot.lane.b32.xlu2 %v5737_v55, %s6986_s22  ;;  %v1967_v55 = vsel %vm647_vm12, %v5310_v16, %v5311_v0 }
 0x528   :  { %5723 = vrot.lane.b32.xlu0 %v5722_v17, %s6986_s22  ;;  %v5335_v17 = vunpack.i.l.bf16 %v13513_v52  ;;  %v5747_v58 = vpack.i.bf16 %v1967_v55, %v1966_v34  ;;  %v13515_v55 = vunpack.i.h.bf16 %v8114_v57 }
 0x529   :  { %v8522_v1 = vpop.permute.xlu2 %5578 }
 0x52a   :  { %v8524_v37 = vpop.permute.xlu0 %5523  ;;  %5733 = vrot.lane.b32.xlu1 %v5732_v61, %s6986_s22  ;;  %v1669_v27 = vsel %vm209_vm13, %v5331_v12, %v5335_v17  ;;  %v1670_v19 = vsel %vm209_vm13, %v5335_v17, %v5336_v43  ;;  %v5752_v52 = vpack.i.bf16 %v5330_v29, %v13515_v55  ;;  %v13066_v12 = vunpack.i.h.bf16 %v8308_v30 }
 0x52b   :  { %v5757_v16 = vpack.i.bf16 %v1669_v27, %v1668_v8  ;;  %v5762_v34 = vpack.i.bf16 %v5336_v43, %v1670_v19  ;;  %v5415_v27 = vunpack.i.l.bf16 %v8324_v62  ;;  %v5400_v17 = vunpack.i.l.bf16 %v8355_v26 }
 0x52c   :  { %v8533_v2 = vpop.permute.xlu1 %5503  ;;  %v13063_v43 = vunpack.i.h.bf16 %v8324_v62  ;;  %v13064_v29 = vunpack.i.h.bf16 %v8355_v26  ;;  %v13517_v19 = vunpack.i.h.bf16 %v13506_v48  ;;  %v5430_v55 = vunpack.i.l.bf16 %v8366_v31 }
 0x52d   :  { %v5341_v48 = vunpack.i.h.bf16 %v8279_v53 }
 0x52f   :  { %5743 = vrot.lane.b32.xlu2 %v5742_v7, %s6986_s22  ;;  %v13516_v7 = vunpack.i.h.bf16 %v13505_v3 }
 0x530   :  { %5748 = vrot.lane.b32.xlu0 %v5747_v58, %s6986_s22 }
 0x531   :  { %v8540_v10 = vpop.permute.xlu2 %5588  ;;  %v1740_v25 = vsel %vm562_vm15, %v13516_v7, %v5385_v4  ;;  %v1816_v4 = vsel %vm592_vm2, %v13517_v19, %v5400_v17  ;;  %v1968_v17 = vsel %vm647_vm12, %v5311_v0, %v5430_v55 }
 0x532   :  { %v8542_v61 = vpop.permute.xlu0 %5538  ;;  %5758 = vrot.lane.b32.xlu1 %v5757_v16, %s6986_s22  ;;  %v5767_v57 = vpack.i.bf16 %v13066_v12, %v1740_v25  ;;  %v1892_v16 = vsel %vm622_vm4, %v5301_v59, %v5415_v27  ;;  %v5350_v59 = vunpack.i.l.bf16 %v8251_v60  ;;  %v5340_v27 = vunpack.i.l.bf16 %v8279_v53 }
 0x533   :  { %13514 = vst [vmem:[#allocation62_spill] sm:$0xff] %v8542_v61  ;;  %v5777_v25 = vpack.i.bf16 %v13063_v43, %v1892_v16  ;;  %v5345_v53 = vunpack.i.l.bf16 %v8223_v9 }
 0x534   :  { %v8550_v58 = vpop.permute.xlu1 %5528 }
 0x535   :  { %v1454_v12 = vsel %vm299_vm8, %v5341_v48, %v5345_v53 }
 0x537   :  { %5763 = vrot.lane.b32.xlu2 %v5762_v34, %s6986_s22  ;;  %v5772_v34 = vpack.i.bf16 %v13064_v29, %v1816_v4  ;;  %v1453_v29 = vsel %vm299_vm8, %v5340_v27, %v5341_v48 }
 0x538   :  { %5753 = vrot.lane.b32.xlu0 %v5752_v52, %s6986_s22  ;;  %v13065_v52 = vunpack.i.h.bf16 %v8366_v31 }
 0x539   :  { %v8563_v8 = vpop.permute.xlu2 %5603 }
 0x53a   :  { %v8565_v3 = vpop.permute.xlu0 %5553  ;;  %5768 = vrot.lane.b32.xlu1 %v5767_v57, %s6986_s22  ;;  %v5346_v57 = vunpack.i.h.bf16 %v8223_v9  ;;  %v5782_v16 = vpack.i.bf16 %v13065_v52, %v1968_v17  ;;  %v5361_v17 = vunpack.i.h.bf16 %v8270_v28  ;;  %v5360_v52 = vunpack.i.l.bf16 %v8270_v28 }
 0x53c   :  { %v8578_v7 = vpop.permute.xlu1 %5543  ;;  %v1456_v43 = vsel %vm299_vm8, %v5346_v57, %v5350_v59  ;;  %v1455_v9 = vsel %vm299_vm8, %v5345_v53, %v5346_v57  ;;  %v1531_v48 = vsel %vm483_vm14, %v5360_v52, %v5361_v17 }
 0x53d   :  { %13518 = vst [vmem:[#allocation63_spill] sm:$0xff] %v8578_v7  ;;  %v5797_v0 = vpack.i.bf16 %v5350_v59, %v1456_v43  ;;  %v5365_v7 = vunpack.i.l.bf16 %v8297_v23  ;;  %v5356_v43 = vunpack.i.h.bf16 %v8249_v14  ;;  %v5355_v59 = vunpack.i.l.bf16 %v8249_v14 }
 0x53e   :  { %v5792_v27 = vpack.i.bf16 %v1455_v9, %v1454_v12  ;;  %v5371_v14 = vunpack.i.h.bf16 %v8290_v54  ;;  %v5376_v12 = vunpack.i.h.bf16 %v8317_v22  ;;  %v5375_v9 = vunpack.i.l.bf16 %v8317_v22 }
 0x53f   :  { %5773 = vrot.lane.b32.xlu2 %v5772_v34, %s6986_s22  ;;  %v1530_v28 = vsel %vm483_vm14, %v5356_v43, %v5360_v52  ;;  %v5380_v22 = vunpack.i.l.bf16 %v8267_v63 }
 0x540   :  { %5778 = vrot.lane.b32.xlu0 %v5777_v25, %s6986_s22  ;;  %v13519_v25 = vunpack.i.h.bf16 %v8131_v42 }
 0x541   :  { %v8589_v19 = vpop.permute.xlu2 %5628 }
 0x542   :  { %v8591_v4 = vpop.permute.xlu0 %5558  ;;  %5783 = vrot.lane.b32.xlu1 %v5782_v16, %s6986_s22  ;;  %v5787_v34 = vpack.i.bf16 %v1453_v29, %v13519_v25  ;;  %v1532_v16 = vsel %vm483_vm14, %v5361_v17, %v5365_v7  ;;  %v5807_v25 = vpack.i.bf16 %v1531_v48, %v1530_v28 }
 0x543   :  { %v5812_v57 = vpack.i.bf16 %v5365_v7, %v1532_v16  ;;  %v13521_v7 = vunpack.i.h.bf16 %v8123_v39  ;;  %v13523_v16 = vunpack.i.h.bf16 %v8086_v46  ;;  %v5391_v39 = vunpack.i.h.bf16 %v8336_v36 }
 0x544   :  { %v8597_v55 = vpop.permute.xlu1 %5563 }
 0x547   :  { %5798 = vrot.lane.b32.xlu2 %v5797_v0, %s6986_s22  ;;  %v1529_v0 = vsel %vm483_vm14, %v5355_v59, %v5356_v43 }
 0x548   :  { %5788 = vrot.lane.b32.xlu0 %v5787_v34, %s6986_s22  ;;  %v5370_v34 = vunpack.i.l.bf16 %v8290_v54  ;;  %v5802_v43 = vpack.i.bf16 %v1529_v0, %v13521_v7  ;;  %v1607_v54 = vsel %vm239_vm5, %v5375_v9, %v5376_v12  ;;  %v5390_v0 = vunpack.i.l.bf16 %v8336_v36 }
 0x549   :  { %v8610_v42 = vpop.permute.xlu2 %5638  ;;  %v13524_v36 = vunpack.i.h.bf16 %v8308_v30  ;;  %v5426_v30 = vunpack.i.h.bf16 %v8373_v32 }
 0x54a   :  { %v8612_v29 = vpop.permute.xlu0 %5583  ;;  %5793 = vrot.lane.b32.xlu1 %v5792_v27, %s6986_s22  ;;  %v1605_v59 = vsel %vm239_vm5, %v5370_v34, %v5371_v14  ;;  %v1606_v27 = vsel %vm239_vm5, %v5371_v14, %v5375_v9  ;;  %v5396_v14 = vunpack.i.h.bf16 %v8288_v33  ;;  %v5395_v34 = vunpack.i.l.bf16 %v8288_v33 }
 0x54b   :  { %13520 = vst [vmem:[#allocation64_spill] sm:$0xff] %v8612_v29  ;;  %v5822_v48 = vpack.i.bf16 %v1607_v54, %v1606_v27  ;;  %v5411_v9 = vunpack.i.h.bf16 %v8327_v35  ;;  %v1741_v27 = vsel %vm562_vm15, %v13524_v36, %v5390_v0  ;;  %v1742_v54 = vsel %vm562_vm15, %v5390_v0, %v5391_v39 }
 0x54c   :  { %v8619_v53 = vpop.permute.xlu1 %5573  ;;  %v1744_v33 = vsel %vm562_vm15, %v5395_v34, %v5396_v14  ;;  %v5425_v36 = vunpack.i.l.bf16 %v8373_v32  ;;  %v5421_v0 = vunpack.i.h.bf16 %v8346_v41 }
 0x54e   :  { %v1895_v32 = vsel %vm622_vm4, %v5421_v0, %v5425_v36 }
 0x54f   :  { %5808 = vrot.lane.b32.xlu2 %v5807_v25, %s6986_s22  ;;  %v1608_v25 = vsel %vm239_vm5, %v5376_v12, %v5380_v22  ;;  %v5410_v12 = vunpack.i.l.bf16 %v8327_v35 }
 0x550   :  { %5813 = vrot.lane.b32.xlu0 %v5812_v57, %s6986_s22  ;;  %v5817_v57 = vpack.i.bf16 %v1605_v59, %v13523_v16  ;;  %v1743_v59 = vsel %vm562_vm15, %v5391_v39, %v5395_v34  ;;  %v5405_v39 = vunpack.i.l.bf16 %v8305_v51 }
 0x551   :  { %v8627_v52 = vpop.permute.xlu2 %5648 }
 0x552   :  { %v8629_v17 = vpop.permute.xlu0 %5593  ;;  %5803 = vrot.lane.b32.xlu1 %v5802_v43, %s6986_s22  ;;  %v5827_v43 = vpack.i.bf16 %v5380_v22, %v1608_v25  ;;  %v5832_v22 = vpack.i.bf16 %v1742_v54, %v1741_v27  ;;  %v1820_v25 = vsel %vm592_vm2, %v5410_v12, %v5411_v9  ;;  %v13526_v9 = vunpack.i.h.bf16 %v8355_v26 }
 0x553   :  { %v1896_v27 = vsel %vm622_vm4, %v5425_v36, %v5426_v30  ;;  %v5436_v54 = vunpack.i.h.bf16 %v8395_v38  ;;  %v5440_v30 = vunpack.i.l.bf16 %v8343_v47 }
 0x554   :  { %v8638_v28 = vpop.permute.xlu1 %5598 }
 0x555   :  { %13522 = vst [vmem:[#allocation52_spill] sm:$0xff] %v8638_v28  ;;  %v1971_v36 = vsel %vm647_vm12, %v5436_v54, %v5440_v30 }
 0x557   :  { %5818 = vrot.lane.b32.xlu2 %v5817_v57, %s6986_s22  ;;  %v5837_v57 = vpack.i.bf16 %v1744_v33, %v1743_v59  ;;  %v5420_v59 = vunpack.i.l.bf16 %v8346_v41  ;;  %v13527_v41 = vunpack.i.h.bf16 %v8324_v62 }
 0x558   :  { %5823 = vrot.lane.b32.xlu0 %v5822_v48, %s6986_s22  ;;  %v5406_v48 = vunpack.i.h.bf16 %v8305_v51 }
 0x559   :  { %v8650_v7 = vpop.permute.xlu2 %5663  ;;  %v1893_v26 = vsel %vm622_vm4, %v13527_v41, %v5420_v59 }
 0x55a   :  { %v8652_v46 = vpop.permute.xlu0 %5608  ;;  %5828 = vrot.lane.b32.xlu1 %v5827_v43, %s6986_s22  ;;  %v1819_v35 = vsel %vm592_vm2, %v5406_v48, %v5410_v12  ;;  %v1817_v12 = vsel %vm592_vm2, %v13526_v9, %v5405_v39  ;;  %v1818_v51 = vsel %vm592_vm2, %v5405_v39, %v5406_v48  ;;  %v5441_v48 = vunpack.i.h.bf16 %v8343_v47 }
 0x55b   :  { %v5847_v34 = vpack.i.bf16 %v1820_v25, %v1819_v35  ;;  %v1894_v35 = vsel %vm622_vm4, %v5420_v59, %v5421_v0  ;;  %v5435_v25 = vunpack.i.l.bf16 %v8395_v38  ;;  %v13528_v9 = vunpack.i.h.bf16 %v8366_v31 }
 0x55c   :  { %v8663_v16 = vpop.permute.xlu1 %5613  ;;  %v13073_v59 = vunpack.i.h.bf16 %v8446_v20  ;;  %v1972_v47 = vsel %vm647_vm12, %v5440_v30, %v5441_v48 }
 0x55d   :  { %v1969_v0 = vsel %vm647_vm12, %v13528_v9, %v5435_v25  ;;  %v1970_v38 = vsel %vm647_vm12, %v5435_v25, %v5436_v54  ;;  %v5480_v54 = vunpack.i.l.bf16 %v8433_v21  ;;  %v5466_v9 = vunpack.i.h.bf16 %v8467_v13 }
 0x55e   :  { %v5862_v31 = vpack.i.bf16 %v1970_v38, %v1969_v0  ;;  %v13070_v0 = vunpack.i.h.bf16 %v8364_v50  ;;  %v5470_v38 = vunpack.i.l.bf16 %v8364_v50 }
 0x55f   :  { %5833 = vrot.lane.b32.xlu2 %v5832_v22, %s6986_s22  ;;  %v5857_v22 = vpack.i.bf16 %v1896_v27, %v1895_v32  ;;  %v5456_v32 = vunpack.i.h.bf16 %v8407_v18  ;;  %v5455_v27 = vunpack.i.l.bf16 %v8407_v18  ;;  %v5476_v18 = vunpack.i.h.bf16 %v8383_v15 }
 0x560   :  { %5838 = vrot.lane.b32.xlu0 %v5837_v57, %s6986_s22  ;;  %v5842_v57 = vpack.i.bf16 %v1818_v51, %v1817_v12  ;;  %v5460_v12 = vunpack.i.l.bf16 %v8446_v20 }
 0x561   :  { %v8675_v43 = vpop.permute.xlu2 %5678  ;;  %v1671_v48 = vsel %vm209_vm13, %v5455_v27, %v5456_v32 }
 0x562   :  { %v8673_v14 = vpop.permute.xlu0 %5618  ;;  %13525 = vst [vmem:[#allocation53_spill] sm:$0xff] %v8675_v43  ;;  %5848 = vrot.lane.b32.xlu1 %v5847_v34, %s6986_s22  ;;  %v5852_v34 = vpack.i.bf16 %v1894_v35, %v1893_v26  ;;  %v1672_v41 = vsel %vm209_vm13, %v5456_v32, %v5460_v12  ;;  %v1673_v26 = vsel %vm209_vm13, %v5460_v12, %v13073_v59  ;;  %v5486_v32 = vunpack.i.h.bf16 %v8458_v45 }
 0x563   :  { %v5877_v25 = vpack.i.bf16 %v1673_v26, %v1672_v41  ;;  %v5872_v12 = vpack.i.bf16 %v1671_v48, %v5455_v27  ;;  %v1459_v41 = vsel %vm299_vm8, %v5466_v9, %v5470_v38  ;;  %v5351_v26 = vunpack.i.h.bf16 %v8251_v60 }
 0x564   :  { %v8686_v33 = vpop.permute.xlu1 %5623  ;;  %v1460_v27 = vsel %vm299_vm8, %v5470_v38, %v13070_v0  ;;  %v5475_v48 = vunpack.i.l.bf16 %v8383_v15 }
 0x566   :  { %v1534_v15 = vsel %vm483_vm14, %v5475_v48, %v5476_v18 }
 0x567   :  { %5858 = vrot.lane.b32.xlu2 %v5857_v22, %s6986_s22  ;;  %v13068_v22 = vunpack.i.h.bf16 %v8433_v21 }
 0x568   :  { %5843 = vrot.lane.b32.xlu0 %v5842_v57, %s6986_s22  ;;  %v5867_v57 = vpack.i.bf16 %v1972_v47, %v1971_v36  ;;  %v1535_v36 = vsel %vm483_vm14, %v5476_v18, %v5480_v54  ;;  %v5495_v18 = vunpack.i.l.bf16 %v8481_v6 }
 0x569   :  { %v8700_v62 = vpop.permute.xlu2 %5688 }
 0x56a   :  { %v8698_v39 = vpop.permute.xlu0 %5643  ;;  %5853 = vrot.lane.b32.xlu1 %v5852_v34, %s6986_s22  ;;  %v1536_v34 = vsel %vm483_vm14, %v5480_v54, %v13068_v22  ;;  %v5465_v54 = vunpack.i.l.bf16 %v8467_v13 }
 0x56c   :  { %v8712_v51 = vpop.permute.xlu1 %5633  ;;  %v1458_v60 = vsel %vm299_vm8, %v5465_v54, %v5466_v9  ;;  %v5500_v9 = vunpack.i.l.bf16 %v8513_v11 }
 0x56f   :  { %5863 = vrot.lane.b32.xlu2 %v5862_v31, %s6986_s22  ;;  %v5485_v31 = vunpack.i.l.bf16 %v8458_v45  ;;  %v5887_v45 = vpack.i.bf16 %v1460_v27, %v1459_v41 }
 0x570   :  { %5868 = vrot.lane.b32.xlu0 %v5867_v57, %s6986_s22  ;;  %v5897_v57 = vpack.i.bf16 %v1536_v34, %v1535_v36 }
 0x571   :  { %v8725_v30 = vpop.permute.xlu2 %5693 }
 0x572   :  { %v8723_v35 = vpop.permute.xlu0 %5653  ;;  %5878 = vrot.lane.b32.xlu1 %v5877_v25, %s6986_s22  ;;  %v5381_v25 = vunpack.i.h.bf16 %v8267_v63  ;;  %v5366_v63 = vunpack.i.h.bf16 %v8297_v23  ;;  %v5496_v23 = vunpack.i.h.bf16 %v8481_v6 }
 0x574   :  { %v8736_v47 = vpop.permute.xlu1 %5658  ;;  %v1609_v13 = vsel %vm239_vm5, %v5381_v25, %v5485_v31  ;;  %v1533_v38 = vsel %vm483_vm14, %v5366_v63, %v5475_v48  ;;  %v13069_v25 = vunpack.i.h.bf16 %v8492_v5 }
 0x577   :  { %5898 = vrot.lane.b32.xlu2 %v5897_v57, %s6986_s22  ;;  %v1457_v57 = vsel %vm299_vm8, %v5351_v26, %v5465_v54  ;;  %v13072_v26 = vunpack.i.h.bf16 %v8513_v11  ;;  %v5892_v54 = vpack.i.bf16 %v1534_v15, %v1533_v38  ;;  %v1745_v15 = vsel %vm562_vm15, %v5495_v18, %v5496_v23 }
 0x578   :  { %5873 = vrot.lane.b32.xlu0 %v5872_v12, %s6986_s22  ;;  %v1610_v12 = vsel %vm239_vm5, %v5485_v31, %v5486_v32  ;;  %v5882_v41 = vpack.i.bf16 %v1458_v60, %v1457_v57  ;;  %v5490_v31 = vunpack.i.l.bf16 %v8492_v5  ;;  %v1746_v57 = vsel %vm562_vm15, %v5496_v23, %v5500_v9 }
 0x579   :  { %v8752_v34 = vpop.permute.xlu2 %5713  ;;  %v5902_v27 = vpack.i.bf16 %v1610_v12, %v1609_v13  ;;  %v1747_v60 = vsel %vm562_vm15, %v5500_v9, %v13072_v26  ;;  %v5912_v9 = vpack.i.bf16 %v1745_v15, %v5495_v18  ;;  %v5520_v23 = vunpack.i.l.bf16 %v8506_v24 }
 0x57a   :  { %v8750_v36 = vpop.permute.xlu0 %5668  ;;  %5888 = vrot.lane.b32.xlu1 %v5887_v45, %s6986_s22  ;;  %v1611_v13 = vsel %vm239_vm5, %v5486_v32, %v5490_v31  ;;  %v1612_v12 = vsel %vm239_vm5, %v5490_v31, %v13069_v25  ;;  %v5917_v38 = vpack.i.bf16 %v1747_v60, %v1746_v57  ;;  %v5506_v32 = vunpack.i.h.bf16 %v8533_v2 }
 0x57b   :  { %13529 = vst [vmem:[#allocation57_spill] sm:$0xff] %v8750_v36  ;;  %v5907_v63 = vpack.i.bf16 %v1612_v12, %v1611_v13  ;;  %v5510_v31 = vunpack.i.l.bf16 %v8404_v56  ;;  %v5521_v13 = vunpack.i.h.bf16 %v8506_v24  ;;  %v5516_v18 = vunpack.i.h.bf16 %v8431_v49 }
 0x57c   :  { %v8762_v22 = vpop.permute.xlu1 %5673  ;;  %v5515_v60 = vunpack.i.l.bf16 %v8431_v49  ;;  %v5555_v26 = vunpack.i.l.bf16 %v8565_v3 }
 0x57d   :  { %13530 = vst [vmem:[#allocation68_spill] sm:$0xff] %v8762_v22  ;;  %v1822_v12 = vsel %vm592_vm2, %v5506_v32, %v5510_v31  ;;  %v1898_v24 = vsel %vm622_vm4, %v5516_v18, %v5520_v23  ;;  %v1899_v0 = vsel %vm622_vm4, %v5520_v23, %v5521_v13 }
 0x57f   :  { %5903 = vrot.lane.b32.xlu2 %v5902_v27, %s6986_s22  ;;  %v13071_v27 = vunpack.i.h.bf16 %v8404_v56 }
 0x580   :  { %5883 = vrot.lane.b32.xlu0 %v5882_v41, %s6986_s22  ;;  %v5505_v41 = vunpack.i.l.bf16 %v8533_v2 }
 0x581   :  { %v8774_v45 = vpop.permute.xlu2 %5738  ;;  %v1823_v57 = vsel %vm592_vm2, %v5510_v31, %v13071_v27  ;;  %v5526_v31 = vunpack.i.h.bf16 %v8524_v37  ;;  %v5937_v27 = vpack.i.bf16 %v1899_v0, %v1898_v24 }
 0x582   :  { %v8772_v48 = vpop.permute.xlu0 %5698  ;;  %5893 = vrot.lane.b32.xlu1 %v5892_v54, %s6986_s22  ;;  %v1821_v2 = vsel %vm592_vm2, %v5505_v41, %v5506_v32  ;;  %v5927_v15 = vpack.i.bf16 %v1823_v57, %v1822_v12  ;;  %v5531_v32 = vunpack.i.h.bf16 %v8550_v58  ;;  %v1897_v12 = vsel %vm622_vm4, %v5515_v60, %v5516_v18 }
 0x583   :  { %13531 = vst [vmem:[#allocation65_spill] sm:$0xff] %v8772_v48  ;;  %v5550_v18 = vunpack.i.l.bf16 %v8479_v44 }
 0x584   :  { %v8785_v6 = vpop.permute.xlu1 %5683 }
 0x587   :  { %5918 = vrot.lane.b32.xlu2 %v5917_v38, %s6986_s22 }
 0x588   :  { %5908 = vrot.lane.b32.xlu0 %v5907_v63, %s6986_s22  ;;  %v5922_v63 = vpack.i.bf16 %v1821_v2, %v5505_v41  ;;  %v5525_v2 = vunpack.i.l.bf16 %v8524_v37  ;;  %v5551_v37 = vunpack.i.h.bf16 %v8479_v44  ;;  %v5605_v44 = vunpack.i.l.bf16 %v8563_v8 }
 0x589   :  { %v8796_v25 = vpop.permute.xlu2 %5743 }
 0x58a   :  { %v8794_v54 = vpop.permute.xlu0 %5703  ;;  %5913 = vrot.lane.b32.xlu1 %v5912_v9, %s6986_s22  ;;  %v5530_v9 = vunpack.i.l.bf16 %v8550_v58  ;;  %v1973_v24 = vsel %vm647_vm12, %v5525_v2, %v5526_v31  ;;  %v5585_v58 = vunpack.i.l.bf16 %v8612_v29  ;;  %v5575_v29 = vunpack.i.l.bf16 %v8619_v53 }
 0x58b   :  { %v5942_v59 = vpack.i.bf16 %v1973_v24, %v5525_v2  ;;  %v5635_v24 = vunpack.i.l.bf16 %v8712_v51 }
 0x58c   :  { %v8808_v38 = vpop.permute.xlu1 %5708  ;;  %v1974_v23 = vsel %vm647_vm12, %v5526_v31, %v5530_v9  ;;  %v1975_v57 = vsel %vm647_vm12, %v5530_v9, %v5531_v32  ;;  %v1674_v31 = vsel %vm209_vm13, %v5550_v18, %v5551_v37 }
 0x58d   :  { %v5947_v0 = vpack.i.bf16 %v1975_v57, %v1974_v23  ;;  %v13534_v23 = vunpack.i.h.bf16 %v8446_v20 }
 0x58f   :  { %5923 = vrot.lane.b32.xlu2 %v5922_v63, %s6986_s22  ;;  %v5932_v63 = vpack.i.bf16 %v1897_v12, %v5515_v60  ;;  %v5556_v60 = vunpack.i.h.bf16 %v8565_v3  ;;  %v1675_v12 = vsel %vm209_vm13, %v5551_v37, %v5555_v26  ;;  %v5952_v57 = vpack.i.bf16 %v5550_v18, %v13534_v23 }
 0x590   :  { %5928 = vrot.lane.b32.xlu0 %v5927_v15, %s6986_s22  ;;  %v13075_v3 = vunpack.i.h.bf16 %v8563_v8  ;;  %v13074_v37 = vunpack.i.h.bf16 %v8712_v51  ;;  %v1900_v23 = vsel %vm622_vm4, %v5521_v13, %v5635_v24  ;;  %v13539_v13 = vunpack.i.h.bf16 %v8404_v56 }
 0x591   :  { %v8819_v41 = vpop.permute.xlu2 %5763  ;;  %v1676_v2 = vsel %vm209_vm13, %v5555_v26, %v5556_v60  ;;  %v5620_v26 = vunpack.i.l.bf16 %v8673_v14 }
 0x592   :  { %v8817_v49 = vpop.permute.xlu0 %5718  ;;  %13533 = vst [vmem:[#allocation66_spill] sm:$0xff] %v8819_v41  ;;  %5938 = vrot.lane.b32.xlu1 %v5937_v27, %s6986_s22 }
 0x593   :  { %13532 = vst [vmem:[#allocation70_spill] sm:$0xff] %v8817_v49  ;;  %v1824_v24 = vsel %vm592_vm2, %v13539_v13, %v5620_v26  ;;  %v5570_v26 = vunpack.i.l.bf16 %v8504_v40  ;;  %v13542_v13 = vunpack.i.h.bf16 %v8364_v50 }
 0x594   :  { %v8828_v15 = vpop.permute.xlu1 %5728 }
 0x597   :  { %5948 = vrot.lane.b32.xlu2 %v5947_v0, %s6986_s22  ;;  %v5957_v0 = vpack.i.bf16 %v1675_v12, %v1674_v31  ;;  %v13537_v12 = vunpack.i.h.bf16 %v8513_v11  ;;  %v5561_v11 = vunpack.i.h.bf16 %v8591_v4 }
 0x598   :  { %5933 = vrot.lane.b32.xlu0 %v5932_v63, %s6986_s22 }
 0x599   :  { %v8838_v27 = vpop.permute.xlu2 %5773  ;;  %v1748_v31 = vsel %vm562_vm15, %v13537_v12, %v5605_v44  ;;  %v5560_v44 = vunpack.i.l.bf16 %v8591_v4  ;;  %v5650_v12 = vunpack.i.l.bf16 %v8627_v52 }
 0x59a   :  { %v8836_v9 = vpop.permute.xlu0 %5723  ;;  %5943 = vrot.lane.b32.xlu1 %v5942_v59, %s6986_s22  ;;  %v5962_v59 = vpack.i.bf16 %v5556_v60, %v1676_v2  ;;  %v13076_v60 = vunpack.i.h.bf16 %v8673_v14 }
 0x59b   :  { %v1461_v4 = vsel %vm299_vm8, %v5560_v44, %v5561_v11  ;;  %v1976_v56 = vsel %vm647_vm12, %v5531_v32, %v5650_v12  ;;  %v5565_v44 = vunpack.i.l.bf16 %v8597_v55  ;;  %v5581_v32 = vunpack.i.h.bf16 %v8522_v1 }
 0x59c   :  { %v8846_v63 = vpop.permute.xlu1 %5733 }
 0x59d   :  { %v1462_v50 = vsel %vm299_vm8, %v5561_v11, %v5565_v44  ;;  %v5596_v11 = vunpack.i.h.bf16 %v8629_v17 }
 0x59f   :  { %5953 = vrot.lane.b32.xlu2 %v5952_v57, %s6986_s22  ;;  %v5967_v57 = vpack.i.bf16 %v13075_v3, %v1748_v31  ;;  %v5972_v31 = vpack.i.bf16 %v13076_v60, %v1824_v24  ;;  %v5566_v3 = vunpack.i.h.bf16 %v8597_v55  ;;  %v5987_v24 = vpack.i.bf16 %v1461_v4, %v13542_v13 }
 0x5a0   :  { %5958 = vrot.lane.b32.xlu0 %v5957_v0, %s6986_s22  ;;  %v5977_v0 = vpack.i.bf16 %v13074_v37, %v1900_v23  ;;  %v1540_v55 = vsel %vm483_vm14, %v5581_v32, %v5585_v58  ;;  %v5576_v13 = vunpack.i.h.bf16 %v8619_v53 }
 0x5a1   :  { %v8857_v18 = vpop.permute.xlu2 %5798  ;;  %v1464_v60 = vsel %vm299_vm8, %v5566_v3, %v5570_v26  ;;  %v1463_v4 = vsel %vm299_vm8, %v5565_v44, %v5566_v3  ;;  %v5595_v3 = vunpack.i.l.bf16 %v8629_v17 }
 0x5a2   :  { %v8855_v20 = vpop.permute.xlu0 %5748  ;;  %13536 = vst [vmem:[#allocation71_spill] sm:$0xff] %v8857_v18  ;;  %5963 = vrot.lane.b32.xlu1 %v5962_v59, %s6986_s22  ;;  %v13077_v59 = vunpack.i.h.bf16 %v8627_v52  ;;  %v5997_v12 = vpack.i.bf16 %v5570_v26, %v1464_v60  ;;  %v5992_v60 = vpack.i.bf16 %v1463_v4, %v1462_v50  ;;  %v5590_v4 = vunpack.i.l.bf16 %v8540_v10 }
 0x5a3   :  { %13535 = vst [vmem:[#allocation73_spill] sm:$0xff] %v8855_v20  ;;  %v1537_v53 = vsel %vm483_vm14, %v5575_v29, %v5576_v13  ;;  %v1615_v17 = vsel %vm239_vm5, %v5595_v3, %v5596_v11  ;;  %v5615_v29 = vunpack.i.l.bf16 %v8663_v16 }
 0x5a4   :  { %v8870_v2 = vpop.permute.xlu1 %5758 }
 0x5a5   :  { %13538 = vst [vmem:[#allocation74_spill] sm:$0xff] %v8870_v2  ;;  %v5706_v2 = vunpack.i.h.bf16 %v8794_v54 }
 0x5a7   :  { %5978 = vrot.lane.b32.xlu2 %v5977_v0, %s6986_s22 }
 0x5a8   :  { %5968 = vrot.lane.b32.xlu0 %v5967_v57, %s6986_s22  ;;  %v5982_v57 = vpack.i.bf16 %v13077_v59, %v1976_v56 }
 0x5a9   :  { %v8885_v37 = vpop.permute.xlu2 %5808 }
 0x5aa   :  { %v8883_v23 = vpop.permute.xlu0 %5753  ;;  %5973 = vrot.lane.b32.xlu1 %v5972_v31, %s6986_s22 }
 0x5ab   :  { %13540 = vst [vmem:[#allocation67_spill] sm:$0xff] %v8883_v23 }
 0x5ac   :  { %v8896_v0 = vpop.permute.xlu1 %5768 }
 0x5ad   :  { %13541 = vst [vmem:[#allocation72_spill] sm:$0xff] %v8896_v0 }
 0x5af   :  { %5988 = vrot.lane.b32.xlu2 %v5987_v24, %s6986_s22  ;;  %v6012_v24 = vpack.i.bf16 %v5585_v58, %v1540_v55 }
 0x5b0   :  { %5983 = vrot.lane.b32.xlu0 %v5982_v57, %s6986_s22  ;;  %v5580_v57 = vunpack.i.l.bf16 %v8522_v1  ;;  %v5591_v1 = vunpack.i.h.bf16 %v8540_v10  ;;  %v5616_v10 = vunpack.i.h.bf16 %v8663_v16 }
 0x5b1   :  { %v8908_v56 = vpop.permute.xlu2 %5818 }
 0x5b2   :  { %v8906_v31 = vpop.permute.xlu0 %5778  ;;  %13544 = vst [vmem:[#allocation78_spill] sm:$0xff] %v8908_v56  ;;  %5998 = vrot.lane.b32.xlu1 %v5997_v12, %s6986_s22  ;;  %v1538_v26 = vsel %vm483_vm14, %v5576_v13, %v5580_v57  ;;  %v1539_v44 = vsel %vm483_vm14, %v5580_v57, %v5581_v32  ;;  %v1614_v55 = vsel %vm239_vm5, %v5591_v1, %v5595_v3  ;;  %v13547_v32 = vunpack.i.h.bf16 %v8433_v21 }
 0x5b3   :  { %13543 = vst [vmem:[#allocation77_spill] sm:$0xff] %v8906_v31  ;;  %v6007_v58 = vpack.i.bf16 %v1539_v44, %v1538_v26  ;;  %v1613_v26 = vsel %vm239_vm5, %v5590_v4, %v5591_v1  ;;  %v5600_v44 = vunpack.i.l.bf16 %v8638_v28  ;;  %v5611_v13 = vunpack.i.h.bf16 %v8652_v46 }
 0x5b4   :  { %v8916_v59 = vpop.permute.xlu1 %5783  ;;  %v6002_v57 = vpack.i.bf16 %v1537_v53, %v13547_v32  ;;  %v13548_v3 = vunpack.i.h.bf16 %v8492_v5  ;;  %v5610_v4 = vunpack.i.l.bf16 %v8652_v46  ;;  %v1752_v16 = vsel %vm562_vm15, %v5615_v29, %v5616_v10 }
 0x5b5   :  { %v1616_v1 = vsel %vm239_vm5, %v5596_v11, %v5600_v44  ;;  %v5626_v32 = vunpack.i.h.bf16 %v8686_v33  ;;  %v5625_v46 = vunpack.i.l.bf16 %v8686_v33 }
 0x5b6   :  { %v1750_v11 = vsel %vm562_vm15, %v5610_v4, %v5611_v13 }
 0x5b7   :  { %6013 = vrot.lane.b32.xlu2 %v6012_v24, %s6986_s22  ;;  %v1826_v33 = vsel %vm592_vm2, %v5625_v46, %v5626_v32 }
 0x5b8   :  { %5993 = vrot.lane.b32.xlu0 %v5992_v60, %s6986_s22  ;;  %v6022_v60 = vpack.i.bf16 %v1615_v17, %v1614_v55  ;;  %v1751_v55 = vsel %vm562_vm15, %v5611_v13, %v5615_v29  ;;  %v6027_v17 = vpack.i.bf16 %v5600_v44, %v1616_v1  ;;  %v5631_v44 = vunpack.i.h.bf16 %v8589_v19 }
 0x5b9   :  { %v8928_v50 = vpop.permute.xlu2 %5833  ;;  %v6037_v5 = vpack.i.bf16 %v1752_v16, %v1751_v55  ;;  %v13552_v1 = vunpack.i.h.bf16 %v8673_v14  ;;  %v5645_v55 = vunpack.i.l.bf16 %v8698_v39  ;;  %v5641_v16 = vunpack.i.h.bf16 %v8610_v42 }
 0x5ba   :  { %v8926_v12 = vpop.permute.xlu0 %5788  ;;  %13546 = vst [vmem:[#allocation80_spill] sm:$0xff] %v8928_v50  ;;  %6008 = vrot.lane.b32.xlu1 %v6007_v58, %s6986_s22  ;;  %v6017_v58 = vpack.i.bf16 %v1613_v26, %v13548_v3  ;;  %v5630_v3 = vunpack.i.l.bf16 %v8589_v19 }
 0x5bb   :  { %13545 = vst [vmem:[#allocation79_spill] sm:$0xff] %v8926_v12  ;;  %v1825_v13 = vsel %vm592_vm2, %v13552_v1, %v5625_v46  ;;  %v1903_v14 = vsel %vm622_vm4, %v5641_v16, %v5645_v55  ;;  %v5656_v46 = vunpack.i.h.bf16 %v8723_v35 }
 0x5bc   :  { %v8935_v24 = vpop.permute.xlu1 %5793  ;;  %v1827_v10 = vsel %vm592_vm2, %v5626_v32, %v5630_v3  ;;  %v1828_v19 = vsel %vm592_vm2, %v5630_v3, %v5631_v44  ;;  %v5661_v32 = vunpack.i.h.bf16 %v8736_v47 }
 0x5bd   :  { %v13118_v49 = vunpack.i.h.bf16 %v8935_v24 }
 0x5bf   :  { %6023 = vrot.lane.b32.xlu2 %v6022_v60, %s6986_s22  ;;  %v13551_v60 = vunpack.i.h.bf16 %v8563_v8 }
 0x5c0   :  { %6003 = vrot.lane.b32.xlu0 %v6002_v57, %s6986_s22 }
 0x5c1   :  { %v8950_v53 = vpop.permute.xlu2 %5858  ;;  %v1749_v26 = vsel %vm562_vm15, %v13551_v60, %v5610_v4  ;;  %v5646_v4 = vunpack.i.h.bf16 %v8698_v39  ;;  %v6042_v60 = vpack.i.bf16 %v1826_v33, %v1825_v13  ;;  %v5640_v39 = vunpack.i.l.bf16 %v8610_v42 }
 0x5c2   :  { %v8948_v21 = vpop.permute.xlu0 %5813  ;;  %6018 = vrot.lane.b32.xlu1 %v6017_v58, %s6986_s22  ;;  %v6032_v29 = vpack.i.bf16 %v1750_v11, %v1749_v26  ;;  %v5660_v11 = vunpack.i.l.bf16 %v8736_v47  ;;  %v5655_v13 = vunpack.i.l.bf16 %v8723_v35 }
 0x5c3   :  { %13549 = vst [vmem:[#allocation81_spill] sm:$0xff] %v8948_v21  ;;  %v1904_v26 = vsel %vm622_vm4, %v5645_v55, %v5646_v4  ;;  %v1902_v42 = vsel %vm622_vm4, %v5640_v39, %v5641_v16 }
 0x5c4   :  { %v8958_v57 = vpop.permute.xlu1 %5803  ;;  %v6057_v3 = vpack.i.bf16 %v1904_v26, %v1903_v14  ;;  %v1979_v47 = vsel %vm647_vm12, %v5656_v46, %v5660_v11  ;;  %v1980_v33 = vsel %vm647_vm12, %v5660_v11, %v5661_v32 }
 0x5c5   :  { %13550 = vst [vmem:[#allocation82_spill] sm:$0xff] %v8958_v57 }
 0x5c7   :  { %6038 = vrot.lane.b32.xlu2 %v6037_v5, %s6986_s22  ;;  %v6047_v5 = vpack.i.bf16 %v1828_v19, %v1827_v10  ;;  %v6067_v19 = vpack.i.bf16 %v1980_v33, %v1979_v47 }
 0x5c8   :  { %6028 = vrot.lane.b32.xlu0 %v6027_v17, %s6986_s22 }
 0x5c9   :  { %v8972_v8 = vpop.permute.xlu2 %5863 }
 0x5ca   :  { %v8970_v58 = vpop.permute.xlu0 %5823  ;;  %6033 = vrot.lane.b32.xlu1 %v6032_v29, %s6986_s22  ;;  %v13555_v29 = vunpack.i.h.bf16 %v8712_v51 }
 0x5cb   :  { %v5825_v22 = vunpack.i.l.bf16 %v8970_v58  ;;  %v13568_v43 = vunpack.i.h.bf16 %v8970_v58 }
 0x5cc   :  { %v8983_v17 = vpop.permute.xlu1 %5828  ;;  %v1901_v1 = vsel %vm622_vm4, %v13555_v29, %v5640_v39 }
 0x5cd   :  { %v6052_v55 = vpack.i.bf16 %v1902_v42, %v1901_v1 }
 0x5cf   :  { %6043 = vrot.lane.b32.xlu2 %v6042_v60, %s6986_s22  ;;  %v1978_v60 = vsel %vm647_vm12, %v5655_v13, %v5656_v46 }
 0x5d0   :  { %6048 = vrot.lane.b32.xlu0 %v6047_v5, %s6986_s22  ;;  %v13556_v5 = vunpack.i.h.bf16 %v8627_v52 }
 0x5d1   :  { %v8995_v10 = vpop.permute.xlu2 %5898 }
 0x5d2   :  { %v8993_v44 = vpop.permute.xlu0 %5838  ;;  %13554 = vst [vmem:[#allocation84_spill] sm:$0xff] %v8995_v10  ;;  %6058 = vrot.lane.b32.xlu1 %v6057_v3, %s6986_s22  ;;  %v1977_v51 = vsel %vm647_vm12, %v13556_v5, %v5655_v13 }
 0x5d3   :  { %13553 = vst [vmem:[#allocation83_spill] sm:$0xff] %v8993_v44  ;;  %v6062_v35 = vpack.i.bf16 %v1978_v60, %v1977_v51 }
 0x5d4   :  { %v9005_v4 = vpop.permute.xlu1 %5848 }
 0x5d7   :  { %6068 = vrot.lane.b32.xlu2 %v6067_v19, %s6986_s22 }
 0x5d8   :  { %6053 = vrot.lane.b32.xlu0 %v6052_v55, %s6986_s22 }
 0x5d9   :  { %v9015_v26 = vpop.permute.xlu2 %5903 }
 0x5da   :  { %v9013_v14 = vpop.permute.xlu0 %5843  ;;  %6063 = vrot.lane.b32.xlu1 %v6062_v35, %s6986_s22  ;;  %v5906_v23 = vunpack.i.h.bf16 %v9015_v26 }
 0x5dc   :  { %v9018_v16 = vpop.permute.xlu1 %5853 }
 0x5e1   :  { %v9022_v52 = vpop.permute.xlu2 %5918 }
 0x5e2   :  { %v9020_v32 = vpop.permute.xlu0 %5868  ;;  %13558 = vst [vmem:[#allocation86_spill] sm:$0xff] %v9022_v52 }
 0x5e3   :  { %13557 = vst [vmem:[#allocation85_spill] sm:$0xff] %v9020_v32 }
 0x5e4   :  { %v9024_v11 = vpop.permute.xlu1 %5878 }
 0x5e5   :  { %13559 = vst [vmem:[#allocation87_spill] sm:$0xff] %v9024_v11 }
 0x5e9   :  { %v9028_v46 = vpop.permute.xlu2 %5923 }
 0x5ea   :  { %v9026_v39 = vpop.permute.xlu0 %5873 }
 0x5eb   :  { %13560 = vst [vmem:[#allocation88_spill] sm:$0xff] %v9026_v39 }
 0x5ec   :  { %v9030_v3 = vpop.permute.xlu1 %5888 }
 0x5f1   :  { %v9034_v1 = vpop.permute.xlu2 %5948 }
 0x5f2   :  { %v9032_v29 = vpop.permute.xlu0 %5883  ;;  %13561 = vst [vmem:[#allocation89_spill] sm:$0xff] %v9034_v1 }
 0x5f4   :  { %v9036_v13 = vpop.permute.xlu1 %5893 }
 0x5f9   :  { %v9040_v33 = vpop.permute.xlu2 %5953 }
 0x5fa   :  { %v9038_v47 = vpop.permute.xlu0 %5908  ;;  %13562 = vst [vmem:[#allocation90_spill] sm:$0xff] %v9040_v33  ;;  %v13103_v33 = vunpack.i.l.bf16 %v8808_v38 }
 0x5fb   :  { %v13099_v36 = vunpack.i.l.bf16 %v9038_v47 }
 0x5fc   :  { %v9042_v42 = vpop.permute.xlu1 %5913 }
 0x601   :  { %v9046_v19 = vpop.permute.xlu2 %5978 }
 0x602   :  { %v9044_v55 = vpop.permute.xlu0 %5928  ;;  %13563 = vst [vmem:[#allocation91_spill] sm:$0xff] %v9046_v19 }
 0x604   :  { %v9048_v5 = vpop.permute.xlu1 %5938 }
 0x609   :  { %v9052_v60 = vpop.permute.xlu2 %5988 }
 0x60a   :  { %v9050_v51 = vpop.permute.xlu0 %5933  ;;  %13564 = vst [vmem:[#allocation92_spill] sm:$0xff] %v9052_v60 }
 0x60c   :  { %v9054_v35 = vpop.permute.xlu1 %5943 }
 0x611   :  { %v9058_v40 = vpop.permute.xlu2 %6013 }
 0x612   :  { %v9056_v28 = vpop.permute.xlu0 %5958  ;;  %13566 = vst [vmem:[#allocation94_spill] sm:$0xff] %v9058_v40  ;;  %v13111_v40 = vunpack.i.l.bf16 %v8995_v10  ;;  %v5905_v10 = vunpack.i.l.bf16 %v9015_v26 }
 0x613   :  { %13565 = vst [vmem:[#allocation93_spill] sm:$0xff] %v9056_v28  ;;  %v2438_v28 = vsel %vm420_vm6, %v5825_v22, %v13568_v43 }
 0x614   :  { %v9060_v20 = vpop.permute.xlu1 %5963 }
 0x615   :  { %13567 = vst [vmem:[#allocation95_spill] sm:$0xff] %v9060_v20  ;;  %v2442_v20 = vsel %vm420_vm6, %v5906_v23, %v13099_v36 }
 0x619   :  { %v9064_v1 = vpop.permute.xlu2 %6023 }
 0x61a   :  { %v9062_v32 = vpop.permute.xlu0 %5968  ;;  %v13097_v18 = vunpack.i.h.bf16 %v9064_v1  ;;  %v6025_v41 = vunpack.i.l.bf16 %v9064_v1 }
 0x61c   :  { %v2446_v11 = vsel %vm420_vm6, %v6025_v41, %v13097_v18  ;;  %v9075_v39 = vpop.permute.xlu1 %5973 }
 0x61d   :  { %2773 = vmatpush.msrb.mxu3 %v2446_v11  ;;  %v2434_v11 = vsel %vm420_vm6, %v5706_v2, %v13103_v33 }
 0x61f   :  { %2774 = vmatpush.msrb.mxu3 %v2442_v20  ;;  %v13112_v20 = vunpack.i.h.bf16 %v9036_v13 }
 0x621   :  { %2775 = vmatpush.msrb.mxu3 %v2438_v28  ;;  %v2426_v50 = vsel %vm420_vm6, %v13112_v20, %v13111_v40  ;;  %v13116_v28 = vunpack.i.h.bf16 %v8725_v30  ;;  %v13575_v20 = vunpack.i.l.bf16 %v8772_v48 }
 0x622   :  { %v9085_v21 = vpop.permute.xlu0 %5983 }
 0x623   :  { %2776 = vmatpush.msrb.mxu3 %v2434_v11 }
 0x624   :  { %v9090_v18 = vpop.permute.xlu1 %5998 }
 0x625   :  { %13569 = vst [vmem:[#allocation96_spill] sm:$0xff] %v9090_v18 }
 0x62a   :  { %v9092_v0 = vpop.permute.xlu0 %5993 }
 0x62b   :  { %v13576_v26 = vunpack.i.h.bf16 %v9092_v0  ;;  %v13577_v40 = vunpack.i.l.bf16 %v9092_v0 }
 0x62c   :  { %v9094_v36 = vpop.permute.xlu1 %6008 }
 0x62d   :  { %13570 = vst [vmem:[#allocation97_spill] sm:$0xff] %v9094_v36  ;;  %v13107_v44 = vunpack.i.h.bf16 %v9094_v36  ;;  %v6010_v43 = vunpack.i.l.bf16 %v9094_v36  ;;  %v2418_v36 = vsel %vm420_vm6, %v13116_v28, %v13575_v20  ;;  %v5821_v28 = vunpack.i.h.bf16 %v8908_v56  ;;  %v13594_v56 = vld [vmem:[#allocation69_spill] sm:$0xff] }
 0x62f   :  { %v2430_v11 = vsel %vm420_vm6, %v6010_v43, %v13107_v44  ;;  %v13572_v44 = vunpack.i.h.bf16 %v8885_v37 }
 0x630   :  { %2777 = vmatpush.msrb.mxu3 %v2430_v11  ;;  %v13573_v11 = vunpack.i.l.bf16 %v8885_v37 }
 0x632   :  { %v9105_v33 = vpop.permute.xlu0 %6003  ;;  %2778 = vmatpush.msrb.mxu3 %v2426_v50  ;;  %v2422_v52 = vsel %vm420_vm6, %v13573_v11, %v13572_v44  ;;  %v13117_v11 = vunpack.i.l.bf16 %v9030_v3  ;;  %v2441_v44 = vsel %vm420_vm6, %v5905_v10, %v5906_v23  ;;  %v13579_v23 = vunpack.i.l.bf16 %v8935_v24 }
 0x633   :  { %13571 = vst [vmem:[#allocation98_spill] sm:$0xff] %v9105_v33 }
 0x634   :  { %v9121_v18 = vpop.permute.xlu1 %6018  ;;  %2779 = vmatpush.msrb.mxu3 %v2422_v52  ;;  %v2406_v10 = vsel %vm420_vm6, %v13579_v23, %v13118_v49  ;;  %v5806_v49 = vunpack.i.h.bf16 %v8958_v57  ;;  %v13588_v23 = vunpack.i.l.bf16 %v8885_v37 }
 0x635   :  { %13574 = vst [vmem:[#allocation99_spill] sm:$0xff] %v9121_v18  ;;  %v6021_v50 = vunpack.i.h.bf16 %v9121_v18  ;;  %v2414_v18 = vsel %vm420_vm6, %v13577_v40, %v13576_v26  ;;  %v13120_v40 = vunpack.i.h.bf16 %v8650_v7 }
 0x636   :  { %2780 = vmatpush.msrb.mxu3 %v2418_v36  ;;  %v5705_v36 = vunpack.i.l.bf16 %v8794_v54  ;;  %v6006_v54 = vunpack.i.h.bf16 %v9105_v33 }
 0x637   :  { %v2445_v52 = vsel %vm420_vm6, %v6021_v50, %v6025_v41  ;;  %v13578_v41 = vunpack.i.h.bf16 %v9032_v29 }
 0x638   :  { %2686 = vmatpush.msrb.mxu0 %v2445_v52  ;;  %2781 = vmatpush.msrb.mxu3 %v2414_v18  ;;  %v13119_v18 = vunpack.i.l.bf16 %v8700_v62  ;;  %v2437_v52 = vsel %vm420_vm6, %v5821_v28, %v5825_v22  ;;  %v13580_v22 = vunpack.i.h.bf16 %v8785_v6 }
 0x639   :  { %v2410_v50 = vsel %vm420_vm6, %v13578_v41, %v13117_v11  ;;  %v13581_v11 = vld [vmem:[#allocation58_spill] sm:$0xff]  ;;  %v2429_v41 = vsel %vm420_vm6, %v6006_v54, %v6010_v43  ;;  %v13586_v43 = vunpack.i.l.bf16 %v8542_v61 }
 0x63a   :  { %v9141_v20 = vpop.permute.xlu0 %6028  ;;  %2687 = vmatpush.msrb.mxu0 %v2441_v44  ;;  %2782 = vmatpush.msrb.mxu3 %v2410_v50  ;;  %v5895_v44 = vunpack.i.l.bf16 %v9036_v13  ;;  %v2433_v50 = vsel %vm420_vm6, %v5705_v36, %v5706_v2  ;;  %v2402_v28 = vsel %vm420_vm6, %v13580_v22, %v13119_v18  ;;  %v13583_v2 = vunpack.i.l.bf16 %v8650_v7  ;;  %v13584_v18 = vld [vmem:[#allocation76_spill] sm:$0xff] }
 0x63c   :  { %v9161_v48 = vpop.permute.xlu1 %6033  ;;  %2688 = vmatpush.msrb.mxu0 %v2437_v52  ;;  %2783 = vmatpush.msrb.mxu3 %v2406_v10  ;;  %v13582_v52 = vld [vmem:[#allocation60_spill] sm:$0xff]  ;;  %v2398_v36 = vsel %vm420_vm6, %v13583_v2, %v13120_v40  ;;  %v9195_v40 = vpop.permute.xlu2 %6038 }
 0x63d   :  { %v13122_v10 = vunpack.i.h.bf16 %v13582_v52 }
 0x63e   :  { %2689 = vmatpush.msrb.mxu0 %v2433_v50  ;;  %2784 = vmatpush.msrb.mxu3 %v2402_v28  ;;  %v5695_v50 = vunpack.i.l.bf16 %v8725_v30  ;;  %v13585_v28 = vunpack.i.h.bf16 %v9036_v13  ;;  %v2421_v13 = vsel %vm420_vm6, %v5806_v49, %v13588_v23  ;;  %v13593_v23 = vunpack.i.l.bf16 %v13584_v18 }
 0x63f   :  { %v2394_v54 = vsel %vm420_vm6, %v13122_v10, %v13586_v43  ;;  %v5885_v43 = vunpack.i.l.bf16 %v9032_v29  ;;  %v13592_v10 = vunpack.i.h.bf16 %v8725_v30 }
 0x640   :  { %2690 = vmatpush.msrb.mxu0 %v2429_v41  ;;  %2785 = vmatpush.msrb.mxu3 %v2398_v36  ;;  %v2425_v26 = vsel %vm420_vm6, %v5895_v44, %v13585_v28  ;;  %v13587_v41 = vld [vmem:[#allocation75_spill] sm:$0xff]  ;;  %v13589_v44 = vunpack.i.h.bf16 %v13581_v11  ;;  %v13590_v28 = vunpack.i.l.bf16 %v13581_v11 }
 0x641   :  { %v5316_v2 = vunpack.i.h.bf16 %v13587_v41  ;;  %v5315_v36 = vunpack.i.l.bf16 %v13587_v41  ;;  %v5991_v41 = vunpack.i.h.bf16 %v9052_v60  ;;  %v2417_v49 = vsel %vm420_vm6, %v5695_v50, %v13592_v10 }
 0x642   :  { %v9181_v22 = vpop.permute.xlu0 %6048  ;;  %2691 = vmatpush.msrb.mxu0 %v2425_v26  ;;  %2786 = vmatpush.msrb.mxu3 %v2394_v54  ;;  %v2390_v57 = vsel %vm420_vm6, %v13590_v28, %v13589_v44  ;;  %v9208_v54 = vld [vmem:[#allocation4] sm:$0xff]  ;;  %v13595_v28 = vld [vmem:[#allocation63_spill] sm:$0xff]  ;;  %v5791_v50 = vunpack.i.h.bf16 %v8926_v12  ;;  %v13597_v44 = vunpack.i.h.bf16 %v9032_v29  ;;  %v5935_v60 = vunpack.i.l.bf16 %v9050_v51 }
 0x643   :  { %v2386_v33 = vsel %vm420_vm6, %v5316_v2, %v13593_v23  ;;  %v5546_v61 = vunpack.i.h.bf16 %v13595_v28  ;;  %v9225_v10 = vsel %vm420_vm6, %v5315_v36, %v5316_v2  ;;  %v5981_v23 = vunpack.i.h.bf16 %v9046_v19 }
 0x644   :  { %v9206_v26 = vpop.permute.xlu1 %6058  ;;  %2692 = vmatpush.msrb.mxu0 %v2421_v13  ;;  %2787 = vmatpush.msrb.mxu3 %v2390_v57  ;;  %v5685_v57 = vunpack.i.l.bf16 %v8785_v6  ;;  %v13596_v13 = vunpack.i.l.bf16 %v9092_v0  ;;  %v2409_v28 = vsel %vm420_vm6, %v5885_v43, %v13597_v44  ;;  %v13599_v43 = vunpack.i.l.bf16 %v8935_v24 }
 0x645   :  { %13591 = vst [vmem:[#allocation58_spill] sm:$0xff] %v9206_v26  ;;  %v13601_v12 = vunpack.i.l.bf16 %v9206_v26  ;;  %v5745_v26 = vunpack.i.l.bf16 %v8796_v25 }
 0x646   :  { %2693 = vmatpush.msrb.mxu0 %v2417_v49  ;;  %2788 = vmatpush.msrb.mxu3 %v2386_v33  ;;  %v2413_v30 = vsel %vm420_vm6, %v5991_v41, %v13596_v13  ;;  %v5535_v13 = vunpack.i.l.bf16 %v13582_v52  ;;  %v13598_v49 = vunpack.i.l.bf16 %v8650_v7  ;;  %v2405_v44 = vsel %vm420_vm6, %v5791_v50, %v13599_v43 }
 0x647   :  { %2789 = vmatmul.f32.vlgmr.msrb.gmra.mxu3 %v9208_v54  ;;  %v13600_v41 = vunpack.i.h.bf16 %v8785_v6  ;;  %v13609_v6 = vunpack.i.l.bf16 %v13581_v11 }
 0x648   :  { %2694 = vmatpush.msrb.mxu0 %v2413_v30  ;;  %v2397_v29 = vsel %vm420_vm6, %v5546_v61, %v13598_v49 }
 0x649   :  { %v2401_v2 = vsel %vm420_vm6, %v5685_v57, %v13600_v41  ;;  %v9265_v57 = vld [vmem:[#allocation4 + $0x18] sm:$0xff]  ;;  %v5986_v41 = vunpack.i.h.bf16 %v9085_v21 }
 0x64a   :  { %v9230_v33 = vpop.permute.xlu0 %6053  ;;  %2695 = vmatpush.msrb.mxu0 %v2409_v28 }
 0x64b   :  { %v13130_v36 = vunpack.i.l.bf16 %v9230_v33  ;;  %v13602_v28 = vunpack.i.h.bf16 %v9230_v33 }
 0x64c   :  { %v9263_v43 = vpop.permute.xlu1 %6063  ;;  %2696 = vmatpush.msrb.mxu0 %v2405_v44  ;;  %v5735_v44 = vunpack.i.l.bf16 %v8846_v63 }
 0x64d   :  { %v2509_v19 = vsel %vm420_vm6, %v5981_v23, %v13130_v36  ;;  %v2511_v30 = vsel %vm420_vm6, %v13602_v28, %v13601_v12  ;;  %v5945_v23 = vunpack.i.l.bf16 %v9054_v35  ;;  %v9269_v36 = vpop.permute.xlu2 %6043  ;;  %v13134_v12 = vunpack.i.l.bf16 %v9263_v43 }
 0x64e   :  { %2715 = vmatpush.msrb.mxu1 %v2509_v19  ;;  %2889 = vmatpush.msra.mxu3 %v2511_v30  ;;  %v13603_v28 = vunpack.i.h.bf16 %v9050_v51  ;;  %v5781_v19 = vunpack.i.h.bf16 %v8906_v31  ;;  %v13606_v30 = vunpack.i.l.bf16 %v9018_v16  ;;  %v5786_v31 = vunpack.i.h.bf16 %v8916_v59 }
 0x64f   :  { %2697 = vmatpush.msrb.mxu0 %v2401_v2  ;;  %2792 = vmatmul.f32.gmra.mxu3 %v9265_v57  ;;  %v13604_v2 = vunpack.i.h.bf16 %v9048_v5 }
 0x650   :  { %v2505_v61 = vsel %vm420_vm6, %v5935_v60, %v13603_v28  ;;  %v2525_v60 = vsel %vm420_vm6, %v5986_v41, %v13134_v12  ;;  %v13136_v28 = vunpack.i.l.bf16 %v8950_v53  ;;  %v2501_v50 = vsel %vm420_vm6, %v5781_v19, %v13606_v30 }
 0x651   :  { %2716 = vmatpush.msrb.mxu1 %v2505_v61  ;;  %2698 = vmatpush.msrb.mxu0 %v2397_v29  ;;  %v13605_v61 = vunpack.i.l.bf16 %v9048_v5  ;;  %v13607_v41 = vunpack.i.h.bf16 %v13582_v52  ;;  %v13608_v29 = vunpack.i.h.bf16 %v9054_v35  ;;  %v5976_v19 = vunpack.i.h.bf16 %v9075_v39 }
 0x652   :  { %2756 = vmatpush.msrb.mxu2 %v2525_v60  ;;  %v13135_v30 = vunpack.i.l.bf16 %v9181_v22  ;;  %v13611_v52 = vunpack.i.h.bf16 %v9018_v16 }
 0x653   :  { %v2507_v49 = vsel %vm420_vm6, %v13605_v61, %v13604_v2  ;;  %v2393_v12 = vsel %vm420_vm6, %v5535_v13, %v13607_v41  ;;  %2717 = vmatpush.msrb.mxu1 %v2501_v50  ;;  %v2521_v60 = vsel %vm420_vm6, %v5945_v23, %v13608_v29  ;;  %v13610_v2 = vunpack.i.h.bf16 %v13594_v56  ;;  %v13654_v56 = vld [vmem:[#allocation93_spill] sm:$0xff] }
 0x654   :  { %2890 = vmatpush.msra.mxu3 %v2507_v49  ;;  %2699 = vmatpush.msrb.mxu0 %v2393_v12  ;;  %v2503_v13 = vsel %vm420_vm6, %v13611_v52, %v13136_v28  ;;  %v13612_v49 = vunpack.i.h.bf16 %v8846_v63  ;;  %v13614_v41 = vunpack.i.h.bf16 %v8774_v45  ;;  %v13615_v12 = vunpack.i.l.bf16 %v8774_v45 }
 0x655   :  { %v2389_v61 = vsel %vm420_vm6, %v13610_v2, %v13609_v6  ;;  %2757 = vmatpush.msrb.mxu2 %v2521_v60  ;;  %v13613_v6 = vunpack.i.l.bf16 %v8972_v8  ;;  %v13616_v60 = vunpack.i.h.bf16 %v8796_v25  ;;  %v13146_v52 = vunpack.i.h.bf16 %v9028_v46 }
 0x656   :  { %v2497_v50 = vsel %vm420_vm6, %v5735_v44, %v13612_v49  ;;  %2891 = vmatpush.msra.mxu3 %v2503_v13  ;;  %v2499_v29 = vsel %vm420_vm6, %v13615_v12, %v13614_v41  ;;  %v13137_v44 = vunpack.i.h.bf16 %v9269_v36  ;;  %v13141_v13 = vunpack.i.l.bf16 %v9141_v20  ;;  %2700 = vmatpush.msrb.mxu0 %v2389_v61  ;;  %v9340_v12 = vld [vmem:[#allocation4 + $0x30] sm:$0xff] }
 0x657   :  { %2718 = vmatpush.msrb.mxu1 %v2497_v50  ;;  %v2517_v23 = vsel %vm420_vm6, %v5786_v31, %v13613_v6  ;;  %v2513_v2 = vsel %vm420_vm6, %v5745_v26, %v13616_v60  ;;  %v13617_v31 = vunpack.i.l.bf16 %v9269_v36  ;;  %v5925_v50 = vunpack.i.l.bf16 %v9028_v46  ;;  %v9338_v26 = vld [vmem:[#allocation4 + $0x10] sm:$0xff]  ;;  %2795 = vmatmul.f32.gmra.mxu3 %v9340_v12 }
 0x658   :  { %2758 = vmatpush.msrb.mxu2 %v2517_v23  ;;  %v13138_v6 = vunpack.i.h.bf16 %v9044_v55  ;;  %v13147_v41 = vunpack.i.l.bf16 %v9044_v55  ;;  %2892 = vmatpush.msra.mxu3 %v2499_v29  ;;  %13618 = vst [vmem:[#allocation60_spill] sm:$0xff] %v9338_v26  ;;  %v13139_v23 = vunpack.i.h.bf16 %v9038_v47  ;;  %v13620_v28 = vunpack.i.l.bf16 %v9230_v33 }
 0x659   :  { %v2493_v49 = vsel %vm420_vm6, %v5976_v19, %v13617_v31  ;;  %2701 = vmatpush.msrb.mxu0 %v9225_v10  ;;  %v2495_v19 = vsel %vm420_vm6, %v13137_v44, %v13135_v30  ;;  %v13144_v31 = vunpack.i.h.bf16 %v9013_v14  ;;  %v5725_v10 = vunpack.i.l.bf16 %v8836_v9 }
 0x65a   :  { %2719 = vmatpush.msrb.mxu1 %v2493_v49  ;;  %2759 = vmatpush.msrb.mxu2 %v2513_v2  ;;  %v13143_v49 = vunpack.i.l.bf16 %v9013_v14  ;;  %v13619_v30 = vunpack.i.h.bf16 %v9230_v33  ;;  %v5776_v61 = vunpack.i.h.bf16 %v8838_v27  ;;  %v13140_v60 = vunpack.i.l.bf16 %v9005_v4 }
 0x65b   :  { %2893 = vmatpush.msra.mxu3 %v2495_v19  ;;  %2702 = vmatmul.f32.vlgmr.msrb.gmra.mxu0 %v9208_v54  ;;  %v13621_v19 = vunpack.i.h.bf16 %v9064_v1  ;;  %v2489_v2 = vsel %vm420_vm6, %v5925_v50, %v13146_v52  ;;  %v2491_v33 = vsel %vm420_vm6, %v13147_v41, %v13138_v6  ;;  %v13142_v1 = vunpack.i.h.bf16 %v8808_v38  ;;  %v13642_v52 = vld [vmem:[#allocation83_spill] sm:$0xff] }
 0x65c   :  { %5078 = vmatmul.msk.f32.vlgmr.msrb.gmra.mxu2 %vm2673_vm3, %v9338_v26  ;;  %v2510_v44 = vsel %vm420_vm6, %v13620_v28, %v13619_v30  ;;  %2720 = vmatpush.msrb.mxu1 %v2489_v2  ;;  %v13622_v28 = vunpack.i.l.bf16 %v9048_v5  ;;  %v13623_v30 = vunpack.i.h.bf16 %v9050_v51  ;;  %v13624_v50 = vunpack.i.l.bf16 %v9038_v47  ;;  %v13659_v26 = vld [vmem:[#allocation95_spill] sm:$0xff] }
 0x65d   :  { %v2447_v29 = vsel %vm420_vm6, %v13621_v19, %v13141_v13  ;;  %2802 = vmatpush.msra.mxu0 %v2510_v44  ;;  %2894 = vmatpush.msra.mxu3 %v2491_v33  ;;  %v13149_v19 = vunpack.i.h.bf16 %v9161_v48  ;;  %v13145_v6 = vunpack.i.l.bf16 %v9161_v48  ;;  %v2485_v2 = vsel %vm420_vm6, %v5776_v61, %v13143_v49  ;;  %v9434_v13 = vld [vmem:[#allocation4 + $0x28] sm:$0xff]  ;;  %v13645_v49 = vld [vmem:[#allocation72_spill] sm:$0xff] }
 0x65e   :  { %2860 = vmatpush.msra.mxu2 %v2447_v29  ;;  %v2506_v44 = vsel %vm420_vm6, %v13623_v30, %v13622_v28  ;;  %v2443_v29 = vsel %vm420_vm6, %v13624_v50, %v13139_v23  ;;  %v2487_v51 = vsel %vm420_vm6, %v13144_v31, %v13140_v60  ;;  %2721 = vmatpush.msrb.mxu1 %v2485_v2  ;;  %v13625_v28 = vunpack.i.h.bf16 %v9018_v16  ;;  %v13641_v31 = vld [vmem:[#allocation70_spill] sm:$0xff] }
 0x65f   :  { %2803 = vmatpush.msra.mxu0 %v2506_v44  ;;  %2895 = vmatpush.msra.mxu3 %v2487_v51  ;;  %v13626_v30 = vunpack.i.l.bf16 %v9018_v16  ;;  %v13627_v50 = vunpack.i.l.bf16 %v8983_v17  ;;  %v13628_v61 = vunpack.i.h.bf16 %v8970_v58  ;;  %v5971_v23 = vunpack.i.h.bf16 %v9062_v32  ;;  %13635 = vst [vmem:[#allocation76_spill] sm:$0xff] %v9434_v13 }
 0x660   :  { %2861 = vmatpush.msra.mxu2 %v2443_v29  ;;  %v13148_v60 = vunpack.i.l.bf16 %v9195_v40  ;;  %v13629_v2 = vunpack.i.h.bf16 %v8836_v9  ;;  %v13630_v16 = vunpack.i.h.bf16 %v8828_v15  ;;  %v13154_v58 = vunpack.i.h.bf16 %v9042_v42 }
 0x661   :  { %v2502_v44 = vsel %vm420_vm6, %v13626_v30, %v13625_v28  ;;  %v2439_v29 = vsel %vm420_vm6, %v13628_v61, %v13627_v50  ;;  %v13631_v28 = vunpack.i.l.bf16 %v8828_v15  ;;  %v5915_v50 = vunpack.i.l.bf16 %v9042_v42 }
 0x662   :  { %2804 = vmatpush.msra.mxu0 %v2502_v44  ;;  %2862 = vmatpush.msra.mxu2 %v2439_v29  ;;  %v2481_v51 = vsel %vm420_vm6, %v5725_v10, %v13629_v2  ;;  %v13632_v61 = vunpack.i.l.bf16 %v8774_v45  ;;  %v13633_v44 = vunpack.i.h.bf16 %v8846_v63  ;;  %v13634_v10 = vunpack.i.l.bf16 %v8808_v38 }
 0x663   :  { %v2483_v30 = vsel %vm420_vm6, %v13631_v28, %v13630_v16  ;;  %2722 = vmatpush.msrb.mxu1 %v2481_v51  ;;  %v13636_v16 = vld [vmem:[#allocation86_spill] sm:$0xff]  ;;  %v2477_v63 = vsel %vm420_vm6, %v5971_v23, %v13145_v6  ;;  %v2479_v51 = vsel %vm420_vm6, %v13149_v19, %v13148_v60  ;;  %2705 = vmatmul.f32.gmra.mxu0 %v9265_v57  ;;  %v13643_v60 = vunpack.i.h.bf16 %v9269_v36  ;;  %v13647_v6 = vld [vmem:[#allocation97_spill] sm:$0xff] }
 0x664   :  { %2896 = vmatpush.msra.mxu3 %v2483_v30  ;;  %v2498_v29 = vsel %vm420_vm6, %v13633_v44, %v13632_v61  ;;  %v2435_v2 = vsel %vm420_vm6, %v13634_v10, %v13142_v1  ;;  %v9446_v30 = vld [vmem:[#allocation4 + $0x48] sm:$0xff]  ;;  %v5715_v61 = vunpack.i.l.bf16 %v8752_v34  ;;  %v13638_v44 = vld [vmem:[#allocation80_spill] sm:$0xff]  ;;  %5079 = vmatmul.msk.f32.gmra.mxu2 %vm2673_vm3, %v9434_v13  ;;  %v13644_v19 = vunpack.i.l.bf16 %v9269_v36  ;;  %v13658_v36 = vld [vmem:[#allocation53_spill] sm:$0xff] }
 0x665   :  { %2805 = vmatpush.msra.mxu0 %v2498_v29  ;;  %2863 = vmatpush.msra.mxu2 %v2435_v2  ;;  %13637 = vst [vmem:[#allocation75_spill] sm:$0xff] %v9446_v30  ;;  %v13639_v1 = vld [vmem:[#allocation84_spill] sm:$0xff]  ;;  %v13640_v29 = vld [vmem:[#allocation94_spill] sm:$0xff]  ;;  %v13648_v23 = vunpack.i.h.bf16 %v13647_v6  ;;  %v2473_v28 = vsel %vm420_vm6, %v5915_v50, %v13154_v58  ;;  %v13651_v33 = vunpack.i.l.bf16 %v9044_v55  ;;  %v13652_v6 = vunpack.i.h.bf16 %v9028_v46 }
 0x666   :  { %v13150_v2 = vunpack.i.l.bf16 %v13640_v29  ;;  %2723 = vmatpush.msrb.mxu1 %v2477_v63  ;;  %2897 = vmatpush.msra.mxu3 %v2479_v51  ;;  %v2494_v10 = vsel %vm420_vm6, %v13644_v19, %v13643_v60  ;;  %v5771_v63 = vunpack.i.h.bf16 %v13645_v49  ;;  %v13646_v51 = vld [vmem:[#allocation81_spill] sm:$0xff]  ;;  %v13649_v60 = vunpack.i.h.bf16 %v13636_v16  ;;  %v13664_v13 = vld [vmem:[#allocation90_spill] sm:$0xff]  ;;  %v13682_v49 = vld [vmem:[#allocation68_spill] sm:$0xff] }
 0x667   :  { %2798 = vmatmul.f32.gmra.mxu3 %v9446_v30  ;;  %2806 = vmatpush.msra.mxu0 %v2494_v10  ;;  %v13650_v19 = vunpack.i.l.bf16 %v13636_v16  ;;  %v13662_v50 = vunpack.i.h.bf16 %v9013_v14  ;;  %v13667_v46 = vunpack.i.h.bf16 %v8752_v34 }
 0x668   :  { %v2431_v41 = vsel %vm420_vm6, %v13648_v23, %v13150_v2  ;;  %2724 = vmatpush.msrb.mxu1 %v2473_v28  ;;  %v2490_v23 = vsel %vm420_vm6, %v13652_v6, %v13651_v33  ;;  %v13653_v2 = vld [vmem:[#allocation65_spill] sm:$0xff]  ;;  %v13656_v28 = vunpack.i.l.bf16 %v13639_v1  ;;  %v13660_v6 = vunpack.i.l.bf16 %v13642_v52 }
 0x669   :  { %2864 = vmatpush.msra.mxu2 %v2431_v41  ;;  %v2475_v10 = vsel %vm420_vm6, %v13650_v19, %v13649_v60  ;;  %2807 = vmatpush.msra.mxu0 %v2490_v23  ;;  %v13655_v41 = vunpack.i.h.bf16 %v13639_v1  ;;  %v13657_v60 = vunpack.i.l.bf16 %v13638_v44 }
 0x66a   :  { %2898 = vmatpush.msra.mxu3 %v2475_v10  ;;  %v13661_v10 = vunpack.i.h.bf16 %v13638_v44 }
 0x66b   :  { %v2427_v58 = vsel %vm420_vm6, %v13656_v28, %v13655_v41  ;;  %v2469_v19 = vsel %vm420_vm6, %v5771_v63, %v13657_v60  ;;  %v13663_v41 = vunpack.i.l.bf16 %v9013_v14  ;;  %v5956_v63 = vunpack.i.h.bf16 %v13664_v13  ;;  %2708 = vmatmul.f32.gmra.mxu0 %v9340_v12 }
 0x66c   :  { %2865 = vmatpush.msra.mxu2 %v2427_v58  ;;  %2725 = vmatpush.msrb.mxu1 %v2469_v19  ;;  %v2471_v23 = vsel %vm420_vm6, %v13661_v10, %v13660_v6  ;;  %v13665_v60 = vunpack.i.l.bf16 %v13646_v51  ;;  %v13666_v58 = vunpack.i.h.bf16 %v8885_v37  ;;  %v2465_v6 = vsel %vm420_vm6, %v5715_v61, %v13667_v46  ;;  %v13673_v46 = vld [vmem:[#allocation87_spill] sm:$0xff] }
 0x66d   :  { %v2486_v28 = vsel %vm420_vm6, %v13663_v41, %v13662_v50  ;;  %2899 = vmatpush.msra.mxu3 %v2471_v23  ;;  %v13668_v10 = vunpack.i.h.bf16 %v13641_v31  ;;  %v13669_v14 = vunpack.i.l.bf16 %v13641_v31  ;;  %v13670_v41 = vld [vmem:[#allocation88_spill] sm:$0xff]  ;;  %v13671_v37 = vunpack.i.l.bf16 %v8828_v15 }
 0x66e   :  { %2808 = vmatpush.msra.mxu0 %v2486_v28  ;;  %v2423_v19 = vsel %vm420_vm6, %v13666_v58, %v13665_v60  ;;  %v5875_v23 = vunpack.i.l.bf16 %v13670_v41  ;;  %2726 = vmatpush.msrb.mxu1 %v2465_v6  ;;  %v13672_v60 = vunpack.i.h.bf16 %v8836_v9  ;;  %v9539_v28 = vld [vmem:[#allocation4 + $0x40] sm:$0xff]  ;;  %v13678_v9 = vld [vmem:[#allocation67_spill] sm:$0xff]  ;;  %v13679_v58 = vld [vmem:[#allocation96_spill] sm:$0xff]  ;;  %v5675_v13 = vunpack.i.l.bf16 %v13682_v49 }
 0x66f   :  { %v2467_v50 = vsel %vm420_vm6, %v13669_v14, %v13668_v10  ;;  %2866 = vmatpush.msra.mxu2 %v2423_v19  ;;  %v13674_v10 = vunpack.i.h.bf16 %v13653_v2  ;;  %v13675_v14 = vunpack.i.l.bf16 %v13653_v2  ;;  %v13676_v19 = vunpack.i.l.bf16 %v13654_v56  ;;  %13677 = vst [vmem:[#allocation86_spill] sm:$0xff] %v9539_v28 }
 0x670   :  { %v2482_v61 = vsel %vm420_vm6, %v13672_v60, %v13671_v37  ;;  %2900 = vmatpush.msra.mxu3 %v2467_v50  ;;  %v5756_v37 = vunpack.i.h.bf16 %v13678_v9  ;;  %v13680_v50 = vunpack.i.l.bf16 %v13659_v26  ;;  %v13684_v60 = vunpack.i.h.bf16 %v9161_v48  ;;  %5080 = vmatmul.msk.f32.gmra.mxu2 %vm2673_vm3, %v9539_v28  ;;  %v13694_v26 = vld [vmem:[#allocation71_spill] sm:$0xff] }
 0x671   :  { %2809 = vmatpush.msra.mxu0 %v2482_v61  ;;  %v2419_v33 = vsel %vm420_vm6, %v13675_v14, %v13674_v10  ;;  %v2461_v6 = vsel %vm420_vm6, %v5956_v63, %v13676_v19  ;;  %v13681_v61 = vunpack.i.h.bf16 %v13654_v56  ;;  %v13683_v19 = vld [vmem:[#allocation74_spill] sm:$0xff]  ;;  %v13690_v9 = vunpack.i.h.bf16 %v13673_v46 }
 0x672   :  { %2867 = vmatpush.msra.mxu2 %v2419_v33  ;;  %2727 = vmatpush.msrb.mxu1 %v2461_v6  ;;  %v13685_v33 = vunpack.i.l.bf16 %v9161_v48  ;;  %v13688_v48 = vunpack.i.h.bf16 %v13670_v41  ;;  %v13689_v63 = vld [vmem:[#allocation66_spill] sm:$0xff] }
 0x673   :  { %v2463_v10 = vsel %vm420_vm6, %v13681_v61, %v13680_v50  ;;  %v9560_v50 = vpop.permute.xlu2 %6068  ;;  %v13686_v61 = vunpack.i.l.bf16 %v13679_v58  ;;  %v13161_v52 = vunpack.i.l.bf16 %v13689_v63  ;;  %2711 = vmatmul.f32.gmra.mxu0 %v9446_v30  ;;  %v13723_v30 = vunpack.i.h.bf16 %v8650_v7 }
 0x674   :  { %2901 = vmatpush.msra.mxu3 %v2463_v10  ;;  %v2478_v6 = vsel %vm420_vm6, %v13685_v33, %v13684_v60  ;;  %v13687_v10 = vunpack.i.h.bf16 %v9092_v0  ;;  %v2457_v60 = vsel %vm420_vm6, %v5875_v23, %v13688_v48  ;;  %v13692_v0 = vunpack.i.l.bf16 %v13636_v16  ;;  %v9606_v48 = vld [vmem:[#allocation4 + $0x8] sm:$0xff] }
 0x675   :  { %2810 = vmatpush.msra.mxu0 %v2478_v6  ;;  %2728 = vmatpush.msrb.mxu1 %v2457_v60  ;;  %v13691_v6 = vunpack.i.l.bf16 %v13673_v46  ;;  %v13162_v23 = vunpack.i.l.bf16 %v13694_v26  ;;  %v13696_v60 = vunpack.i.l.bf16 %v9030_v3 }
 0x676   :  { %v2415_v14 = vsel %vm420_vm6, %v13687_v10, %v13686_v61  ;;  %v13693_v61 = vunpack.i.h.bf16 %v9042_v42  ;;  %v6071_v42 = vunpack.i.h.bf16 %v9560_v50 }
 0x677   :  { %2868 = vmatpush.msra.mxu2 %v2415_v14  ;;  %v2459_v28 = vsel %vm420_vm6, %v13691_v6, %v13690_v9  ;;  %v13695_v14 = vunpack.i.h.bf16 %v9030_v3  ;;  %v13697_v9 = vunpack.i.l.bf16 %v13683_v19 }
 0x678   :  { %v2474_v10 = vsel %vm420_vm6, %v13693_v61, %v13692_v0  ;;  %2902 = vmatpush.msra.mxu3 %v2459_v28  ;;  %v13163_v0 = vunpack.i.l.bf16 %v9560_v50  ;;  %v13698_v28 = vunpack.i.h.bf16 %v13683_v19 }
 0x679   :  { %2811 = vmatpush.msra.mxu0 %v2474_v10  ;;  %v2411_v33 = vsel %vm420_vm6, %v13696_v60, %v13695_v14  ;;  %v2453_v6 = vsel %vm420_vm6, %v5756_v37, %v13697_v9  ;;  %v13699_v10 = vunpack.i.h.bf16 %v13638_v44  ;;  %v13700_v14 = vunpack.i.l.bf16 %v13638_v44 }
 0x67a   :  { %2869 = vmatpush.msra.mxu2 %v2411_v33  ;;  %2729 = vmatpush.msrb.mxu1 %v2453_v6  ;;  %v2455_v61 = vsel %vm420_vm6, %v13698_v28, %v13161_v52  ;;  %v13701_v37 = vunpack.i.h.bf16 %v8935_v24  ;;  %v13702_v9 = vunpack.i.h.bf16 %v13682_v49  ;;  %v13703_v44 = vunpack.i.h.bf16 %v13658_v36 }
 0x67b   :  { %v2470_v60 = vsel %vm420_vm6, %v13700_v14, %v13699_v10  ;;  %2903 = vmatpush.msra.mxu3 %v2455_v61  ;;  %v13704_v28 = vunpack.i.l.bf16 %v13658_v36  ;;  %v13705_v61 = vld [vmem:[#allocation57_spill] sm:$0xff]  ;;  %v13706_v24 = vunpack.i.l.bf16 %v13641_v31  ;;  %v13712_v52 = vunpack.i.h.bf16 %v8700_v62 }
 0x67c   :  { %2812 = vmatpush.msra.mxu0 %v2470_v60  ;;  %v2407_v33 = vsel %vm420_vm6, %v13701_v37, %v13162_v23  ;;  %v2449_v6 = vsel %vm420_vm6, %v5675_v13, %v13702_v9  ;;  %v5985_v60 = vunpack.i.l.bf16 %v9085_v21  ;;  %v13707_v37 = vunpack.i.h.bf16 %v8752_v34  ;;  %v13711_v21 = vld [vmem:[#allocation89_spill] sm:$0xff]  ;;  %v13714_v23 = vld [vmem:[#allocation62_spill] sm:$0xff] }
 0x67d   :  { %2870 = vmatpush.msra.mxu2 %v2407_v33  ;;  %2730 = vmatpush.msrb.mxu1 %v2449_v6  ;;  %v2451_v10 = vsel %vm420_vm6, %v13704_v28, %v13703_v44  ;;  %v13708_v33 = vunpack.i.h.bf16 %v9263_v43  ;;  %v13709_v9 = vunpack.i.l.bf16 %v9263_v43  ;;  %v9634_v44 = vld [vmem:[#allocation4 + $0x58] sm:$0xff]  ;;  %v13713_v34 = vunpack.i.l.bf16 %v8700_v62 }
 0x67e   :  { %2904 = vmatpush.msra.mxu3 %v2451_v10  ;;  %2731 = vmatmul.f32.vlgmr.msrb.gmra.mxu1 %v9606_v48  ;;  %v2466_v13 = vsel %vm420_vm6, %v13707_v37, %v13706_v24  ;;  %13710 = vst [vmem:[#allocation80_spill] sm:$0xff] %v9634_v44  ;;  %v2528_v37 = vsel %vm420_vm6, %v13163_v0, %v6071_v42  ;;  %v5951_v10 = vunpack.i.h.bf16 %v13711_v21  ;;  %v13718_v42 = vunpack.i.l.bf16 %v13654_v56 }
 0x67f   :  { %v2526_v6 = vsel %vm420_vm6, %v13709_v9, %v13708_v33  ;;  %2813 = vmatpush.msra.mxu0 %v2466_v13  ;;  %v2403_v24 = vsel %vm420_vm6, %v13713_v34, %v13712_v52  ;;  %v13715_v9 = vld [vmem:[#allocation85_spill] sm:$0xff]  ;;  %5081 = vmatmul.msk.f32.gmra.mxu2 %vm2673_vm3, %v9634_v44  ;;  %v13717_v52 = vunpack.i.h.bf16 %v13654_v56  ;;  %v13719_v0 = vunpack.i.l.bf16 %v13711_v21 }
 0x680   :  { %2843 = vmatpush.msra.mxu1 %v2526_v6  ;;  %v5871_v14 = vunpack.i.h.bf16 %v13715_v9  ;;  %2871 = vmatpush.msra.mxu2 %v2403_v24  ;;  %v13716_v13 = vld [vmem:[#allocation73_spill] sm:$0xff]  ;;  %v13720_v28 = vunpack.i.h.bf16 %v9054_v35  ;;  %v5785_v6 = vunpack.i.l.bf16 %v8916_v59  ;;  %v13722_v44 = vunpack.i.l.bf16 %v13705_v61 }
 0x681   :  { %3017 = vmatpush.msrb.mxu3 %v2528_v37  ;;  %v2462_v34 = vsel %vm420_vm6, %v13718_v42, %v13717_v52  ;;  %v13721_v37 = vld [vmem:[#allocation59_spill] sm:$0xff]  ;;  %v2524_v52 = vsel %vm420_vm6, %v5951_v10, %v5985_v60  ;;  %v6031_v42 = vunpack.i.h.bf16 %v9141_v20  ;;  %v13724_v35 = vunpack.i.l.bf16 %v13673_v46 }
 0x682   :  { %v2522_v24 = vsel %vm420_vm6, %v13720_v28, %v13719_v0  ;;  %2814 = vmatpush.msra.mxu0 %v2462_v34  ;;  %v2399_v56 = vsel %vm420_vm6, %v13723_v30, %v13722_v44  ;;  %v13725_v0 = vunpack.i.h.bf16 %v13670_v41  ;;  %v13726_v28 = vunpack.i.h.bf16 %v8972_v8  ;;  %2905 = vmatmul.f32.vlgmr.msra.gmra.mxu3 %v9606_v48 }
 0x683   :  { %2844 = vmatpush.msra.mxu1 %v2522_v24  ;;  %2872 = vmatpush.msra.mxu2 %v2399_v56  ;;  %v13727_v34 = vunpack.i.l.bf16 %v8972_v8  ;;  %v5751_v60 = vunpack.i.h.bf16 %v13716_v13  ;;  %v13728_v44 = vunpack.i.h.bf16 %v13714_v23  ;;  %v13729_v24 = vunpack.i.l.bf16 %v13714_v23 }
 0x684   :  { %3018 = vmatpush.msrb.mxu3 %v2524_v52  ;;  %v2458_v59 = vsel %vm420_vm6, %v13725_v0, %v13724_v35  ;;  %v13730_v56 = vunpack.i.l.bf16 %v13715_v9  ;;  %v13731_v35 = vld [vmem:[#allocation99_spill] sm:$0xff]  ;;  %v13735_v30 = vunpack.i.h.bf16 %v8796_v25  ;;  %v13739_v25 = vunpack.i.l.bf16 %v9141_v20 }
 0x685   :  { %v2518_v7 = vsel %vm420_vm6, %v13727_v34, %v13726_v28  ;;  %2815 = vmatpush.msra.mxu0 %v2458_v59  ;;  %v2395_v41 = vsel %vm420_vm6, %v13729_v24, %v13728_v44  ;;  %v6020_v0 = vunpack.i.l.bf16 %v13731_v35  ;;  %v13732_v28 = vunpack.i.h.bf16 %v13683_v19  ;;  %v13736_v24 = vld [vmem:[#allocation58_spill] sm:$0xff] }
 0x686   :  { %2845 = vmatpush.msra.mxu1 %v2518_v7  ;;  %v2520_v52 = vsel %vm420_vm6, %v13730_v56, %v5871_v14  ;;  %2873 = vmatpush.msra.mxu2 %v2395_v41  ;;  %v13733_v34 = vunpack.i.l.bf16 %v13683_v19  ;;  %v13734_v7 = vunpack.i.l.bf16 %v13716_v13  ;;  %v6061_v33 = vunpack.i.h.bf16 %v13736_v24 }
 0x687   :  { %3019 = vmatpush.msrb.mxu3 %v2520_v52  ;;  %v13737_v14 = vunpack.i.l.bf16 %v13721_v37  ;;  %v13738_v41 = vunpack.i.h.bf16 %v13581_v11  ;;  %v2516_v19 = vsel %vm420_vm6, %v5751_v60, %v5785_v6  ;;  %v9711_v52 = vld [vmem:[#allocation4 + $0x20] sm:$0xff]  ;;  %v13740_v35 = vunpack.i.l.bf16 %v13658_v36 }
 0x688   :  { %v2454_v59 = vsel %vm420_vm6, %v13733_v34, %v13732_v28  ;;  %v2514_v44 = vsel %vm420_vm6, %v13735_v30, %v13734_v7  ;;  %v2448_v30 = vsel %vm420_vm6, %v13739_v25, %v6031_v42  ;;  %v13741_v28 = vunpack.i.h.bf16 %v13682_v49  ;;  %2734 = vmatmul.f32.gmra.mxu1 %v9711_v52  ;;  %v13748_v25 = vld [vmem:[#allocation91_spill] sm:$0xff] }
 0x689   :  { %2816 = vmatpush.msra.mxu0 %v2454_v59  ;;  %2846 = vmatpush.msra.mxu1 %v2514_v44  ;;  %v2391_v56 = vsel %vm420_vm6, %v13738_v41, %v13737_v14  ;;  %v5831_v11 = vunpack.i.h.bf16 %v8983_v17  ;;  %v13742_v6 = vunpack.i.h.bf16 %v13584_v18  ;;  %v13743_v59 = vunpack.i.l.bf16 %v13584_v18  ;;  %v13747_v41 = vld [vmem:[#allocation78_spill] sm:$0xff] }
 0x68a   :  { %2874 = vmatpush.msra.mxu2 %v2391_v56  ;;  %3020 = vmatpush.msrb.mxu3 %v2516_v19  ;;  %v2450_v34 = vsel %vm420_vm6, %v13741_v28, %v13740_v35  ;;  %v13744_v20 = vunpack.i.l.bf16 %v9560_v50  ;;  %v13745_v42 = vunpack.i.h.bf16 %v9263_v43  ;;  %v13746_v44 = vunpack.i.h.bf16 %v9038_v47 }
 0x68b   :  { %2947 = vmatpush.msrb.mxu1 %v2448_v30  ;;  %2817 = vmatpush.msra.mxu0 %v2450_v34  ;;  %v2387_v7 = vsel %vm420_vm6, %v13743_v59, %v13742_v6  ;;  %v5820_v56 = vunpack.i.l.bf16 %v13747_v41  ;;  %v5861_v19 = vunpack.i.h.bf16 %v8950_v53  ;;  %v5980_v30 = vunpack.i.l.bf16 %v13748_v25 }
 0x68c   :  { %2875 = vmatpush.msra.mxu2 %v2387_v7  ;;  %v2527_v49 = vsel %vm420_vm6, %v13745_v42, %v13744_v20  ;;  %v2444_v14 = vsel %vm420_vm6, %v13746_v44, %v6020_v0  ;;  %v13749_v35 = vunpack.i.l.bf16 %v13736_v24  ;;  %2818 = vmatmul.f32.vlgmr.msra.gmra.mxu0 %v9606_v48  ;;  %v13750_v43 = vunpack.i.l.bf16 %v13711_v21  ;;  %v13751_v0 = vld [vmem:[#allocation77_spill] sm:$0xff]  ;;  %v13756_v20 = vld [vmem:[#allocation98_spill] sm:$0xff] }
 0x68d   :  { %2930 = vmatpush.msrb.mxu0 %v2527_v49  ;;  %2948 = vmatpush.msrb.mxu1 %v2444_v14  ;;  %v5780_v28 = vunpack.i.l.bf16 %v13751_v0  ;;  %v6016_v34 = vunpack.i.h.bf16 %v13640_v29  ;;  %v13752_v6 = vunpack.i.l.bf16 %v8983_v17  ;;  %v13754_v21 = vunpack.i.l.bf16 %v13715_v9  ;;  %v9772_v14 = vld [vmem:[#allocation4 + $0x38] sm:$0xff] }
 0x68e   :  { %v2512_v50 = vsel %vm420_vm6, %v13749_v35, %v6061_v33  ;;  %v2523_v47 = vsel %vm420_vm6, %v13750_v43, %v5951_v10  ;;  %2876 = vmatmul.f32.vlgmr.msra.gmra.mxu2 %v9208_v54  ;;  %v13753_v33 = vunpack.i.h.bf16 %v9048_v5  ;;  %v13755_v10 = vunpack.i.h.bf16 %v8972_v8  ;;  %2908 = vmatmul.f32.gmra.mxu3 %v9711_v52 }
 0x68f   :  { %2976 = vmatpush.msrb.mxu2 %v2512_v50  ;;  %2931 = vmatpush.msrb.mxu0 %v2523_v47  ;;  %v2440_v24 = vsel %vm420_vm6, %v13752_v6, %v5831_v11  ;;  %v6005_v42 = vunpack.i.l.bf16 %v13756_v20  ;;  %v6051_v49 = vunpack.i.h.bf16 %v9181_v22  ;;  %v13757_v17 = vunpack.i.h.bf16 %v8808_v38 }
 0x690   :  { %v2508_v59 = vsel %vm420_vm6, %v13753_v33, %v5980_v30  ;;  %2949 = vmatpush.msrb.mxu1 %v2440_v24  ;;  %v2519_v7 = vsel %vm420_vm6, %v13755_v10, %v13754_v21  ;;  %v13758_v11 = vunpack.i.l.bf16 %v8950_v53  ;;  %v13759_v8 = vunpack.i.l.bf16 %v13716_v13  ;;  %v13762_v13 = vld [vmem:[#allocation82_spill] sm:$0xff] }
 0x691   :  { %2977 = vmatpush.msrb.mxu2 %v2508_v59  ;;  %2932 = vmatpush.msrb.mxu0 %v2519_v7  ;;  %v2436_v5 = vsel %vm420_vm6, %v13757_v17, %v5820_v56  ;;  %v5816_v41 = vunpack.i.h.bf16 %v13646_v51  ;;  %v5975_v25 = vunpack.i.l.bf16 %v9075_v39  ;;  %v13760_v38 = vunpack.i.l.bf16 %v13640_v29 }
 0x692   :  { %v2504_v44 = vsel %vm420_vm6, %v13758_v11, %v5861_v19  ;;  %2950 = vmatpush.msrb.mxu1 %v2436_v5  ;;  %v2515_v9 = vsel %vm420_vm6, %v13759_v8, %v5751_v60  ;;  %v13761_v53 = vunpack.i.h.bf16 %v8774_v45  ;;  %v5805_v30 = vunpack.i.l.bf16 %v13762_v13 }
 0x693   :  { %2978 = vmatpush.msrb.mxu2 %v2504_v44  ;;  %2933 = vmatpush.msrb.mxu0 %v2515_v9  ;;  %v2432_v56 = vsel %vm420_vm6, %v13760_v38, %v6016_v34  ;;  %v5851_v60 = vunpack.i.h.bf16 %v9005_v4  ;;  %v13763_v35 = vunpack.i.h.bf16 %v13639_v1  ;;  %v13764_v29 = vunpack.i.l.bf16 %v9181_v22  ;;  %v13776_v44 = vld [vmem:[#allocation72_spill] sm:$0xff] }
 0x694   :  { %v2500_v19 = vsel %vm420_vm6, %v13761_v53, %v5780_v28  ;;  %2951 = vmatpush.msrb.mxu1 %v2432_v56  ;;  %v5775_v45 = vunpack.i.l.bf16 %v8838_v27  ;;  %v6001_v43 = vunpack.i.h.bf16 %v13679_v58  ;;  %2821 = vmatmul.f32.gmra.mxu0 %v9711_v52  ;;  %v13765_v47 = vunpack.i.l.bf16 %v13646_v51  ;;  %v13767_v28 = vld [vmem:[#allocation92_spill] sm:$0xff]  ;;  %v13780_v56 = vld [vmem:[#allocation95_spill] sm:$0xff] }
 0x695   :  { %2979 = vmatpush.msrb.mxu2 %v2500_v19  ;;  %2737 = vmatmul.f32.gmra.mxu1 %v9772_v14  ;;  %v2428_v39 = vsel %vm420_vm6, %v13763_v35, %v6005_v42  ;;  %v2496_v50 = vsel %vm420_vm6, %v13764_v29, %v6051_v49  ;;  %v13766_v0 = vunpack.i.h.bf16 %v9044_v55  ;;  %v5990_v34 = vunpack.i.l.bf16 %v13767_v28  ;;  %v9810_v55 = vld [vmem:[#allocation4 + $0x50] sm:$0xff] }
 0x696   :  { %2952 = vmatpush.msrb.mxu1 %v2428_v39  ;;  %2879 = vmatmul.f32.gmra.mxu2 %v9265_v57  ;;  %v2424_v1 = vsel %vm420_vm6, %v13765_v47, %v5816_v41  ;;  %v6041_v27 = vunpack.i.h.bf16 %v9195_v40  ;;  %v13768_v6 = vunpack.i.h.bf16 %v13653_v2  ;;  %v13769_v51 = vunpack.i.l.bf16 %v9005_v4  ;;  %v13772_v4 = vld [vmem:[#allocation79_spill] sm:$0xff] }
 0x697   :  { %2980 = vmatpush.msrb.mxu2 %v2496_v50  ;;  %v2492_v22 = vsel %vm420_vm6, %v13766_v0, %v5975_v25  ;;  %v5801_v59 = vunpack.i.h.bf16 %v13694_v26  ;;  %v5970_v21 = vunpack.i.l.bf16 %v9062_v32  ;;  %v13770_v10 = vunpack.i.l.bf16 %v13679_v58  ;;  %v13773_v49 = vld [vmem:[#allocation83_spill] sm:$0xff]  ;;  %2911 = vmatmul.f32.gmra.mxu3 %v9772_v14 }
 0x698   :  { %2953 = vmatpush.msrb.mxu1 %v2424_v1  ;;  %v2420_v24 = vsel %vm420_vm6, %v13768_v6, %v5805_v30  ;;  %v2488_v33 = vsel %vm420_vm6, %v13769_v51, %v5851_v60  ;;  %v13771_v2 = vunpack.i.h.bf16 %v8828_v15  ;;  %v5790_v42 = vunpack.i.l.bf16 %v13772_v4  ;;  %v13779_v25 = vld [vmem:[#allocation63_spill] sm:$0xff]  ;;  %v13783_v60 = vld [vmem:[#allocation90_spill] sm:$0xff] }
 0x699   :  { %2981 = vmatpush.msrb.mxu2 %v2492_v22  ;;  %v2416_v7 = vsel %vm420_vm6, %v13770_v10, %v6001_v43  ;;  %v5841_v17 = vunpack.i.h.bf16 %v13773_v49  ;;  %v13774_v5 = vunpack.i.h.bf16 %v9030_v3  ;;  %v13775_v58 = vunpack.i.l.bf16 %v9195_v40  ;;  %v13786_v43 = vld [vmem:[#allocation60_spill] sm:$0xff]  ;;  %v13790_v28 = vld [vmem:[#allocation67_spill] sm:$0xff] }
 0x69a   :  { %2954 = vmatpush.msrb.mxu1 %v2420_v24  ;;  %v2484_v20 = vsel %vm420_vm6, %v13771_v2, %v5775_v45  ;;  %v5671_v15 = vunpack.i.h.bf16 %v13705_v61  ;;  %v5770_v8 = vunpack.i.l.bf16 %v13776_v44  ;;  %v13777_v9 = vunpack.i.l.bf16 %v13694_v26 }
 0x69b   :  { %2982 = vmatpush.msrb.mxu2 %v2488_v33  ;;  %v2412_v32 = vsel %vm420_vm6, %v13774_v5, %v5990_v34  ;;  %v2480_v11 = vsel %vm420_vm6, %v13775_v58, %v6041_v27  ;;  %v13778_v41 = vunpack.i.h.bf16 %v13636_v16  ;;  %v5545_v38 = vunpack.i.l.bf16 %v13779_v25  ;;  %v13791_v27 = vld [vmem:[#allocation75_spill] sm:$0xff] }
 0x69c   :  { %2955 = vmatpush.msrb.mxu1 %v2416_v7  ;;  %2824 = vmatmul.f32.gmra.mxu0 %v9772_v14  ;;  %v2408_v3 = vsel %vm420_vm6, %v13777_v9, %v5801_v59  ;;  %v5966_v53 = vunpack.i.h.bf16 %v13780_v56  ;;  %v13781_v19 = vunpack.i.h.bf16 %v8700_v62  ;;  %v13782_v26 = vunpack.i.l.bf16 %v13773_v49  ;;  %v13797_v7 = vld [vmem:[#allocation76_spill] sm:$0xff] }
 0x69d   :  { %2983 = vmatpush.msrb.mxu2 %v2484_v20  ;;  %2740 = vmatmul.f32.gmra.mxu1 %v9810_v55  ;;  %v2476_v40 = vsel %vm420_vm6, %v13778_v41, %v5970_v21  ;;  %v5451_v16 = vunpack.i.h.bf16 %v13721_v37  ;;  %v5955_v35 = vunpack.i.l.bf16 %v13783_v60  ;;  %v13784_v39 = vunpack.i.l.bf16 %v13705_v61 }
 0x69e   :  { %2956 = vmatpush.msrb.mxu1 %v2412_v32  ;;  %2882 = vmatmul.f32.gmra.mxu2 %v9340_v12  ;;  %v2404_v13 = vsel %vm420_vm6, %v13781_v19, %v5790_v42  ;;  %v2472_v30 = vsel %vm420_vm6, %v13782_v26, %v5841_v17  ;;  %v13785_v50 = vunpack.i.h.bf16 %v13641_v31  ;;  %v5766_v45 = vunpack.i.h.bf16 %v13689_v63  ;;  %v13789_v31 = vld [vmem:[#allocation69_spill] sm:$0xff] }
 0x69f   :  { %2984 = vmatpush.msrb.mxu2 %v2480_v11  ;;  %v2400_v29 = vsel %vm420_vm6, %v13784_v39, %v5671_v15  ;;  %v13787_v47 = vunpack.i.h.bf16 %v13714_v23  ;;  %v13788_v0 = vunpack.i.l.bf16 %v13780_v56  ;;  %v5325_v22 = vunpack.i.l.bf16 %v13789_v31  ;;  %2914 = vmatmul.f32.gmra.mxu3 %v9810_v55 }
 0x6a0   :  { %2957 = vmatpush.msrb.mxu1 %v2408_v3  ;;  %v2468_v62 = vsel %vm420_vm6, %v13785_v50, %v5770_v8  ;;  %v5755_v34 = vunpack.i.l.bf16 %v13790_v28  ;;  %v13792_v6 = vunpack.i.l.bf16 %v13721_v37  ;;  %v13793_v24 = vunpack.i.h.bf16 %v13673_v46 }
 0x6a1   :  { %2985 = vmatpush.msrb.mxu2 %v2476_v40  ;;  %v2396_v1 = vsel %vm420_vm6, %v13787_v47, %v5545_v38  ;;  %v2464_v61 = vsel %vm420_vm6, %v13788_v0, %v5966_v53  ;;  %v13794_v33 = vunpack.i.h.bf16 %v13584_v18  ;;  %v13795_v21 = vunpack.i.l.bf16 %v13689_v63  ;;  %v13798_v18 = vld [vmem:[#allocation86_spill] sm:$0xff] }
 0x6a2   :  { %2958 = vmatpush.msrb.mxu1 %v2404_v13  ;;  %v2392_v23 = vsel %vm420_vm6, %v13792_v6, %v5451_v16  ;;  %v2460_v51 = vsel %vm420_vm6, %v13793_v24, %v5955_v35  ;;  %v13796_v37 = vunpack.i.h.bf16 %v13658_v36  ;;  %v13799_v36 = vld [vmem:[#allocation80_spill] sm:$0xff] }
 0x6a3   :  { %2986 = vmatpush.msrb.mxu2 %v2472_v30  ;;  %v2388_v59 = vsel %vm420_vm6, %v13794_v33, %v5325_v22  ;;  %v2456_v10 = vsel %vm420_vm6, %v13795_v21, %v5766_v45  ;;  %v13800_v30 = vld [vmem:[#allocation49_spill] sm:$0xff] }
 0x6a4   :  { %2959 = vmatpush.msrb.mxu1 %v2400_v29  ;;  %2827 = vmatmul.f32.gmra.mxu0 %v9810_v55  ;;  %v2452_v46 = vsel %vm420_vm6, %v13796_v37, %v5755_v34 }
 0x6a5   :  { %2987 = vmatpush.msrb.mxu2 %v2468_v62  ;;  %5082 = vmatmul.msk.f32.vlgmr.msra.gmra.mxu1 %vm2673_vm3, %v13786_v43 }
 0x6a6   :  { %2960 = vmatpush.msrb.mxu1 %v2396_v1  ;;  %2885 = vmatmul.f32.gmra.mxu2 %v13791_v27 }
 0x6a7   :  { %2988 = vmatpush.msrb.mxu2 %v2464_v61  ;;  %5090 = vmatmul.msk.f32.vlgmr.msrb.gmra.mxu3 %vm2673_vm3, %v13786_v43  ;;  %v13801_v61 = vld [vmem:[#allocation51_spill] sm:$0xff] }
 0x6a8   :  { %2961 = vmatpush.msrb.mxu1 %v2392_v23 }
 0x6a9   :  { %2989 = vmatpush.msrb.mxu2 %v2460_v51 }
 0x6aa   :  { %2962 = vmatpush.msrb.mxu1 %v2388_v59 }
 0x6ab   :  { %2990 = vmatpush.msrb.mxu2 %v2456_v10 }
 0x6ac   :  { %5086 = vmatmul.msk.f32.vlgmr.msrb.gmra.mxu0 %vm2673_vm3, %v13786_v43 }
 0x6ad   :  { %2991 = vmatpush.msrb.mxu2 %v2452_v46  ;;  %5083 = vmatmul.msk.f32.gmra.mxu1 %vm2673_vm3, %v13797_v7 }
 0x6ae   :  { %2992 = vmatmul.f32.vlgmr.msrb.gmra.mxu2 %v9606_v48 }
 0x6af   :  { %5091 = vmatmul.msk.f32.gmra.mxu3 %vm2673_vm3, %v13797_v7 }
 0x6b4   :  { %5087 = vmatmul.msk.f32.gmra.mxu0 %vm2673_vm3, %v13797_v7 }
 0x6b5   :  { %5084 = vmatmul.msk.f32.gmra.mxu1 %vm2673_vm3, %v13798_v18 }
 0x6b6   :  { %2995 = vmatmul.f32.gmra.mxu2 %v9711_v52 }
 0x6b7   :  { %5092 = vmatmul.msk.f32.gmra.mxu3 %vm2673_vm3, %v13798_v18 }
 0x6bc   :  { %5088 = vmatmul.msk.f32.gmra.mxu0 %vm2673_vm3, %v13798_v18 }
 0x6bd   :  { %5085 = vmatmul.msk.f32.gmra.mxu1 %vm2673_vm3, %v13799_v36 }
 0x6be   :  { %2998 = vmatmul.f32.gmra.mxu2 %v9772_v14 }
 0x6bf   :  { %5093 = vmatmul.msk.f32.gmra.mxu3 %vm2673_vm3, %v13799_v36 }
 0x6c4   :  { %5089 = vmatmul.msk.f32.gmra.mxu0 %vm2673_vm3, %v13799_v36 }
 0x6c5   :  { %2963 = vmatmul.f32.vlgmr.msrb.gmra.mxu1 %v9208_v54 }
 0x6c6   :  { %3001 = vmatmul.f32.gmra.mxu2 %v9810_v55 }
 0x6ca   :  { %v2790_v52 = vpop.f32.mrf.mxu3 }
 0x6cb   :  { %v2791_v35 = vadd.f32 %v2790_v52, %v13800_v30 }
 0x6cd   :  { %2966 = vmatmul.f32.gmra.mxu1 %v9265_v57 }
 0x6d2   :  { %v2793_v54 = vpop.f32.mrf.mxu3 }
 0x6d5   :  { %2969 = vmatmul.f32.gmra.mxu1 %v9340_v12 }
 0x6d8   :  { %v2703_v63 = vpop.f32.mrf.mxu0 }
 0x6d9   :  { %v2704_v16 = vadd.f32 %v2703_v63, %v13800_v30 }
 0x6da   :  { %v9919_v55 = vpop.f32.mrf.mxu3 }
 0x6dd   :  { %2972 = vmatmul.f32.gmra.mxu1 %v13791_v27  ;;  %v2794_v27 = vadd.f32 %v2793_v54, %v13801_v61 }
 0x6df   :  { %v2761_v48 = vpop.f32.mrf.mxu2 }
 0x6e0   :  { %v2706_v14 = vpop.f32.mrf.mxu0 }
 0x6e1   :  { %v2707_v31 = vadd.f32 %v2706_v14, %v13801_v61 }
 0x6e7   :  { %v2764_v2 = vpop.f32.mrf.mxu2 }
 0x6e8   :  { %v9915_v20 = vpop.f32.mrf.mxu0 }
 0x6ea   :  { %v9925_v12 = vpop.f32.mrf.mxu3 }
 0x6f0   :  { %v9921_v49 = vpop.f32.mrf.mxu0 }
 0x6f3   :  { %v9917_v42 = vpop.f32.mrf.mxu2 }
 0x6fb   :  { %v2732_v4 = vpop.f32.mrf.mxu1 }
 0x6fc   :  { %v2733_v29 = vadd.f32 %v2732_v4, %v2704_v16 }
 0x6fe   :  { %v9942_v1 = vadd.f32 %v2761_v48, %v2733_v29 }
 0x700   :  { %v3066_v24 = vmul.f32 %v9942_v1, %v9942_v1 }
 0x702   :  { %v9923_v17 = vpop.f32.mrf.mxu2 }
 0x705   :  { %v2735_v57 = vpop.f32.mrf.mxu1  ;;  %v2906_v11 = vpop.f32.mrf.mxu3 }
 0x706   :  { %v2736_v51 = vadd.f32 %v2735_v57, %v2707_v31 }
 0x708   :  { %v9963_v48 = vadd.f32 %v2764_v2, %v2736_v51 }
 0x709   :  { %v2819_v5 = vpop.f32.mrf.mxu0 }
 0x70a   :  { %v2820_v62 = vadd.f32 %v2819_v5, %v2791_v35  ;;  %v13802_v5 = vld [vmem:[#allocation27_spill] sm:$0xff] }
 0x711   :  { %v2877_v58 = vpop.f32.mrf.mxu2  ;;  %v2822_v15 = vpop.f32.mrf.mxu0 }
 0x712   :  { %v2738_v32 = vpop.f32.mrf.mxu1  ;;  %v2909_v9 = vpop.f32.mrf.mxu3  ;;  %v2878_v39 = vadd.f32 %v2877_v58, %v13800_v30  ;;  %v2823_v33 = vadd.f32 %v2822_v15, %v2794_v27  ;;  %v2710_v58 = vadd.f32 %v9915_v20, %v13802_v5 }
 0x714   :  { %v2907_v43 = vadd.f32 %v2906_v11, %v2878_v39 }
 0x719   :  { %v2880_v8 = vpop.f32.mrf.mxu2  ;;  %v2825_v41 = vpop.f32.mrf.mxu0 }
 0x71a   :  { %v9927_v44 = vpop.f32.mrf.mxu1  ;;  %v2912_v38 = vpop.f32.mrf.mxu3  ;;  %v2881_v22 = vadd.f32 %v2880_v8, %v13801_v61  ;;  %v2797_v8 = vadd.f32 %v9919_v55, %v13802_v5 }
 0x71c   :  { %v2910_v37 = vadd.f32 %v2909_v9, %v2881_v22  ;;  %v2826_v16 = vadd.f32 %v2825_v41, %v2797_v8 }
 0x721   :  { %v2883_v40 = vpop.f32.mrf.mxu2  ;;  %v9929_v56 = vpop.f32.mrf.mxu0 }
 0x722   :  { %v2848_v3 = vpop.f32.mrf.mxu1  ;;  %v9933_v13 = vpop.f32.mrf.mxu3  ;;  %v2884_v11 = vadd.f32 %v2883_v40, %v13802_v5 }
 0x723   :  { %v9940_v47 = vadd.f32 %v2848_v3, %v2820_v62 }
 0x724   :  { %v2913_v35 = vadd.f32 %v2912_v38, %v2884_v11 }
 0x725   :  { %v3067_v6 = vmul.f32 %v9940_v47, %v9940_v47  ;;  %v3042_v59 = vadd.f32 %v9940_v47, %v9942_v1 }
 0x727   :  { %v3082_v7 = vadd.f32 %v3067_v6, %v3066_v24 }
 0x729   :  { %v9931_v19 = vpop.f32.mrf.mxu2  ;;  %v2935_v26 = vpop.f32.mrf.mxu0 }
 0x72a   :  { %v2851_v25 = vpop.f32.mrf.mxu1  ;;  %v3022_v45 = vpop.f32.mrf.mxu3  ;;  %v9944_v0 = vadd.f32 %v2935_v26, %v2907_v43 }
 0x72b   :  { %v9958_v18 = vadd.f32 %v2851_v25, %v2823_v33  ;;  %v2739_v25 = vadd.f32 %v2738_v32, %v2710_v58 }
 0x72c   :  { %v3068_v21 = vmul.f32 %v9944_v0, %v9944_v0  ;;  %v3043_v36 = vadd.f32 %v3042_v59, %v9944_v0 }
 0x72d   :  { %v3071_v2 = vmul.f32 %v9958_v18, %v9958_v18  ;;  %v3047_v55 = vadd.f32 %v9958_v18, %v9963_v48  ;;  %v9989_v32 = vadd.f32 %v9917_v42, %v2739_v25 }
 0x72e   :  { %v3083_v57 = vadd.f32 %v3082_v7, %v3068_v21 }
 0x72f   :  { %v3074_v24 = vmul.f32 %v9989_v32, %v9989_v32 }
 0x731   :  { %v2993_v50 = vpop.f32.mrf.mxu2  ;;  %v2938_v28 = vpop.f32.mrf.mxu0 }
 0x732   :  { %v2854_v53 = vpop.f32.mrf.mxu1  ;;  %v3025_v52 = vpop.f32.mrf.mxu3  ;;  %v9965_v14 = vadd.f32 %v2938_v28, %v2910_v37 }
 0x733   :  { %v9984_v29 = vadd.f32 %v2854_v53, %v2826_v16 }
 0x734   :  { %v3072_v20 = vmul.f32 %v9965_v14, %v9965_v14  ;;  %v3048_v41 = vadd.f32 %v3047_v55, %v9965_v14 }
 0x735   :  { %v3052_v21 = vadd.f32 %v9984_v29, %v9989_v32 }
 0x739   :  { %v2996_v46 = vpop.f32.mrf.mxu2  ;;  %v2941_v26 = vpop.f32.mrf.mxu0 }
 0x73a   :  { %v9936_v60 = vpop.f32.mrf.mxu1  ;;  %v3028_v28 = vpop.f32.mrf.mxu3 }
 0x741   :  { %v2999_v62 = vpop.f32.mrf.mxu2  ;;  %v2944_v59 = vpop.f32.mrf.mxu0 }
 0x742   :  { %v2964_v34 = vpop.f32.mrf.mxu1 }
 0x743   :  { %v2965_v23 = vadd.f32 %v2964_v34, %v13800_v30  ;;  %v3070_v30 = vmul.f32 %v9963_v48, %v9963_v48  ;;  %v3075_v34 = vmul.f32 %v9984_v29, %v9984_v29 }
 0x745   :  { %v2994_v10 = vadd.f32 %v2993_v50, %v2965_v23  ;;  %v3087_v39 = vadd.f32 %v3071_v2, %v3070_v30 }
 0x747   :  { %v9961_v63 = vadd.f32 %v3022_v45, %v2994_v10  ;;  %v9992_v45 = vadd.f32 %v2941_v26, %v2913_v35  ;;  %v3088_v38 = vadd.f32 %v3087_v39, %v3072_v20  ;;  %v3092_v10 = vadd.f32 %v3075_v34, %v3074_v24 }
 0x749   :  { %v3069_v54 = vmul.f32 %v9961_v63, %v9961_v63  ;;  %v3044_v4 = vadd.f32 %v3043_v36, %v9961_v63 }
 0x74a   :  { %v2967_v15 = vpop.f32.mrf.mxu1 }
 0x74b   :  { %v2968_v9 = vadd.f32 %v2967_v15, %v13801_v61  ;;  %3045 = vadd.xlane.f32.xlu0 %v3044_v4  ;;  %v3084_v3 = vadd.f32 %v3083_v57, %v3069_v54  ;;  %v13803_v61 = vld [vmem:[#allocation50_spill] sm:$0xff]  ;;  %v3002_v54 = vpop.f32.mrf.mxu2 }
 0x74c   :  { %v2800_v31 = vadd.f32 %v9925_v12, %v13803_v61  ;;  %v2713_v53 = vadd.f32 %v9921_v49, %v13803_v61  ;;  %v2887_v22 = vadd.f32 %v9931_v19, %v13803_v61  ;;  %v3076_v19 = vmul.f32 %v9992_v45, %v9992_v45 }
 0x74d   :  { %v2997_v40 = vadd.f32 %v2996_v46, %v2968_v9  ;;  %3085 = vadd.xlane.f32.xlu1 %v3084_v3 }
 0x74e   :  { %v2742_v12 = vadd.f32 %v9927_v44, %v2713_v53  ;;  %v2829_v49 = vadd.f32 %v9929_v56, %v2800_v31  ;;  %v2916_v33 = vadd.f32 %v9933_v13, %v2887_v22  ;;  %v3053_v56 = vadd.f32 %v3052_v21, %v9992_v45 }
 0x74f   :  { %v9986_v50 = vadd.f32 %v3025_v52, %v2997_v40  ;;  %v3093_v36 = vadd.f32 %v3092_v10, %v3076_v19  ;;  %v13804_v40 = vld [vmem:[#allocation12_spill] sm:$0xff] }
 0x750   :  { %v10016_v37 = vadd.f32 %v9936_v60, %v2829_v49  ;;  %v10021_v44 = vadd.f32 %v9923_v17, %v2742_v12  ;;  %v10024_v7 = vadd.f32 %v2944_v59, %v2916_v33  ;;  %v3031_v17 = vpop.f32.mrf.mxu3 }
 0x751   :  { %v3073_v43 = vmul.f32 %v9986_v50, %v9986_v50  ;;  %v3049_v23 = vadd.f32 %v3048_v41, %v9986_v50 }
 0x752   :  { %v2970_v42 = vpop.f32.mrf.mxu1  ;;  %v3079_v4 = vmul.f32 %v10016_v37, %v10016_v37  ;;  %v3078_v58 = vmul.f32 %v10021_v44, %v10021_v44  ;;  %v3080_v11 = vmul.f32 %v10024_v7, %v10024_v7  ;;  %v3057_v8 = vadd.f32 %v10016_v37, %v10021_v44 }
 0x753   :  { %v2971_v27 = vadd.f32 %v2970_v42, %v13802_v5  ;;  %v3089_v6 = vadd.f32 %v3088_v38, %v3073_v43 }
 0x754   :  { %v3097_v2 = vadd.f32 %v3079_v4, %v3078_v58  ;;  %v3058_v3 = vadd.f32 %v3057_v8, %v10024_v7 }
 0x755   :  { %v3000_v51 = vadd.f32 %v2999_v62, %v2971_v27  ;;  %3090 = vadd.xlane.f32.xlu2 %v3089_v6  ;;  %3050 = vadd.xlane.f32.xlu1 %v3049_v23 }
 0x756   :  { %v3098_v26 = vadd.f32 %v3097_v2, %v3080_v11 }
 0x757   :  { %v10018_v46 = vadd.f32 %v3028_v28, %v3000_v51 }
 0x759   :  { %v3077_v13 = vmul.f32 %v10018_v46, %v10018_v46  ;;  %v3054_v57 = vadd.f32 %v3053_v56, %v10018_v46 }
 0x75a   :  { %v2973_v52 = vpop.f32.mrf.mxu1 }
 0x75b   :  { %v2974_v60 = vadd.f32 %v2973_v52, %v13803_v61  ;;  %v3094_v5 = vadd.f32 %v3093_v36, %v3077_v13 }
 0x75d   :  { %v3003_v15 = vadd.f32 %v3002_v54, %v2974_v60  ;;  %3055 = vadd.xlane.f32.xlu2 %v3054_v57  ;;  %3095 = vadd.xlane.f32.xlu0 %v3094_v5  ;;  %v3034_v54 = vld [vmem:[%s12924_s10] sm:$0xff] }
 0x75f   :  { %v10038_v9 = vadd.f32 %v3031_v17, %v3003_v15 }
 0x761   :  { %v3081_v25 = vmul.f32 %v10038_v9, %v10038_v9  ;;  %v3059_v16 = vadd.f32 %v3058_v3, %v10038_v9 }
 0x763   :  { %v3099_v30 = vadd.f32 %v3098_v26, %v3081_v25  ;;  %v3035_v26 = vld [vmem:[%s12924_s10 + $0x8] sm:$0xff] }
 0x765   :  { %3100 = vadd.xlane.f32.xlu1 %v3099_v30  ;;  %3060 = vadd.xlane.f32.xlu0 %v3059_v16 }
 0x7be   :  { %v3046_v20 = vpop.xlane.xlu0 %3045 }
 0x7bf   :  { %v3062_v35 = vmul.f32 %v3046_v20, %v13804_v40  ;;  %v3038_v20 = vld [vmem:[%s12925_s11] sm:$0xff] }
 0x7c0   :  { %v3086_v55 = vpop.xlane.xlu1 %3085 }
 0x7c1   :  { %v3106_v39 = vmul.f32 %v3062_v35, %v3062_v35  ;;  %v3102_v62 = vmul.f32 %v3086_v55, %v13804_v40 }
 0x7c3   :  { %v3110_v41 = vsub.f32 %v3102_v62, %v3106_v39 }
 0x7c5   :  { %v3114_v43 = vadd.f32 1e-05, %v3110_v41 }
 0x7c7   :  { %6913 = vrsqrt.f32 %v3114_v43  ;;  %vm3124_vm9 = vweird.f32 %v3114_v43 }
 0x7c8   :  { %v3091_v38 = vpop.xlane.xlu2 %3090  ;;  %v3051_v61 = vpop.xlane.xlu1 %3050 }
 0x7c9   :  { %v3063_v31 = vmul.f32 %v3051_v61, %v13804_v40  ;;  %v3103_v53 = vmul.f32 %v3091_v38, %v13804_v40 }
 0x7cb   :  { %v3107_v22 = vmul.f32 %v3063_v31, %v3063_v31 }
 0x7cd   :  { %v6914_v42 = vpop.eup %6913  ;;  %v3111_v28 = vsub.f32 %v3103_v53, %v3107_v22 }
 0x7ce   :  { %v3119_v34 = vmul.f32 %v6914_v42, %v3114_v43  ;;  %vm3125_vm7 = vweird.f32 %v6914_v42 }
 0x7cf   :  { %v3115_v27 = vadd.f32 1e-05, %v3111_v28  ;;  %vm3126_vm10 = vmor %vm3124_vm9, %vm3125_vm7 }
 0x7d0   :  { %v3120_v6 = vmul.f32 %v6914_v42, %v3119_v34  ;;  %v3056_v23 = vpop.xlane.xlu2 %3055  ;;  %v3096_v24 = vpop.xlane.xlu0 %3095 }
 0x7d1   :  { %6915 = vrsqrt.f32 %v3115_v27  ;;  %v3064_v12 = vmul.f32 %v3056_v23, %v13804_v40  ;;  %v3104_v51 = vmul.f32 %v3096_v24, %v13804_v40  ;;  %vm3134_vm1 = vweird.f32 %v3115_v27 }
 0x7d2   :  { %v3121_v49 = vmul.f32 0.5, %v3120_v6 }
 0x7d3   :  { %v3108_v19 = vmul.f32 %v3064_v12, %v3064_v12 }
 0x7d4   :  { %v3122_v33 = vsub.f32 1.5, %v3121_v49 }
 0x7d5   :  { %v3112_v59 = vsub.f32 %v3104_v51, %v3108_v19  ;;  %v3037_v51 = vld [vmem:[%s12924_s10 + $0x18] sm:$0xff] }
 0x7d6   :  { %v3123_v56 = vmul.f32 %v6914_v42, %v3122_v33 }
 0x7d7   :  { %v6916_v21 = vpop.eup %6915  ;;  %v3116_v10 = vadd.f32 1e-05, %v3112_v59 }
 0x7d8   :  { %v3129_v13 = vmul.f32 %v6916_v21, %v3115_v27  ;;  %v3101_v36 = vpop.xlane.xlu1 %3100  ;;  %v3061_v52 = vpop.xlane.xlu0 %3060  ;;  %v3127_v57 = vsel %vm3126_vm10, %v6914_v42, %v3123_v56  ;;  %vm3135_vm11 = vweird.f32 %v6916_v21  ;;  %v3036_v42 = vld [vmem:[%s12924_s10 + $0x10] sm:$0xff] }
 0x7d9   :  { %6917 = vrsqrt.f32 %v3116_v10  ;;  %v3065_v4 = vmul.f32 %v3061_v52, %v13804_v40  ;;  %v3105_v5 = vmul.f32 %v3101_v36, %v13804_v40  ;;  %v3158_v58 = vmul.f32 %v3127_v57, %v3034_v54  ;;  %vm3136_vm7 = vmor %vm3134_vm1, %vm3135_vm11 }
 0x7da   :  { %v3130_v60 = vmul.f32 %v6916_v21, %v3129_v13  ;;  %vm3144_vm10 = vweird.f32 %v3116_v10 }
 0x7db   :  { %v3109_v17 = vmul.f32 %v3065_v4, %v3065_v4  ;;  %3164 = vperm.xlu2 %5121, %v3158_v58   ;;  %v3198_v25 = vmul.f32 %v3158_v58, %v3062_v35  ;;  %v3039_v35 = vld [vmem:[%s12925_s11 + $0x8] sm:$0xff] }
 0x7dc   :  { %v3131_v11 = vmul.f32 0.5, %v3130_v60 }
 0x7dd   :  { %v3113_v15 = vsub.f32 %v3105_v5, %v3109_v17  ;;  %v3202_v62 = vsub.f32 %v3038_v20, %v3198_v25  ;;  %v13805_v25 = vld [vmem:[#allocation36_spill] sm:$0xff] }
 0x7de   :  { %v3132_v8 = vsub.f32 1.5, %v3131_v11 }
 0x7df   :  { %v6918_v2 = vpop.eup %6917  ;;  %v3117_v3 = vadd.f32 1e-05, %v3113_v15 }
 0x7e0   :  { %v3133_v30 = vmul.f32 %v6916_v21, %v3132_v8  ;;  %v3139_v16 = vmul.f32 %v6918_v2, %v3116_v10  ;;  %vm3145_vm9 = vweird.f32 %v6918_v2  ;;  %v3041_v10 = vld [vmem:[%s12925_s11 + $0x18] sm:$0xff] }
 0x7e1   :  { %6919 = vrsqrt.f32 %v3117_v3  ;;  %vm3146_vm11 = vmor %vm3144_vm10, %vm3145_vm9 }
 0x7e2   :  { %v3137_v40 = vsel %vm3136_vm7, %v6916_v21, %v3133_v30  ;;  %v3140_v55 = vmul.f32 %v6918_v2, %v3139_v16  ;;  %vm3154_vm7 = vweird.f32 %v3117_v3  ;;  %v13806_v16 = vld [vmem:[#allocation17_spill] sm:$0xff] }
 0x7e3   :  { %v3159_v39 = vmul.f32 %v3137_v40, %v3035_v26  ;;  %3208 = vperm.xlu2 %5121, %v3202_v62   ;;  %v13808_v62 = vld [vmem:[#allocation32_spill] sm:$0xff] }
 0x7e4   :  { %v3141_v41 = vmul.f32 0.5, %v3140_v55  ;;  %v13807_v55 = vld [vmem:[#allocation29_spill] sm:$0xff] }
 0x7e5   :  { %v3199_v43 = vmul.f32 %v3159_v39, %v3063_v31  ;;  %3169 = vperm.xlu0 %5119, %v3159_v39   ;;  %v3040_v31 = vld [vmem:[%s12925_s11 + $0x10] sm:$0xff] }
 0x7e6   :  { %v3142_v38 = vsub.f32 1.5, %v3141_v41  ;;  %v13809_v41 = vld [vmem:[#allocation33_spill] sm:$0xff] }
 0x7e7   :  { %v6920_v61 = vpop.eup %6919  ;;  %v3203_v53 = vsub.f32 %v3039_v35, %v3199_v43 }
 0x7e8   :  { %v3149_v22 = vmul.f32 %v6920_v61, %v3117_v3  ;;  %v3143_v28 = vmul.f32 %v6918_v2, %v3142_v38  ;;  %vm3155_vm1 = vweird.f32 %v6920_v61  ;;  %v13810_v38 = vld [vmem:[#allocation13_spill] sm:$0xff] }
 0x7e9   :  { %3213 = vperm.xlu1 %5120, %v3203_v53   ;;  %vm3156_vm9 = vmor %vm3154_vm7, %vm3155_vm1  ;;  %v13811_v53 = vld [vmem:[#allocation37_spill] sm:$0xff] }
 0x7ea   :  { %v3150_v34 = vmul.f32 %v6920_v61, %v3149_v22  ;;  %v3147_v27 = vsel %vm3146_vm11, %v6918_v2, %v3143_v28 }
 0x7eb   :  { %v3160_v6 = vmul.f32 %v3147_v27, %v3036_v42  ;;  %v13812_v42 = vld [vmem:[#allocation38_spill] sm:$0xff] }
 0x7ec   :  { %v3151_v23 = vmul.f32 0.5, %v3150_v34 }
 0x7ed   :  { %v3200_v24 = vmul.f32 %v3160_v6, %v3064_v12 }
 0x7ee   :  { %v3152_v49 = vsub.f32 1.5, %v3151_v23  ;;  %v13813_v23 = vld [vmem:[#allocation39_spill] sm:$0xff] }
 0x7ef   :  { %v3204_v19 = vsub.f32 %v3040_v31, %v3200_v24  ;;  %v13814_v24 = vld [vmem:[#allocation24_spill] sm:$0xff] }
 0x7f0   :  { %v3153_v33 = vmul.f32 %v6920_v61, %v3152_v49 }
 0x7f1   :  { %3174 = vperm.xlu1 %5120, %v3160_v6   ;;  %3218 = vperm.xlu0 %5119, %v3204_v19   ;;  %v13815_v19 = vld [vmem:[#allocation34_spill] sm:$0xff] }
 0x7f2   :  { %v3157_v59 = vsel %vm3156_vm9, %v6920_v61, %v3153_v33  ;;  %v13816_v33 = vld [vmem:[#allocation35_spill] sm:$0xff] }
 0x7f3   :  { %v3161_v21 = vmul.f32 %v3157_v59, %v3037_v51 }
 0x7f5   :  { %v3201_v56 = vmul.f32 %v3161_v21, %v3065_v4 }
 0x7f7   :  { %v3205_v12 = vsub.f32 %v3041_v10, %v3201_v56  ;;  %v13818_v56 = vld [vmem:[#allocation40_spill] sm:$0xff] }
 0x7f9   :  { %3179 = vperm.xlu0 %5119, %v3161_v21   ;;  %3223 = vperm.xlu2 %5121, %v3205_v12   ;;  %v13817_v21 = vld [vmem:[#allocation16_spill] sm:$0xff] }
 0x835   :  { %v3165_v13 = vpop.permute.xlu2 %3164 }
 0x836   :  { %v3182_v36 = vmul.f32 %v3165_v13, %v9942_v1  ;;  %v3183_v52 = vmul.f32 %v3165_v13, %v9940_v47  ;;  %v3184_v54 = vmul.f32 %v3165_v13, %v9944_v0  ;;  %v3185_v60 = vmul.f32 %v3165_v13, %v9961_v63 }
 0x83d   :  { %v3209_v57 = vpop.permute.xlu2 %3208 }
 0x83e   :  { %v3226_v5 = vadd.f32 %v3209_v57, %v3182_v36  ;;  %v3227_v17 = vadd.f32 %v3209_v57, %v3183_v52  ;;  %v3228_v58 = vadd.f32 %v3209_v57, %v3184_v54  ;;  %v3229_v11 = vadd.f32 %v3209_v57, %v3185_v60  ;;  %v13819_v60 = vld [vmem:[#allocation41_spill] sm:$0xff] }
 0x840   :  { %vm3242_vm10 = vcmp.ge.f32.partialorder %v3226_v5, 0.0  ;;  %vm3243_vm11 = vcmp.ge.f32.partialorder %v3227_v17, 0.0  ;;  %vm3244_vm1 = vcmp.ge.f32.partialorder %v3228_v58, 0.0  ;;  %vm3245_vm7 = vcmp.ge.f32.partialorder %v3229_v11, 0.0 }
 0x841   :  { %v3258_v4 = vmul.f32 0.2, %v3226_v5  ;;  %v3259_v15 = vmul.f32 0.2, %v3227_v17  ;;  %v3260_v8 = vmul.f32 0.2, %v3228_v58 }
 0x842   :  { %v3261_v2 = vmul.f32 0.2, %v3229_v11 }
 0x843   :  { %v10080_v1 = vsel %vm3242_vm10, %v3226_v5, %v3258_v4  ;;  %v10082_v47 = vsel %vm3243_vm11, %v3227_v17, %v3259_v15  ;;  %v10084_v0 = vsel %vm3244_vm1, %v3228_v58, %v3260_v8  ;;  %v13820_v5 = vld [vmem:[#allocation42_spill] sm:$0xff] }
 0x844   :  { %v10086_v63 = vsel %vm3245_vm7, %v3229_v11, %v3261_v2  ;;  %3290 = vst [vmem:[#allocation2 + $0x70] sm:$0xff] %v10080_v1  ;;  %v6072_v3 = vpack.i.bf16 %v10082_v47, %v10080_v1  ;;  %v3372_v26 = vmul.f32 %v10084_v0, %v13805_v25  ;;  %v3350_v39 = vmul.f32 %v10080_v1, %v13807_v55  ;;  %v13821_v2 = vld [vmem:[#allocation44_spill] sm:$0xff] }
 0x845   :  { %3291 = vst [vmem:[#allocation2 + $0x78] sm:$0xff] %v10082_v47  ;;  %v6077_v30 = vpack.i.bf16 %v10086_v63, %v10084_v0  ;;  %v3373_v20 = vmul.f32 %v10086_v63, %v13806_v16  ;;  %v3351_v35 = vmul.f32 %v10082_v47, %v13808_v62  ;;  %v3352_v43 = vmul.f32 %v10084_v0, %v13809_v41 }
 0x846   :  { %3292 = vst [vmem:[#allocation2 + $0x90] sm:$0xff] %v10084_v0  ;;  %6073 = vrot.lane.b32.xlu1 %v6072_v3, %s6978_s28  ;;  %v3353_v61 = vmul.f32 %v10086_v63, %v13810_v38  ;;  %v3390_v22 = vmul.f32 %v10080_v1, %v13811_v53  ;;  %v3391_v28 = vmul.f32 %v10082_v47, %v13812_v42 }
 0x847   :  { %3293 = vst [vmem:[#allocation2 + $0x80] sm:$0xff] %v10086_v63  ;;  %6078 = vrot.lane.b32.xlu0 %v6077_v30, %s6978_s28  ;;  %v6097_v40 = vpack.i.bf16 %v3373_v20, %v3372_v26  ;;  %v6082_v34 = vpack.i.bf16 %v3351_v35, %v3350_v39  ;;  %v3392_v31 = vmul.f32 %v10084_v0, %v13813_v23  ;;  %v13822_v26 = vld [vmem:[#allocation45_spill] sm:$0xff] }
 0x848   :  { %v6087_v27 = vpack.i.bf16 %v3353_v61, %v3352_v43  ;;  %v6102_v6 = vpack.i.bf16 %v3391_v28, %v3390_v22  ;;  %v3393_v49 = vmul.f32 %v10086_v63, %v13814_v24  ;;  %v3370_v51 = vmul.f32 %v10080_v1, %v13815_v19  ;;  %v13823_v43 = vld [vmem:[#allocation47_spill] sm:$0xff]  ;;  %v10149_v61 = vld [vmem:[#allocation2 + $0x38] sm:$0xff]  ;;  %v13825_v22 = vld [vmem:[#allocation10_spill] sm:$0xff] }
 0x849   :  { %6098 = vrot.lane.b32.xlu2 %v6097_v40, %s6994_s5  ;;  %v3371_v59 = vmul.f32 %v10082_v47, %v13816_v33  ;;  %v3429_v10 = vmul.f32 %v10080_v1, %v13817_v21  ;;  %v3430_v12 = vmul.f32 %v10082_v47, %v13818_v56  ;;  %v3431_v57 = vmul.f32 %v10084_v0, %v13819_v60 }
 0x84a   :  { %v6107_v13 = vpack.i.bf16 %v3393_v49, %v3392_v31  ;;  %v3432_v17 = vmul.f32 %v10086_v63, %v13820_v5  ;;  %v3451_v3 = vmul.f32 %v10084_v0, %v13821_v2  ;;  %v3452_v30 = vmul.f32 %v10086_v63, %v13822_v26  ;;  %v13843_v26 = vld [vmem:[#allocation54_spill] sm:$0xff] }
 0x84b   :  { %v6092_v52 = vpack.i.bf16 %v3371_v59, %v3370_v51  ;;  %v6112_v54 = vpack.i.bf16 %v3430_v12, %v3429_v10  ;;  %v10153_v28 = vmul.f32 %v10149_v61, %v13825_v22  ;;  %v13826_v51 = vld [vmem:[#allocation19_spill] sm:$0xff] }
 0x84c   :  { %v6127_v31 = vpack.i.bf16 %v3452_v30, %v3451_v3  ;;  %v3449_v59 = vmul.f32 %v10080_v1, %v13826_v51  ;;  %v13827_v10 = vld [vmem:[#allocation43_spill] sm:$0xff]  ;;  %v13834_v3 = vld [vmem:[#allocation22_spill] sm:$0xff] }
 0x84d   :  { %v3450_v12 = vmul.f32 %v10082_v47, %v13827_v10  ;;  %v10183_v30 = vmul.f32 %v10149_v61, %v13834_v3  ;;  %v13841_v3 = vld [vmem:[#allocation28_spill] sm:$0xff] }
 0x84e   :  { %6083 = vrot.lane.b32.xlu1 %v6082_v34, %s6981_s16 }
 0x84f   :  { %6088 = vrot.lane.b32.xlu0 %v6087_v27, %s6981_s16  ;;  %13835 = vst [vmem:[#allocation81_spill] sm:$0xff] %v10183_v30  ;;  %v3492_v30 = vmul.f32 %v10086_v63, %v13841_v3 }
 0x851   :  { %6103 = vrot.lane.b32.xlu2 %v6102_v6, %s6979_s0 }
 0x856   :  { %6108 = vrot.lane.b32.xlu1 %v6107_v13, %s6979_s0  ;;  %v13828_v13 = vld [vmem:[#allocation18_spill] sm:$0xff] }
 0x857   :  { %v3170_v36 = vpop.permute.xlu0 %3169  ;;  %6093 = vrot.lane.b32.xlu0 %v6092_v52, %s6994_s5 }
 0x858   :  { %v3186_v58 = vmul.f32 %v3170_v36, %v9963_v48  ;;  %v3187_v11 = vmul.f32 %v3170_v36, %v9958_v18  ;;  %v3188_v4 = vmul.f32 %v3170_v36, %v9965_v14  ;;  %v3189_v15 = vmul.f32 %v3170_v36, %v9986_v50  ;;  %v13824_v14 = vld [vmem:[#allocation48_spill] sm:$0xff] }
 0x859   :  { %6113 = vrot.lane.b32.xlu2 %v6112_v54, %s6989_s2  ;;  %v6117_v48 = vpack.i.bf16 %v3432_v17, %v3431_v57  ;;  %v3471_v18 = vmul.f32 %v10084_v0, %v13823_v43  ;;  %v3472_v50 = vmul.f32 %v10086_v63, %v13824_v14  ;;  %v10162_v36 = vmul.f32 %v10149_v61, %v13828_v13  ;;  %v13839_v13 = vld [vmem:[#allocation30_spill] sm:$0xff] }
 0x85b   :  { %v3214_v8 = vpop.permute.xlu1 %3213  ;;  %v6137_v17 = vpack.i.bf16 %v3472_v50, %v3471_v18  ;;  %v13838_v50 = vld [vmem:[#allocation20_spill] sm:$0xff] }
 0x85c   :  { %v3230_v20 = vadd.f32 %v3214_v8, %v3186_v58  ;;  %v3231_v40 = vadd.f32 %v3214_v8, %v3187_v11  ;;  %v3232_v39 = vadd.f32 %v3214_v8, %v3188_v4  ;;  %v3233_v35 = vadd.f32 %v3214_v8, %v3189_v15  ;;  %v13832_v11 = vld [vmem:[#allocation14_spill] sm:$0xff]  ;;  %v13833_v15 = vld [vmem:[#allocation15_spill] sm:$0xff] }
 0x85d   :  { %v10175_v4 = vmul.f32 %v10149_v61, %v13832_v11  ;;  %v10179_v8 = vmul.f32 %v10149_v61, %v13833_v15  ;;  %v3489_v22 = vmul.f32 %v10080_v1, %v13838_v50  ;;  %v13840_v11 = vld [vmem:[#allocation31_spill] sm:$0xff] }
 0x85e   :  { %vm3246_vm9 = vcmp.ge.f32.partialorder %v3230_v20, 0.0  ;;  %vm3247_vm10 = vcmp.ge.f32.partialorder %v3231_v40, 0.0  ;;  %vm3248_vm11 = vcmp.ge.f32.partialorder %v3232_v39, 0.0  ;;  %vm3249_vm1 = vcmp.ge.f32.partialorder %v3233_v35, 0.0  ;;  %6118 = vrot.lane.b32.xlu1 %v6117_v48, %s6989_s2  ;;  %v13837_v48 = vld [vmem:[#allocation46_spill] sm:$0xff] }
 0x85f   :  { %v3262_v34 = vmul.f32 0.2, %v3230_v20  ;;  %v3263_v27 = vmul.f32 0.2, %v3231_v40  ;;  %v3264_v6 = vmul.f32 0.2, %v3232_v39  ;;  %6128 = vrot.lane.b32.xlu0 %v6127_v31, %s6990_s3  ;;  %v3470_v18 = vmul.f32 %v10082_v47, %v13837_v48 }
 0x860   :  { %v3265_v49 = vmul.f32 0.2, %v3233_v35  ;;  %v3491_v15 = vmul.f32 %v10084_v0, %v13840_v11 }
 0x861   :  { %v10164_v52 = vsel %vm3246_vm9, %v3230_v20, %v3262_v34  ;;  %v10166_v54 = vsel %vm3247_vm10, %v3231_v40, %v3263_v27  ;;  %v10168_v57 = vsel %vm3248_vm11, %v3232_v39, %v3264_v6  ;;  %6138 = vrot.lane.b32.xlu2 %v6137_v17, %s6992_s8  ;;  %v13836_v39 = vld [vmem:[#allocation25_spill] sm:$0xff]  ;;  %v3490_v17 = vmul.f32 %v10082_v47, %v13839_v13 }
 0x862   :  { %13829 = vst [vmem:[#allocation84_spill] sm:$0xff] %v10164_v52  ;;  %v10171_v58 = vsel %vm3249_vm1, %v3233_v35, %v3265_v49  ;;  %v3469_v35 = vmul.f32 %v10080_v1, %v13836_v39  ;;  %v6122_v49 = vpack.i.bf16 %v3450_v12, %v3449_v59  ;;  %v13844_v59 = vld [vmem:[#allocation11_spill] sm:$0xff] }
 0x863   :  { %13830 = vst [vmem:[#allocation94_spill] sm:$0xff] %v10166_v54  ;;  %v3175_v20 = vpop.permute.xlu1 %3174  ;;  %v3219_v40 = vpop.permute.xlu0 %3218  ;;  %v3333_v12 = vmul.f32 %v10086_v63, %v13844_v59  ;;  %v13847_v63 = vld [vmem:[#allocation21_spill] sm:$0xff] }
 0x864   :  { %13831 = vst [vmem:[#allocation70_spill] sm:$0xff] %v10168_v57  ;;  %v3190_v34 = vmul.f32 %v3175_v20, %v9989_v32  ;;  %v3191_v27 = vmul.f32 %v3175_v20, %v9984_v29  ;;  %v3192_v6 = vmul.f32 %v3175_v20, %v9992_v45  ;;  %v3193_v31 = vmul.f32 %v3175_v20, %v10018_v46  ;;  %v13842_v29 = vld [vmem:[#allocation56_spill] sm:$0xff] }
 0x865   :  { %v6132_v51 = vpack.i.bf16 %v3470_v18, %v3469_v35  ;;  %v3331_v45 = vmul.f32 %v10082_v47, %v13842_v29  ;;  %v3332_v46 = vmul.f32 %v10084_v0, %v13843_v26  ;;  %v13845_v47 = vld [vmem:[#allocation55_spill] sm:$0xff] }
 0x866   :  { %v3234_v48 = vadd.f32 %v3219_v40, %v3190_v34  ;;  %v3235_v39 = vadd.f32 %v3219_v40, %v3191_v27  ;;  %v3236_v50 = vadd.f32 %v3219_v40, %v3192_v6  ;;  %v3237_v32 = vadd.f32 %v3219_v40, %v3193_v31  ;;  %6123 = vrot.lane.b32.xlu1 %v6122_v49, %s6990_s3  ;;  %v13846_v0 = vld [vmem:[#allocation23_spill] sm:$0xff] }
 0x867   :  { %6133 = vrot.lane.b32.xlu0 %v6132_v51, %s6992_s8  ;;  %v6142_v40 = vpack.i.bf16 %v3490_v17, %v3489_v22  ;;  %v3330_v18 = vmul.f32 %v10080_v1, %v13845_v47  ;;  %v10214_v6 = vmul.f32 %v10149_v61, %v13846_v0  ;;  %v10218_v31 = vmul.f32 %v10149_v61, %v13847_v63  ;;  %v13849_v22 = vld [vmem:[#allocation26_spill] sm:$0xff] }
 0x868   :  { %vm3250_vm7 = vcmp.ge.f32.partialorder %v3234_v48, 0.0  ;;  %vm3251_vm9 = vcmp.ge.f32.partialorder %v3235_v39, 0.0  ;;  %vm3252_vm10 = vcmp.ge.f32.partialorder %v3236_v50, 0.0  ;;  %vm3253_vm11 = vcmp.ge.f32.partialorder %v3237_v32, 0.0 }
 0x869   :  { %v3266_v20 = vmul.f32 0.2, %v3234_v48  ;;  %v3267_v34 = vmul.f32 0.2, %v3235_v39  ;;  %v3268_v27 = vmul.f32 0.2, %v3236_v50  ;;  %6143 = vrot.lane.b32.xlu2 %v6142_v40, %s6991_s23  ;;  %v10229_v1 = vmul.f32 %v10149_v61, %v13849_v22 }
 0x86a   :  { %v3269_v35 = vmul.f32 0.2, %v3237_v32  ;;  %13848 = vst [vmem:[#allocation97_spill] sm:$0xff] %v10218_v31  ;;  %v6152_v22 = vpack.i.bf16 %v3330_v18, %v10153_v28  ;;  %v10264_v18 = vmul.f32 %v10168_v57, %v13809_v41 }
 0x86b   :  { %v10220_v3 = vsel %vm3250_vm7, %v3234_v48, %v3266_v20  ;;  %v10222_v49 = vsel %vm3251_vm9, %v3235_v39, %v3267_v34  ;;  %v10224_v14 = vsel %vm3252_vm10, %v3236_v50, %v3268_v27  ;;  %v3180_v51 = vpop.permute.xlu0 %3179  ;;  %13850 = vst [vmem:[#allocation65_spill] sm:$0xff] %v10229_v1  ;;  %v3224_v39 = vpop.permute.xlu2 %3223  ;;  %v6147_v20 = vpack.i.bf16 %v3492_v30, %v3491_v15 }
 0x86c   :  { %v10232_v17 = vsel %vm3253_vm11, %v3237_v32, %v3269_v35  ;;  %v3194_v0 = vmul.f32 %v3180_v51, %v10021_v44  ;;  %v3195_v63 = vmul.f32 %v3180_v51, %v10016_v37  ;;  %v3196_v48 = vmul.f32 %v3180_v51, %v10024_v7 }
 0x86d   :  { %v3197_v50 = vmul.f32 %v3180_v51, %v10038_v9  ;;  %v6157_v34 = vpack.i.bf16 %v3332_v46, %v3331_v45  ;;  %v6162_v27 = vpack.i.bf16 %v10153_v28, %v3333_v12  ;;  %v3358_v44 = vmul.f32 %v10171_v58, %v13810_v38 }
 0x86e   :  { %v3238_v40 = vadd.f32 %v3224_v39, %v3194_v0  ;;  %v3239_v31 = vadd.f32 %v3224_v39, %v3195_v63  ;;  %v3240_v61 = vadd.f32 %v3224_v39, %v3196_v48  ;;  %v10244_v37 = vmul.f32 %v10166_v54, %v13816_v33  ;;  %6148 = vrot.lane.b32.xlu1 %v6147_v20, %s6991_s23 }
 0x86f   :  { %v3241_v32 = vadd.f32 %v3224_v39, %v3197_v50  ;;  %v10248_v7 = vmul.f32 %v10168_v57, %v13805_v25  ;;  %6158 = vrot.lane.b32.xlu0 %v6157_v34, %s6986_s22  ;;  %v10254_v45 = vmul.f32 %v10164_v52, %v13807_v55  ;;  %v10260_v35 = vmul.f32 %v10166_v54, %v13808_v62 }
 0x870   :  { %vm3254_vm1 = vcmp.ge.f32.partialorder %v3238_v40, 0.0  ;;  %vm3255_vm7 = vcmp.ge.f32.partialorder %v3239_v31, 0.0  ;;  %vm3256_vm9 = vcmp.ge.f32.partialorder %v3240_v61, 0.0  ;;  %v3270_v9 = vmul.f32 0.2, %v3238_v40 }
 0x871   :  { %vm3257_vm10 = vcmp.ge.f32.partialorder %v3241_v32, 0.0  ;;  %v3271_v30 = vmul.f32 0.2, %v3239_v31  ;;  %v3272_v15 = vmul.f32 0.2, %v3240_v61  ;;  %6163 = vrot.lane.b32.xlu2 %v6162_v27, %s6986_s22  ;;  %v10273_v63 = vmul.f32 %v10164_v52, %v13811_v53 }
 0x872   :  { %v3273_v46 = vmul.f32 0.2, %v3241_v32  ;;  %v10256_v12 = vsel %vm3254_vm1, %v3238_v40, %v3270_v9  ;;  %v6167_v39 = vpack.i.bf16 %v10166_v54, %v10164_v52  ;;  %v10281_v50 = vmul.f32 %v10171_v58, %v13806_v16 }
 0x873   :  { %v10266_v51 = vsel %vm3255_vm7, %v3239_v31, %v3271_v30  ;;  %v10268_v0 = vsel %vm3256_vm9, %v3240_v61, %v3272_v15  ;;  %v10285_v31 = vmul.f32 %v10164_v52, %v13817_v21  ;;  %v6172_v20 = vpack.i.bf16 %v10171_v58, %v10168_v57 }
 0x874   :  { %v10275_v48 = vsel %vm3257_vm10, %v3241_v32, %v3273_v46  ;;  %v10291_v34 = vmul.f32 %v10164_v52, %v13815_v19  ;;  %v10295_v27 = vmul.f32 %v10166_v54, %v13827_v10  ;;  %v10299_v40 = vmul.f32 %v10168_v57, %v13821_v2 }
 0x875   :  { %v6187_v61 = vpack.i.bf16 %v10175_v4, %v3358_v44  ;;  %v6197_v32 = vpack.i.bf16 %v10248_v7, %v10244_v37  ;;  %v6177_v9 = vpack.i.bf16 %v10254_v45, %v10175_v4  ;;  %v10308_v30 = vmul.f32 %v10168_v57, %v13843_v26 }
 0x876   :  { %13851 = vst [vmem:[#allocation93_spill] sm:$0xff] %v10295_v27  ;;  %v10318_v44 = vmul.f32 %v10171_v58, %v13844_v59  ;;  %6153 = vrot.lane.b32.xlu1 %v6152_v22, %s6986_s22  ;;  %v10327_v45 = vmul.f32 %v10166_v54, %v13839_v13  ;;  %v10331_v46 = vmul.f32 %v10168_v57, %v13840_v11 }
 0x877   :  { %13852 = vst [vmem:[#allocation53_spill] sm:$0xff] %v10299_v40  ;;  %6188 = vrot.lane.b32.xlu0 %v6187_v61, %s6981_s16  ;;  %v10344_v15 = vmul.f32 %v10166_v54, %v13812_v42  ;;  %v10350_v61 = vmul.f32 %v10164_v52, %v13845_v47  ;;  %v10354_v22 = vmul.f32 %v10166_v54, %v13842_v29  ;;  %v13880_v52 = vld [vmem:[#allocation19_spill] sm:$0xff]  ;;  %v13890_v54 = vld [vmem:[#allocation28_spill] sm:$0xff] }
 0x878   :  { %13853 = vst [vmem:[#allocation88_spill] sm:$0xff] %v10308_v30  ;;  %v10359_v7 = vmul.f32 %v10168_v57, %v13813_v23  ;;  %v10363_v37 = vmul.f32 %v10224_v14, %v13805_v25  ;;  %v10367_v27 = vmul.f32 %v10232_v17, %v13806_v16  ;;  %v10371_v1 = vmul.f32 %v10220_v3, %v13807_v55  ;;  %v13888_v57 = vld [vmem:[#allocation46_spill] sm:$0xff] }
 0x879   :  { %13854 = vst [vmem:[#allocation87_spill] sm:$0xff] %v10318_v44  ;;  %6168 = vrot.lane.b32.xlu2 %v6167_v39, %s6978_s28  ;;  %v10377_v39 = vmul.f32 %v10222_v49, %v13808_v62  ;;  %v10385_v30 = vmul.f32 %v10232_v17, %v13810_v38  ;;  %v10391_v44 = vmul.f32 %v10220_v3, %v13811_v53 }
 0x87a   :  { %13855 = vst [vmem:[#allocation96_spill] sm:$0xff] %v10327_v45  ;;  %v10395_v45 = vmul.f32 %v10222_v49, %v13812_v42  ;;  %v10407_v16 = vmul.f32 %v10232_v17, %v13814_v24  ;;  %v10417_v40 = vmul.f32 %v10222_v49, %v13818_v56  ;;  %v10425_v38 = vmul.f32 %v10222_v49, %v13816_v33 }
 0x87b   :  { %13856 = vst [vmem:[#allocation68_spill] sm:$0xff] %v10331_v46  ;;  %v10381_v46 = vmul.f32 %v10224_v14, %v13809_v41 }
 0x87c   :  { %13857 = vst [vmem:[#allocation74_spill] sm:$0xff] %v10350_v61  ;;  %v10399_v61 = vmul.f32 %v10224_v14, %v13813_v23 }
 0x87d   :  { %13858 = vst [vmem:[#allocation66_spill] sm:$0xff] %v10354_v22  ;;  %v10421_v22 = vmul.f32 %v10220_v3, %v13815_v19 }
 0x87e   :  { %13859 = vst [vmem:[#allocation71_spill] sm:$0xff] %v10363_v37  ;;  %v10411_v37 = vmul.f32 %v10220_v3, %v13817_v21  ;;  %6173 = vrot.lane.b32.xlu1 %v6172_v20, %s6978_s28  ;;  %v10463_v20 = vmul.f32 %v10220_v3, %v13880_v52 }
 0x87f   :  { %13860 = vst [vmem:[#allocation57_spill] sm:$0xff] %v10367_v27  ;;  %v10432_v27 = vmul.f32 %v10224_v14, %v13819_v60  ;;  %6198 = vrot.lane.b32.xlu0 %v6197_v32, %s6994_s5 }
 0x880   :  { %13861 = vst [vmem:[#allocation89_spill] sm:$0xff] %v10371_v1 }
 0x881   :  { %13862 = vst [vmem:[#allocation62_spill] sm:$0xff] %v10377_v39  ;;  %v13879_v39 = vld [vmem:[#allocation45_spill] sm:$0xff]  ;;  %6178 = vrot.lane.b32.xlu2 %v6177_v9, %s6981_s16  ;;  %v10508_v9 = vmul.f32 %v10222_v49, %v13842_v29 }
 0x882   :  { %13863 = vst [vmem:[#allocation85_spill] sm:$0xff] %v10381_v46  ;;  %v10459_v32 = vmul.f32 %v10232_v17, %v13879_v39  ;;  %v10467_v46 = vmul.f32 %v10222_v49, %v13827_v10 }
 0x883   :  { %13864 = vst [vmem:[#allocation73_spill] sm:$0xff] %v10385_v30  ;;  %v10453_v30 = vmul.f32 %v10224_v14, %v13821_v2 }
 0x884   :  { %13865 = vst [vmem:[#allocation59_spill] sm:$0xff] %v10391_v44  ;;  %v10436_v44 = vmul.f32 %v10232_v17, %v13820_v5 }
 0x885   :  { %13866 = vst [vmem:[#allocation99_spill] sm:$0xff] %v10395_v45  ;;  %v10440_v45 = vmul.f32 %v10224_v14, %v13823_v43 }
 0x886   :  { %13867 = vst [vmem:[#allocation58_spill] sm:$0xff] %v10399_v61  ;;  %v13876_v61 = vld [vmem:[#allocation48_spill] sm:$0xff] }
 0x887   :  { %13868 = vst [vmem:[#allocation78_spill] sm:$0xff] %v10407_v16  ;;  %v10449_v16 = vmul.f32 %v10232_v17, %v13876_v61 }
 0x888   :  { %13869 = vst [vmem:[#allocation91_spill] sm:$0xff] %v10411_v37  ;;  %v10490_v37 = vmul.f32 %v10222_v49, %v13888_v57 }
 0x889   :  { %13870 = vst [vmem:[#allocation77_spill] sm:$0xff] %v10417_v40  ;;  %v13883_v40 = vld [vmem:[#allocation20_spill] sm:$0xff] }
 0x88a   :  { %13871 = vst [vmem:[#allocation98_spill] sm:$0xff] %v10421_v22  ;;  %v10474_v1 = vmul.f32 %v10220_v3, %v13883_v40 }
 0x88b   :  { %13872 = vst [vmem:[#allocation82_spill] sm:$0xff] %v10425_v38  ;;  %v10504_v38 = vmul.f32 %v10232_v17, %v13844_v59 }
 0x88c   :  { %13873 = vst [vmem:[#allocation92_spill] sm:$0xff] %v10432_v27  ;;  %v10478_v27 = vmul.f32 %v10222_v49, %v13839_v13  ;;  %v10500_v13 = vmul.f32 %v10232_v17, %v13890_v54 }
 0x88d   :  { %13874 = vst [vmem:[#allocation79_spill] sm:$0xff] %v10436_v44  ;;  %v13886_v44 = vld [vmem:[#allocation25_spill] sm:$0xff] }
 0x88e   :  { %13875 = vst [vmem:[#allocation83_spill] sm:$0xff] %v10440_v45  ;;  %v10482_v22 = vmul.f32 %v10220_v3, %v13886_v44  ;;  %v10494_v45 = vmul.f32 %v10224_v14, %v13840_v11 }
 0x88f   :  { %13877 = vst [vmem:[#allocation72_spill] sm:$0xff] %v10449_v16  ;;  %v10518_v16 = vmul.f32 %v10220_v3, %v13845_v47 }
 0x890   :  { %13878 = vst [vmem:[#allocation63_spill] sm:$0xff] %v10453_v30  ;;  %v13903_v30 = vpack.i.bf16 %v10291_v34, %v10179_v8  ;;  %v13905_v34 = vpack.i.bf16 %v10285_v31, %v10162_v36 }
 0x891   :  { %13881 = vst [vmem:[#allocation95_spill] sm:$0xff] %v10463_v20  ;;  %v10546_v20 = vmul.f32 %v10268_v0, %v13809_v41  ;;  %v10566_v41 = vmul.f32 %v10268_v0, %v13805_v25  ;;  %v10642_v25 = vmul.f32 %v10256_v12, %v13886_v44 }
 0x892   :  { %13882 = vst [vmem:[#allocation90_spill] sm:$0xff] %v10467_v46  ;;  %v10514_v46 = vmul.f32 %v10224_v14, %v13843_v26 }
 0x893   :  { %13884 = vst [vmem:[#allocation60_spill] sm:$0xff] %v10474_v1  ;;  %v10538_v1 = vmul.f32 %v10171_v58, %v13879_v39 }
 0x894   :  { %13885 = vst [vmem:[#allocation69_spill] sm:$0xff] %v10478_v27  ;;  %v10630_v27 = vmul.f32 %v10275_v48, %v13879_v39  ;;  %v13904_v39 = vld [vmem:[#allocation97_spill] sm:$0xff] }
 0x895   :  { %13887 = vst [vmem:[#allocation67_spill] sm:$0xff] %v10482_v22  ;;  %v10530_v22 = vmul.f32 %v10266_v51, %v13808_v62  ;;  %v13892_v62 = vpack.i.bf16 %v10273_v63, %v10214_v6  ;;  %v6212_v63 = vpack.i.bf16 %v10359_v7, %v10344_v15  ;;  %v10604_v15 = vmul.f32 %v10256_v12, %v13817_v21  ;;  %v13906_v21 = vld [vmem:[#allocation65_spill] sm:$0xff] }
 0x896   :  { %13889 = vst [vmem:[#allocation75_spill] sm:$0xff] %v10490_v37  ;;  %v13891_v37 = vpack.i.bf16 %v10264_v18, %v10260_v35  ;;  %v10554_v35 = vmul.f32 %v10256_v12, %v13807_v55  ;;  %v10558_v18 = vmul.f32 %v10256_v12, %v13815_v19  ;;  %v10576_v19 = vmul.f32 %v10256_v12, %v13811_v53 }
 0x897   :  { %6208 = vrot.lane.b32.xlu0 %v13892_v62, %s6979_s0  ;;  %v3398_v62 = vmul.f32 %v10171_v58, %v13814_v24  ;;  %v10590_v55 = vmul.f32 %v10266_v51, %v13812_v42  ;;  %13895 = vst [vmem:[#allocation86_spill] sm:$0xff] %v10604_v15  ;;  %v10608_v7 = vmul.f32 %v10266_v51, %v13818_v56  ;;  %v13911_v15 = vld [vmem:[#allocation94_spill] sm:$0xff] }
 0x898   :  { %6183 = vrot.lane.b32.xlu1 %v13891_v37, %s6981_s16  ;;  %v10562_v37 = vmul.f32 %v10266_v51, %v13816_v33  ;;  %13893 = vst [vmem:[#allocation76_spill] sm:$0xff] %v10576_v19  ;;  %v13894_v33 = vpack.i.bf16 %v10179_v8, %v10281_v50  ;;  %v10596_v50 = vmul.f32 %v10268_v0, %v13813_v23 }
 0x899   :  { %13896 = vst [vmem:[#allocation80_spill] sm:$0xff] %v10608_v7  ;;  %v10612_v42 = vmul.f32 %v10268_v0, %v13819_v60  ;;  %v10616_v23 = vmul.f32 %v10266_v51, %v13827_v10  ;;  %v10620_v53 = vmul.f32 %v10268_v0, %v13821_v2  ;;  %v10638_v19 = vmul.f32 %v10256_v12, %v13880_v52 }
 0x89a   :  { %6203 = vrot.lane.b32.xlu2 %v13894_v33, %s6994_s5  ;;  %v10600_v33 = vmul.f32 %v10275_v48, %v13820_v5  ;;  %13900 = vst [vmem:[#allocation50_spill] sm:$0xff] %v10630_v27  ;;  %v10652_v10 = vmul.f32 %v10266_v51, %v13888_v57  ;;  %v10656_v2 = vmul.f32 %v10268_v0, %v13823_v43 }
 0x89b   :  { %13897 = vst [vmem:[#allocation49_spill] sm:$0xff] %v10612_v42  ;;  %v10676_v7 = vmul.f32 %v10256_v12, %v13883_v40  ;;  %v10688_v27 = vmul.f32 %v10268_v0, %v13840_v11  ;;  %v10697_v42 = vmul.f32 %v10256_v12, %v13845_v47  ;;  %v3435_v31 = vmul.f32 %v13911_v15, %v13818_v56  ;;  %v13912_v47 = vld [vmem:[#allocation70_spill] sm:$0xff]  ;;  %v13913_v11 = vld [vmem:[#allocation84_spill] sm:$0xff] }
 0x89c   :  { %13898 = vst [vmem:[#allocation51_spill] sm:$0xff] %v10616_v23  ;;  %v10660_v23 = vmul.f32 %v10275_v48, %v13876_v61  ;;  %v3437_v56 = vmul.f32 %v10171_v58, %v13820_v5 }
 0x89d   :  { %13899 = vst [vmem:[#allocation27_spill] sm:$0xff] %v10620_v53  ;;  %v10672_v53 = vmul.f32 %v10275_v48, %v13890_v54 }
 0x89e   :  { %13901 = vst [vmem:[#allocation12_spill] sm:$0xff] %v10638_v19  ;;  %v10711_v19 = vmul.f32 %v10275_v48, %v13844_v59 }
 0x89f   :  { %13902 = vst [vmem:[#allocation36_spill] sm:$0xff] %v10642_v25  ;;  %6223 = vrot.lane.b32.xlu0 %v13905_v34, %s6989_s2  ;;  %v13909_v34 = vld [vmem:[#allocation30_spill] sm:$0xff]  ;;  %v13910_v25 = vld [vmem:[#allocation81_spill] sm:$0xff] }
 0x8a0   :  { %6193 = vrot.lane.b32.xlu1 %v13903_v30, %s6994_s5  ;;  %13907 = vst [vmem:[#allocation29_spill] sm:$0xff] %v10672_v53  ;;  %v10684_v30 = vmul.f32 %v10266_v51, %v13909_v34  ;;  %v10701_v34 = vmul.f32 %v10266_v51, %v13842_v29  ;;  %v6217_v53 = vpack.i.bf16 %v10214_v6, %v3398_v62 }
 0x8a1   :  { %13908 = vst [vmem:[#allocation32_spill] sm:$0xff] %v10676_v7  ;;  %v3436_v7 = vmul.f32 %v13912_v47, %v13819_v60  ;;  %v3475_v60 = vmul.f32 %v13911_v15, %v13888_v57  ;;  %v3476_v62 = vmul.f32 %v13912_v47, %v13823_v43  ;;  %v3454_v29 = vmul.f32 %v13913_v11, %v13880_v52 }
 0x8a2   :  { %6213 = vrot.lane.b32.xlu2 %v6212_v63, %s6979_s0  ;;  %v10707_v63 = vmul.f32 %v10268_v0, %v13843_v26  ;;  %v6247_v26 = vpack.i.bf16 %v13904_v39, %v10538_v1  ;;  %v6232_v1 = vpack.i.bf16 %v10162_v36, %v3437_v56  ;;  %v3494_v57 = vmul.f32 %v13913_v11, %v13883_v40  ;;  %v13918_v56 = vld [vmem:[#allocation88_spill] sm:$0xff] }
 0x8a3   :  { %v6227_v59 = vpack.i.bf16 %v3436_v7, %v3435_v31  ;;  %v6237_v5 = vpack.i.bf16 %v3454_v29, %v13904_v39  ;;  %v10742_v15 = vpop.permute.xlu2 %6098  ;;  %v3477_v43 = vmul.f32 %v10171_v58, %v13876_v61  ;;  %v13914_v7 = vld [vmem:[#allocation53_spill] sm:$0xff] }
 0x8a4   :  { %v6267_v52 = vpack.i.bf16 %v3494_v57, %v13910_v25  ;;  %v13915_v31 = vld [vmem:[#allocation93_spill] sm:$0xff]  ;;  %v13923_v57 = vpack.i.bf16 %v10222_v49, %v10220_v3  ;;  %v13930_v3 = vld [vmem:[#allocation71_spill] sm:$0xff] }
 0x8a5   :  { %v13916_v47 = vpack.i.bf16 %v13914_v7, %v13915_v31  ;;  %v6262_v29 = vpack.i.bf16 %v13906_v21, %v3477_v43  ;;  %v13926_v7 = vld [vmem:[#allocation66_spill] sm:$0xff] }
 0x8a6   :  { %v13927_v31 = vld [vmem:[#allocation74_spill] sm:$0xff] }
 0x8a7   :  { %6248 = vrot.lane.b32.xlu0 %v6247_v26, %s6990_s3  ;;  %v3474_v26 = vmul.f32 %v13913_v11, %v13886_v44 }
 0x8a8   :  { %6218 = vrot.lane.b32.xlu1 %v6217_v53, %s6979_s0  ;;  %v6257_v53 = vpack.i.bf16 %v3476_v62, %v3475_v60  ;;  %v3497_v62 = vmul.f32 %v10171_v58, %v13890_v54  ;;  %v13924_v54 = vpack.i.bf16 %v10232_v17, %v10224_v14  ;;  %v13933_v14 = vld [vmem:[#allocation89_spill] sm:$0xff] }
 0x8a9   :  { %v6252_v61 = vpack.i.bf16 %v3474_v26, %v13906_v21 }
 0x8aa   :  { %6228 = vrot.lane.b32.xlu2 %v6227_v59, %s6989_s2  ;;  %v13917_v59 = vld [vmem:[#allocation87_spill] sm:$0xff] }
 0x8ab   :  { %v10756_v40 = vpop.permute.xlu2 %6103  ;;  %v13919_v60 = vpack.i.bf16 %v13917_v59, %v13918_v56 }
 0x8af   :  { %6258 = vrot.lane.b32.xlu0 %v6257_v53, %s6992_s8  ;;  %v13921_v53 = vld [vmem:[#allocation96_spill] sm:$0xff] }
 0x8b0   :  { %6233 = vrot.lane.b32.xlu1 %v6232_v1, %s6989_s2  ;;  %v13920_v1 = vld [vmem:[#allocation68_spill] sm:$0xff] }
 0x8b1   :  { %v13922_v44 = vpack.i.bf16 %v13920_v1, %v13921_v53  ;;  %v13938_v53 = vld [vmem:[#allocation99_spill] sm:$0xff] }
 0x8b2   :  { %6238 = vrot.lane.b32.xlu2 %v6237_v5, %s6990_s3  ;;  %v6277_v5 = vpack.i.bf16 %v13910_v25, %v3497_v62  ;;  %v13936_v62 = vld [vmem:[#allocation85_spill] sm:$0xff] }
 0x8b3   :  { %v10770_v11 = vpop.permute.xlu2 %6113 }
 0x8b7   :  { %6268 = vrot.lane.b32.xlu0 %v6267_v52, %s6991_s23 }
 0x8b8   :  { %6243 = vrot.lane.b32.xlu1 %v13916_v47, %s6990_s3  ;;  %v10778_v43 = vpop.permute.xlu1 %6073  ;;  %v13928_v47 = vpack.i.bf16 %v13926_v7, %v13927_v31  ;;  %v13942_v7 = vld [vmem:[#allocation58_spill] sm:$0xff] }
 0x8b9   :  { %v10784_v58 = vpop.permute.xlu0 %6078 }
 0x8ba   :  { %6263 = vrot.lane.b32.xlu2 %v6262_v29, %s6992_s8  ;;  %v13929_v29 = vld [vmem:[#allocation57_spill] sm:$0xff] }
 0x8bb   :  { %v10786_v52 = vpop.permute.xlu2 %6138  ;;  %v13931_v49 = vpack.i.bf16 %v13929_v29, %v13930_v3  ;;  %v13945_v3 = vld [vmem:[#allocation82_spill] sm:$0xff] }
 0x8bc   :  { %13925 = vst [vmem:[#allocation33_spill] sm:$0xff] %v10786_v52 }
 0x8bf   :  { %6288 = vrot.lane.b32.xlu0 %v13919_v60, %s6986_s22  ;;  %v13935_v60 = vld [vmem:[#allocation73_spill] sm:$0xff] }
 0x8c0   :  { %6253 = vrot.lane.b32.xlu1 %v6252_v61, %s6992_s8  ;;  %v10796_v26 = vpop.permute.xlu1 %6083  ;;  %v13932_v61 = vld [vmem:[#allocation62_spill] sm:$0xff]  ;;  %v13937_v1 = vpack.i.bf16 %v13935_v60, %v13936_v62 }
 0x8c1   :  { %v13934_v17 = vpack.i.bf16 %v13932_v61, %v13933_v14  ;;  %v10802_v59 = vpop.permute.xlu0 %6088  ;;  %v13948_v14 = vld [vmem:[#allocation77_spill] sm:$0xff] }
 0x8c2   :  { %6273 = vrot.lane.b32.xlu2 %v13922_v44, %s6991_s23  ;;  %v13939_v44 = vld [vmem:[#allocation59_spill] sm:$0xff] }
 0x8c3   :  { %v10804_v56 = vpop.permute.xlu2 %6143 }
 0x8c7   :  { %6293 = vrot.lane.b32.xlu0 %v13923_v57, %s6978_s28 }
 0x8c8   :  { %6278 = vrot.lane.b32.xlu1 %v6277_v5, %s6991_s23  ;;  %v13940_v5 = vpack.i.bf16 %v13938_v53, %v13939_v44  ;;  %v10814_v57 = vpop.permute.xlu1 %6108  ;;  %v13953_v53 = vld [vmem:[#allocation92_spill] sm:$0xff] }
 0x8ca   :  { %6298 = vrot.lane.b32.xlu2 %v13924_v54, %s6978_s28  ;;  %v13941_v54 = vld [vmem:[#allocation78_spill] sm:$0xff] }
 0x8cb   :  { %v13943_v31 = vpack.i.bf16 %v13941_v54, %v13942_v7  ;;  %v10822_v29 = vpop.permute.xlu2 %6163  ;;  %v13956_v7 = vld [vmem:[#allocation63_spill] sm:$0xff] }
 0x8cc   :  { %13944 = vst [vmem:[#allocation37_spill] sm:$0xff] %v10822_v29  ;;  %v13965_v29 = vld [vmem:[#allocation75_spill] sm:$0xff] }
 0x8cf   :  { %6318 = vrot.lane.b32.xlu0 %v13931_v49, %s6994_s5  ;;  %v13946_v49 = vld [vmem:[#allocation98_spill] sm:$0xff] }
 0x8d0   :  { %6283 = vrot.lane.b32.xlu1 %v13928_v47, %s6986_s22  ;;  %v10820_v47 = vpop.permute.xlu0 %6093  ;;  %v13947_v61 = vpack.i.bf16 %v13945_v3, %v13946_v49  ;;  %v10832_v62 = vpop.permute.xlu1 %6118  ;;  %v13958_v3 = vld [vmem:[#allocation72_spill] sm:$0xff]  ;;  %v13959_v49 = vld [vmem:[#allocation83_spill] sm:$0xff] }
 0x8d1   :  { %13951 = vst [vmem:[#allocation38_spill] sm:$0xff] %v10832_v62 }
 0x8d2   :  { %6303 = vrot.lane.b32.xlu2 %v13934_v17, %s6981_s16  ;;  %v13949_v17 = vld [vmem:[#allocation91_spill] sm:$0xff] }
 0x8d3   :  { %v13950_v60 = vpack.i.bf16 %v13948_v14, %v13949_v17  ;;  %v10840_v54 = vpop.permute.xlu2 %6168  ;;  %v13962_v17 = vld [vmem:[#allocation90_spill] sm:$0xff] }
 0x8d7   :  { %6323 = vrot.lane.b32.xlu0 %v13940_v5, %s6979_s0 }
 0x8d8   :  { %6308 = vrot.lane.b32.xlu1 %v13937_v1, %s6981_s16  ;;  %v13952_v1 = vld [vmem:[#allocation79_spill] sm:$0xff]  ;;  %v10838_v5 = vpop.permute.xlu0 %6128  ;;  %v10850_v14 = vpop.permute.xlu1 %6123 }
 0x8d9   :  { %v13954_v44 = vpack.i.bf16 %v13952_v1, %v13953_v53  ;;  %13955 = vst [vmem:[#allocation39_spill] sm:$0xff] %v10838_v5 }
 0x8da   :  { %6328 = vrot.lane.b32.xlu2 %v13943_v31, %s6979_s0  ;;  %v13957_v31 = vpack.i.bf16 %v10459_v32, %v13956_v7  ;;  %13961 = vst [vmem:[#allocation24_spill] sm:$0xff] %v10850_v14  ;;  %v13966_v32 = vld [vmem:[#allocation67_spill] sm:$0xff] }
 0x8db   :  { %v13967_v7 = vpack.i.bf16 %v13965_v29, %v13966_v32  ;;  %v13974_v29 = vpack.i.bf16 %v10514_v46, %v10508_v9  ;;  %v13975_v32 = vpack.i.bf16 %v10153_v28, %v10504_v38  ;;  %v13978_v46 = vpack.i.bf16 %v10266_v51, %v10256_v12 }
 0x8dc   :  { %v13979_v38 = vpack.i.bf16 %v10275_v48, %v10268_v0 }
 0x8df   :  { %6333 = vrot.lane.b32.xlu0 %v13950_v60, %s6989_s2  ;;  %v13963_v60 = vld [vmem:[#allocation95_spill] sm:$0xff] }
 0x8e0   :  { %6313 = vrot.lane.b32.xlu1 %v13947_v61, %s6994_s5  ;;  %v13960_v61 = vpack.i.bf16 %v13958_v3, %v13959_v49  ;;  %v13964_v1 = vpack.i.bf16 %v13962_v17, %v13963_v60  ;;  %v10856_v53 = vpop.permute.xlu0 %6133  ;;  %v13969_v3 = vld [vmem:[#allocation60_spill] sm:$0xff]  ;;  %v13972_v17 = vpack.i.bf16 %v10500_v13, %v10494_v45  ;;  %v13977_v13 = vpack.i.bf16 %v10518_v16, %v10153_v28 }
 0x8e1   :  { %v13980_v16 = vpack.i.bf16 %v10546_v20, %v10530_v22  ;;  %v13226_v22 = vunpack.i.l.bf16 %v10804_v56 }
 0x8e2   :  { %6338 = vrot.lane.b32.xlu2 %v13954_v44, %s6989_s2  ;;  %v10858_v44 = vpop.permute.xlu2 %6178 }
 0x8e7   :  { %6358 = vrot.lane.b32.xlu0 %v13960_v61, %s6992_s8  ;;  %v10868_v61 = vpop.permute.xlu1 %6148 }
 0x8e8   :  { %6348 = vrot.lane.b32.xlu1 %v13957_v31, %s6990_s3  ;;  %v13968_v31 = vld [vmem:[#allocation69_spill] sm:$0xff]  ;;  %13971 = vst [vmem:[#allocation34_spill] sm:$0xff] %v10868_v61  ;;  %v10874_v60 = vpop.permute.xlu0 %6158 }
 0x8e9   :  { %v13970_v49 = vpack.i.bf16 %v13968_v31, %v13969_v3  ;;  %13973 = vst [vmem:[#allocation35_spill] sm:$0xff] %v10874_v60  ;;  %v13984_v60 = vpack.i.bf16 %v10558_v18, %v10179_v8  ;;  %v3408_v8 = vmul.f32 %v10275_v48, %v13814_v24  ;;  %v13996_v24 = vld [vmem:[#allocation80_spill] sm:$0xff] }
 0x8ea   :  { %6343 = vrot.lane.b32.xlu2 %v13964_v1, %s6990_s3 }
 0x8ef   :  { %6363 = vrot.lane.b32.xlu0 %v13970_v49, %s6991_s23 }
 0x8f0   :  { %6353 = vrot.lane.b32.xlu1 %v13967_v7, %s6992_s8  ;;  %v10886_v7 = vpop.permute.xlu1 %6153  ;;  %v10892_v45 = vpop.permute.xlu0 %6188 }
 0x8f1   :  { %13976 = vst [vmem:[#allocation16_spill] sm:$0xff] %v10886_v7 }
 0x8f2   :  { %6368 = vrot.lane.b32.xlu2 %v13972_v17, %s6991_s23 }
 0x8f4   :  { %v10876_v1 = vpop.permute.xlu2 %6203 }
 0x8f5   :  { %v6205_v3 = vunpack.i.l.bf16 %v10876_v1 }
 0x8f7   :  { %6383 = vrot.lane.b32.xlu0 %v13975_v32, %s6986_s22 }
 0x8f8   :  { %6378 = vrot.lane.b32.xlu1 %v13974_v29, %s6986_s22  ;;  %v10902_v9 = vpop.permute.xlu1 %6173  ;;  %v6199_v28 = vpop.permute.xlu0 %6198  ;;  %v13981_v29 = vld [vmem:[#allocation13_spill] sm:$0xff] }
 0x8f9   :  { %v6201_v49 = vunpack.i.h.bf16 %v6199_v28  ;;  %v3368_v0 = vmul.f32 %v10275_v48, %v13981_v29  ;;  %v6200_v7 = vunpack.i.l.bf16 %v6199_v28 }
 0x8fa   :  { %6373 = vrot.lane.b32.xlu2 %v13977_v13, %s6986_s22 }
 0x8fb   :  { %v3652_v12 = vsel %vm483_vm14, %v6201_v49, %v6205_v3 }
 0x8fc   :  { %v6214_v31 = vpop.permute.xlu2 %6213  ;;  %v10915_v32 = vpack.i.bf16 %v6205_v3, %v3652_v12 }
 0x8ff   :  { %6393 = vrot.lane.b32.xlu0 %v13979_v38, %s6978_s28  ;;  %v6216_v38 = vunpack.i.h.bf16 %v6214_v31 }
 0x900   :  { %6388 = vrot.lane.b32.xlu1 %v13978_v46, %s6978_s28  ;;  %v13982_v46 = vpack.i.bf16 %v10554_v35, %v10175_v4 }
 0x902   :  { %6403 = vrot.lane.b32.xlu2 %v13980_v16, %s6981_s16  ;;  %v6215_v16 = vunpack.i.l.bf16 %v6214_v31 }
 0x904   :  { %v10909_v17 = vpop.permute.xlu2 %6228 }
 0x905   :  { %v6231_v51 = vunpack.i.h.bf16 %v10909_v17  ;;  %v6230_v13 = vunpack.i.l.bf16 %v10909_v17  ;;  %v13227_v17 = vunpack.i.h.bf16 %v10858_v44 }
 0x907   :  { %v3862_v20 = vsel %vm562_vm15, %v6230_v13, %v6231_v51  ;;  %6398 = vrot.lane.b32.xlu0 %v13982_v46, %s6981_s16 }
 0x908   :  { %3567 = vrot.lane.b32.xlu1 %v3368_v0, %s6981_s16  ;;  %v10927_v29 = vpack.i.bf16 %v3862_v20, %v13226_v22  ;;  %v10954_v22 = vsel %vm239_vm5, %v6215_v16, %v6216_v38 }
 0x909   :  { %v10938_v4 = vpop.permute.xlu0 %6208 }
 0x90a   :  { %13983 = vst [vmem:[#allocation40_spill] sm:$0xff] %v10927_v29  ;;  %v10929_v3 = vpop.permute.xlu1 %6183  ;;  %6408 = vrot.lane.b32.xlu2 %v13984_v60, %s6994_s5  ;;  %v13230_v35 = vunpack.i.h.bf16 %v10938_v4 }
 0x90b   :  { %v13228_v12 = vunpack.i.h.bf16 %v10929_v3  ;;  %v6185_v0 = vunpack.i.l.bf16 %v10929_v3 }
 0x90c   :  { %v10951_v46 = vpop.permute.xlu2 %6238  ;;  %v10961_v18 = vsel %vm239_vm5, %v13230_v35, %v6215_v16  ;;  %v10982_v35 = vsel %vm483_vm14, %v6200_v7, %v6201_v49  ;;  %v13991_v49 = vpack.i.bf16 %v10596_v50, %v10590_v55  ;;  %v13993_v55 = vld [vmem:[#allocation86_spill] sm:$0xff] }
 0x90d   :  { %v10944_v31 = vsel %vm299_vm8, %v13227_v17, %v6185_v0  ;;  %v10949_v20 = vsel %vm299_vm8, %v6185_v0, %v13228_v12  ;;  %13985 = vst [vmem:[#allocation41_spill] sm:$0xff] %v10951_v46  ;;  %v13986_v17 = vld [vmem:[#allocation17_spill] sm:$0xff]  ;;  %v13987_v12 = vpack.i.bf16 %v10566_v41, %v10562_v37  ;;  %v13994_v50 = vpack.i.bf16 %v13993_v55, %v10162_v36 }
 0x90e   :  { %v3388_v0 = vmul.f32 %v10275_v48, %v13986_v17 }
 0x910   :  { %6413 = vrot.lane.b32.xlu1 %v13987_v12, %s6994_s5  ;;  %3643 = vrot.lane.b32.xlu0 %v3388_v0, %s6994_s5  ;;  %v13989_v12 = vld [vmem:[#allocation76_spill] sm:$0xff] }
 0x911   :  { %v10978_v60 = vpop.permute.xlu0 %6223 }
 0x912   :  { %v10974_v29 = vpop.permute.xlu1 %6193  ;;  %3719 = vrot.lane.b32.xlu2 %v3408_v8, %s6979_s0  ;;  %13988 = vst [vmem:[#allocation42_spill] sm:$0xff] %v10978_v60  ;;  %v6226_v17 = vunpack.i.h.bf16 %v10978_v60  ;;  %v13990_v8 = vpack.i.bf16 %v13989_v12, %v10214_v6  ;;  %v13251_v60 = vunpack.i.h.bf16 %v10786_v52 }
 0x913   :  { %v13231_v16 = vunpack.i.h.bf16 %v10974_v29 }
 0x914   :  { %v10989_v41 = vpop.permute.xlu2 %6263  ;;  %v3861_v48 = vsel %vm562_vm15, %v6226_v17, %v6230_v13  ;;  %v13992_v13 = vpack.i.bf16 %v10162_v36, %v10600_v33 }
 0x915   :  { %v10987_v37 = vsel %vm483_vm14, %v13231_v16, %v6200_v7  ;;  %v10994_v28 = vpack.i.bf16 %v3861_v48, %v6226_v17  ;;  %v13239_v55 = vunpack.i.l.bf16 %v10989_v41 }
 0x918   :  { %6418 = vrot.lane.b32.xlu1 %v13990_v8, %s6979_s0  ;;  %6423 = vrot.lane.b32.xlu0 %v13991_v49, %s6979_s0  ;;  %v13233_v8 = vunpack.i.l.bf16 %v10832_v62  ;;  %v13995_v49 = vld [vmem:[#allocation49_spill] sm:$0xff] }
 0x919   :  { %v11011_v17 = vpop.permute.xlu0 %6248  ;;  %v13997_v33 = vpack.i.bf16 %v13995_v49, %v13996_v24 }
 0x91a   :  { %v11004_v7 = vpop.permute.xlu1 %6218  ;;  %6438 = vrot.lane.b32.xlu2 %v13992_v13, %s6989_s2 }
 0x91b   :  { %v6220_v0 = vunpack.i.l.bf16 %v11004_v7 }
 0x91c   :  { %v11014_v6 = vpop.permute.xlu2 %6273 }
 0x91d   :  { %v3728_v48 = vsel %vm239_vm5, %v6216_v38, %v6220_v0  ;;  %v13234_v38 = vunpack.i.h.bf16 %v10770_v11 }
 0x91e   :  { %v11016_v12 = vpack.i.bf16 %v6220_v0, %v3728_v48  ;;  %v13998_v0 = vld [vmem:[#allocation27_spill] sm:$0xff] }
 0x91f   :  { %v13999_v48 = vld [vmem:[#allocation51_spill] sm:$0xff]  ;;  %v11044_v24 = vsel %vm562_vm15, %v13234_v38, %v13233_v8 }
 0x920   :  { %6428 = vrot.lane.b32.xlu1 %v13994_v50, %s6989_s2  ;;  %6433 = vrot.lane.b32.xlu0 %v13997_v33, %s6989_s2  ;;  %v14000_v5 = vpack.i.bf16 %v13998_v0, %v13999_v48  ;;  %14001 = vst [vmem:[#allocation44_spill] sm:$0xff] %v11044_v24  ;;  %v14005_v48 = vld [vmem:[#allocation50_spill] sm:$0xff]  ;;  %v13245_v24 = vunpack.i.l.bf16 %v11011_v17 }
 0x921   :  { %v11035_v36 = vpop.permute.xlu0 %6258  ;;  %v14006_v8 = vpack.i.bf16 %v13904_v39, %v14005_v48 }
 0x922   :  { %v11027_v13 = vpop.permute.xlu1 %6233  ;;  %6448 = vrot.lane.b32.xlu2 %v14000_v5, %s6990_s3  ;;  %v13238_v50 = vunpack.i.h.bf16 %v11035_v36  ;;  %v6241_v5 = vunpack.i.h.bf16 %v10951_v46 }
 0x923   :  { %v13235_v16 = vunpack.i.l.bf16 %v11027_v13 }
 0x924   :  { %v11051_v33 = vpop.permute.xlu2 %6298  ;;  %v11060_v0 = vsel %vm622_vm4, %v13238_v50, %v13239_v55  ;;  %v14010_v55 = vld [vmem:[#allocation36_spill] sm:$0xff] }
 0x925   :  { %v11049_v49 = vsel %vm562_vm15, %v6231_v51, %v13235_v16  ;;  %14003 = vst [vmem:[#allocation10_spill] sm:$0xff] %v11051_v33  ;;  %v14007_v51 = vld [vmem:[#allocation12_spill] sm:$0xff]  ;;  %v14011_v48 = vpack.i.bf16 %v14010_v55, %v13906_v21 }
 0x926   :  { %14002 = vst [vmem:[#allocation47_spill] sm:$0xff] %v11049_v49  ;;  %v14008_v38 = vpack.i.bf16 %v14007_v51, %v13904_v39  ;;  %v13247_v39 = vunpack.i.l.bf16 %v11014_v6 }
 0x927   :  { %14004 = vst [vmem:[#allocation43_spill] sm:$0xff] %v11060_v0 }
 0x928   :  { %6453 = vrot.lane.b32.xlu1 %v14006_v8, %s6990_s3  ;;  %6443 = vrot.lane.b32.xlu0 %v14008_v38, %s6990_s3 }
 0x929   :  { %v11080_v8 = vpop.permute.xlu0 %6268 }
 0x92a   :  { %v11070_v16 = vpop.permute.xlu1 %6243  ;;  %6458 = vrot.lane.b32.xlu2 %v14011_v48, %s6992_s8  ;;  %v13248_v38 = vunpack.i.h.bf16 %v11080_v8  ;;  %v6270_v52 = vunpack.i.l.bf16 %v11080_v8 }
 0x92b   :  { %14009 = vst [vmem:[#allocation18_spill] sm:$0xff] %v11070_v16  ;;  %v13244_v49 = vunpack.i.h.bf16 %v11070_v16  ;;  %v13243_v50 = vunpack.i.l.bf16 %v11070_v16  ;;  %v6080_v16 = vunpack.i.l.bf16 %v10784_v58 }
 0x92c   :  { %v11094_v62 = vpop.permute.xlu2 %6303  ;;  %v11103_v48 = vsel %vm647_vm12, %v13248_v38, %v13247_v39  ;;  %v13252_v39 = vunpack.i.l.bf16 %v11035_v36 }
 0x92d   :  { %v3937_v51 = vsel %vm592_vm2, %v6241_v5, %v13243_v50  ;;  %v11092_v46 = vsel %vm592_vm2, %v13244_v49, %v13245_v24  ;;  %v14014_v50 = vpack.i.bf16 %v10656_v2, %v10652_v10  ;;  %v14015_v49 = vpack.i.bf16 %v13906_v21, %v10660_v23  ;;  %v14016_v10 = vld [vmem:[#allocation29_spill] sm:$0xff] }
 0x92e   :  { %14012 = vst [vmem:[#allocation14_spill] sm:$0xff] %v11092_v46  ;;  %v11096_v55 = vpack.i.bf16 %v3937_v51, %v6241_v5  ;;  %v6076_v5 = vunpack.i.h.bf16 %v10778_v43  ;;  %v6075_v51 = vunpack.i.l.bf16 %v10778_v43  ;;  %v14017_v2 = vpack.i.bf16 %v13910_v25, %v14016_v10 }
 0x930   :  { %14013 = vst [vmem:[#allocation15_spill] sm:$0xff] %v11096_v55  ;;  %6463 = vrot.lane.b32.xlu1 %v14014_v50, %s6992_s8  ;;  %6468 = vrot.lane.b32.xlu0 %v14015_v49, %s6992_s8  ;;  %v3785_v10 = vsel %vm209_vm13, %v6075_v51, %v6076_v5  ;;  %v14024_v55 = vpack.i.bf16 %v10701_v34, %v10697_v42  ;;  %s5048_s8 = sshll.u32 %s12928_s14, 4  ;;  %s5049_s8 = int_to_ptr.hbm [resolvable:$true] %s5048_s8 }
 0x931   :  { %v11121_v50 = vpop.permute.xlu0 %6288 }
 0x932   :  { %v6254_v24 = vpop.permute.xlu1 %6253  ;;  %6483 = vrot.lane.b32.xlu2 %v14017_v2, %s6991_s23  ;;  %14018 = vst [vmem:[#allocation22_spill] sm:$0xff] %v11121_v50  ;;  %v6300_v2 = vunpack.i.l.bf16 %v11051_v33 }
 0x933   :  { %v6256_v38 = vunpack.i.h.bf16 %v6254_v24  ;;  %v6255_v0 = vunpack.i.l.bf16 %v6254_v24  ;;  %v14026_v24 = vunpack.i.l.bf16 %v11027_v13 }
 0x934   :  { %v11131_v43 = vpop.permute.xlu2 %6328 }
 0x935   :  { %v11126_v23 = vsel %vm622_vm4, %v13251_v60, %v6255_v0  ;;  %v4013_v21 = vsel %vm622_vm4, %v6256_v38, %v13252_v39  ;;  %v14021_v0 = vld [vmem:[#allocation32_spill] sm:$0xff]  ;;  %v6236_v39 = vunpack.i.h.bf16 %v11027_v13  ;;  %v14031_v13 = vunpack.i.h.bf16 %v11051_v33 }
 0x936   :  { %14019 = vst [vmem:[#allocation31_spill] sm:$0xff] %v11126_v23  ;;  %v11133_v49 = vpack.i.bf16 %v4013_v21, %v6256_v38  ;;  %v14022_v60 = vpack.i.bf16 %v14021_v0, %v13910_v25  ;;  %v14023_v38 = vpack.i.bf16 %v10688_v27, %v10684_v30  ;;  %v6497_v21 = vpack.i.bf16 %v3785_v10, %v6075_v51 }
 0x937   :  { %v13257_v23 = vunpack.i.h.bf16 %v10868_v61  ;;  %v13258_v25 = vunpack.i.h.bf16 %v11014_v6  ;;  %v3786_v27 = vsel %vm209_vm13, %v6076_v5, %v6080_v16  ;;  %v14025_v30 = vunpack.i.h.bf16 %v10784_v58 }
 0x938   :  { %14020 = vst [vmem:[#allocation56_spill] sm:$0xff] %v11133_v49  ;;  %6473 = vrot.lane.b32.xlu1 %v14022_v60, %s6991_s23  ;;  %6478 = vrot.lane.b32.xlu0 %v14023_v38, %s6991_s23  ;;  %v6251_v10 = vunpack.i.h.bf16 %v11011_v17 }
 0x939   :  { %v11158_v49 = vpop.permute.xlu0 %6293  ;;  %v3787_v51 = vsel %vm209_vm13, %v6080_v16, %v14025_v30  ;;  %v11174_v42 = vsel %vm647_vm12, %v13257_v23, %v6270_v52  ;;  %v14034_v23 = vld [vmem:[#allocation61_spill] sm:$0xff]  ;;  %v6086_v52 = vunpack.i.h.bf16 %v10796_v26 }
 0x93a   :  { %v6279_v46 = vpop.permute.xlu1 %6278  ;;  %6488 = vrot.lane.b32.xlu2 %v14024_v55, %s6986_s22  ;;  %v13260_v38 = vunpack.i.h.bf16 %v11158_v49  ;;  %14028 = vst [vmem:[#allocation11_spill] sm:$0xff] %v11174_v42 }
 0x93b   :  { %v6281_v60 = vunpack.i.h.bf16 %v6279_v46  ;;  %v6280_v0 = vunpack.i.l.bf16 %v6279_v46  ;;  %v11169_v46 = vsel %vm562_vm15, %v14026_v24, %v6236_v39  ;;  %v11189_v39 = vsel %vm209_vm13, %v6300_v2, %v14031_v13 }
 0x93c   :  { %14027 = vst [vmem:[#allocation54_spill] sm:$0xff] %v11169_v46  ;;  %v11184_v55 = vpop.permute.xlu2 %6338  ;;  %v11198_v24 = vsel %vm209_vm13, %v13260_v38, %v6300_v2  ;;  %v14035_v2 = vpack.i.bf16 %v10711_v19, %v10707_v63  ;;  %v6100_v38 = vunpack.i.l.bf16 %v10742_v15  ;;  %v6106_v19 = vunpack.i.h.bf16 %v10756_v40  ;;  %v14041_v46 = vld [vmem:[#allocation52_spill] sm:$0xff] }
 0x93d   :  { %v11179_v34 = vsel %vm647_vm12, %v13258_v25, %v6280_v0  ;;  %v11182_v16 = vsel %vm647_vm12, %v6280_v0, %v6281_v60  ;;  %14032 = vst [vmem:[#allocation21_spill] sm:$0xff] %v11189_v39  ;;  %v6096_v60 = vunpack.i.h.bf16 %v10820_v47  ;;  %v13262_v13 = vunpack.i.l.bf16 %v11184_v55 }
 0x93e   :  { %14029 = vst [vmem:[#allocation55_spill] sm:$0xff] %v11179_v34  ;;  %v5571_v25 = vunpack.i.h.bf16 %v14034_v23  ;;  %v14036_v0 = vunpack.i.l.bf16 %v11011_v17  ;;  %v14038_v23 = vunpack.i.h.bf16 %v11184_v55  ;;  %v6110_v63 = vunpack.i.l.bf16 %v10814_v57 }
 0x93f   :  { %14030 = vst [vmem:[#allocation23_spill] sm:$0xff] %v11182_v16  ;;  %v6085_v16 = vunpack.i.l.bf16 %v10796_v26  ;;  %v6502_v26 = vpack.i.bf16 %v3787_v51, %v3786_v27  ;;  %v3647_v42 = vsel %vm483_vm14, %v6096_v60, %v6100_v38  ;;  %v14042_v34 = vunpack.i.h.bf16 %v10742_v15 }
 0x940   :  { %14033 = vst [vmem:[#allocation26_spill] sm:$0xff] %v11198_v24  ;;  %6493 = vrot.lane.b32.xlu1 %v14035_v2, %s6986_s22  ;;  %v11217_v30 = vsel %vm592_vm2, %v14036_v0, %v6251_v10  ;;  %v11224_v5 = vsel %vm562_vm15, %v13262_v13, %v14038_v23  ;;  %6498 = vrot.lane.b32.xlu0 %v6497_v21, %s6986_s22  ;;  %v6090_v2 = vunpack.i.l.bf16 %v10802_v59  ;;  %v6105_v0 = vunpack.i.l.bf16 %v10756_v40 }
 0x941   :  { %14037 = vst [vmem:[#allocation48_spill] sm:$0xff] %v11217_v30  ;;  %v11238_v27 = vpop.permute.xlu0 %6318  ;;  %v3569_v51 = vsel %vm299_vm8, %v5571_v25, %v6085_v16  ;;  %v3570_v13 = vsel %vm299_vm8, %v6085_v16, %v6086_v52  ;;  %v5601_v40 = vunpack.i.h.bf16 %v14041_v46  ;;  %v3648_v23 = vsel %vm483_vm14, %v6100_v38, %v14042_v34 }
 0x942   :  { %14039 = vst [vmem:[#allocation45_spill] sm:$0xff] %v11224_v5  ;;  %v11232_v10 = vpop.permute.xlu1 %6283  ;;  %6503 = vrot.lane.b32.xlu2 %v6502_v26, %s6986_s22  ;;  %v14043_v21 = vunpack.i.l.bf16 %v11121_v50  ;;  %v3571_v16 = vsel %vm299_vm8, %v6086_v52, %v6090_v2  ;;  %v14046_v17 = vunpack.i.h.bf16 %v10802_v59  ;;  %v6095_v46 = vunpack.i.l.bf16 %v10820_v47  ;;  %v14047_v50 = vld [vmem:[#allocation64_spill] sm:$0xff] }
 0x943   :  { %14040 = vst [vmem:[#allocation19_spill] sm:$0xff] %v11232_v10  ;;  %v14044_v26 = vunpack.i.h.bf16 %v11232_v10  ;;  %v6522_v33 = vpack.i.bf16 %v3648_v23, %v3647_v42  ;;  %v3721_v38 = vsel %vm239_vm5, %v5601_v40, %v6105_v0  ;;  %v3722_v34 = vsel %vm239_vm5, %v6105_v0, %v6106_v19 }
 0x944   :  { %v11249_v5 = vpop.permute.xlu2 %6343  ;;  %v3572_v30 = vsel %vm299_vm8, %v6090_v2, %v14046_v17  ;;  %v6507_v24 = vpack.i.bf16 %v3570_v13, %v3569_v51  ;;  %v5586_v39 = vunpack.i.h.bf16 %v14047_v50  ;;  %v3723_v10 = vsel %vm239_vm5, %v6106_v19, %v6110_v63 }
 0x945   :  { %v11256_v25 = vsel %vm420_vm6, %v14044_v26, %v14043_v21  ;;  %v14048_v21 = vunpack.i.h.bf16 %v10814_v57  ;;  %v13276_v2 = vunpack.i.h.bf16 %v11131_v43  ;;  %v6330_v47 = vunpack.i.l.bf16 %v11131_v43 }
 0x946   :  { %14045 = vst [vmem:[#allocation20_spill] sm:$0xff] %v11256_v25  ;;  %v6512_v42 = vpack.i.bf16 %v3572_v30, %v3571_v16  ;;  %v3645_v17 = vsel %vm483_vm14, %v5586_v39, %v6095_v46  ;;  %v3646_v13 = vsel %vm483_vm14, %v6095_v46, %v6096_v60  ;;  %v6527_v19 = vpack.i.bf16 %v3722_v34, %v3721_v38 }
 0x947   :  { %v3724_v52 = vsel %vm239_vm5, %v6110_v63, %v14048_v21  ;;  %v13277_v0 = vunpack.i.h.bf16 %v11094_v62  ;;  %v6221_v30 = vunpack.i.h.bf16 %v11004_v7  ;;  %v6125_v60 = vunpack.i.l.bf16 %v10850_v14 }
 0x948   :  { %6523 = vrot.lane.b32.xlu1 %v6522_v33, %s6986_s22  ;;  %6508 = vrot.lane.b32.xlu0 %v6507_v24, %s6986_s22  ;;  %v6532_v51 = vpack.i.bf16 %v3724_v52, %v3723_v10  ;;  %v13278_v24 = vunpack.i.h.bf16 %v10850_v14  ;;  %v11288_v26 = vsel %vm239_vm5, %v6330_v47, %v13276_v2  ;;  %v6206_v46 = vunpack.i.h.bf16 %v10876_v1 }
 0x949   :  { %v6324_v23 = vpop.permute.xlu0 %6323  ;;  %v6266_v14 = vunpack.i.h.bf16 %v10989_v41 }
 0x94a   :  { %v11276_v50 = vpop.permute.xlu1 %6308  ;;  %6513 = vrot.lane.b32.xlu2 %v6512_v42, %s6986_s22  ;;  %v6326_v39 = vunpack.i.h.bf16 %v6324_v23  ;;  %v6325_v40 = vunpack.i.l.bf16 %v6324_v23 }
 0x94b   :  { %14049 = vst [vmem:[#allocation25_spill] sm:$0xff] %v11276_v50  ;;  %v13274_v63 = vunpack.i.h.bf16 %v11276_v50  ;;  %v6310_v33 = vunpack.i.l.bf16 %v11276_v50 }
 0x94c   :  { %v11300_v7 = vpop.permute.xlu2 %6368  ;;  %v11305_v38 = vsel %vm239_vm5, %v6326_v39, %v6330_v47  ;;  %v11308_v34 = vsel %vm239_vm5, %v6221_v30, %v6325_v40  ;;  %v11311_v21 = vsel %vm239_vm5, %v6325_v40, %v6326_v39  ;;  %v6517_v30 = vpack.i.bf16 %v3646_v13, %v3645_v17 }
 0x94d   :  { %v11293_v16 = vsel %vm299_vm8, %v13277_v0, %v6310_v33  ;;  %v11298_v10 = vsel %vm299_vm8, %v6310_v33, %v13274_v63  ;;  %v13275_v33 = vunpack.i.h.bf16 %v11300_v7  ;;  %v13279_v23 = vunpack.i.l.bf16 %v11300_v7 }
 0x94e   :  { %v6115_v63 = vunpack.i.l.bf16 %v10770_v11  ;;  %v13281_v39 = vunpack.i.h.bf16 %v10856_v53  ;;  %v6135_v40 = vunpack.i.l.bf16 %v10856_v53  ;;  %v14050_v17 = vunpack.i.h.bf16 %v10770_v11 }
 0x94f   :  { %v11326_v47 = vsel %vm647_vm12, %v13279_v23, %v13275_v33 }
 0x950   :  { %6528 = vrot.lane.b32.xlu1 %v6527_v19, %s6986_s22  ;;  %6533 = vrot.lane.b32.xlu0 %v6532_v51, %s6986_s22  ;;  %v3933_v19 = vsel %vm592_vm2, %v6125_v60, %v13278_v24  ;;  %v3857_v13 = vsel %vm562_vm15, %v6115_v63, %v14050_v17  ;;  %v14052_v17 = vunpack.i.l.bf16 %v11184_v55 }
 0x951   :  { %v11339_v2 = vpop.permute.xlu0 %6333  ;;  %v6542_v23 = vpack.i.bf16 %v3933_v19, %v6125_v60  ;;  %v6547_v25 = vpack.i.bf16 %v3857_v13, %v6115_v63  ;;  %v6171_v60 = vunpack.i.h.bf16 %v10840_v54  ;;  %v6170_v19 = vunpack.i.l.bf16 %v10840_v54 }
 0x952   :  { %v11331_v42 = vpop.permute.xlu1 %6313  ;;  %6518 = vrot.lane.b32.xlu2 %v6517_v30, %s6986_s22  ;;  %v13283_v51 = vunpack.i.h.bf16 %v11339_v2  ;;  %v4009_v30 = vsel %vm622_vm4, %v6135_v40, %v13281_v39  ;;  %v6175_v39 = vunpack.i.l.bf16 %v10902_v9 }
 0x953   :  { %v13280_v52 = vunpack.i.h.bf16 %v11331_v42  ;;  %v6315_v33 = vunpack.i.l.bf16 %v11331_v42  ;;  %v6537_v11 = vpack.i.bf16 %v4009_v30, %v6135_v40  ;;  %v14055_v30 = vunpack.i.h.bf16 %v10784_v58 }
 0x954   :  { %v11354_v24 = vpop.permute.xlu2 %6373  ;;  %v3789_v40 = vsel %vm209_vm13, %v6171_v60, %v6175_v39  ;;  %v6180_v58 = vunpack.i.l.bf16 %v10858_v44 }
 0x955   :  { %v11347_v0 = vsel %vm483_vm14, %v6206_v46, %v6315_v33  ;;  %v11352_v1 = vsel %vm483_vm14, %v6315_v33, %v13280_v52  ;;  %14051 = vst [vmem:[#allocation46_spill] sm:$0xff] %v11354_v24  ;;  %v3866_v46 = vsel %vm562_vm15, %v13283_v51, %v14052_v17  ;;  %v14053_v33 = vunpack.i.h.bf16 %v11080_v8 }
 0x956   :  { %v6176_v17 = vunpack.i.h.bf16 %v10902_v9  ;;  %v14056_v51 = vunpack.i.l.bf16 %v10989_v41 }
 0x957   :  { %v11368_v52 = vpack.i.bf16 %v3866_v46, %v14053_v33  ;;  %v6552_v33 = vpack.i.bf16 %v6170_v19, %v14055_v30 }
 0x958   :  { %6543 = vrot.lane.b32.xlu1 %v6542_v23, %s6986_s22  ;;  %6548 = vrot.lane.b32.xlu0 %v6547_v25, %s6986_s22  ;;  %v3788_v23 = vsel %vm209_vm13, %v6170_v19, %v6171_v60  ;;  %v11394_v8 = vsel %vm622_vm4, %v14056_v51, %v6266_v14  ;;  %v3790_v19 = vsel %vm209_vm13, %v6175_v39, %v6176_v17 }
 0x959   :  { %14054 = vst [vmem:[#allocation28_spill] sm:$0xff] %v11368_v52  ;;  %v11382_v54 = vpop.permute.xlu0 %6358  ;;  %v14058_v52 = vunpack.i.h.bf16 %v11249_v5 }
 0x95a   :  { %v11377_v63 = vpop.permute.xlu1 %6348  ;;  %6538 = vrot.lane.b32.xlu2 %v6537_v11, %s6986_s22  ;;  %v6360_v9 = vunpack.i.l.bf16 %v11382_v54  ;;  %v14059_v41 = vunpack.i.h.bf16 %v11382_v54 }
 0x95b   :  { %v13284_v13 = vunpack.i.h.bf16 %v11377_v63  ;;  %v6350_v46 = vunpack.i.l.bf16 %v11377_v63 }
 0x95c   :  { %v11406_v25 = vpop.permute.xlu2 %6403  ;;  %v11415_v51 = vsel %vm622_vm4, %v6360_v9, %v14059_v41  ;;  %v6190_v41 = vunpack.i.l.bf16 %v10892_v45 }
 0x95d   :  { %v11399_v11 = vsel %vm592_vm2, %v6350_v46, %v13284_v13  ;;  %v11404_v60 = vsel %vm592_vm2, %v14058_v52, %v6350_v46  ;;  %v6557_v13 = vpack.i.bf16 %v3789_v40, %v3788_v23  ;;  %v6562_v52 = vpack.i.bf16 %v6176_v17, %v3790_v19 }
 0x95e   :  { %14057 = vst [vmem:[#allocation97_spill] sm:$0xff] %v11399_v11  ;;  %v14060_v46 = vunpack.i.h.bf16 %v10858_v44  ;;  %v14061_v17 = vunpack.i.h.bf16 %v10802_v59  ;;  %v14064_v19 = vunpack.i.h.bf16 %v11035_v36  ;;  %v14066_v59 = vunpack.i.l.bf16 %v11300_v7 }
 0x960   :  { %6553 = vrot.lane.b32.xlu1 %v6552_v33, %s6986_s22  ;;  %6558 = vrot.lane.b32.xlu0 %v6557_v13, %s6986_s22  ;;  %v3573_v39 = vsel %vm299_vm8, %v6180_v58, %v14060_v46  ;;  %v14063_v33 = vunpack.i.h.bf16 %v10929_v3 }
 0x961   :  { %v11427_v11 = vpop.permute.xlu0 %6363  ;;  %v6567_v40 = vpack.i.bf16 %v3573_v39, %v14061_v17 }
 0x962   :  { %v11424_v50 = vpop.permute.xlu1 %6353  ;;  %6563 = vrot.lane.b32.xlu2 %v6562_v52, %s6986_s22  ;;  %v13287_v23 = vunpack.i.h.bf16 %v11427_v11  ;;  %v3576_v58 = vsel %vm299_vm8, %v14063_v33, %v6190_v41  ;;  %v14065_v52 = vunpack.i.l.bf16 %v11035_v36  ;;  %v6195_v33 = vunpack.i.l.bf16 %v10974_v29 }
 0x963   :  { %v13288_v14 = vunpack.i.h.bf16 %v11424_v50  ;;  %v13296_v36 = vunpack.i.h.bf16 %v11238_v27 }
 0x964   :  { %v11439_v13 = vpop.permute.xlu2 %6408  ;;  %v11449_v46 = vsel %vm622_vm4, %v14065_v52, %v14064_v19  ;;  %v6577_v19 = vpack.i.bf16 %v6190_v41, %v3576_v58  ;;  %v14069_v58 = vunpack.i.h.bf16 %v10974_v29  ;;  %v14072_v29 = vunpack.i.h.bf16 %v10742_v15 }
 0x965   :  { %v11437_v44 = vsel %vm622_vm4, %v13288_v14, %v6360_v9  ;;  %v11456_v9 = vsel %vm647_vm12, %v13287_v23, %v14066_v59  ;;  %v6411_v39 = vunpack.i.h.bf16 %v11439_v13  ;;  %v6410_v17 = vunpack.i.l.bf16 %v11439_v13 }
 0x966   :  { %14062 = vst [vmem:[#allocation65_spill] sm:$0xff] %v11437_v44  ;;  %v14067_v59 = vpack.i.bf16 %v10949_v20, %v10944_v31  ;;  %v13291_v13 = vunpack.i.h.bf16 %v11354_v24  ;;  %v3649_v31 = vsel %vm483_vm14, %v6195_v33, %v14069_v58  ;;  %v6210_v33 = vunpack.i.l.bf16 %v10938_v4 }
 0x967   :  { %v3657_v52 = vsel %vm483_vm14, %v6410_v17, %v6411_v39  ;;  %v14074_v15 = vunpack.i.h.bf16 %v10938_v4 }
 0x968   :  { %6568 = vrot.lane.b32.xlu1 %v6567_v40, %s6986_s22  ;;  %6573 = vrot.lane.b32.xlu0 %v14067_v59, %s6986_s22  ;;  %v11472_v23 = vpack.i.bf16 %v3657_v52, %v13296_v36  ;;  %v14082_v36 = vld [vmem:[#allocation33_spill] sm:$0xff] }
 0x969   :  { %v11479_v41 = vpop.permute.xlu0 %6383 }
 0x96a   :  { %v11474_v3 = vpop.permute.xlu1 %6378  ;;  %6578 = vrot.lane.b32.xlu2 %v6577_v19, %s6986_s22  ;;  %v6385_v20 = vunpack.i.l.bf16 %v11479_v41  ;;  %v6582_v19 = vpack.i.bf16 %v3649_v31, %v14072_v29  ;;  %v3725_v31 = vsel %vm239_vm5, %v6210_v33, %v14074_v15  ;;  %v14076_v29 = vunpack.i.h.bf16 %v10814_v57 }
 0x96b   :  { %14068 = vst [vmem:[#allocation30_spill] sm:$0xff] %v11474_v3  ;;  %v13290_v30 = vunpack.i.h.bf16 %v11474_v3  ;;  %v13289_v40 = vunpack.i.l.bf16 %v11474_v3  ;;  %v13292_v57 = vunpack.i.l.bf16 %v10868_v61  ;;  %v6295_v15 = vunpack.i.l.bf16 %v11158_v49 }
 0x96c   :  { %v11486_v17 = vpop.permute.xlu2 %3719 }
 0x96d   :  { %v11493_v52 = vsel %vm420_vm6, %v13291_v13, %v13289_v40  ;;  %v11498_v59 = vsel %vm420_vm6, %v13290_v30, %v6385_v20  ;;  %v14073_v40 = vpack.i.bf16 %v10982_v35, %v10987_v37  ;;  %v13293_v30 = vunpack.i.h.bf16 %v11406_v25 }
 0x96e   :  { %14070 = vst [vmem:[#allocation81_spill] sm:$0xff] %v11493_v52 }
 0x96f   :  { %14071 = vst [vmem:[#allocation94_spill] sm:$0xff] %v11498_v59  ;;  %v14083_v59 = vunpack.i.h.bf16 %v11014_v6 }
 0x970   :  { %6593 = vrot.lane.b32.xlu1 %v10915_v32, %s6986_s22  ;;  %6583 = vrot.lane.b32.xlu0 %v6582_v19, %s6986_s22  ;;  %v14075_v32 = vpack.i.bf16 %v10954_v22, %v10961_v18  ;;  %v6597_v19 = vpack.i.bf16 %v3725_v31, %v14076_v29  ;;  %v13306_v29 = vunpack.i.l.bf16 %v14082_v36 }
 0x971   :  { %v11508_v14 = vpop.permute.xlu0 %6393 }
 0x972   :  { %v11506_v58 = vpop.permute.xlu1 %6388  ;;  %6588 = vrot.lane.b32.xlu2 %v14073_v40, %s6986_s22 }
 0x974   :  { %v11514_v20 = vpop.permute.xlu2 %6438 }
 0x978   :  { %6603 = vrot.lane.b32.xlu1 %v14075_v32, %s6986_s22  ;;  %6608 = vrot.lane.b32.xlu0 %v11016_v12, %s6986_s22  ;;  %v6146_v12 = vunpack.i.h.bf16 %v10804_v56 }
 0x979   :  { %v11536_v37 = vpop.permute.xlu0 %6398 }
 0x97a   :  { %v11528_v35 = vpop.permute.xlu1 %3567  ;;  %6598 = vrot.lane.b32.xlu2 %v6597_v19, %s6986_s22  ;;  %v11551_v31 = vsel %vm647_vm12, %v6146_v12, %v13292_v57  ;;  %v14079_v19 = vld [vmem:[#allocation56_spill] sm:$0xff]  ;;  %v14080_v57 = vunpack.i.h.bf16 %v11158_v49 }
 0x97b   :  { %v11534_v4 = vsel %vm299_vm8, %v13293_v30, %v11528_v35  ;;  %14077 = vst [vmem:[#allocation70_spill] sm:$0xff] %v11551_v31  ;;  %v14087_v31 = vld [vmem:[#allocation18_spill] sm:$0xff] }
 0x97c   :  { %v11542_v18 = vpop.permute.xlu2 %6448  ;;  %v3791_v22 = vsel %vm209_vm13, %v6295_v15, %v14080_v57  ;;  %v14089_v44 = vunpack.i.l.bf16 %v14087_v31 }
 0x97d   :  { %v13295_v40 = vunpack.i.h.bf16 %v11542_v18  ;;  %v13294_v33 = vunpack.i.l.bf16 %v11542_v18  ;;  %v6637_v61 = vpack.i.bf16 %v3791_v22, %v6295_v15  ;;  %v14090_v22 = vunpack.i.h.bf16 %v11382_v54 }
 0x97e   :  { %v14092_v54 = vunpack.i.h.bf16 %v11094_v62 }
 0x97f   :  { %v11558_v32 = vsel %vm592_vm2, %v13294_v33, %v13295_v40 }
 0x980   :  { %14078 = vst [vmem:[#allocation84_spill] sm:$0xff] %v11558_v32  ;;  %6623 = vrot.lane.b32.xlu1 %v10994_v28, %s6986_s22  ;;  %6613 = vrot.lane.b32.xlu0 %v14079_v19, %s6986_s22  ;;  %v14081_v28 = vld [vmem:[#allocation15_spill] sm:$0xff]  ;;  %v14084_v19 = vunpack.i.l.bf16 %v11014_v6  ;;  %v14088_v32 = vunpack.i.h.bf16 %v14087_v31 }
 0x982   :  { %v11566_v13 = vpop.permute.xlu1 %6413  ;;  %v11573_v40 = vpop.permute.xlu0 %3643  ;;  %6618 = vrot.lane.b32.xlu2 %v14081_v28, %s6986_s22  ;;  %v4090_v3 = vsel %vm647_vm12, %v14084_v19, %v14083_v59  ;;  %v14085_v28 = vunpack.i.h.bf16 %v10856_v53  ;;  %v6305_v19 = vunpack.i.l.bf16 %v11094_v62  ;;  %v11610_v53 = vsel %vm592_vm2, %v14089_v44, %v14088_v32 }
 0x983   :  { %v13303_v30 = vunpack.i.h.bf16 %v11566_v13  ;;  %v6415_v33 = vunpack.i.l.bf16 %v11566_v13 }
 0x984   :  { %v11591_v24 = vpop.permute.xlu2 %6458  ;;  %v4010_v52 = vsel %vm622_vm4, %v14085_v28, %v13306_v29  ;;  %v3578_v32 = vsel %vm299_vm8, %v6305_v19, %v14092_v54  ;;  %v14097_v29 = vunpack.i.h.bf16 %v11238_v27 }
 0x985   :  { %v11584_v49 = vsel %vm483_vm14, %v6411_v39, %v6415_v33  ;;  %v11589_v57 = vsel %vm483_vm14, %v6415_v33, %v13303_v30  ;;  %v6460_v39 = vunpack.i.l.bf16 %v11591_v24  ;;  %v6627_v59 = vpack.i.bf16 %v4010_v52, %v4090_v3  ;;  %v14091_v52 = vld [vmem:[#allocation43_spill] sm:$0xff] }
 0x986   :  { %v14086_v33 = vunpack.i.l.bf16 %v10804_v56  ;;  %v6191_v3 = vunpack.i.h.bf16 %v10892_v45 }
 0x987   :  { %v11615_v15 = vsel %vm622_vm4, %v14090_v22, %v6460_v39  ;;  %v14093_v39 = vld [vmem:[#allocation42_spill] sm:$0xff] }
 0x988   :  { %v4085_v30 = vsel %vm647_vm12, %v14086_v33, %v6146_v12  ;;  %6638 = vrot.lane.b32.xlu1 %v6637_v61, %s6986_s22  ;;  %6628 = vrot.lane.b32.xlu0 %v6627_v59, %s6986_s22  ;;  %v3577_v44 = vsel %vm299_vm8, %v6191_v3, %v6305_v19  ;;  %v6225_v59 = vunpack.i.l.bf16 %v14093_v39  ;;  %v14094_v19 = vunpack.i.h.bf16 %v11331_v42 }
 0x989   :  { %v6632_v56 = vpack.i.bf16 %v4085_v30, %v14091_v52  ;;  %v6320_v30 = vunpack.i.l.bf16 %v11238_v27  ;;  %v6647_v62 = vpack.i.bf16 %v3578_v32, %v3577_v44  ;;  %v14095_v52 = vunpack.i.h.bf16 %v11131_v43  ;;  %v14098_v32 = vld [vmem:[#allocation21_spill] sm:$0xff] }
 0x98a   :  { %v11623_v31 = vpop.permute.xlu1 %6418  ;;  %v11631_v45 = vpop.permute.xlu0 %6423 }
 0x98b   :  { %v13308_v28 = vunpack.i.h.bf16 %v11623_v31  ;;  %v6420_v61 = vunpack.i.l.bf16 %v11623_v31  ;;  %6633 = vrot.lane.b32.xlu2 %v6632_v56, %s6986_s22  ;;  %v3655_v3 = vsel %vm483_vm14, %v14094_v19, %v6320_v30  ;;  %v14096_v56 = vld [vmem:[#allocation38_spill] sm:$0xff] }
 0x98c   :  { %v11639_v22 = vpop.permute.xlu2 %6483  ;;  %v13307_v6 = vunpack.i.h.bf16 %v14096_v56 }
 0x98d   :  { %v3733_v33 = vsel %vm239_vm5, %v6420_v61, %v13308_v28  ;;  %v6486_v12 = vunpack.i.h.bf16 %v11639_v22  ;;  %v13309_v39 = vunpack.i.l.bf16 %v11639_v22  ;;  %v3656_v61 = vsel %vm483_vm14, %v6320_v30, %v14097_v29 }
 0x98e   :  { %v11646_v54 = vpack.i.bf16 %v3733_v33, %v14095_v52  ;;  %v11658_v42 = vsel %vm562_vm15, %v13307_v6, %v6225_v59  ;;  %v6662_v43 = vpack.i.bf16 %v3656_v61, %v3655_v3  ;;  %v14099_v33 = vld [vmem:[#allocation26_spill] sm:$0xff]  ;;  %v6440_v59 = vunpack.i.l.bf16 %v11514_v20 }
 0x98f   :  { %v11663_v44 = vsel %vm647_vm12, %v13309_v39, %v6486_v12  ;;  %v14100_v19 = vpack.i.bf16 %v14098_v32, %v14099_v33  ;;  %v6355_v12 = vunpack.i.l.bf16 %v11424_v50  ;;  %v13313_v6 = vunpack.i.l.bf16 %v11427_v11 }
 0x990   :  { %6648 = vrot.lane.b32.xlu1 %v6647_v62, %s6986_s22  ;;  %v14101_v32 = vunpack.i.h.bf16 %v11184_v55  ;;  %v6386_v28 = vunpack.i.h.bf16 %v11479_v41 }
 0x991   :  { %6643 = vrot.lane.b32.xlu0 %v14100_v19, %s6986_s22 }
 0x992   :  { %v6429_v29 = vpop.permute.xlu1 %6428  ;;  %v6434_v52 = vpop.permute.xlu0 %6433 }
 0x993   :  { %v6431_v30 = vunpack.i.h.bf16 %v6429_v29  ;;  %v6430_v62 = vunpack.i.l.bf16 %v6429_v29  ;;  %6663 = vrot.lane.b32.xlu2 %v6662_v43, %s6986_s22  ;;  %v6436_v3 = vunpack.i.h.bf16 %v6434_v52  ;;  %v6435_v61 = vunpack.i.l.bf16 %v6434_v52 }
 0x994   :  { %v11680_v19 = vpop.permute.xlu2 %6488  ;;  %v14103_v29 = vpack.i.bf16 %v11298_v10, %v11293_v16  ;;  %v14105_v16 = vpack.i.bf16 %v11311_v21, %v11308_v34  ;;  %v14109_v21 = vunpack.i.h.bf16 %v11377_v63  ;;  %v14111_v63 = vunpack.i.h.bf16 %v11249_v5 }
 0x995   :  { %v11678_v33 = vsel %vm562_vm15, %v14101_v32, %v6430_v62  ;;  %v11685_v43 = vsel %vm562_vm15, %v6436_v3, %v6440_v59  ;;  %v3869_v27 = vsel %vm562_vm15, %v6431_v30, %v6435_v61  ;;  %v3870_v52 = vsel %vm562_vm15, %v6435_v61, %v6436_v3 }
 0x996   :  { %v11690_v39 = vpack.i.bf16 %v3869_v27, %v6431_v30  ;;  %v11694_v55 = vpack.i.bf16 %v3870_v52, %v13313_v6  ;;  %v13310_v62 = vunpack.i.l.bf16 %v11680_v19  ;;  %v14102_v32 = vpack.i.bf16 %v11288_v26, %v11305_v38 }
 0x997   :  { %v6335_v27 = vunpack.i.l.bf16 %v11339_v2  ;;  %v14104_v3 = vunpack.i.h.bf16 %v11424_v50  ;;  %v14108_v52 = vunpack.i.h.bf16 %v11339_v2  ;;  %v14110_v2 = vpack.i.bf16 %v11352_v1, %v11347_v0 }
 0x998   :  { %6673 = vrot.lane.b32.xlu1 %v14102_v32, %s6986_s22  ;;  %v11708_v41 = vsel %vm420_vm6, %v6386_v28, %v13310_v62  ;;  %v14106_v28 = vunpack.i.h.bf16 %v11542_v18  ;;  %v14114_v0 = vunpack.i.l.bf16 %v14082_v36  ;;  %v6400_v34 = vunpack.i.l.bf16 %v11536_v37 }
 0x999   :  { %6653 = vrot.lane.b32.xlu0 %v14103_v29, %s6986_s22  ;;  %v4017_v61 = vsel %vm622_vm4, %v6355_v12, %v14104_v3  ;;  %v3865_v32 = vsel %vm562_vm15, %v6335_v27, %v14108_v52 }
 0x99a   :  { %v11711_v30 = vpop.permute.xlu1 %6453  ;;  %v11717_v38 = vpop.permute.xlu0 %6443  ;;  %v6677_v3 = vpack.i.bf16 %v4017_v61, %v6355_v12 }
 0x99b   :  { %v13311_v26 = vunpack.i.l.bf16 %v11711_v30  ;;  %6668 = vrot.lane.b32.xlu2 %v14105_v16, %s6986_s22  ;;  %v6445_v10 = vunpack.i.l.bf16 %v11717_v38 }
 0x99c   :  { %v11731_v50 = vpop.permute.xlu2 %6503 }
 0x99d   :  { %v11729_v29 = vsel %vm592_vm2, %v14106_v28, %v13311_v26  ;;  %14107 = vst [vmem:[#allocation53_spill] sm:$0xff] %v11731_v50  ;;  %v11741_v16 = vsel %vm592_vm2, %v14109_v21, %v6445_v10  ;;  %v6345_v28 = vunpack.i.l.bf16 %v11249_v5  ;;  %v6687_v26 = vpack.i.bf16 %v3865_v32, %v6335_v27 }
 0x99e   :  { %v14113_v32 = vunpack.i.h.bf16 %v14082_v36  ;;  %v6441_v36 = vunpack.i.h.bf16 %v11514_v20 }
 0x99f   :  { %v3941_v10 = vsel %vm592_vm2, %v6345_v28, %v14111_v63 }
 0x9a0   :  { %6678 = vrot.lane.b32.xlu1 %v6677_v3, %s6986_s22  ;;  %v11768_v1 = vsel %vm622_vm4, %v14114_v0, %v14113_v32  ;;  %v6682_v5 = vpack.i.bf16 %v3941_v10, %v6345_v28  ;;  %v14116_v28 = vpack.i.bf16 %v11449_v46, %v11456_v9  ;;  %v6391_v9 = vunpack.i.h.bf16 %v11506_v58 }
 0x9a1   :  { %6658 = vrot.lane.b32.xlu0 %v14110_v2, %s6986_s22  ;;  %v14115_v2 = vpack.i.bf16 %v11103_v48, %v11415_v51  ;;  %v6390_v48 = vunpack.i.l.bf16 %v11506_v58  ;;  %v14117_v51 = vunpack.i.h.bf16 %v11300_v7  ;;  %v6401_v58 = vunpack.i.h.bf16 %v11536_v37 }
 0x9a2   :  { %v11751_v12 = vpop.permute.xlu1 %6463  ;;  %v11753_v61 = vpop.permute.xlu0 %6468 }
 0x9a3   :  { %6688 = vrot.lane.b32.xlu2 %v6687_v26, %s6986_s22  ;;  %v6471_v52 = vunpack.i.h.bf16 %v11753_v61  ;;  %v13314_v3 = vunpack.i.l.bf16 %v11753_v61 }
 0x9a4   :  { %v11761_v27 = vpop.permute.xlu2 %6513 }
 0x9a5   :  { %14112 = vst [vmem:[#allocation93_spill] sm:$0xff] %v11761_v27  ;;  %v11773_v26 = vsel %vm622_vm4, %v13314_v3, %v6471_v52 }
 0x9a8   :  { %6698 = vrot.lane.b32.xlu1 %v14115_v2, %s6986_s22  ;;  %v14118_v2 = vunpack.i.l.bf16 %v11639_v22  ;;  %v14120_v22 = vld [vmem:[#allocation10_spill] sm:$0xff] }
 0x9a9   :  { %6683 = vrot.lane.b32.xlu0 %v6682_v5, %s6986_s22  ;;  %v11802_v5 = vsel %vm562_vm15, %v6440_v59, %v6441_v36  ;;  %v14119_v59 = vpack.i.bf16 %v11610_v53, %v11615_v15  ;;  %v14121_v36 = vunpack.i.h.bf16 %v14120_v22  ;;  %v13322_v53 = vunpack.i.h.bf16 %v11680_v19 }
 0x9aa   :  { %v11783_v63 = vpop.permute.xlu1 %6473  ;;  %v11786_v0 = vpop.permute.xlu0 %6478 }
 0x9ab   :  { %v6475_v32 = vunpack.i.l.bf16 %v11783_v63  ;;  %6693 = vrot.lane.b32.xlu2 %v14116_v28, %s6986_s22  ;;  %v13312_v10 = vunpack.i.h.bf16 %v11786_v0  ;;  %v6395_v28 = vunpack.i.l.bf16 %v11508_v14 }
 0x9ac   :  { %v11799_v20 = vpop.permute.xlu2 %6518 }
 0x9ad   :  { %v11797_v52 = vsel %vm647_vm12, %v14117_v51, %v6475_v32  ;;  %v11809_v46 = vsel %vm647_vm12, %v13312_v10, %v14118_v2  ;;  %v6396_v32 = vunpack.i.h.bf16 %v11508_v14  ;;  %v6712_v51 = vpack.i.bf16 %v6390_v48, %v14121_v36  ;;  %v14122_v2 = vld [vmem:[#allocation97_spill] sm:$0xff] }
 0x9ae   :  { %v14123_v62 = vpack.i.bf16 %v11394_v8, %v14122_v2  ;;  %v3794_v14 = vsel %vm209_vm13, %v6390_v48, %v6391_v9  ;;  %v3795_v21 = vsel %vm209_vm13, %v6391_v9, %v6395_v28  ;;  %v3581_v36 = vsel %vm299_vm8, %v6400_v34, %v6401_v58  ;;  %v14127_v10 = vld [vmem:[#allocation25_spill] sm:$0xff] }
 0x9af   :  { %v3796_v8 = vsel %vm209_vm13, %v6395_v28, %v6396_v32  ;;  %v6717_v9 = vpack.i.bf16 %v3795_v21, %v3794_v14  ;;  %v6405_v2 = vunpack.i.l.bf16 %v11406_v25  ;;  %v14128_v6 = vunpack.i.h.bf16 %v14127_v10 }
 0x9b0   :  { %6703 = vrot.lane.b32.xlu1 %v14119_v59, %s6986_s22  ;;  %v13321_v14 = vunpack.i.h.bf16 %v11799_v20 }
 0x9b1   :  { %6708 = vrot.lane.b32.xlu0 %v14123_v62, %s6986_s22  ;;  %v13316_v62 = vunpack.i.l.bf16 %v11731_v50  ;;  %v6727_v3 = vpack.i.bf16 %v3581_v36, %v14128_v6  ;;  %v3582_v34 = vsel %vm299_vm8, %v6401_v58, %v6405_v2  ;;  %v14130_v6 = vunpack.i.h.bf16 %v11406_v25 }
 0x9b2   :  { %v11828_v7 = vpop.permute.xlu1 %6493  ;;  %v11834_v59 = vpop.permute.xlu0 %6498 }
 0x9b3   :  { %14124 = vst [vmem:[#allocation87_spill] sm:$0xff] %v11828_v7  ;;  %v13315_v15 = vunpack.i.l.bf16 %v11828_v7  ;;  %6713 = vrot.lane.b32.xlu2 %v6712_v51, %s6986_s22  ;;  %v13319_v37 = vunpack.i.h.bf16 %v11834_v59  ;;  %v6722_v51 = vpack.i.bf16 %v6396_v32, %v3796_v8  ;;  %v13318_v32 = vunpack.i.l.bf16 %v11761_v27 }
 0x9b4   :  { %v11840_v22 = vpop.permute.xlu2 %6538  ;;  %v3583_v10 = vsel %vm299_vm8, %v6405_v2, %v14130_v6  ;;  %v6425_v6 = vunpack.i.l.bf16 %v11631_v45  ;;  %v14158_v7 = vunpack.i.l.bf16 %v11751_v12 }
 0x9b5   :  { %v11847_v48 = vsel %vm420_vm6, %v13322_v53, %v13315_v15  ;;  %v11855_v28 = vsel %vm420_vm6, %v13319_v37, %v13316_v62  ;;  %v6732_v36 = vpack.i.bf16 %v3583_v10, %v3582_v34  ;;  %v14133_v34 = vpack.i.bf16 %v11528_v35, %v11534_v4 }
 0x9b6   :  { %14125 = vst [vmem:[#allocation88_spill] sm:$0xff] %v11847_v48 }
 0x9b7   :  { %14126 = vst [vmem:[#allocation68_spill] sm:$0xff] %v11855_v28 }
 0x9b8   :  { %6718 = vrot.lane.b32.xlu1 %v6717_v9, %s6986_s22 }
 0x9b9   :  { %6723 = vrot.lane.b32.xlu0 %v6722_v51, %s6986_s22 }
 0x9ba   :  { %v11862_v21 = vpop.permute.xlu1 %6523  ;;  %v11866_v15 = vpop.permute.xlu0 %6508 }
 0x9bb   :  { %14129 = vst [vmem:[#allocation96_spill] sm:$0xff] %v11862_v21  ;;  %v13317_v62 = vunpack.i.l.bf16 %v11862_v21  ;;  %6728 = vrot.lane.b32.xlu2 %v6727_v3, %s6986_s22  ;;  %v13320_v8 = vunpack.i.h.bf16 %v11866_v15  ;;  %v14132_v3 = vunpack.i.h.bf16 %v11566_v13  ;;  %v6426_v13 = vunpack.i.h.bf16 %v11631_v45 }
 0x9bc   :  { %v11875_v9 = vpop.permute.xlu2 %6563 }
 0x9bd   :  { %14131 = vst [vmem:[#allocation66_spill] sm:$0xff] %v11875_v9  ;;  %v11882_v58 = vsel %vm420_vm6, %v13321_v14, %v13317_v62  ;;  %v3660_v51 = vsel %vm483_vm14, %v14132_v3, %v11573_v40  ;;  %v11893_v25 = vsel %vm420_vm6, %v13320_v8, %v13318_v32  ;;  %v3735_v4 = vsel %vm239_vm5, %v6425_v6, %v6426_v13 }
 0x9be   :  { %v6752_v2 = vpack.i.bf16 %v11573_v40, %v3660_v51  ;;  %v14135_v40 = vunpack.i.h.bf16 %v11623_v31  ;;  %v14137_v31 = vpack.i.bf16 %v11589_v57, %v11584_v49  ;;  %v6446_v57 = vunpack.i.h.bf16 %v11717_v38 }
 0x9c0   :  { %6733 = vrot.lane.b32.xlu1 %v6732_v36, %s6986_s22  ;;  %v3734_v35 = vsel %vm239_vm5, %v14135_v40, %v6425_v6 }
 0x9c1   :  { %6738 = vrot.lane.b32.xlu0 %v14133_v34, %s6986_s22  ;;  %v13328_v34 = vunpack.i.l.bf16 %v11751_v12 }
 0x9c2   :  { %v11903_v10 = vpop.permute.xlu1 %6528  ;;  %v6534_v3 = vpop.permute.xlu0 %6533 }
 0x9c3   :  { %v13325_v62 = vunpack.i.h.bf16 %v11903_v10  ;;  %6753 = vrot.lane.b32.xlu2 %v6752_v2, %s6986_s22  ;;  %v6536_v32 = vunpack.i.h.bf16 %v6534_v3  ;;  %v6535_v36 = vunpack.i.l.bf16 %v6534_v3  ;;  %v6762_v2 = vpack.i.bf16 %v3735_v4, %v3734_v35 }
 0x9c4   :  { %v11907_v37 = vpop.permute.xlu2 %6578  ;;  %v3736_v3 = vsel %vm239_vm5, %v6426_v13, %v11486_v17  ;;  %vm5030_vm5 = vcmask 1040384  }
 0x9c5   :  { %14134 = vst [vmem:[#allocation74_spill] sm:$0xff] %v11907_v37  ;;  %v11916_v45 = vsel %vm420_vm6, %v13325_v62, %v6535_v36  ;;  %v11919_v51 = vsel %vm420_vm6, %v6535_v36, %v6536_v32  ;;  %v6461_v36 = vunpack.i.h.bf16 %v11591_v24  ;;  %v6767_v35 = vpack.i.bf16 %v11486_v17, %v3736_v3 }
 0x9c6   :  { %14136 = vst [vmem:[#allocation57_spill] sm:$0xff] %v11919_v51 }
 0x9c7   :  { %v4021_v49 = vsel %vm622_vm4, %v6461_v36, %v13328_v34 }
 0x9c8   :  { %6743 = vrot.lane.b32.xlu1 %v11472_v23, %s6986_s22  ;;  %v6772_v4 = vpack.i.bf16 %v4021_v49, %v6461_v36 }
 0x9c9   :  { %6748 = vrot.lane.b32.xlu0 %v14137_v31, %s6986_s22  ;;  %v13323_v31 = vunpack.i.h.bf16 %v11731_v50 }
 0x9ca   :  { %v11928_v6 = vpop.permute.xlu1 %6543  ;;  %v11932_v40 = vpop.permute.xlu0 %6548 }
 0x9cb   :  { %6763 = vrot.lane.b32.xlu2 %v6762_v2, %s6986_s22  ;;  %v14138_v2 = vunpack.i.l.bf16 %v11542_v18 }
 0x9cc   :  { %v11936_v23 = vpop.permute.xlu2 %6588 }
 0x9cd   :  { %v3945_v24 = vsel %vm592_vm2, %v6446_v57, %v14138_v2  ;;  %v14141_v2 = vld [vmem:[#allocation39_spill] sm:$0xff] }
 0x9ce   :  { %v13329_v14 = vunpack.i.l.bf16 %v14141_v2 }
 0x9d0   :  { %6768 = vrot.lane.b32.xlu1 %v6767_v35, %s6986_s22  ;;  %v6476_v35 = vunpack.i.h.bf16 %v11783_v63 }
 0x9d1   :  { %6758 = vrot.lane.b32.xlu0 %v11646_v54, %s6986_s22  ;;  %v13326_v54 = vunpack.i.l.bf16 %v11875_v9 }
 0x9d2   :  { %v6554_v13 = vpop.permute.xlu1 %6553  ;;  %v11950_v17 = vpop.permute.xlu0 %6558 }
 0x9d3   :  { %14139 = vst [vmem:[#allocation71_spill] sm:$0xff] %v11950_v17  ;;  %v6556_v3 = vunpack.i.h.bf16 %v6554_v13  ;;  %v6555_v8 = vunpack.i.l.bf16 %v6554_v13  ;;  %6773 = vrot.lane.b32.xlu2 %v6772_v4, %s6986_s22  ;;  %v13327_v38 = vunpack.i.h.bf16 %v11950_v17  ;;  %v13324_v36 = vunpack.i.l.bf16 %v11950_v17 }
 0x9d4   :  { %v11957_v49 = vpop.permute.xlu2 %6598  ;;  %v6782_v13 = vpack.i.bf16 %v3945_v24, %v6446_v57 }
 0x9d5   :  { %v11962_v18 = vsel %vm420_vm6, %v13323_v31, %v6555_v8  ;;  %v6600_v4 = vunpack.i.l.bf16 %v11957_v49  ;;  %v11969_v53 = vsel %vm420_vm6, %v6556_v3, %v13324_v36  ;;  %v11976_v63 = vsel %vm420_vm6, %v13327_v38, %v13326_v54  ;;  %v14143_v31 = vld [vmem:[#allocation24_spill] sm:$0xff] }
 0x9d6   :  { %14140 = vst [vmem:[#allocation62_spill] sm:$0xff] %v11962_v18  ;;  %v6466_v8 = vunpack.i.h.bf16 %v11751_v12  ;;  %v14144_v57 = vunpack.i.h.bf16 %v14143_v31  ;;  %v13332_v54 = vunpack.i.h.bf16 %v11761_v27  ;;  %v14146_v31 = vunpack.i.l.bf16 %v11753_v61 }
 0x9d7   :  { %14142 = vst [vmem:[#allocation89_spill] sm:$0xff] %v11976_v63  ;;  %v11986_v3 = vsel %vm420_vm6, %v6536_v32, %v6600_v4 }
 0x9d8   :  { %v3934_v24 = vsel %vm592_vm2, %v14144_v57, %v13329_v14  ;;  %6783 = vrot.lane.b32.xlu1 %v6782_v13, %s6986_s22  ;;  %14145 = vst [vmem:[#allocation73_spill] sm:$0xff] %v11986_v3  ;;  %v4023_v13 = vsel %vm622_vm4, %v6466_v8, %v14146_v31  ;;  %v13333_v57 = vunpack.i.l.bf16 %v11907_v37  ;;  %v4022_v37 = vsel %vm622_vm4, %v14158_v7, %v6466_v8 }
 0x9d9   :  { %v6777_v36 = vpack.i.bf16 %v3934_v24, %v6476_v35  ;;  %6803 = vrot.lane.b32.xlu0 %v11690_v39, %s6986_s22 }
 0x9da   :  { %v6569_v62 = vpop.permute.xlu1 %6568  ;;  %v11991_v38 = vpop.permute.xlu0 %6573 }
 0x9db   :  { %v6571_v34 = vunpack.i.h.bf16 %v6569_v62  ;;  %v6570_v18 = vunpack.i.l.bf16 %v6569_v62  ;;  %6778 = vrot.lane.b32.xlu2 %v6777_v36, %s6986_s22  ;;  %v13335_v32 = vunpack.i.h.bf16 %v11991_v38  ;;  %v13334_v4 = vunpack.i.l.bf16 %v11991_v38 }
 0x9dc   :  { %v12000_v39 = vpop.permute.xlu2 %6618  ;;  %v14148_v62 = vunpack.i.h.bf16 %v11427_v11  ;;  %v14149_v36 = vunpack.i.l.bf16 %v11427_v11  ;;  %v6480_v11 = vunpack.i.l.bf16 %v11786_v0 }
 0x9dd   :  { %v12005_v24 = vsel %vm420_vm6, %v13332_v54, %v6570_v18  ;;  %v12015_v31 = vsel %vm420_vm6, %v6571_v34, %v13334_v4  ;;  %v12022_v9 = vsel %vm420_vm6, %v13335_v32, %v13333_v57  ;;  %v14151_v18 = vld [vmem:[#allocation31_spill] sm:$0xff]  ;;  %v14152_v54 = vld [vmem:[#allocation14_spill] sm:$0xff]  ;;  %v13343_v34 = vunpack.i.h.bf16 %v11936_v23 }
 0x9de   :  { %14147 = vst [vmem:[#allocation85_spill] sm:$0xff] %v12005_v24  ;;  %v4093_v61 = vsel %vm647_vm12, %v14149_v36, %v14148_v62  ;;  %v14153_v24 = vpack.i.bf16 %v14151_v18, %v14152_v54  ;;  %v13345_v57 = vunpack.i.h.bf16 %v11862_v21  ;;  %v13344_v4 = vunpack.i.l.bf16 %v11936_v23 }
 0x9df   :  { %v6817_v14 = vpack.i.bf16 %v4093_v61, %v4023_v13  ;;  %14150 = vst [vmem:[#allocation99_spill] sm:$0xff] %v12022_v9  ;;  %v14155_v61 = vld [vmem:[#allocation40_spill] sm:$0xff]  ;;  %v4097_v32 = vsel %vm647_vm12, %v6476_v35, %v6480_v11  ;;  %v14160_v35 = vld [vmem:[#allocation47_spill] sm:$0xff] }
 0x9e0   :  { %6788 = vrot.lane.b32.xlu1 %v14153_v24, %s6986_s22 }
 0x9e1   :  { %6818 = vrot.lane.b32.xlu0 %v6817_v14, %s6986_s22 }
 0x9e2   :  { %v12030_v62 = vpop.permute.xlu1 %6593  ;;  %v6584_v13 = vpop.permute.xlu0 %6583 }
 0x9e3   :  { %14154 = vst [vmem:[#allocation59_spill] sm:$0xff] %v12030_v62  ;;  %v13342_v36 = vunpack.i.l.bf16 %v12030_v62  ;;  %6798 = vrot.lane.b32.xlu2 %v14155_v61, %s6986_s22  ;;  %v6586_v54 = vunpack.i.h.bf16 %v6584_v13  ;;  %v6585_v24 = vunpack.i.l.bf16 %v6584_v13  ;;  %v14159_v62 = vld [vmem:[#allocation28_spill] sm:$0xff] }
 0x9e5   :  { %v12038_v18 = vpop.permute.xlu2 %6633  ;;  %v12045_v14 = vsel %vm420_vm6, %v13343_v34, %v13342_v36  ;;  %v12051_v61 = vsel %vm420_vm6, %v6586_v54, %v13344_v4  ;;  %v12056_v13 = vsel %vm420_vm6, %v13345_v57, %v6585_v24  ;;  %v6807_v36 = vpack.i.bf16 %v4097_v32, %v4022_v37  ;;  %v14161_v34 = vld [vmem:[#allocation44_spill] sm:$0xff]  ;;  %v14163_v54 = vld [vmem:[#allocation41_spill] sm:$0xff] }
 0x9e6   :  { %14156 = vst [vmem:[#allocation78_spill] sm:$0xff] %v12045_v14  ;;  %v14162_v3 = vpack.i.bf16 %v14160_v35, %v14161_v34  ;;  %v6240_v4 = vunpack.i.l.bf16 %v14163_v54  ;;  %v14164_v24 = vunpack.i.h.bf16 %v11786_v0  ;;  %v6131_v37 = vunpack.i.h.bf16 %v14141_v2 }
 0x9e7   :  { %14157 = vst [vmem:[#allocation58_spill] sm:$0xff] %v12056_v13 }
 0x9e8   :  { %6793 = vrot.lane.b32.xlu1 %v14159_v62, %s6986_s22  ;;  %v4098_v57 = vsel %vm647_vm12, %v6480_v11, %v14164_v24  ;;  %v14167_v62 = vld [vmem:[#allocation65_spill] sm:$0xff]  ;;  %v14169_v11 = vunpack.i.h.bf16 %v14096_v56 }
 0x9e9   :  { %6833 = vrot.lane.b32.xlu0 %v14162_v3, %s6986_s22  ;;  %v3936_v3 = vsel %vm592_vm2, %v6131_v37, %v6240_v4  ;;  %v6812_v34 = vpack.i.bf16 %v14167_v62, %v4098_v57  ;;  %v14171_v4 = vpack.i.bf16 %v11773_v26, %v11768_v1 }
 0x9ea   :  { %v12068_v48 = vpop.permute.xlu1 %6603  ;;  %v12073_v12 = vpop.permute.xlu0 %6608 }
 0x9eb   :  { %14165 = vst [vmem:[#allocation82_spill] sm:$0xff] %v12073_v12  ;;  %v13347_v7 = vunpack.i.h.bf16 %v12068_v48  ;;  %6808 = vrot.lane.b32.xlu2 %v6807_v36, %s6986_s22  ;;  %v13346_v8 = vunpack.i.l.bf16 %v12073_v12  ;;  %v14170_v36 = vunpack.i.l.bf16 %v14096_v56  ;;  %v14172_v56 = vld [vmem:[#allocation84_spill] sm:$0xff]  ;;  %v14203_v17 = vunpack.i.h.bf16 %v12068_v48 }
 0x9ed   :  { %v12079_v32 = vpop.permute.xlu2 %6663  ;;  %v12088_v0 = vsel %vm420_vm6, %v13347_v7, %v13346_v8  ;;  %v3859_v35 = vsel %vm562_vm15, %v14170_v36, %v14169_v11  ;;  %v14173_v8 = vld [vmem:[#allocation70_spill] sm:$0xff]  ;;  %v13352_v36 = vunpack.i.h.bf16 %v11840_v22 }
 0x9ee   :  { %14166 = vst [vmem:[#allocation98_spill] sm:$0xff] %v12079_v32  ;;  %v6837_v54 = vpack.i.bf16 %v3859_v35, %v3936_v3  ;;  %v14174_v11 = vpack.i.bf16 %v14172_v56, %v14173_v8  ;;  %v6456_v3 = vunpack.i.h.bf16 %v11711_v30  ;;  %v14178_v56 = vld [vmem:[#allocation48_spill] sm:$0xff] }
 0x9ef   :  { %14168 = vst [vmem:[#allocation77_spill] sm:$0xff] %v12088_v0  ;;  %v6530_v0 = vunpack.i.l.bf16 %v11903_v10 }
 0x9f0   :  { %6813 = vrot.lane.b32.xlu1 %v6812_v34, %s6986_s22  ;;  %v14175_v34 = vpack.i.bf16 %v11729_v29, %v11404_v60  ;;  %v14177_v60 = vunpack.i.l.bf16 %v14141_v2 }
 0x9f1   :  { %6843 = vrot.lane.b32.xlu0 %v14171_v4, %s6986_s22 }
 0x9f2   :  { %v12100_v57 = vpop.permute.xlu1 %6623  ;;  %v12102_v24 = vpop.permute.xlu0 %6613  ;;  %v3935_v29 = vsel %vm592_vm2, %v14177_v60, %v6131_v37 }
 0x9f3   :  { %6838 = vrot.lane.b32.xlu2 %v6837_v54, %s6986_s22  ;;  %v14176_v54 = vunpack.i.l.bf16 %v11711_v30  ;;  %v14181_v30 = vpack.i.bf16 %v11741_v16, %v11685_v43  ;;  %v14184_v16 = vpack.i.bf16 %v11809_v46, %v11802_v5  ;;  %v14186_v5 = vld [vmem:[#allocation55_spill] sm:$0xff]  ;;  %v14187_v46 = vld [vmem:[#allocation54_spill] sm:$0xff] }
 0x9f5   :  { %v12105_v62 = vpop.permute.xlu2 %6668 }
 0x9f6   :  { %v13373_v14 = vunpack.i.h.bf16 %v12105_v62 }
 0x9f8   :  { %6823 = vrot.lane.b32.xlu1 %v14174_v11, %s6986_s22  ;;  %v14179_v11 = vld [vmem:[#allocation45_spill] sm:$0xff] }
 0x9f9   :  { %6853 = vrot.lane.b32.xlu0 %v11694_v55, %s6986_s22  ;;  %v3948_v55 = vsel %vm592_vm2, %v14176_v54, %v6456_v3 }
 0x9fa   :  { %v12114_v1 = vpop.permute.xlu1 %6638  ;;  %v12116_v26 = vpop.permute.xlu0 %6628  ;;  %v6857_v7 = vpack.i.bf16 %v3948_v55, %v3935_v29  ;;  %v14185_v29 = vpack.i.bf16 %v11326_v47, %v11678_v33  ;;  %v14190_v33 = vld [vmem:[#allocation34_spill] sm:$0xff] }
 0x9fb   :  { %6848 = vrot.lane.b32.xlu2 %v14175_v34, %s6986_s22  ;;  %v13349_v35 = vunpack.i.h.bf16 %v12116_v26  ;;  %v14180_v34 = vpack.i.bf16 %v14178_v56, %v14179_v11  ;;  %v13351_v2 = vunpack.i.h.bf16 %v12114_v1  ;;  %v6635_v56 = vunpack.i.l.bf16 %v12038_v18 }
 0x9fd   :  { %v12124_v8 = vpop.permute.xlu2 %6688  ;;  %v12134_v4 = vsel %vm420_vm6, %v13352_v36, %v13349_v35 }
 0xa00   :  { %6828 = vrot.lane.b32.xlu1 %v14180_v34, %s6986_s22 }
 0xa01   :  { %6863 = vrot.lane.b32.xlu0 %v14181_v30, %s6986_s22 }
 0xa02   :  { %v12147_v3 = vpop.permute.xlu1 %6648 }
 0xa03   :  { %v12149_v54 = vpop.permute.xlu0 %6643  ;;  %6858 = vrot.lane.b32.xlu2 %v6857_v7, %s6986_s22 }
 0xa04   :  { %14182 = vst [vmem:[#allocation91_spill] sm:$0xff] %v12149_v54  ;;  %v13348_v37 = vunpack.i.l.bf16 %v12149_v54  ;;  %v13354_v36 = vunpack.i.h.bf16 %v12149_v54 }
 0xa05   :  { %v12154_v60 = vpop.permute.xlu2 %6693 }
 0xa06   :  { %v13350_v55 = vunpack.i.h.bf16 %v12154_v60  ;;  %v12163_v43 = vsel %vm420_vm6, %v13351_v2, %v13348_v37 }
 0xa07   :  { %14183 = vst [vmem:[#allocation79_spill] sm:$0xff] %v12163_v43 }
 0xa08   :  { %6878 = vrot.lane.b32.xlu1 %v14184_v16, %s6986_s22  ;;  %v12172_v7 = vsel %vm420_vm6, %v13350_v55, %v6635_v56  ;;  %v14188_v16 = vpack.i.bf16 %v14186_v5, %v14187_v46  ;;  %v14192_v55 = vunpack.i.l.bf16 %v14190_v33  ;;  %v14193_v46 = vpack.i.bf16 %v11658_v42, %v11663_v44  ;;  %v5012_v42 = vld [vmem:[#allocation3] sm:$0x1] }
 0xa09   :  { %6868 = vrot.lane.b32.xlu0 %v14185_v29, %s6986_s22  ;;  %v14191_v29 = vunpack.i.h.bf16 %v14190_v33 }
 0xa0a   :  { %v12178_v11 = vpop.permute.xlu1 %6673 }
 0xa0b   :  { %v12180_v34 = vpop.permute.xlu0 %6653  ;;  %v13353_v30 = vunpack.i.h.bf16 %v12178_v11  ;;  %v6675_v37 = vunpack.i.l.bf16 %v12178_v11  ;;  %6873 = vrot.lane.b32.xlu2 %v14188_v16, %s6986_s22  ;;  %v4087_v2 = vsel %vm647_vm12, %v14192_v55, %v14191_v29  ;;  %v14195_v29 = vld [vmem:[#allocation11_spill] sm:$0xff] }
 0xa0c   :  { %v6887_v5 = vpack.i.bf16 %v11797_v52, %v4087_v2  ;;  %v13355_v44 = vunpack.i.h.bf16 %v12180_v34 }
 0xa0d   :  { %v12188_v35 = vpop.permute.xlu2 %6713  ;;  %v12193_v47 = vsel %vm420_vm6, %v6675_v37, %v13353_v30  ;;  %v14196_v30 = vld [vmem:[#allocation23_spill] sm:$0xff] }
 0xa0e   :  { %14189 = vst [vmem:[#allocation92_spill] sm:$0xff] %v12193_v47  ;;  %v6715_v13 = vunpack.i.l.bf16 %v12188_v35  ;;  %v14197_v52 = vpack.i.bf16 %v14195_v29, %v14196_v30 }
 0xa10   :  { %6883 = vrot.lane.b32.xlu1 %v14193_v46, %s6986_s22  ;;  %v12210_v16 = vsel %vm420_vm6, %v13354_v36, %v6715_v13  ;;  %v13362_v36 = vunpack.i.l.bf16 %v12116_v26 }
 0xa11   :  { %14194 = vst [vmem:[#allocation63_spill] sm:$0xff] %v12210_v16  ;;  %6888 = vrot.lane.b32.xlu0 %v6887_v5, %s6986_s22 }
 0xa12   :  { %v12213_v33 = vpop.permute.xlu1 %6678 }
 0xa13   :  { %v12215_v55 = vpop.permute.xlu0 %6658  ;;  %6893 = vrot.lane.b32.xlu2 %v14197_v52, %s6986_s22 }
 0xa15   :  { %v12221_v2 = vpop.permute.xlu2 %6728 }
 0xa16   :  { %v6730_v46 = vunpack.i.l.bf16 %v12221_v2 }
 0xa18   :  { %5015 = vperm.xlu1 %5120, %v5012_v42   ;;  %v12228_v13 = vsel %vm420_vm6, %v13355_v44, %v6730_v46  ;;  %v13370_v46 = vunpack.i.h.bf16 %v12000_v39 }
 0xa19   :  { %14198 = vst [vmem:[#allocation72_spill] sm:$0xff] %v12228_v13 }
 0xa1a   :  { %v12230_v5 = vpop.permute.xlu1 %6698 }
 0xa1b   :  { %v12233_v16 = vpop.permute.xlu0 %6683  ;;  %v13363_v30 = vunpack.i.h.bf16 %v12230_v5  ;;  %v13369_v44 = vunpack.i.l.bf16 %v12230_v5 }
 0xa1d   :  { %v12236_v29 = vpop.permute.xlu2 %6753  ;;  %v12243_v52 = vsel %vm420_vm6, %v13363_v30, %v13362_v36 }
 0xa1e   :  { %14199 = vst [vmem:[#allocation83_spill] sm:$0xff] %v12236_v29 }
 0xa22   :  { %v12245_v42 = vpop.permute.xlu1 %6703 }
 0xa23   :  { %v12249_v13 = vpop.permute.xlu0 %6708  ;;  %v13368_v27 = vunpack.i.h.bf16 %v12245_v42  ;;  %v6705_v9 = vunpack.i.l.bf16 %v12245_v42 }
 0xa24   :  { %v6711_v12 = vunpack.i.h.bf16 %v12249_v13 }
 0xa25   :  { %v12254_v50 = vpop.permute.xlu2 %6763  ;;  %v12261_v36 = vsel %vm420_vm6, %v13370_v46, %v13368_v27  ;;  %v12266_v30 = vsel %vm420_vm6, %v13369_v44, %v6705_v9  ;;  %v4538_v44 = vsel %vm420_vm6, %v13373_v14, %v6675_v37  ;;  %v6680_v37 = vunpack.i.l.bf16 %v12213_v33 }
 0xa26   :  { %14200 = vst [vmem:[#allocation90_spill] sm:$0xff] %v12266_v30  ;;  %v13371_v28 = vunpack.i.h.bf16 %v12254_v50  ;;  %v13372_v63 = vunpack.i.l.bf16 %v12254_v50  ;;  %v12271_v21 = vsel %vm420_vm6, %v6635_v56, %v6711_v12 }
 0xa27   :  { %14201 = vst [vmem:[#allocation95_spill] sm:$0xff] %v12271_v21  ;;  %v14204_v21 = vunpack.i.l.bf16 %v12068_v48 }
 0xa28   :  { %v4542_v27 = vsel %vm420_vm6, %v13372_v63, %v13371_v28 }
 0xa29   :  { %4832 = vmatpush.msra.mxu3 %v4542_v27  ;;  %v4534_v28 = vsel %vm420_vm6, %v14204_v21, %v14203_v17  ;;  %v13380_v21 = vunpack.i.h.bf16 %v12102_v24  ;;  %v6615_v17 = vunpack.i.l.bf16 %v12102_v24  ;;  %v6540_v27 = vunpack.i.l.bf16 %v11840_v22 }
 0xa2a   :  { %v12280_v9 = vpop.permute.xlu1 %6718 }
 0xa2b   :  { %v12285_v46 = vpop.permute.xlu0 %6723  ;;  %4833 = vmatpush.msra.mxu3 %v4538_v44  ;;  %v14205_v44 = vunpack.i.h.bf16 %v12280_v9 }
 0xa2c   :  { %14202 = vst [vmem:[#allocation75_spill] sm:$0xff] %v12285_v46  ;;  %v13378_v56 = vunpack.i.l.bf16 %v12285_v46  ;;  %v14207_v46 = vunpack.i.h.bf16 %v12213_v33 }
 0xa2d   :  { %v12295_v63 = vpop.permute.xlu2 %6773  ;;  %4834 = vmatpush.msra.mxu3 %v4534_v28 }
 0xa2e   :  { %v13379_v14 = vunpack.i.h.bf16 %v12295_v63  ;;  %v6775_v12 = vunpack.i.l.bf16 %v12295_v63  ;;  %v12305_v30 = vsel %vm420_vm6, %v14205_v44, %v13378_v56  ;;  %v4601_v44 = vsel %vm420_vm6, %v6680_v37, %v14207_v46 }
 0xa2f   :  { %14206 = vst [vmem:[#allocation67_spill] sm:$0xff] %v12305_v30  ;;  %4835 = vmatpush.msra.mxu3 %v11916_v45  ;;  %v4597_v45 = vsel %vm420_vm6, %v6615_v17, %v13380_v21  ;;  %v13382_v30 = vunpack.i.h.bf16 %v12079_v32  ;;  %v13389_v37 = vunpack.i.h.bf16 %v12215_v55 }
 0xa30   :  { %v4605_v28 = vsel %vm420_vm6, %v6775_v12, %v13379_v14  ;;  %v14209_v12 = vunpack.i.h.bf16 %v11840_v22 }
 0xa31   :  { %4792 = vmatpush.msra.mxu1 %v4605_v28 }
 0xa32   :  { %v12314_v54 = vpop.permute.xlu1 %6733  ;;  %v4593_v28 = vsel %vm420_vm6, %v6540_v27, %v14209_v12  ;;  %v13388_v27 = vunpack.i.l.bf16 %v12079_v32  ;;  %v6670_v32 = vunpack.i.l.bf16 %v12105_v62 }
 0xa33   :  { %v12319_v56 = vpop.permute.xlu0 %6738  ;;  %4793 = vmatpush.msra.mxu1 %v4601_v44 }
 0xa34   :  { %14208 = vst [vmem:[#allocation69_spill] sm:$0xff] %v12319_v56  ;;  %v4522_v12 = vsel %vm420_vm6, %v13389_v37, %v13388_v27  ;;  %v13391_v56 = vunpack.i.l.bf16 %v12314_v54 }
 0xa35   :  { %v12324_v43 = vpop.permute.xlu2 %6778  ;;  %4794 = vmatpush.msra.mxu1 %v4597_v45 }
 0xa37   :  { %4795 = vmatpush.msra.mxu1 %v4593_v28  ;;  %v13390_v28 = vunpack.i.h.bf16 %v12314_v54 }
 0xa3a   :  { %v6744_v14 = vpop.permute.xlu1 %6743 }
 0xa3b   :  { %v12330_v51 = vpop.permute.xlu0 %6748  ;;  %v6745_v46 = vunpack.i.l.bf16 %v6744_v14 }
 0xa3c   :  { %14210 = vst [vmem:[#allocation60_spill] sm:$0xff] %v12330_v51  ;;  %v13383_v44 = vunpack.i.h.bf16 %v12330_v51  ;;  %v6750_v17 = vunpack.i.l.bf16 %v12330_v51 }
 0xa3d   :  { %v12335_v21 = vpop.permute.xlu2 %6798  ;;  %v12340_v22 = vsel %vm420_vm6, %v13382_v30, %v6745_v46  ;;  %v14212_v30 = vunpack.i.h.bf16 %v11936_v23 }
 0xa3e   :  { %14211 = vst [vmem:[#allocation13_spill] sm:$0xff] %v12340_v22  ;;  %v4526_v45 = vsel %vm420_vm6, %v6750_v17, %v13383_v44  ;;  %v14213_v22 = vunpack.i.l.bf16 %v11936_v23  ;;  %v4510_v23 = vsel %vm420_vm6, %v13391_v56, %v13390_v28  ;;  %v6601_v28 = vunpack.i.h.bf16 %v11957_v49 }
 0xa3f   :  { %4836 = vmatpush.msra.mxu3 %v4526_v45  ;;  %v14216_v56 = vunpack.i.h.bf16 %v12105_v62  ;;  %v14219_v49 = vunpack.i.l.bf16 %v12068_v48  ;;  %v14220_v62 = vunpack.i.h.bf16 %v11991_v38  ;;  %v6660_v48 = vunpack.i.l.bf16 %v12215_v55 }
 0xa40   :  { %v4518_v44 = vsel %vm420_vm6, %v14213_v22, %v14212_v30  ;;  %v6780_v30 = vunpack.i.l.bf16 %v12324_v43  ;;  %v14214_v22 = vunpack.i.l.bf16 %v12254_v50 }
 0xa41   :  { %4837 = vmatpush.msra.mxu3 %v4522_v12 }
 0xa42   :  { %v12353_v46 = vpop.permute.xlu1 %6768 }
 0xa43   :  { %v6759_v45 = vpop.permute.xlu0 %6758  ;;  %4838 = vmatpush.msra.mxu3 %v4518_v44  ;;  %v4537_v44 = vsel %vm420_vm6, %v6670_v32, %v14216_v56  ;;  %v4533_v32 = vsel %vm420_vm6, %v6601_v28, %v14219_v49  ;;  %v14222_v28 = vunpack.i.h.bf16 %v11903_v10  ;;  %v14225_v10 = vunpack.i.l.bf16 %v11680_v19 }
 0xa44   :  { %v6761_v51 = vunpack.i.h.bf16 %v6759_v45  ;;  %v6760_v29 = vunpack.i.l.bf16 %v6759_v45  ;;  %v14215_v45 = vunpack.i.h.bf16 %v12178_v11  ;;  %v14218_v11 = vunpack.i.l.bf16 %v12180_v34 }
 0xa45   :  { %v12362_v37 = vpop.permute.xlu2 %6808  ;;  %4839 = vmatpush.msra.mxu3 %v11882_v58  ;;  %v6651_v58 = vunpack.i.h.bf16 %v12147_v3 }
 0xa46   :  { %v4541_v12 = vsel %vm420_vm6, %v6761_v51, %v14214_v22  ;;  %v12378_v27 = vsel %vm420_vm6, %v14215_v45, %v6760_v29  ;;  %v14217_v47 = vunpack.i.h.bf16 %v12362_v37 }
 0xa47   :  { %4772 = vmatpush.msra.mxu0 %v4541_v12  ;;  %4840 = vmatpush.msra.mxu3 %v4510_v23  ;;  %v4506_v29 = vsel %vm420_vm6, %v6651_v58, %v14218_v11  ;;  %v6746_v23 = vunpack.i.h.bf16 %v6744_v14 }
 0xa48   :  { %v4621_v51 = vsel %vm420_vm6, %v6780_v30, %v14217_v47  ;;  %v14221_v47 = vunpack.i.l.bf16 %v11991_v38  ;;  %v13393_v30 = vunpack.i.h.bf16 %v12233_v16  ;;  %v4529_v38 = vsel %vm420_vm6, %v6530_v0, %v14222_v28 }
 0xa49   :  { %4773 = vmatpush.msra.mxu0 %v4537_v44  ;;  %4824 = vmatpush.msra.mxu2 %v4621_v51  ;;  %v6685_v44 = vunpack.i.l.bf16 %v12233_v16  ;;  %v6620_v51 = vunpack.i.l.bf16 %v12000_v39  ;;  %v6545_v28 = vunpack.i.l.bf16 %v11928_v6 }
 0xa4a   :  { %4841 = vmatpush.msra.mxu3 %v4506_v29  ;;  %v12394_v22 = vpop.permute.xlu1 %6783  ;;  %v4502_v56 = vsel %vm420_vm6, %v14221_v47, %v14220_v62  ;;  %v14223_v29 = vld [vmem:[#allocation19_spill] sm:$0xff]  ;;  %v14224_v62 = vunpack.i.h.bf16 %v11680_v19  ;;  %v6520_v47 = vunpack.i.l.bf16 %v11799_v20  ;;  %v14227_v19 = vld [vmem:[#allocation16_spill] sm:$0xff] }
 0xa4b   :  { %v12406_v12 = vpop.permute.xlu0 %6803  ;;  %v13392_v14 = vunpack.i.h.bf16 %v12394_v22  ;;  %v6785_v45 = vunpack.i.l.bf16 %v12394_v22  ;;  %4774 = vmatpush.msra.mxu0 %v4533_v32  ;;  %v6285_v49 = vunpack.i.l.bf16 %v14223_v29  ;;  %v4525_v32 = vsel %vm420_vm6, %v6746_v23, %v6750_v17 }
 0xa4c   :  { %4842 = vmatpush.msra.mxu3 %v4502_v56  ;;  %v4494_v0 = vsel %vm420_vm6, %v14225_v10, %v14224_v62  ;;  %v6546_v56 = vunpack.i.h.bf16 %v11928_v6  ;;  %v14226_v17 = vunpack.i.h.bf16 %v12215_v55  ;;  %v14228_v62 = vunpack.i.h.bf16 %v12000_v39  ;;  %v14229_v10 = vld [vmem:[#allocation35_spill] sm:$0xff] }
 0xa4d   :  { %4775 = vmatpush.msra.mxu0 %v4529_v38  ;;  %v4589_v11 = vsel %vm420_vm6, %v6785_v45, %v13392_v14  ;;  %v6156_v45 = vunpack.i.h.bf16 %v14227_v19  ;;  %v6806_v38 = vunpack.i.h.bf16 %v12406_v12  ;;  %v13394_v14 = vunpack.i.l.bf16 %v14229_v10 }
 0xa4e   :  { %4843 = vmatpush.msra.mxu3 %v11893_v25  ;;  %4796 = vmatpush.msra.mxu1 %v4589_v11  ;;  %v4585_v25 = vsel %vm420_vm6, %v6685_v44, %v13393_v30  ;;  %v4521_v23 = vsel %vm420_vm6, %v6660_v48, %v14226_v17  ;;  %v6805_v11 = vunpack.i.l.bf16 %v12406_v12  ;;  %v14230_v44 = vld [vmem:[#allocation81_spill] sm:$0xff]  ;;  %v14231_v55 = vunpack.i.h.bf16 %v14223_v29 }
 0xa4f   :  { %4776 = vmatpush.msra.mxu0 %v4525_v32  ;;  %v4581_v32 = vsel %vm420_vm6, %v6620_v51, %v14228_v62  ;;  %v6690_v17 = vunpack.i.l.bf16 %v12124_v8  ;;  %v14232_v51 = vunpack.i.h.bf16 %v11799_v20  ;;  %v4577_v62 = vsel %vm420_vm6, %v6545_v28, %v6546_v56 }
 0xa50   :  { %4844 = vmatpush.msra.mxu3 %v4494_v0  ;;  %4797 = vmatpush.msra.mxu1 %v4585_v25  ;;  %v4486_v48 = vsel %vm420_vm6, %v6285_v49, %v14231_v55  ;;  %v6691_v25 = vunpack.i.h.bf16 %v12124_v8  ;;  %v6810_v55 = vunpack.i.l.bf16 %v12362_v37  ;;  %v6625_v20 = vunpack.i.l.bf16 %v12100_v57 }
 0xa51   :  { %4777 = vmatpush.msra.mxu0 %v4521_v23  ;;  %v4513_v23 = vsel %vm420_vm6, %v6520_v47, %v14232_v51  ;;  %v4482_v47 = vsel %vm420_vm6, %v6156_v45, %v13394_v14  ;;  %v14233_v28 = vunpack.i.l.bf16 %v12314_v54  ;;  %v6640_v14 = vunpack.i.l.bf16 %v12114_v1 }
 0xa52   :  { %4845 = vmatpush.msra.mxu3 %v14230_v44  ;;  %v12443_v0 = vpop.permute.xlu1 %6788  ;;  %4798 = vmatpush.msra.mxu1 %v4581_v32  ;;  %v6650_v32 = vunpack.i.l.bf16 %v12147_v3  ;;  %v6731_v44 = vunpack.i.h.bf16 %v12221_v2  ;;  %v4573_v2 = vsel %vm420_vm6, %v6805_v11, %v6806_v38  ;;  %v4569_v11 = vsel %vm420_vm6, %v6690_v17, %v6691_v25 }
 0xa53   :  { %v12452_v39 = vpop.permute.xlu0 %6818  ;;  %4778 = vmatpush.msra.mxu0 %v12051_v61  ;;  %v13397_v61 = vunpack.i.h.bf16 %v12100_v57  ;;  %v6716_v3 = vunpack.i.h.bf16 %v12188_v35  ;;  %v14239_v29 = vunpack.i.h.bf16 %v11834_v59 }
 0xa54   :  { %v13395_v30 = vunpack.i.l.bf16 %v12452_v39  ;;  %4846 = vmatpush.msra.mxu3 %v4486_v48  ;;  %4799 = vmatpush.msra.mxu1 %v4577_v62  ;;  %v4509_v48 = vsel %vm420_vm6, %v6731_v44, %v14233_v28  ;;  %v6550_v62 = vunpack.i.l.bf16 %v11932_v40  ;;  %v6510_v44 = vunpack.i.l.bf16 %v11866_v15 }
 0xa55   :  { %4779 = vmatpush.msra.mxu0 %v4513_v23  ;;  %v13396_v23 = vunpack.i.h.bf16 %v11932_v40  ;;  %v6720_v28 = vunpack.i.l.bf16 %v12280_v9  ;;  %v4565_v17 = vsel %vm420_vm6, %v6625_v20, %v13397_v61 }
 0xa56   :  { %4847 = vmatpush.msra.mxu3 %v4482_v47  ;;  %4800 = vmatpush.msra.mxu1 %v4573_v2  ;;  %v4607_v51 = vsel %vm420_vm6, %v6810_v55, %v13395_v30  ;;  %v12489_v47 = vld [vmem:[%s12926_s12] sm:$0xff]  ;;  %v4505_v2 = vsel %vm420_vm6, %v6650_v32, %v6651_v58  ;;  %v14235_v30 = vunpack.i.h.bf16 %v11866_v15  ;;  %v6155_v15 = vunpack.i.l.bf16 %v14227_v19 }
 0xa57   :  { %4780 = vmatpush.msra.mxu0 %v4509_v48  ;;  %4848 = vmatmul.f32.vlgmr.msra.gmra.mxu3 %v12489_v47  ;;  %v12497_v48 = vpop.permute.xlu2 %6838  ;;  %v4561_v32 = vsel %vm420_vm6, %v6550_v62, %v13396_v23  ;;  %v4557_v35 = vsel %vm420_vm6, %v6716_v3, %v6720_v28  ;;  %v14237_v23 = vld [vmem:[#allocation37_spill] sm:$0xff] }
 0xa58   :  { %4912 = vmatpush.msrb.mxu3 %v4607_v51  ;;  %4801 = vmatpush.msra.mxu1 %v4569_v11  ;;  %v14234_v11 = vld [vmem:[#allocation46_spill] sm:$0xff]  ;;  %v4497_v20 = vsel %vm420_vm6, %v6510_v44, %v14235_v30  ;;  %v6166_v61 = vunpack.i.h.bf16 %v14237_v23 }
 0xa59   :  { %4781 = vmatpush.msra.mxu0 %v4505_v2  ;;  %v6375_v2 = vunpack.i.l.bf16 %v14234_v11  ;;  %v14238_v30 = vunpack.i.h.bf16 %v14234_v11 }
 0xa5a   :  { %v12502_v51 = vpop.permute.xlu1 %6793  ;;  %4802 = vmatpush.msra.mxu1 %v4565_v17  ;;  %v6500_v17 = vunpack.i.l.bf16 %v11834_v59 }
 0xa5b   :  { %v12506_v58 = vpop.permute.xlu0 %6833  ;;  %4782 = vmatpush.msra.mxu0 %v12015_v31  ;;  %v14236_v31 = vunpack.i.h.bf16 %v12114_v1  ;;  %v4489_v44 = vsel %vm420_vm6, %v6375_v2, %v14238_v30  ;;  %v12538_v1 = vld [vmem:[%s12926_s12 + $0x8] sm:$0xff] }
 0xa5c   :  { %4803 = vmatpush.msra.mxu1 %v4561_v32 }
 0xa5d   :  { %4783 = vmatpush.msra.mxu0 %v4497_v20  ;;  %v4553_v62 = vsel %vm420_vm6, %v6640_v14, %v14236_v31  ;;  %v6821_v14 = vunpack.i.h.bf16 %v12452_v39  ;;  %v6695_v31 = vunpack.i.l.bf16 %v12154_v60 }
 0xa5e   :  { %4804 = vmatpush.msra.mxu1 %v4557_v35 }
 0xa5f   :  { %4784 = vmatpush.msra.mxu0 %v11708_v41  ;;  %v4485_v41 = vsel %vm420_vm6, %v6166_v61, %v6285_v49  ;;  %v12541_v32 = vpop.permute.xlu2 %6848  ;;  %v4481_v49 = vsel %vm420_vm6, %v6155_v15, %v6156_v45  ;;  %v14240_v61 = vunpack.i.h.bf16 %v12295_v63  ;;  %v14243_v45 = vunpack.i.h.bf16 %v12213_v33 }
 0xa60   :  { %4805 = vmatpush.msra.mxu1 %v4553_v62  ;;  %v14241_v62 = vunpack.i.h.bf16 %v12362_v37  ;;  %v4618_v37 = vsel %vm420_vm6, %v6821_v14, %v6695_v31  ;;  %v14244_v33 = vunpack.i.h.bf16 %v12154_v60 }
 0xa61   :  { %4785 = vmatpush.msra.mxu0 %v4489_v44  ;;  %v4606_v35 = vsel %vm420_vm6, %v14240_v61, %v6810_v55  ;;  %v14245_v55 = vunpack.i.h.bf16 %v12102_v24  ;;  %v6636_v44 = vunpack.i.h.bf16 %v12038_v18  ;;  %v6795_v61 = vunpack.i.l.bf16 %v12502_v51 }
 0xa62   :  { %v12529_v3 = vpop.permute.xlu1 %6813  ;;  %4806 = vmatpush.msra.mxu1 %v11969_v53  ;;  %v4545_v53 = vsel %vm420_vm6, %v6500_v17, %v14239_v29  ;;  %v14242_v17 = vunpack.i.l.bf16 %v12230_v5 }
 0xa63   :  { %v12543_v11 = vpop.permute.xlu0 %6843  ;;  %v6816_v2 = vunpack.i.h.bf16 %v12529_v3  ;;  %v6815_v20 = vunpack.i.l.bf16 %v12529_v3  ;;  %4786 = vmatpush.msra.mxu0 %v4485_v41  ;;  %v4598_v30 = vsel %vm420_vm6, %v14245_v55, %v14244_v33  ;;  %v14248_v33 = vunpack.i.h.bf16 %v12233_v16 }
 0xa64   :  { %4807 = vmatpush.msra.mxu1 %v4545_v53  ;;  %v6845_v63 = vunpack.i.l.bf16 %v12543_v11  ;;  %v6850_v53 = vunpack.i.l.bf16 %v12541_v32 }
 0xa65   :  { %4787 = vmatpush.msra.mxu0 %v4481_v49  ;;  %v4622_v59 = vsel %vm420_vm6, %v14241_v62, %v6815_v20  ;;  %v4603_v19 = vsel %vm420_vm6, %v6816_v2, %v14242_v17  ;;  %v4602_v15 = vsel %vm420_vm6, %v14243_v45, %v6816_v2  ;;  %4808 = vmatmul.f32.vlgmr.msra.gmra.mxu1 %v12538_v1  ;;  %v14246_v2 = vunpack.i.h.bf16 %v12116_v26 }
 0xa66   :  { %4884 = vmatpush.msrb.mxu1 %v4622_v59  ;;  %4913 = vmatpush.msrb.mxu3 %v4603_v19  ;;  %v14247_v62 = vunpack.i.h.bf16 %v12394_v22  ;;  %v6710_v45 = vunpack.i.l.bf16 %v12249_v13  ;;  %v6781_v22 = vunpack.i.h.bf16 %v12324_v43  ;;  %v4586_v55 = vsel %vm420_vm6, %v14248_v33, %v6850_v53 }
 0xa67   :  { %4852 = vmatpush.msrb.mxu0 %v4606_v35  ;;  %v4595_v29 = vsel %vm420_vm6, %v14246_v2, %v6845_v63  ;;  %v6770_v2 = vunpack.i.l.bf16 %v12353_v46 }
 0xa68   :  { %4788 = vmatmul.f32.vlgmr.msra.gmra.mxu0 %v12489_v47  ;;  %4885 = vmatpush.msrb.mxu1 %v4618_v37  ;;  %v4587_v43 = vsel %vm420_vm6, %v6850_v53, %v6710_v45  ;;  %v6796_v53 = vunpack.i.h.bf16 %v12502_v51 }
 0xa69   :  { %4853 = vmatpush.msrb.mxu0 %v4602_v15  ;;  %4914 = vmatpush.msrb.mxu3 %v12172_v7  ;;  %v6851_v7 = vunpack.i.h.bf16 %v12541_v32  ;;  %v6800_v15 = vunpack.i.l.bf16 %v12335_v21 }
 0xa6a   :  { %v12581_v41 = vpop.permute.xlu1 %6823  ;;  %4886 = vmatpush.msrb.mxu1 %v12243_v52  ;;  %v12595_v52 = vpop.permute.xlu2 %6858 }
 0xa6b   :  { %4854 = vmatpush.msrb.mxu0 %v4598_v30  ;;  %v6854_v24 = vpop.permute.xlu0 %6853  ;;  %v6826_v49 = vunpack.i.h.bf16 %v12581_v41  ;;  %v6825_v18 = vunpack.i.l.bf16 %v12581_v41  ;;  %4915 = vmatpush.msrb.mxu3 %v4595_v29  ;;  %v12617_v30 = vld [vmem:[%s12926_s12 + $0x10] sm:$0xff]  ;;  %v6860_v29 = vunpack.i.l.bf16 %v12595_v52  ;;  %s6995_s12 = smov [#allocation7]  }
 0xa6c   :  { %v6855_v35 = vunpack.i.l.bf16 %v6854_v24  ;;  %v6856_v16 = vunpack.i.h.bf16 %v6854_v24  ;;  %v4578_v24 = vsel %vm420_vm6, %v6546_v56, %v6781_v22  ;;  %v6801_v56 = vunpack.i.h.bf16 %v12335_v21  ;;  %s5046_s2 = sshll.u32 %s6995_s12, 4  ;;  %s5047_s2 = int_to_ptr.vmem [resolvable:$true] %s5046_s2 }
 0xa6d   :  { %4855 = vmatpush.msrb.mxu0 %v12134_v4  ;;  %v4590_v59 = vsel %vm420_vm6, %v14247_v62, %v6826_v49  ;;  %v4610_v17 = vsel %vm420_vm6, %v6636_v44, %v6825_v18  ;;  %v4591_v19 = vsel %vm420_vm6, %v6826_v49, %v6851_v7  ;;  %v6790_v4 = vunpack.i.l.bf16 %v12443_v0 }
 0xa6e   :  { %v4617_v37 = vsel %vm420_vm6, %v6855_v35, %v6821_v14  ;;  %4887 = vmatpush.msrb.mxu1 %v4610_v17  ;;  %4916 = vmatpush.msrb.mxu3 %v4591_v19  ;;  %v14249_v14 = vunpack.i.h.bf16 %v12230_v5  ;;  %v4609_v62 = vsel %vm420_vm6, %v6800_v15, %v6636_v44  ;;  %v14250_v5 = vunpack.i.h.bf16 %v12245_v42 }
 0xa6f   :  { %4856 = vmatpush.msrb.mxu0 %v4590_v59  ;;  %4825 = vmatpush.msra.mxu2 %v4617_v37  ;;  %v14251_v42 = vunpack.i.h.bf16 %v12254_v50  ;;  %v4579_v6 = vsel %vm420_vm6, %v6781_v22, %v6860_v29  ;;  %v4574_v17 = vsel %vm420_vm6, %v6806_v38, %v6856_v16  ;;  %v6836_v19 = vunpack.i.h.bf16 %v12506_v58  ;;  %v14252_v37 = vld [vmem:[#allocation92_spill] sm:$0xff]  ;;  %v14253_v38 = vld [vmem:[#allocation77_spill] sm:$0xff] }
 0xa70   :  { %v4613_v49 = vsel %vm420_vm6, %v6795_v61, %v14249_v14  ;;  %5095 = vmatmul.msk.f32.vlgmr.msrb.gmra.mxu1 %vm2673_vm3, %v12617_v30  ;;  %4917 = vmatpush.msrb.mxu3 %v4587_v43  ;;  %v4583_v61 = vsel %vm420_vm6, %v14250_v5, %v6790_v4  ;;  %v6835_v15 = vunpack.i.l.bf16 %v12506_v58  ;;  %v4570_v21 = vsel %vm420_vm6, %v6691_v25, %v6796_v53 }
 0xa71   :  { %4857 = vmatpush.msrb.mxu0 %v4586_v55  ;;  %4826 = vmatpush.msra.mxu2 %v4613_v49  ;;  %v4543_v51 = vsel %vm420_vm6, %v14251_v42, %v6770_v2  ;;  %v14254_v22 = vunpack.i.h.bf16 %v12100_v57  ;;  %v14255_v55 = vld [vmem:[#allocation83_spill] sm:$0xff]  ;;  %v6841_v49 = vunpack.i.h.bf16 %v12497_v48  ;;  %v4567_v25 = vsel %vm420_vm6, %v6801_v56, %v6836_v19 }
 0xa72   :  { %v12629_v35 = vpop.permute.xlu1 %6828  ;;  %4918 = vmatpush.msrb.mxu3 %v4583_v61  ;;  %v6755_v14 = vunpack.i.l.bf16 %v14255_v55  ;;  %v12678_v43 = vpop.permute.xlu2 %6873  ;;  %v14257_v5 = vunpack.i.h.bf16 %v11932_v40  ;;  %v14260_v40 = vunpack.i.h.bf16 %v12280_v9 }
 0xa73   :  { %4858 = vmatpush.msrb.mxu0 %v12261_v36  ;;  %v12639_v59 = vpop.permute.xlu0 %6863  ;;  %4827 = vmatpush.msra.mxu2 %v4609_v62  ;;  %v6830_v36 = vunpack.i.l.bf16 %v12629_v35  ;;  %v4566_v33 = vsel %vm420_vm6, %v14254_v22, %v6801_v56  ;;  %v6876_v56 = vunpack.i.h.bf16 %v12678_v43  ;;  %v14267_v22 = vld [vmem:[#allocation91_spill] sm:$0xff] }
 0xa74   :  { %v6865_v44 = vunpack.i.l.bf16 %v12639_v59  ;;  %5094 = vmatmul.msk.f32.vlgmr.msra.gmra.mxu2 %vm2673_vm3, %v12617_v30  ;;  %4919 = vmatpush.msrb.mxu3 %v4579_v6  ;;  %v4562_v61 = vsel %vm420_vm6, %v14257_v5, %v6835_v15  ;;  %v4563_v6 = vsel %vm420_vm6, %v6835_v15, %v6841_v49  ;;  %v14270_v5 = vld [vmem:[#allocation78_spill] sm:$0xff] }
 0xa75   :  { %4859 = vmatpush.msrb.mxu0 %v4578_v24  ;;  %4892 = vmatpush.msrb.mxu2 %v4543_v51  ;;  %v4571_v12 = vsel %vm420_vm6, %v6796_v53, %v6830_v36  ;;  %v14258_v24 = vld [vmem:[#allocation60_spill] sm:$0xff] }
 0xa76   :  { %v4575_v50 = vsel %vm420_vm6, %v6856_v16, %v6865_v44  ;;  %v14256_v16 = vld [vmem:[#allocation57_spill] sm:$0xff]  ;;  %v14259_v42 = vunpack.i.h.bf16 %v14258_v24 }
 0xa77   :  { %4860 = vmatpush.msrb.mxu0 %v4574_v17  ;;  %4893 = vmatpush.msrb.mxu2 %v14252_v37  ;;  %v4558_v17 = vsel %vm420_vm6, %v6720_v28, %v14260_v40  ;;  %v14261_v37 = vld [vmem:[#allocation98_spill] sm:$0xff]  ;;  %v14265_v28 = vld [vmem:[#allocation69_spill] sm:$0xff]  ;;  %v14275_v40 = vld [vmem:[#allocation96_spill] sm:$0xff] }
 0xa78   :  { %4920 = vmatpush.msrb.mxu3 %v4575_v50  ;;  %v4527_v51 = vsel %vm420_vm6, %v14259_v42, %v6755_v14  ;;  %v14263_v15 = vunpack.i.l.bf16 %v14261_v37  ;;  %v6740_v3 = vunpack.i.l.bf16 %v14265_v28  ;;  %v14274_v42 = vunpack.i.l.bf16 %v12116_v26 }
 0xa79   :  { %4861 = vmatpush.msrb.mxu0 %v4570_v21  ;;  %4894 = vmatpush.msrb.mxu2 %v14253_v38  ;;  %v14262_v21 = vunpack.i.h.bf16 %v14261_v37  ;;  %v14264_v38 = vld [vmem:[#allocation67_spill] sm:$0xff] }
 0xa7a   :  { %4921 = vmatpush.msrb.mxu3 %v4571_v12  ;;  %v12680_v8 = vpop.permute.xlu1 %6878 }
 0xa7b   :  { %4862 = vmatpush.msrb.mxu0 %v4566_v33  ;;  %4895 = vmatpush.msrb.mxu2 %v14256_v16  ;;  %v12686_v62 = vpop.permute.xlu0 %6868  ;;  %v6881_v57 = vunpack.i.h.bf16 %v12680_v8  ;;  %v4523_v12 = vsel %vm420_vm6, %v14263_v15, %v14262_v21  ;;  %v14268_v33 = vunpack.i.h.bf16 %v14267_v22  ;;  %v14278_v15 = vld [vmem:[#allocation89_spill] sm:$0xff] }
 0xa7c   :  { %4922 = vmatpush.msrb.mxu3 %v4567_v25  ;;  %v6871_v53 = vunpack.i.h.bf16 %v12686_v62  ;;  %v14269_v25 = vunpack.i.l.bf16 %v14267_v22  ;;  %v14281_v22 = vld [vmem:[#allocation53_spill] sm:$0xff] }
 0xa7d   :  { %4863 = vmatpush.msrb.mxu0 %v4562_v61  ;;  %4896 = vmatpush.msrb.mxu2 %v4527_v51  ;;  %v4623_v50 = vsel %vm420_vm6, %v6815_v20, %v6881_v57  ;;  %v14266_v20 = vld [vmem:[#allocation79_spill] sm:$0xff]  ;;  %v4615_v51 = vsel %vm420_vm6, %v14274_v42, %v6876_v56  ;;  %v14287_v42 = vld [vmem:[#allocation82_spill] sm:$0xff] }
 0xa7e   :  { %4923 = vmatpush.msrb.mxu3 %v4563_v6  ;;  %4944 = vmatpush.msra.mxu1 %v4623_v50  ;;  %v4619_v9 = vsel %vm420_vm6, %v6695_v31, %v6871_v53  ;;  %v4555_v16 = vsel %vm420_vm6, %v14269_v25, %v14268_v33  ;;  %v14271_v61 = vld [vmem:[#allocation71_spill] sm:$0xff]  ;;  %v6846_v6 = vunpack.i.h.bf16 %v12543_v11  ;;  %v14277_v50 = vunpack.i.l.bf16 %v14275_v40 }
 0xa7f   :  { %4864 = vmatpush.msrb.mxu0 %v4558_v17  ;;  %4897 = vmatpush.msrb.mxu2 %v4523_v12  ;;  %v14272_v24 = vunpack.i.h.bf16 %v14271_v61  ;;  %v14273_v60 = vunpack.i.l.bf16 %v14271_v61  ;;  %v14276_v17 = vunpack.i.h.bf16 %v14275_v40  ;;  %v6771_v12 = vunpack.i.h.bf16 %v12353_v46  ;;  %v14290_v40 = vld [vmem:[#allocation93_spill] sm:$0xff] }
 0xa80   :  { %4924 = vmatpush.msrb.mxu3 %v14264_v38  ;;  %4945 = vmatpush.msra.mxu1 %v4619_v9  ;;  %v14279_v38 = vunpack.i.h.bf16 %v12314_v54  ;;  %v14282_v33 = vunpack.i.h.bf16 %v14281_v22  ;;  %v14283_v25 = vunpack.i.l.bf16 %v14281_v22  ;;  %v14285_v61 = vunpack.i.l.bf16 %v12180_v34 }
 0xa81   :  { %4865 = vmatpush.msrb.mxu0 %v14266_v20  ;;  %4898 = vmatpush.msrb.mxu2 %v14270_v5  ;;  %v4550_v31 = vsel %vm420_vm6, %v14273_v60, %v14272_v24  ;;  %v4515_v37 = vsel %vm420_vm6, %v14277_v50, %v14276_v17  ;;  %v14280_v20 = vld [vmem:[#allocation68_spill] sm:$0xff]  ;;  %v14284_v5 = vunpack.i.h.bf16 %v12180_v34  ;;  %v14286_v24 = vunpack.i.l.bf16 %v12452_v39  ;;  %v14288_v39 = vld [vmem:[#allocation99_spill] sm:$0xff] }
 0xa82   :  { %4925 = vmatpush.msrb.mxu3 %v4555_v16  ;;  %4946 = vmatpush.msra.mxu1 %v4615_v51  ;;  %v4511_v9 = vsel %vm420_vm6, %v14279_v38, %v6740_v3  ;;  %v4547_v16 = vsel %vm420_vm6, %v14283_v25, %v14282_v33  ;;  %v6611_v51 = vunpack.i.h.bf16 %v14287_v42  ;;  %v4544_v34 = vsel %vm420_vm6, %v6770_v2, %v6771_v12  ;;  %v14296_v33 = vld [vmem:[#allocation30_spill] sm:$0xff] }
 0xa83   :  { %4866 = vmatpush.msrb.mxu0 %v4550_v31  ;;  %4899 = vmatpush.msrb.mxu2 %v4515_v37  ;;  %v12747_v21 = vpop.permute.xlu0 %6888  ;;  %v4507_v54 = vsel %vm420_vm6, %v14285_v61, %v14284_v5  ;;  %v4608_v60 = vsel %vm420_vm6, %v14286_v24, %v6846_v6  ;;  %v14289_v6 = vld [vmem:[#allocation90_spill] sm:$0xff]  ;;  %v14291_v41 = vunpack.i.h.bf16 %v14290_v40  ;;  %v6791_v50 = vunpack.i.h.bf16 %v12443_v0  ;;  %v14293_v37 = vld [vmem:[#allocation95_spill] sm:$0xff] }
 0xa84   :  { %4926 = vmatpush.msrb.mxu3 %v14278_v15  ;;  %v6890_v26 = vunpack.i.l.bf16 %v12747_v21  ;;  %v6861_v46 = vunpack.i.h.bf16 %v12595_v52  ;;  %v6756_v2 = vunpack.i.h.bf16 %v14255_v55  ;;  %v14294_v15 = vunpack.i.l.bf16 %v14287_v42  ;;  %v14300_v24 = vld [vmem:[#allocation59_spill] sm:$0xff]  ;;  %v6894_v42 = vpop.permute.xlu2 %6893 }
 0xa85   :  { %4867 = vmatpush.msrb.mxu0 %v14280_v20  ;;  %4900 = vmatpush.msrb.mxu2 %v4511_v9  ;;  %v6866_v38 = vunpack.i.h.bf16 %v12639_v59  ;;  %v12800_v9 = vpop.permute.xlu1 %6883  ;;  %v14295_v20 = vld [vmem:[#allocation88_spill] sm:$0xff]  ;;  %v4596_v22 = vsel %vm420_vm6, %v6845_v63, %v6791_v50  ;;  %v14297_v25 = vunpack.i.h.bf16 %v14296_v33  ;;  %v6831_v61 = vunpack.i.h.bf16 %v12629_v35 }
 0xa86   :  { %4927 = vmatpush.msrb.mxu3 %v4547_v16  ;;  %4868 = vmatmul.f32.vlgmr.msrb.gmra.mxu0 %v12538_v1  ;;  %v4611_v31 = vsel %vm420_vm6, %v6825_v18, %v6890_v26  ;;  %v14292_v18 = vunpack.i.l.bf16 %v14290_v40  ;;  %v4536_v12 = vsel %vm420_vm6, %v14294_v15, %v6611_v51  ;;  %v14298_v16 = vunpack.i.l.bf16 %v14296_v33  ;;  %v14301_v51 = vld [vmem:[#allocation20_spill] sm:$0xff] }
 0xa87   :  { %4928 = vmatmul.f32.vlgmr.msrb.gmra.mxu3 %v12538_v1  ;;  %4901 = vmatpush.msrb.mxu2 %v4507_v54  ;;  %v14299_v54 = vld [vmem:[#allocation73_spill] sm:$0xff]  ;;  %v4592_v11 = vsel %vm420_vm6, %v6851_v7, %v6861_v46  ;;  %v6596_v63 = vunpack.i.h.bf16 %v14300_v24  ;;  %v6891_v32 = vunpack.i.h.bf16 %v12747_v21  ;;  %v14302_v7 = vunpack.i.l.bf16 %v14229_v10 }
 0xa88   :  { %4972 = vmatpush.msra.mxu0 %v4608_v60  ;;  %4947 = vmatpush.msra.mxu1 %v4611_v31  ;;  %v4499_v17 = vsel %vm420_vm6, %v14292_v18, %v14291_v41  ;;  %v4491_v5 = vsel %vm420_vm6, %v14298_v16, %v14297_v25  ;;  %v6885_v60 = vunpack.i.l.bf16 %v12800_v9  ;;  %v4528_v31 = vsel %vm420_vm6, %v6755_v14, %v6756_v2  ;;  %v14306_v2 = vld [vmem:[#allocation74_spill] sm:$0xff] }
 0xa89   :  { %4902 = vmatpush.msrb.mxu2 %v14288_v39  ;;  %5096 = vmatmul.msk.f32.vlgmr.msra.gmra.mxu1 %vm2673_vm3, %v12617_v30  ;;  %v6840_v55 = vunpack.i.l.bf16 %v12497_v48  ;;  %v6880_v14 = vunpack.i.l.bf16 %v12680_v8  ;;  %v4584_v13 = vsel %vm420_vm6, %v6790_v4, %v6831_v61  ;;  %v6895_v40 = vunpack.i.l.bf16 %v6894_v42  ;;  %v14316_v48 = vld [vmem:[#allocation63_spill] sm:$0xff] }
 0xa8a   :  { %4952 = vmatpush.msrb.mxu1 %v4544_v34  ;;  %4973 = vmatpush.msra.mxu0 %v14289_v6  ;;  %v4588_v34 = vsel %vm420_vm6, %v6710_v45, %v6866_v38  ;;  %v14303_v6 = vld [vmem:[#allocation13_spill] sm:$0xff]  ;;  %v6741_v45 = vunpack.i.h.bf16 %v14265_v28  ;;  %v4624_v41 = vsel %vm420_vm6, %v6881_v57, %v6885_v60  ;;  %v14304_v18 = vunpack.i.l.bf16 %v14300_v24  ;;  %v14305_v57 = vld [vmem:[#allocation58_spill] sm:$0xff] }
 0xa8b   :  { %4903 = vmatpush.msrb.mxu2 %v4499_v17  ;;  %v6870_v50 = vunpack.i.l.bf16 %v12686_v62  ;;  %v4580_v0 = vsel %vm420_vm6, %v6860_v29, %v6840_v55  ;;  %v4620_v4 = vsel %vm420_vm6, %v6871_v53, %v6891_v32  ;;  %v6875_v8 = vunpack.i.l.bf16 %v12678_v43  ;;  %v14307_v43 = vld [vmem:[#allocation75_spill] sm:$0xff]  ;;  %v14312_v38 = vld [vmem:[#allocation85_spill] sm:$0xff] }
 0xa8c   :  { %4953 = vmatpush.msrb.mxu1 %v12378_v27  ;;  %4974 = vmatpush.msra.mxu0 %v14293_v37  ;;  %v6161_v27 = vunpack.i.h.bf16 %v14229_v10  ;;  %v4520_v17 = vsel %vm420_vm6, %v14304_v18, %v6596_v63  ;;  %v4576_v46 = vsel %vm420_vm6, %v6865_v44, %v6880_v14  ;;  %v6581_v37 = vunpack.i.h.bf16 %v14306_v2 }
 0xa8d   :  { %4904 = vmatpush.msrb.mxu2 %v14295_v20  ;;  %v6896_v15 = vunpack.i.h.bf16 %v6894_v42  ;;  %v4616_v52 = vsel %vm420_vm6, %v6876_v56, %v6895_v40  ;;  %v4512_v29 = vsel %vm420_vm6, %v6740_v3, %v6741_v45  ;;  %v6886_v62 = vunpack.i.h.bf16 %v12800_v9  ;;  %v14308_v56 = vld [vmem:[#allocation72_spill] sm:$0xff]  ;;  %v14309_v3 = vld [vmem:[#allocation87_spill] sm:$0xff]  ;;  %v14314_v20 = vld [vmem:[#allocation22_spill] sm:$0xff]  ;;  %v5016_v14 = vpop.permute.xlu1 %5015 }
 0xa8e   :  { %4954 = vmatpush.msrb.mxu1 %v4536_v12  ;;  %4975 = vmatpush.msra.mxu0 %v4596_v22  ;;  %v4483_v39 = vsel %vm420_vm6, %v14302_v7, %v6161_v27  ;;  %v4572_v59 = vsel %vm420_vm6, %v6830_v36, %v6870_v50  ;;  %v6726_v53 = vunpack.i.h.bf16 %v14307_v43  ;;  %v4568_v28 = vsel %vm420_vm6, %v6836_v19, %v6875_v8 }
 0xa8f   :  { %4905 = vmatpush.msrb.mxu2 %v4491_v5  ;;  %v4612_v44 = vsel %vm420_vm6, %v6890_v26, %v6896_v15  ;;  %v6496_v12 = vunpack.i.h.bf16 %v14309_v3  ;;  %v14310_v35 = vunpack.i.l.bf16 %v14306_v2  ;;  %v4564_v21 = vsel %vm420_vm6, %v6841_v49, %v6886_v62  ;;  %v14311_v26 = vld [vmem:[#allocation66_spill] sm:$0xff] }
 0xa90   :  { %4955 = vmatpush.msrb.mxu1 %v14299_v54  ;;  %4976 = vmatpush.msra.mxu0 %v4592_v11  ;;  %v6566_v58 = vunpack.i.h.bf16 %v14311_v26  ;;  %v14313_v19 = vunpack.i.l.bf16 %v14307_v43  ;;  %v6291_v22 = vunpack.i.h.bf16 %v14314_v20  ;;  %v14315_v33 = vunpack.i.l.bf16 %v14309_v3  ;;  %v14317_v49 = vld [vmem:[#allocation94_spill] sm:$0xff] }
 0xa91   :  { %4906 = vmatpush.msrb.mxu2 %v14301_v51  ;;  %v4504_v36 = vsel %vm420_vm6, %v14310_v35, %v6581_v37  ;;  %v14318_v25 = vunpack.i.l.bf16 %v14311_v26  ;;  %v6165_v5 = vunpack.i.l.bf16 %v14237_v23  ;;  %v14319_v61 = vunpack.i.l.bf16 %v14314_v20  ;;  %v14320_v11 = vld [vmem:[#allocation62_spill] sm:$0xff] }
 0xa92   :  { %4956 = vmatpush.msrb.mxu1 %v4528_v31  ;;  %4977 = vmatpush.msra.mxu0 %v4588_v34  ;;  %v4560_v9 = vsel %vm420_vm6, %v14313_v19, %v6726_v53 }
 0xa93   :  { %4907 = vmatpush.msrb.mxu2 %v4483_v39  ;;  %v4552_v16 = vsel %vm420_vm6, %v14318_v25, %v6566_v58  ;;  %v4488_v54 = vsel %vm420_vm6, %v14319_v61, %v6291_v22  ;;  %v4484_v24 = vsel %vm420_vm6, %v6161_v27, %v6165_v5 }
 0xa94   :  { %4957 = vmatpush.msrb.mxu1 %v14303_v6  ;;  %4978 = vmatpush.msra.mxu0 %v4584_v13  ;;  %v5018_v6 = vperm.slane %v5016_v14, 0 }
 0xa95   :  { %4908 = vmatmul.f32.vlgmr.msrb.gmra.mxu2 %v12489_v47 }
 0xa96   :  { %5004 = vmatpush.msra.mxu2 %v4624_v41  ;;  %4958 = vmatpush.msrb.mxu1 %v4520_v17 }
 0xa97   :  { %4979 = vmatpush.msra.mxu0 %v4580_v0  ;;  %v5036_v0 = vlaneseq }
 0xa98   :  { %5005 = vmatpush.msra.mxu2 %v4620_v4  ;;  %4959 = vmatpush.msrb.mxu1 %v14305_v57 }
 0xa99   :  { %4980 = vmatpush.msra.mxu0 %v4576_v46  ;;  %vm5038_vm8 = vcmp.lt.s32.totalorder %v5036_v0, 512 }
 0xa9a   :  { %5006 = vmatpush.msra.mxu2 %v4616_v52  ;;  %4960 = vmatpush.msrb.mxu1 %v4512_v29 }
 0xa9b   :  { %4981 = vmatpush.msra.mxu0 %v4572_v59 }
 0xa9c   :  { %5007 = vmatpush.msra.mxu2 %v4612_v44  ;;  %4961 = vmatpush.msrb.mxu1 %v14308_v56 }
 0xa9d   :  { %4982 = vmatpush.msra.mxu0 %v4568_v28  ;;  %5097 = vmatmul.msk.f32.vlgmr.msra.gmra.mxu2 %vm2673_vm3, %v12617_v30  ;;  %v4496_v30 = vsel %vm420_vm6, %v14315_v33, %v6496_v12  ;;  %vm5032_vm6 = vcmask 1042434  }
 0xa9e   :  { %4962 = vmatpush.msrb.mxu1 %v4504_v36 }
 0xa9f   :  { %4983 = vmatpush.msra.mxu0 %v4564_v21 }
 0xaa0   :  { %4963 = vmatpush.msrb.mxu1 %v14312_v38 }
 0xaa1   :  { %4984 = vmatpush.msra.mxu0 %v4560_v9 }
 0xaa2   :  { %4964 = vmatpush.msrb.mxu1 %v4496_v30 }
 0xaa3   :  { %4985 = vmatpush.msra.mxu0 %v14316_v48 }
 0xaa4   :  { %4965 = vmatpush.msrb.mxu1 %v14317_v49 }
 0xaa5   :  { %4986 = vmatpush.msra.mxu0 %v4552_v16 }
 0xaa6   :  { %4966 = vmatpush.msrb.mxu1 %v4488_v54 }
 0xaa7   :  { %4987 = vmatpush.msra.mxu0 %v14320_v11 }
 0xaa8   :  { %4967 = vmatpush.msrb.mxu1 %v4484_v24  ;;  %4988 = vmatmul.f32.vlgmr.msra.gmra.mxu0 %v12538_v1 }
 0xaa9   :  { %4968 = vmatmul.f32.vlgmr.msrb.gmra.mxu1 %v12489_v47 }
 0xada   :  { %v4849_v42 = vpop.f32.mrf.mxu3 }
 0xae2   :  { %v4809_v63 = vpop.f32.mrf.mxu1 }
 0xae5   :  { %v4789_v60 = vpop.f32.mrf.mxu0 }
 0xae6   :  { %v4810_v27 = vadd.f32 %v4809_v63, %v4789_v60 }
 0xaed   :  { %v4889_v23 = vpop.f32.mrf.mxu1 }
 0xaf7   :  { %v4829_v31 = vpop.f32.mrf.mxu2 }
 0xaf8   :  { %v4830_v18 = vadd.f32 %v4829_v31, %v4810_v27 }
 0xafa   :  { %v5019_v57 = vadd.f32 %v5018_v6, %v4830_v18 }
 0xb03   :  { %v4869_v51 = vpop.f32.mrf.mxu0 }
 0xb04   :  { %v4870_v39 = vadd.f32 %v4869_v51, %v4849_v42 }
 0xb06   :  { %v4949_v34 = vpop.f32.mrf.mxu1  ;;  %v4890_v10 = vadd.f32 %v4889_v23, %v4870_v39 }
 0xb08   :  { %v5020_v47 = vadd.f32 %v5018_v6, %v4890_v10 }
 0xb0a   :  { %v4929_v7 = vpop.f32.mrf.mxu3  ;;  %v5027_v4 = vrot.slane %v5020_v47, 7 }
 0xb0c   :  { %v5031_v37 = vsel %vm5030_vm5, %v5019_v57, %v5027_v4 }
 0xb18   :  { %v4909_v32 = vpop.f32.mrf.mxu2 }
 0xb19   :  { %v4930_v55 = vadd.f32 %v4929_v7, %v4909_v32 }
 0xb1b   :  { %v4950_v13 = vadd.f32 %v4949_v34, %v4930_v55 }
 0xb1d   :  { %v5021_v17 = vadd.f32 %v5018_v6, %v4950_v13 }
 0xb1f   :  { %v5028_v46 = vrot.slane %v5021_v17, 6 }
 0xb20   :  { %v5009_v40 = vpop.f32.mrf.mxu2 }
 0xb25   :  { %v4989_v45 = vpop.f32.mrf.mxu0 }
 0xb26   :  { %v4969_v1 = vpop.f32.mrf.mxu1 }
 0xb27   :  { %v4990_v41 = vadd.f32 %v4989_v45, %v4969_v1 }
 0xb29   :  { %v5010_v50 = vadd.f32 %v5009_v40, %v4990_v41 }
 0xb2b   :  { %v5022_v8 = vadd.f32 %v5018_v6, %v5010_v50 }
 0xb2d   :  { %v5029_v2 = vrot.slane %v5022_v8, 5 }
 0xb2f   :  { %v5033_v15 = vsel %vm5032_vm6, %v5028_v46, %v5029_v2 }
 0xb30   :  { %v5034_v52 = vsel %vm95_vm0, %v5031_v37, %v5033_v15 }
 0xb31   :  { %5040 = vst.msk [vmem:[#allocation7] sm:$0xf] %vm5038_vm8, %v5034_v52 }
 0xb32   :  { %5051 = dma.vmem_to_hbm [thread:$0]  %s5047_s2, 64, %s5049_s8, [#allocation6]  }
 0xb33   :  { %6973 = dma.done.wait [#allocation6], 64  }
 0xb34   :  { %6974 = vsyncadd [#allocation6], 4294967232 }
 0xb35   :  { %5056 = vsyncpa [#allocation5], 1 }
 0xb36   :  { %5057 = vsyncpa [#allocation6], 1 }

</bundles_post_ra>
